<compile_context>
chip_gen: v6e
topology: v6e:2x2x1
jax: 0.10.0
libtpu: 0.0.40
codegen_flags: <defaults>
</compile_context>

<pallas_src>
import numpy as np

import jax
import jax.numpy as jnp
from jax.experimental import pallas as pl
from jax.experimental.pallas import tpu as pltpu

EPS = 1e-5

# Effective-tap selectors for the phase decomposition of
# (nearest-2x upsample, pad=1, 3x3 conv):
#   output row 2y+py reads input rows y + py + ay - 1 (ay in {0,1}), combining
#   the original dy taps selected by _SEL[py][ay]; identically for columns.
_SEL = np.asarray(
    [[[1., 0., 0.], [0., 1., 1.]],
     [[1., 1., 0.], [0., 0., 1.]]], np.float32)


def _sigmoid(g):
    # Bounded sigmoid (EUP tanh); avoids exp overflow for strongly negative g.
    return 0.5 * jnp.tanh(0.5 * g) + 0.5


# ----------------------------------------------------------------------------
# Fused kernel: n_upsample x (nearest-2x up + pad + conv3x3 + BN + GLU)
# ----------------------------------------------------------------------------
def _make_kernel(geoms, n_blocks):
    """geoms: tuple of (cin, cout, hin, win) per upsampling block."""

    def kernel(*refs):
        h0_ref = refs[0]
        blk_refs = refs[1:1 + 3 * n_blocks]
        out_ref = refs[1 + 3 * n_blocks]
        scratch = refs[2 + 3 * n_blocks:]

        hp = h0_ref[0]                                  # (c0, 6*6), bf16, padded
        for k, (cin, cout, hin, win) in enumerate(geoms):
            wk_ref, sh_ref, e_ref = blk_refs[3 * k:3 * k + 3]
            c2 = 2 * cout
            ws = win + 2                                # padded input row stride
            ns = (hin - 1) * ws + win                   # conv span (input res.)
            shift = sh_ref[...]                         # (c2, 1), f32 (BN shift)

            # ---- 4 output phases; 4 accumulated matmuls each (no im2col) ----
            ph = [[None, None], [None, None]]
            for py in range(2):
                for px in range(2):
                    acc = shift                         # broadcasts to (c2, ns)
                    for ay in range(2):
                        for ax in range(2):
                            idx = ((py * 2 + px) * 2 + ay) * 2 + ax
                            off = (py + ay) * ws + (px + ax)
                            acc = acc + jnp.dot(
                                wk_ref[:, idx * cin:(idx + 1) * cin],
                                hp[:, off:off + ns],
                                preferred_element_type=jnp.float32)
                    # channel GLU
                    ph[py][px] = acc[:cout] * _sigmoid(acc[cout:])

            # ---- re-interleave phases into next padded buffer / output ----
            ho, wo = 2 * hin, 2 * win
            last = (k == n_blocks - 1)
            e0, e1 = e_ref[0], e_ref[1]                 # (win, wo) interleavers
            if not last:
                nref = scratch[k]                       # (cout, (ho+2)*(wo+2))
                wsn = wo + 2
                nref[...] = jnp.zeros_like(nref)        # keep zero padding border
            for y in range(hin):
                base = y * ws                           # junk cols (x>=win) skipped
                for py in range(2):
                    row = (jnp.dot(ph[py][0][:, base:base + win], e0,
                                   preferred_element_type=jnp.float32)
                           + jnp.dot(ph[py][1][:, base:base + win], e1,
                                     preferred_element_type=jnp.float32))
                    r = 2 * y + py
                    if last:
                        out_ref[0, :, r * wo:(r + 1) * wo] = (
                            row.astype(out_ref.dtype))
                    else:
                        start = (r + 1) * wsn + 1       # interior of padded row
                        nref[:, start:start + wo] = row.astype(nref.dtype)
            if not last:
                hp = nref[...]

    return kernel


# ----------------------------------------------------------------------------
# Wrapper
# ----------------------------------------------------------------------------
def root_decoder_pallas(params, c, z):
    """Fused Pallas implementation.  Returns NCHW like the torch module."""
    B = c.shape[0]
    x = jnp.concatenate([c, z], axis=-1).astype(jnp.float32)        # (B, D)
    F2 = params["fc_w"].shape[1]
    c0 = F2 // 32                                                    # F2 = 4*4*c0*2

    # fc (+ folded BatchNorm1d) + GLU : hoisted full-batch XLA GEMM.
    fc_scale = params["fc_gamma"] * jax.lax.rsqrt(params["fc_var"] + EPS)
    fc_shift = params["fc_beta"] - params["fc_mean"] * fc_scale
    y = jnp.dot(x, params["fc_w"] * fc_scale[None, :],
                precision=jax.lax.Precision.HIGHEST) + fc_shift[None, :]
    f = F2 // 2
    h = y[:, :f] * jax.nn.sigmoid(y[:, f:])
    h = h.reshape(B, c0, 4, 4)                                       # torch .view
    if not params["blocks"]:
        return h

    # Zero-pad once for the first block and flatten spatial (row stride 6).
    h0p = jnp.pad(h, ((0, 0), (0, 0), (1, 1), (1, 1)))
    h0p = h0p.reshape(B, c0, 6 * 6).astype(jnp.bfloat16)

    sel = jnp.asarray(_SEL)
    inputs = [h0p]
    spec_meta = [((1, c0, 36), False)]   # (block_shape, grid-invariant?)
    geoms = []
    hh = ww = 4
    cin = c0
    for blk in params["blocks"]:
        w = blk["w"]                                   # (3, 3, cin, 2*cout) HWIO
        c2 = w.shape[-1]
        cout = c2 // 2
        scale = blk["gamma"] * jax.lax.rsqrt(blk["var"] + EPS)
        shift = (blk["beta"] - blk["mean"] * scale).reshape(c2, 1)
        # Fold BN scale into weights; build the 16 effective 2x2-tap matrices
        # Keff[py,px,ay,ax] (each a sum of the original 3x3 taps).
        wsc = w * scale[None, None, None, :]
        keff = jnp.einsum('pad,qbe,deio->pqaboi', sel, sel, wsc)    # (2,2,2,2,c2,cin)
        keff = keff.reshape(16, c2, cin).transpose(1, 0, 2)
        keff = keff.reshape(c2, 16 * cin).astype(jnp.bfloat16)      # lane-dense
        # Column-interleave operators: E[px][x, 2x+px] = 1 (tiny, exact).
        e = np.zeros((2, ww, 2 * ww), np.float32)
        for px in range(2):
            e[px, np.arange(ww), 2 * np.arange(ww) + px] = 1.0
        inputs += [keff, shift.astype(jnp.float32), jnp.asarray(e)]
        spec_meta += [((c2, 16 * cin), True), ((c2, 1), True),
                      ((2, ww, 2 * ww), True)]
        geoms.append((cin, cout, hh, ww))
        hh, ww, cin = 2 * hh, 2 * ww, cout

    cfin, hf, wf = cin, hh, ww
    n_blocks = len(geoms)
    scratch_shapes = [
        pltpu.VMEM(
            (geoms[k][1], (2 * geoms[k][2] + 2) * (2 * geoms[k][3] + 2)),
            jnp.bfloat16)
        for k in range(n_blocks - 1)]

    def build_specs(single_buffer_consts):
        specs = []
        for shape, const in spec_meta:
            if const:
                kwargs = ({"pipeline_mode": pl.Buffered(1)}
                          if single_buffer_consts else {})
                idx_map = ((lambda b: (0, 0)) if len(shape) == 2
                           else (lambda b: (0, 0, 0)))
                specs.append(pl.BlockSpec(shape, idx_map, **kwargs))
            else:
                specs.append(pl.BlockSpec(shape, lambda b: (b, 0, 0)))
        return specs

    def run(single_buffer_consts):
        return pl.pallas_call(
            _make_kernel(tuple(geoms), n_blocks),
            out_shape=jax.ShapeDtypeStruct((B, cfin, hf * wf), jnp.float32),
            grid=(B,),
            in_specs=build_specs(single_buffer_consts),
            out_specs=pl.BlockSpec((1, cfin, hf * wf), lambda b: (b, 0, 0)),
            scratch_shapes=scratch_shapes,
            compiler_params=pltpu.CompilerParams(
                dimension_semantics=("parallel",),
                vmem_limit_bytes=32 * 1024 * 1024),
        )(*inputs)

    try:
        # Grid-invariant operands single-buffered (halves constant VMEM use).
        out_flat = run(True)
    except Exception:
        # Fallback for Pallas versions without BlockSpec pipeline_mode support.
        out_flat = run(False)

    # (c, h*w) is channel-major, so NCHW is a free contiguous reshape.
    return out_flat.reshape(B, cfin, hf, wf)


# ----------------------------------------------------------------------------
# Parameters (deterministic, synthetic) and pure-JAX reference
# ----------------------------------------------------------------------------
def init_params(key, init_channels, cond_dim, z_dim, n_upsample):
    D = cond_dim + z_dim
    F2 = 4 * 4 * init_channels * 2
    keys = iter(jax.random.split(key, 8 + 8 * n_upsample))
    p = {
        "fc_w": 0.05 * jax.random.normal(next(keys), (D, F2), jnp.float32),
        "fc_gamma": 1.0 + 0.1 * jax.random.normal(next(keys), (F2,), jnp.float32),
        "fc_beta": 0.1 * jax.random.normal(next(keys), (F2,), jnp.float32),
        "fc_mean": 0.05 * jax.random.normal(next(keys), (F2,), jnp.float32),
        "fc_var": 1.0 + 0.1 * jax.random.uniform(next(keys), (F2,), jnp.float32),
        "blocks": [],
    }
    channels = [init_channels // 2 ** i for i in range(n_upsample + 1)]
    assert channels[-1] > 0, "Too many upsampling blocks / Too few channels"
    for cin, cout in zip(channels[:-1], channels[1:]):
        c2 = 2 * cout
        p["blocks"].append({
            "w": (1.0 / (3.0 * (cin ** 0.5)))
                 * jax.random.normal(next(keys), (3, 3, cin, c2), jnp.float32),
            "gamma": 1.0 + 0.1 * jax.random.normal(next(keys), (c2,), jnp.float32),
            "beta": 0.1 * jax.random.normal(next(keys), (c2,), jnp.float32),
            "mean": 0.05 * jax.random.normal(next(keys), (c2,), jnp.float32),
            "var": 1.0 + 0.1 * jax.random.uniform(next(keys), (c2,), jnp.float32),
        })
    return p


def root_decoder_reference(params, c, z):
    """Pure-JAX (XLA, highest precision) reference.  NCHW output."""
    x = jnp.concatenate([c, z], axis=-1).astype(jnp.float32)
    y = jnp.dot(x, params["fc_w"], precision=jax.lax.Precision.HIGHEST)
    scale = params["fc_gamma"] * jax.lax.rsqrt(params["fc_var"] + EPS)
    shift = params["fc_beta"] - params["fc_mean"] * scale
    y = y * scale + shift
    f = y.shape[1] // 2
    h = y[:, :f] * jax.nn.sigmoid(y[:, f:])
    B = c.shape[0]
    C = f // 16
    x = h.reshape(B, C, 4, 4)                                        # NCHW
    for blk in params["blocks"]:
        x = jnp.repeat(jnp.repeat(x, 2, axis=2), 2, axis=3)
        y = jax.lax.conv_general_dilated(
            x, blk["w"], window_strides=(1, 1), padding=((1, 1), (1, 1)),
            dimension_numbers=("NCHW", "HWIO", "NCHW"),
            precision=jax.lax.Precision.HIGHEST)
        scale = blk["gamma"] * jax.lax.rsqrt(blk["var"] + EPS)
        shift = blk["beta"] - blk["mean"] * scale
        y = y * scale[None, :, None, None] + shift[None, :, None, None]
        cout = y.shape[1] // 2
        x = y[:, :cout] * jax.nn.sigmoid(y[:, cout:])
    return x


if __name__ == "__main__":
    # Small config: init_channels=16, cond_dim=8, z_dim=8, n_upsample=2
    # -> output (B, 16/2**2, 4*2**2, 4*2**2) = (2, 4, 16, 16)
    init_channels, cond_dim, z_dim, n_upsample = 16, 8, 8, 2
    B = 2

    key = jax.random.PRNGKey(0)
    kp, kc, kz = jax.random.split(key, 3)
    params = init_params(kp, init_channels, cond_dim, z_dim, n_upsample)
    c = jax.random.normal(kc, (B, cond_dim), jnp.float32)
    z = jax.random.normal(kz, (B, z_dim), jnp.float32)

    out = root_decoder_pallas(params, c, z)
    out = jax.block_until_ready(out)

    expected_shape = (B, init_channels // 2 ** n_upsample,
                      4 * 2 ** n_upsample, 4 * 2 ** n_upsample)
    assert out.shape == expected_shape, (out.shape, expected_shape)

    ref = root_decoder_reference(params, c, z)
    err = float(jnp.max(jnp.abs(out - ref)))
    # bf16 MXU paths (weights + inter-block activations) vs f32 HIGHEST ref.
    assert err < 1e-2, f"max abs error too large: {err}"

    print("KERNEL_OK")
</pallas_src>

<mosaic_0001>
module attributes {stable_mosaic.version = 11 : i64} {
  func.func @kernel(%arg0: i32, %arg1: memref<1x16x36xbf16, #tpu.memory_space<vmem>>, %arg2: memref<16x256xbf16, #tpu.memory_space<vmem>>, %arg3: memref<16x1xf32, #tpu.memory_space<vmem>>, %arg4: memref<2x4x8xf32, #tpu.memory_space<vmem>>, %arg5: memref<8x128xbf16, #tpu.memory_space<vmem>>, %arg6: memref<8x1xf32, #tpu.memory_space<vmem>>, %arg7: memref<2x8x16xf32, #tpu.memory_space<vmem>>, %arg8: memref<1x4x256xf32, #tpu.memory_space<vmem>>, %arg9: memref<8x100xbf16, #tpu.memory_space<vmem>>) attributes {dimension_semantics = [#tpu.dimension_semantics<parallel>], iteration_bounds = array<i64: 2>, scalar_prefetch = 0 : i64, scratch_operands = 1 : i64, tpu.core_type = #tpu.core_type<tc>, window_params = [{transform_indices = @transform_0, window_bounds = array<i64: 1, 16, 36>}, {pipeline_mode = #tpu.pipeline_mode<synchronous>, transform_indices = @transform_1, window_bounds = array<i64: 16, 256>}, {pipeline_mode = #tpu.pipeline_mode<synchronous>, transform_indices = @transform_2, window_bounds = array<i64: 16, 1>}, {pipeline_mode = #tpu.pipeline_mode<synchronous>, transform_indices = @transform_3, window_bounds = array<i64: 2, 4, 8>}, {pipeline_mode = #tpu.pipeline_mode<synchronous>, transform_indices = @transform_4, window_bounds = array<i64: 8, 128>}, {pipeline_mode = #tpu.pipeline_mode<synchronous>, transform_indices = @transform_5, window_bounds = array<i64: 8, 1>}, {pipeline_mode = #tpu.pipeline_mode<synchronous>, transform_indices = @transform_6, window_bounds = array<i64: 2, 8, 16>}, {transform_indices = @transform_7, window_bounds = array<i64: 1, 4, 256>}]} {
    %c0 = arith.constant 0 : index
    %c0_0 = arith.constant 0 : index
    %c0_1 = arith.constant 0 : index
    %0 = vector.load %arg1[%c0, %c0_0, %c0_1] : memref<1x16x36xbf16, #tpu.memory_space<vmem>>, vector<1x16x36xbf16>
    %1 = vector.shape_cast %0 : vector<1x16x36xbf16> to vector<16x36xbf16>
    %c0_2 = arith.constant 0 : index
    %c0_3 = arith.constant 0 : index
    %2 = vector.load %arg3[%c0_2, %c0_3] : memref<16x1xf32, #tpu.memory_space<vmem>>, vector<16x1xf32>
    %c0_4 = arith.constant 0 : index
    %c0_5 = arith.constant 0 : index
    %3 = vector.load %arg2[%c0_4, %c0_5] : memref<16x256xbf16, #tpu.memory_space<vmem>>, vector<16x16xbf16>
    %4 = vector.extract_strided_slice %1 {offsets = [0, 0], sizes = [16, 22], strides = [1, 1]} : vector<16x36xbf16> to vector<16x22xbf16>
    %cst = arith.constant dense<0.000000e+00> : vector<16x22xf32>
    %5 = tpu.matmul %3, %4, %cst {dimension_numbers = #tpu.dot_dimension_numbers<[1], [0], [0], [1], [0, 0, 1, 1], [], []>} : vector<16x16xbf16>, vector<16x22xbf16>, vector<16x22xf32> -> vector<16x22xf32>
    %6 = vector.broadcast %2 : vector<16x1xf32> to vector<16x22xf32>
    %7 = arith.addf %6, %5 : vector<16x22xf32>
    %c0_6 = arith.constant 0 : index
    %c16 = arith.constant 16 : index
    %8 = vector.load %arg2[%c0_6, %c16] : memref<16x256xbf16, #tpu.memory_space<vmem>>, vector<16x16xbf16>
    %9 = vector.extract_strided_slice %1 {offsets = [0, 1], sizes = [16, 22], strides = [1, 1]} : vector<16x36xbf16> to vector<16x22xbf16>
    %cst_7 = arith.constant dense<0.000000e+00> : vector<16x22xf32>
    %10 = tpu.matmul %8, %9, %cst_7 {dimension_numbers = #tpu.dot_dimension_numbers<[1], [0], [0], [1], [0, 0, 1, 1], [], []>} : vector<16x16xbf16>, vector<16x22xbf16>, vector<16x22xf32> -> vector<16x22xf32>
    %11 = arith.addf %7, %10 : vector<16x22xf32>
    %c0_8 = arith.constant 0 : index
    %c32 = arith.constant 32 : index
    %12 = vector.load %arg2[%c0_8, %c32] : memref<16x256xbf16, #tpu.memory_space<vmem>>, vector<16x16xbf16>
    %13 = vector.extract_strided_slice %1 {offsets = [0, 6], sizes = [16, 22], strides = [1, 1]} : vector<16x36xbf16> to vector<16x22xbf16>
    %cst_9 = arith.constant dense<0.000000e+00> : vector<16x22xf32>
    %14 = tpu.matmul %12, %13, %cst_9 {dimension_numbers = #tpu.dot_dimension_numbers<[1], [0], [0], [1], [0, 0, 1, 1], [], []>} : vector<16x16xbf16>, vector<16x22xbf16>, vector<16x22xf32> -> vector<16x22xf32>
    %15 = arith.addf %11, %14 : vector<16x22xf32>
    %c0_10 = arith.constant 0 : index
    %c48 = arith.constant 48 : index
    %16 = vector.load %arg2[%c0_10, %c48] : memref<16x256xbf16, #tpu.memory_space<vmem>>, vector<16x16xbf16>
    %17 = vector.extract_strided_slice %1 {offsets = [0, 7], sizes = [16, 22], strides = [1, 1]} : vector<16x36xbf16> to vector<16x22xbf16>
    %cst_11 = arith.constant dense<0.000000e+00> : vector<16x22xf32>
    %18 = tpu.matmul %16, %17, %cst_11 {dimension_numbers = #tpu.dot_dimension_numbers<[1], [0], [0], [1], [0, 0, 1, 1], [], []>} : vector<16x16xbf16>, vector<16x22xbf16>, vector<16x22xf32> -> vector<16x22xf32>
    %19 = arith.addf %15, %18 : vector<16x22xf32>
    %20 = vector.extract_strided_slice %19 {offsets = [0, 0], sizes = [8, 22], strides = [1, 1]} : vector<16x22xf32> to vector<8x22xf32>
    %21 = vector.extract_strided_slice %19 {offsets = [8, 0], sizes = [8, 22], strides = [1, 1]} : vector<16x22xf32> to vector<8x22xf32>
    %cst_12 = arith.constant 5.000000e-01 : f32
    %22 = vector.broadcast %cst_12 : f32 to vector<8x22xf32>
    %23 = arith.mulf %22, %21 : vector<8x22xf32>
    %24 = math.tanh %23 : vector<8x22xf32>
    %cst_13 = arith.constant 5.000000e-01 : f32
    %25 = vector.broadcast %cst_13 : f32 to vector<8x22xf32>
    %26 = arith.mulf %25, %24 : vector<8x22xf32>
    %cst_14 = arith.constant 5.000000e-01 : f32
    %27 = vector.broadcast %cst_14 : f32 to vector<8x22xf32>
    %28 = arith.addf %26, %27 : vector<8x22xf32>
    %29 = arith.mulf %20, %28 : vector<8x22xf32>
    %c0_15 = arith.constant 0 : index
    %c64 = arith.constant 64 : index
    %30 = vector.load %arg2[%c0_15, %c64] : memref<16x256xbf16, #tpu.memory_space<vmem>>, vector<16x16xbf16>
    %31 = vector.extract_strided_slice %1 {offsets = [0, 1], sizes = [16, 22], strides = [1, 1]} : vector<16x36xbf16> to vector<16x22xbf16>
    %cst_16 = arith.constant dense<0.000000e+00> : vector<16x22xf32>
    %32 = tpu.matmul %30, %31, %cst_16 {dimension_numbers = #tpu.dot_dimension_numbers<[1], [0], [0], [1], [0, 0, 1, 1], [], []>} : vector<16x16xbf16>, vector<16x22xbf16>, vector<16x22xf32> -> vector<16x22xf32>
    %33 = vector.broadcast %2 : vector<16x1xf32> to vector<16x22xf32>
    %34 = arith.addf %33, %32 : vector<16x22xf32>
    %c0_17 = arith.constant 0 : index
    %c80 = arith.constant 80 : index
    %35 = vector.load %arg2[%c0_17, %c80] : memref<16x256xbf16, #tpu.memory_space<vmem>>, vector<16x16xbf16>
    %36 = vector.extract_strided_slice %1 {offsets = [0, 2], sizes = [16, 22], strides = [1, 1]} : vector<16x36xbf16> to vector<16x22xbf16>
    %cst_18 = arith.constant dense<0.000000e+00> : vector<16x22xf32>
    %37 = tpu.matmul %35, %36, %cst_18 {dimension_numbers = #tpu.dot_dimension_numbers<[1], [0], [0], [1], [0, 0, 1, 1], [], []>} : vector<16x16xbf16>, vector<16x22xbf16>, vector<16x22xf32> -> vector<16x22xf32>
    %38 = arith.addf %34, %37 : vector<16x22xf32>
    %c0_19 = arith.constant 0 : index
    %c96 = arith.constant 96 : index
    %39 = vector.load %arg2[%c0_19, %c96] : memref<16x256xbf16, #tpu.memory_space<vmem>>, vector<16x16xbf16>
    %40 = vector.extract_strided_slice %1 {offsets = [0, 7], sizes = [16, 22], strides = [1, 1]} : vector<16x36xbf16> to vector<16x22xbf16>
    %cst_20 = arith.constant dense<0.000000e+00> : vector<16x22xf32>
    %41 = tpu.matmul %39, %40, %cst_20 {dimension_numbers = #tpu.dot_dimension_numbers<[1], [0], [0], [1], [0, 0, 1, 1], [], []>} : vector<16x16xbf16>, vector<16x22xbf16>, vector<16x22xf32> -> vector<16x22xf32>
    %42 = arith.addf %38, %41 : vector<16x22xf32>
    %c0_21 = arith.constant 0 : index
    %c112 = arith.constant 112 : index
    %43 = vector.load %arg2[%c0_21, %c112] : memref<16x256xbf16, #tpu.memory_space<vmem>>, vector<16x16xbf16>
    %44 = vector.extract_strided_slice %1 {offsets = [0, 8], sizes = [16, 22], strides = [1, 1]} : vector<16x36xbf16> to vector<16x22xbf16>
    %cst_22 = arith.constant dense<0.000000e+00> : vector<16x22xf32>
    %45 = tpu.matmul %43, %44, %cst_22 {dimension_numbers = #tpu.dot_dimension_numbers<[1], [0], [0], [1], [0, 0, 1, 1], [], []>} : vector<16x16xbf16>, vector<16x22xbf16>, vector<16x22xf32> -> vector<16x22xf32>
    %46 = arith.addf %42, %45 : vector<16x22xf32>
    %47 = vector.extract_strided_slice %46 {offsets = [0, 0], sizes = [8, 22], strides = [1, 1]} : vector<16x22xf32> to vector<8x22xf32>
    %48 = vector.extract_strided_slice %46 {offsets = [8, 0], sizes = [8, 22], strides = [1, 1]} : vector<16x22xf32> to vector<8x22xf32>
    %cst_23 = arith.constant 5.000000e-01 : f32
    %49 = vector.broadcast %cst_23 : f32 to vector<8x22xf32>
    %50 = arith.mulf %49, %48 : vector<8x22xf32>
    %51 = math.tanh %50 : vector<8x22xf32>
    %cst_24 = arith.constant 5.000000e-01 : f32
    %52 = vector.broadcast %cst_24 : f32 to vector<8x22xf32>
    %53 = arith.mulf %52, %51 : vector<8x22xf32>
    %cst_25 = arith.constant 5.000000e-01 : f32
    %54 = vector.broadcast %cst_25 : f32 to vector<8x22xf32>
    %55 = arith.addf %53, %54 : vector<8x22xf32>
    %56 = arith.mulf %47, %55 : vector<8x22xf32>
    %c0_26 = arith.constant 0 : index
    %c128 = arith.constant 128 : index
    %57 = vector.load %arg2[%c0_26, %c128] : memref<16x256xbf16, #tpu.memory_space<vmem>>, vector<16x16xbf16>
    %58 = vector.extract_strided_slice %1 {offsets = [0, 6], sizes = [16, 22], strides = [1, 1]} : vector<16x36xbf16> to vector<16x22xbf16>
    %cst_27 = arith.constant dense<0.000000e+00> : vector<16x22xf32>
    %59 = tpu.matmul %57, %58, %cst_27 {dimension_numbers = #tpu.dot_dimension_numbers<[1], [0], [0], [1], [0, 0, 1, 1], [], []>} : vector<16x16xbf16>, vector<16x22xbf16>, vector<16x22xf32> -> vector<16x22xf32>
    %60 = vector.broadcast %2 : vector<16x1xf32> to vector<16x22xf32>
    %61 = arith.addf %60, %59 : vector<16x22xf32>
    %c0_28 = arith.constant 0 : index
    %c144 = arith.constant 144 : index
    %62 = vector.load %arg2[%c0_28, %c144] : memref<16x256xbf16, #tpu.memory_space<vmem>>, vector<16x16xbf16>
    %63 = vector.extract_strided_slice %1 {offsets = [0, 7], sizes = [16, 22], strides = [1, 1]} : vector<16x36xbf16> to vector<16x22xbf16>
    %cst_29 = arith.constant dense<0.000000e+00> : vector<16x22xf32>
    %64 = tpu.matmul %62, %63, %cst_29 {dimension_numbers = #tpu.dot_dimension_numbers<[1], [0], [0], [1], [0, 0, 1, 1], [], []>} : vector<16x16xbf16>, vector<16x22xbf16>, vector<16x22xf32> -> vector<16x22xf32>
    %65 = arith.addf %61, %64 : vector<16x22xf32>
    %c0_30 = arith.constant 0 : index
    %c160 = arith.constant 160 : index
    %66 = vector.load %arg2[%c0_30, %c160] : memref<16x256xbf16, #tpu.memory_space<vmem>>, vector<16x16xbf16>
    %67 = vector.extract_strided_slice %1 {offsets = [0, 12], sizes = [16, 22], strides = [1, 1]} : vector<16x36xbf16> to vector<16x22xbf16>
    %cst_31 = arith.constant dense<0.000000e+00> : vector<16x22xf32>
    %68 = tpu.matmul %66, %67, %cst_31 {dimension_numbers = #tpu.dot_dimension_numbers<[1], [0], [0], [1], [0, 0, 1, 1], [], []>} : vector<16x16xbf16>, vector<16x22xbf16>, vector<16x22xf32> -> vector<16x22xf32>
    %69 = arith.addf %65, %68 : vector<16x22xf32>
    %c0_32 = arith.constant 0 : index
    %c176 = arith.constant 176 : index
    %70 = vector.load %arg2[%c0_32, %c176] : memref<16x256xbf16, #tpu.memory_space<vmem>>, vector<16x16xbf16>
    %71 = vector.extract_strided_slice %1 {offsets = [0, 13], sizes = [16, 22], strides = [1, 1]} : vector<16x36xbf16> to vector<16x22xbf16>
    %cst_33 = arith.constant dense<0.000000e+00> : vector<16x22xf32>
    %72 = tpu.matmul %70, %71, %cst_33 {dimension_numbers = #tpu.dot_dimension_numbers<[1], [0], [0], [1], [0, 0, 1, 1], [], []>} : vector<16x16xbf16>, vector<16x22xbf16>, vector<16x22xf32> -> vector<16x22xf32>
    %73 = arith.addf %69, %72 : vector<16x22xf32>
    %74 = vector.extract_strided_slice %73 {offsets = [0, 0], sizes = [8, 22], strides = [1, 1]} : vector<16x22xf32> to vector<8x22xf32>
    %75 = vector.extract_strided_slice %73 {offsets = [8, 0], sizes = [8, 22], strides = [1, 1]} : vector<16x22xf32> to vector<8x22xf32>
    %cst_34 = arith.constant 5.000000e-01 : f32
    %76 = vector.broadcast %cst_34 : f32 to vector<8x22xf32>
    %77 = arith.mulf %76, %75 : vector<8x22xf32>
    %78 = math.tanh %77 : vector<8x22xf32>
    %cst_35 = arith.constant 5.000000e-01 : f32
    %79 = vector.broadcast %cst_35 : f32 to vector<8x22xf32>
    %80 = arith.mulf %79, %78 : vector<8x22xf32>
    %cst_36 = arith.constant 5.000000e-01 : f32
    %81 = vector.broadcast %cst_36 : f32 to vector<8x22xf32>
    %82 = arith.addf %80, %81 : vector<8x22xf32>
    %83 = arith.mulf %74, %82 : vector<8x22xf32>
    %c0_37 = arith.constant 0 : index
    %c192 = arith.constant 192 : index
    %84 = vector.load %arg2[%c0_37, %c192] : memref<16x256xbf16, #tpu.memory_space<vmem>>, vector<16x16xbf16>
    %85 = vector.extract_strided_slice %1 {offsets = [0, 7], sizes = [16, 22], strides = [1, 1]} : vector<16x36xbf16> to vector<16x22xbf16>
    %cst_38 = arith.constant dense<0.000000e+00> : vector<16x22xf32>
    %86 = tpu.matmul %84, %85, %cst_38 {dimension_numbers = #tpu.dot_dimension_numbers<[1], [0], [0], [1], [0, 0, 1, 1], [], []>} : vector<16x16xbf16>, vector<16x22xbf16>, vector<16x22xf32> -> vector<16x22xf32>
    %87 = vector.broadcast %2 : vector<16x1xf32> to vector<16x22xf32>
    %88 = arith.addf %87, %86 : vector<16x22xf32>
    %c0_39 = arith.constant 0 : index
    %c208 = arith.constant 208 : index
    %89 = vector.load %arg2[%c0_39, %c208] : memref<16x256xbf16, #tpu.memory_space<vmem>>, vector<16x16xbf16>
    %90 = vector.extract_strided_slice %1 {offsets = [0, 8], sizes = [16, 22], strides = [1, 1]} : vector<16x36xbf16> to vector<16x22xbf16>
    %cst_40 = arith.constant dense<0.000000e+00> : vector<16x22xf32>
    %91 = tpu.matmul %89, %90, %cst_40 {dimension_numbers = #tpu.dot_dimension_numbers<[1], [0], [0], [1], [0, 0, 1, 1], [], []>} : vector<16x16xbf16>, vector<16x22xbf16>, vector<16x22xf32> -> vector<16x22xf32>
    %92 = arith.addf %88, %91 : vector<16x22xf32>
    %c0_41 = arith.constant 0 : index
    %c224 = arith.constant 224 : index
    %93 = vector.load %arg2[%c0_41, %c224] : memref<16x256xbf16, #tpu.memory_space<vmem>>, vector<16x16xbf16>
    %94 = vector.extract_strided_slice %1 {offsets = [0, 13], sizes = [16, 22], strides = [1, 1]} : vector<16x36xbf16> to vector<16x22xbf16>
    %cst_42 = arith.constant dense<0.000000e+00> : vector<16x22xf32>
    %95 = tpu.matmul %93, %94, %cst_42 {dimension_numbers = #tpu.dot_dimension_numbers<[1], [0], [0], [1], [0, 0, 1, 1], [], []>} : vector<16x16xbf16>, vector<16x22xbf16>, vector<16x22xf32> -> vector<16x22xf32>
    %96 = arith.addf %92, %95 : vector<16x22xf32>
    %c0_43 = arith.constant 0 : index
    %c240 = arith.constant 240 : index
    %97 = vector.load %arg2[%c0_43, %c240] : memref<16x256xbf16, #tpu.memory_space<vmem>>, vector<16x16xbf16>
    %98 = vector.extract_strided_slice %1 {offsets = [0, 14], sizes = [16, 22], strides = [1, 1]} : vector<16x36xbf16> to vector<16x22xbf16>
    %cst_44 = arith.constant dense<0.000000e+00> : vector<16x22xf32>
    %99 = tpu.matmul %97, %98, %cst_44 {dimension_numbers = #tpu.dot_dimension_numbers<[1], [0], [0], [1], [0, 0, 1, 1], [], []>} : vector<16x16xbf16>, vector<16x22xbf16>, vector<16x22xf32> -> vector<16x22xf32>
    %100 = arith.addf %96, %99 : vector<16x22xf32>
    %101 = vector.extract_strided_slice %100 {offsets = [0, 0], sizes = [8, 22], strides = [1, 1]} : vector<16x22xf32> to vector<8x22xf32>
    %102 = vector.extract_strided_slice %100 {offsets = [8, 0], sizes = [8, 22], strides = [1, 1]} : vector<16x22xf32> to vector<8x22xf32>
    %cst_45 = arith.constant 5.000000e-01 : f32
    %103 = vector.broadcast %cst_45 : f32 to vector<8x22xf32>
    %104 = arith.mulf %103, %102 : vector<8x22xf32>
    %105 = math.tanh %104 : vector<8x22xf32>
    %cst_46 = arith.constant 5.000000e-01 : f32
    %106 = vector.broadcast %cst_46 : f32 to vector<8x22xf32>
    %107 = arith.mulf %106, %105 : vector<8x22xf32>
    %cst_47 = arith.constant 5.000000e-01 : f32
    %108 = vector.broadcast %cst_47 : f32 to vector<8x22xf32>
    %109 = arith.addf %107, %108 : vector<8x22xf32>
    %110 = arith.mulf %101, %109 : vector<8x22xf32>
    %c0_48 = arith.constant 0 : index
    %c0_49 = arith.constant 0 : index
    %c0_50 = arith.constant 0 : index
    %111 = vector.load %arg4[%c0_48, %c0_49, %c0_50] : memref<2x4x8xf32, #tpu.memory_space<vmem>>, vector<1x4x8xf32>
    %112 = vector.shape_cast %111 : vector<1x4x8xf32> to vector<4x8xf32>
    %c1 = arith.constant 1 : index
    %c0_51 = arith.constant 0 : index
    %c0_52 = arith.constant 0 : index
    %113 = vector.load %arg4[%c1, %c0_51, %c0_52] : memref<2x4x8xf32, #tpu.memory_space<vmem>>, vector<1x4x8xf32>
    %114 = vector.shape_cast %113 : vector<1x4x8xf32> to vector<4x8xf32>
    %cst_53 = arith.constant 0.000000e+00 : bf16
    %115 = vector.broadcast %cst_53 : bf16 to vector<8x100xbf16>
    %c0_54 = arith.constant 0 : index
    %c0_55 = arith.constant 0 : index
    %116 = vector.load %arg9[%c0_54, %c0_55] : memref<8x100xbf16, #tpu.memory_space<vmem>>, vector<8x100xbf16>
    tpu.vector_store %arg9[%c0_54, %c0_55], %115 {strides = array<i32>} : memref<8x100xbf16, #tpu.memory_space<vmem>>, vector<8x100xbf16>,
    %117 = vector.extract_strided_slice %29 {offsets = [0, 0], sizes = [8, 4], strides = [1, 1]} : vector<8x22xf32> to vector<8x4xf32>
    %cst_56 = arith.constant dense<0.000000e+00> : vector<8x8xf32>
    %118 = tpu.matmul %117, %112, %cst_56 {dimension_numbers = #tpu.dot_dimension_numbers<[1], [0], [0], [1], [0, 0, 1, 1], [], []>} : vector<8x4xf32>, vector<4x8xf32>, vector<8x8xf32> -> vector<8x8xf32>
    %119 = vector.extract_strided_slice %56 {offsets = [0, 0], sizes = [8, 4], strides = [1, 1]} : vector<8x22xf32> to vector<8x4xf32>
    %cst_57 = arith.constant dense<0.000000e+00> : vector<8x8xf32>
    %120 = tpu.matmul %119, %114, %cst_57 {dimension_numbers = #tpu.dot_dimension_numbers<[1], [0], [0], [1], [0, 0, 1, 1], [], []>} : vector<8x4xf32>, vector<4x8xf32>, vector<8x8xf32> -> vector<8x8xf32>
    %121 = arith.addf %118, %120 : vector<8x8xf32>
    %122 = arith.truncf %121 : vector<8x8xf32> to vector<8x8xbf16>
    %c0_58 = arith.constant 0 : index
    %c11 = arith.constant 11 : index
    %123 = vector.load %arg9[%c0_58, %c11] : memref<8x100xbf16, #tpu.memory_space<vmem>>, vector<8x8xbf16>
    tpu.vector_store %arg9[%c0_58, %c11], %122 {strides = array<i32>} : memref<8x100xbf16, #tpu.memory_space<vmem>>, vector<8x8xbf16>,
    %124 = vector.extract_strided_slice %83 {offsets = [0, 0], sizes = [8, 4], strides = [1, 1]} : vector<8x22xf32> to vector<8x4xf32>
    %cst_59 = arith.constant dense<0.000000e+00> : vector<8x8xf32>
    %125 = tpu.matmul %124, %112, %cst_59 {dimension_numbers = #tpu.dot_dimension_numbers<[1], [0], [0], [1], [0, 0, 1, 1], [], []>} : vector<8x4xf32>, vector<4x8xf32>, vector<8x8xf32> -> vector<8x8xf32>
    %126 = vector.extract_strided_slice %110 {offsets = [0, 0], sizes = [8, 4], strides = [1, 1]} : vector<8x22xf32> to vector<8x4xf32>
    %cst_60 = arith.constant dense<0.000000e+00> : vector<8x8xf32>
    %127 = tpu.matmul %126, %114, %cst_60 {dimension_numbers = #tpu.dot_dimension_numbers<[1], [0], [0], [1], [0, 0, 1, 1], [], []>} : vector<8x4xf32>, vector<4x8xf32>, vector<8x8xf32> -> vector<8x8xf32>
    %128 = arith.addf %125, %127 : vector<8x8xf32>
    %129 = arith.truncf %128 : vector<8x8xf32> to vector<8x8xbf16>
    %c0_61 = arith.constant 0 : index
    %c21 = arith.constant 21 : index
    %130 = vector.load %arg9[%c0_61, %c21] : memref<8x100xbf16, #tpu.memory_space<vmem>>, vector<8x8xbf16>
    tpu.vector_store %arg9[%c0_61, %c21], %129 {strides = array<i32>} : memref<8x100xbf16, #tpu.memory_space<vmem>>, vector<8x8xbf16>,
    %131 = vector.extract_strided_slice %29 {offsets = [0, 6], sizes = [8, 4], strides = [1, 1]} : vector<8x22xf32> to vector<8x4xf32>
    %cst_62 = arith.constant dense<0.000000e+00> : vector<8x8xf32>
    %132 = tpu.matmul %131, %112, %cst_62 {dimension_numbers = #tpu.dot_dimension_numbers<[1], [0], [0], [1], [0, 0, 1, 1], [], []>} : vector<8x4xf32>, vector<4x8xf32>, vector<8x8xf32> -> vector<8x8xf32>
    %133 = vector.extract_strided_slice %56 {offsets = [0, 6], sizes = [8, 4], strides = [1, 1]} : vector<8x22xf32> to vector<8x4xf32>
    %cst_63 = arith.constant dense<0.000000e+00> : vector<8x8xf32>
    %134 = tpu.matmul %133, %114, %cst_63 {dimension_numbers = #tpu.dot_dimension_numbers<[1], [0], [0], [1], [0, 0, 1, 1], [], []>} : vector<8x4xf32>, vector<4x8xf32>, vector<8x8xf32> -> vector<8x8xf32>
    %135 = arith.addf %132, %134 : vector<8x8xf32>
    %136 = arith.truncf %135 : vector<8x8xf32> to vector<8x8xbf16>
    %c0_64 = arith.constant 0 : index
    %c31 = arith.constant 31 : index
    %137 = vector.load %arg9[%c0_64, %c31] : memref<8x100xbf16, #tpu.memory_space<vmem>>, vector<8x8xbf16>
    tpu.vector_store %arg9[%c0_64, %c31], %136 {strides = array<i32>} : memref<8x100xbf16, #tpu.memory_space<vmem>>, vector<8x8xbf16>,
    %138 = vector.extract_strided_slice %83 {offsets = [0, 6], sizes = [8, 4], strides = [1, 1]} : vector<8x22xf32> to vector<8x4xf32>
    %cst_65 = arith.constant dense<0.000000e+00> : vector<8x8xf32>
    %139 = tpu.matmul %138, %112, %cst_65 {dimension_numbers = #tpu.dot_dimension_numbers<[1], [0], [0], [1], [0, 0, 1, 1], [], []>} : vector<8x4xf32>, vector<4x8xf32>, vector<8x8xf32> -> vector<8x8xf32>
    %140 = vector.extract_strided_slice %110 {offsets = [0, 6], sizes = [8, 4], strides = [1, 1]} : vector<8x22xf32> to vector<8x4xf32>
    %cst_66 = arith.constant dense<0.000000e+00> : vector<8x8xf32>
    %141 = tpu.matmul %140, %114, %cst_66 {dimension_numbers = #tpu.dot_dimension_numbers<[1], [0], [0], [1], [0, 0, 1, 1], [], []>} : vector<8x4xf32>, vector<4x8xf32>, vector<8x8xf32> -> vector<8x8xf32>
    %142 = arith.addf %139, %141 : vector<8x8xf32>
    %143 = arith.truncf %142 : vector<8x8xf32> to vector<8x8xbf16>
    %c0_67 = arith.constant 0 : index
    %c41 = arith.constant 41 : index
    %144 = vector.load %arg9[%c0_67, %c41] : memref<8x100xbf16, #tpu.memory_space<vmem>>, vector<8x8xbf16>
    tpu.vector_store %arg9[%c0_67, %c41], %143 {strides = array<i32>} : memref<8x100xbf16, #tpu.memory_space<vmem>>, vector<8x8xbf16>,
    %145 = vector.extract_strided_slice %29 {offsets = [0, 12], sizes = [8, 4], strides = [1, 1]} : vector<8x22xf32> to vector<8x4xf32>
    %cst_68 = arith.constant dense<0.000000e+00> : vector<8x8xf32>
    %146 = tpu.matmul %145, %112, %cst_68 {dimension_numbers = #tpu.dot_dimension_numbers<[1], [0], [0], [1], [0, 0, 1, 1], [], []>} : vector<8x4xf32>, vector<4x8xf32>, vector<8x8xf32> -> vector<8x8xf32>
    %147 = vector.extract_strided_slice %56 {offsets = [0, 12], sizes = [8, 4], strides = [1, 1]} : vector<8x22xf32> to vector<8x4xf32>
    %cst_69 = arith.constant dense<0.000000e+00> : vector<8x8xf32>
    %148 = tpu.matmul %147, %114, %cst_69 {dimension_numbers = #tpu.dot_dimension_numbers<[1], [0], [0], [1], [0, 0, 1, 1], [], []>} : vector<8x4xf32>, vector<4x8xf32>, vector<8x8xf32> -> vector<8x8xf32>
    %149 = arith.addf %146, %148 : vector<8x8xf32>
    %150 = arith.truncf %149 : vector<8x8xf32> to vector<8x8xbf16>
    %c0_70 = arith.constant 0 : index
    %c51 = arith.constant 51 : index
    %151 = vector.load %arg9[%c0_70, %c51] : memref<8x100xbf16, #tpu.memory_space<vmem>>, vector<8x8xbf16>
    tpu.vector_store %arg9[%c0_70, %c51], %150 {strides = array<i32>} : memref<8x100xbf16, #tpu.memory_space<vmem>>, vector<8x8xbf16>,
    %152 = vector.extract_strided_slice %83 {offsets = [0, 12], sizes = [8, 4], strides = [1, 1]} : vector<8x22xf32> to vector<8x4xf32>
    %cst_71 = arith.constant dense<0.000000e+00> : vector<8x8xf32>
    %153 = tpu.matmul %152, %112, %cst_71 {dimension_numbers = #tpu.dot_dimension_numbers<[1], [0], [0], [1], [0, 0, 1, 1], [], []>} : vector<8x4xf32>, vector<4x8xf32>, vector<8x8xf32> -> vector<8x8xf32>
    %154 = vector.extract_strided_slice %110 {offsets = [0, 12], sizes = [8, 4], strides = [1, 1]} : vector<8x22xf32> to vector<8x4xf32>
    %cst_72 = arith.constant dense<0.000000e+00> : vector<8x8xf32>
    %155 = tpu.matmul %154, %114, %cst_72 {dimension_numbers = #tpu.dot_dimension_numbers<[1], [0], [0], [1], [0, 0, 1, 1], [], []>} : vector<8x4xf32>, vector<4x8xf32>, vector<8x8xf32> -> vector<8x8xf32>
    %156 = arith.addf %153, %155 : vector<8x8xf32>
    %157 = arith.truncf %156 : vector<8x8xf32> to vector<8x8xbf16>
    %c0_73 = arith.constant 0 : index
    %c61 = arith.constant 61 : index
    %158 = vector.load %arg9[%c0_73, %c61] : memref<8x100xbf16, #tpu.memory_space<vmem>>, vector<8x8xbf16>
    tpu.vector_store %arg9[%c0_73, %c61], %157 {strides = array<i32>} : memref<8x100xbf16, #tpu.memory_space<vmem>>, vector<8x8xbf16>,
    %159 = vector.extract_strided_slice %29 {offsets = [0, 18], sizes = [8, 4], strides = [1, 1]} : vector<8x22xf32> to vector<8x4xf32>
    %cst_74 = arith.constant dense<0.000000e+00> : vector<8x8xf32>
    %160 = tpu.matmul %159, %112, %cst_74 {dimension_numbers = #tpu.dot_dimension_numbers<[1], [0], [0], [1], [0, 0, 1, 1], [], []>} : vector<8x4xf32>, vector<4x8xf32>, vector<8x8xf32> -> vector<8x8xf32>
    %161 = vector.extract_strided_slice %56 {offsets = [0, 18], sizes = [8, 4], strides = [1, 1]} : vector<8x22xf32> to vector<8x4xf32>
    %cst_75 = arith.constant dense<0.000000e+00> : vector<8x8xf32>
    %162 = tpu.matmul %161, %114, %cst_75 {dimension_numbers = #tpu.dot_dimension_numbers<[1], [0], [0], [1], [0, 0, 1, 1], [], []>} : vector<8x4xf32>, vector<4x8xf32>, vector<8x8xf32> -> vector<8x8xf32>
    %163 = arith.addf %160, %162 : vector<8x8xf32>
    %164 = arith.truncf %163 : vector<8x8xf32> to vector<8x8xbf16>
    %c0_76 = arith.constant 0 : index
    %c71 = arith.constant 71 : index
    %165 = vector.load %arg9[%c0_76, %c71] : memref<8x100xbf16, #tpu.memory_space<vmem>>, vector<8x8xbf16>
    tpu.vector_store %arg9[%c0_76, %c71], %164 {strides = array<i32>} : memref<8x100xbf16, #tpu.memory_space<vmem>>, vector<8x8xbf16>,
    %166 = vector.extract_strided_slice %83 {offsets = [0, 18], sizes = [8, 4], strides = [1, 1]} : vector<8x22xf32> to vector<8x4xf32>
    %cst_77 = arith.constant dense<0.000000e+00> : vector<8x8xf32>
    %167 = tpu.matmul %166, %112, %cst_77 {dimension_numbers = #tpu.dot_dimension_numbers<[1], [0], [0], [1], [0, 0, 1, 1], [], []>} : vector<8x4xf32>, vector<4x8xf32>, vector<8x8xf32> -> vector<8x8xf32>
    %168 = vector.extract_strided_slice %110 {offsets = [0, 18], sizes = [8, 4], strides = [1, 1]} : vector<8x22xf32> to vector<8x4xf32>
    %cst_78 = arith.constant dense<0.000000e+00> : vector<8x8xf32>
    %169 = tpu.matmul %168, %114, %cst_78 {dimension_numbers = #tpu.dot_dimension_numbers<[1], [0], [0], [1], [0, 0, 1, 1], [], []>} : vector<8x4xf32>, vector<4x8xf32>, vector<8x8xf32> -> vector<8x8xf32>
    %170 = arith.addf %167, %169 : vector<8x8xf32>
    %171 = arith.truncf %170 : vector<8x8xf32> to vector<8x8xbf16>
    %c0_79 = arith.constant 0 : index
    %c81 = arith.constant 81 : index
    %172 = vector.load %arg9[%c0_79, %c81] : memref<8x100xbf16, #tpu.memory_space<vmem>>, vector<8x8xbf16>
    tpu.vector_store %arg9[%c0_79, %c81], %171 {strides = array<i32>} : memref<8x100xbf16, #tpu.memory_space<vmem>>, vector<8x8xbf16>,
    %c0_80 = arith.constant 0 : index
    %c0_81 = arith.constant 0 : index
    %173 = vector.load %arg9[%c0_80, %c0_81] : memref<8x100xbf16, #tpu.memory_space<vmem>>, vector<8x100xbf16>
    %c0_82 = arith.constant 0 : index
    %c0_83 = arith.constant 0 : index
    %174 = vector.load %arg6[%c0_82, %c0_83] : memref<8x1xf32, #tpu.memory_space<vmem>>, vector<8x1xf32>
    %c0_84 = arith.constant 0 : index
    %c0_85 = arith.constant 0 : index
    %175 = vector.load %arg5[%c0_84, %c0_85] : memref<8x128xbf16, #tpu.memory_space<vmem>>, vector<8x8xbf16>
    %176 = vector.extract_strided_slice %173 {offsets = [0, 0], sizes = [8, 78], strides = [1, 1]} : vector<8x100xbf16> to vector<8x78xbf16>
    %cst_86 = arith.constant dense<0.000000e+00> : vector<8x78xf32>
    %177 = tpu.matmul %175, %176, %cst_86 {dimension_numbers = #tpu.dot_dimension_numbers<[1], [0], [0], [1], [0, 0, 1, 1], [], []>} : vector<8x8xbf16>, vector<8x78xbf16>, vector<8x78xf32> -> vector<8x78xf32>
    %178 = vector.broadcast %174 : vector<8x1xf32> to vector<8x78xf32>
    %179 = arith.addf %178, %177 : vector<8x78xf32>
    %c0_87 = arith.constant 0 : index
    %c8 = arith.constant 8 : index
    %180 = vector.load %arg5[%c0_87, %c8] : memref<8x128xbf16, #tpu.memory_space<vmem>>, vector<8x8xbf16>
    %181 = vector.extract_strided_slice %173 {offsets = [0, 1], sizes = [8, 78], strides = [1, 1]} : vector<8x100xbf16> to vector<8x78xbf16>
    %cst_88 = arith.constant dense<0.000000e+00> : vector<8x78xf32>
    %182 = tpu.matmul %180, %181, %cst_88 {dimension_numbers = #tpu.dot_dimension_numbers<[1], [0], [0], [1], [0, 0, 1, 1], [], []>} : vector<8x8xbf16>, vector<8x78xbf16>, vector<8x78xf32> -> vector<8x78xf32>
    %183 = arith.addf %179, %182 : vector<8x78xf32>
    %c0_89 = arith.constant 0 : index
    %c16_90 = arith.constant 16 : index
    %184 = vector.load %arg5[%c0_89, %c16_90] : memref<8x128xbf16, #tpu.memory_space<vmem>>, vector<8x8xbf16>
    %185 = vector.extract_strided_slice %173 {offsets = [0, 10], sizes = [8, 78], strides = [1, 1]} : vector<8x100xbf16> to vector<8x78xbf16>
    %cst_91 = arith.constant dense<0.000000e+00> : vector<8x78xf32>
    %186 = tpu.matmul %184, %185, %cst_91 {dimension_numbers = #tpu.dot_dimension_numbers<[1], [0], [0], [1], [0, 0, 1, 1], [], []>} : vector<8x8xbf16>, vector<8x78xbf16>, vector<8x78xf32> -> vector<8x78xf32>
    %187 = arith.addf %183, %186 : vector<8x78xf32>
    %c0_92 = arith.constant 0 : index
    %c24 = arith.constant 24 : index
    %188 = vector.load %arg5[%c0_92, %c24] : memref<8x128xbf16, #tpu.memory_space<vmem>>, vector<8x8xbf16>
    %189 = vector.extract_strided_slice %173 {offsets = [0, 11], sizes = [8, 78], strides = [1, 1]} : vector<8x100xbf16> to vector<8x78xbf16>
    %cst_93 = arith.constant dense<0.000000e+00> : vector<8x78xf32>
    %190 = tpu.matmul %188, %189, %cst_93 {dimension_numbers = #tpu.dot_dimension_numbers<[1], [0], [0], [1], [0, 0, 1, 1], [], []>} : vector<8x8xbf16>, vector<8x78xbf16>, vector<8x78xf32> -> vector<8x78xf32>
    %191 = arith.addf %187, %190 : vector<8x78xf32>
    %192 = vector.extract_strided_slice %191 {offsets = [0, 0], sizes = [4, 78], strides = [1, 1]} : vector<8x78xf32> to vector<4x78xf32>
    %193 = vector.extract_strided_slice %191 {offsets = [4, 0], sizes = [4, 78], strides = [1, 1]} : vector<8x78xf32> to vector<4x78xf32>
    %cst_94 = arith.constant 5.000000e-01 : f32
    %194 = vector.broadcast %cst_94 : f32 to vector<4x78xf32>
    %195 = arith.mulf %194, %193 : vector<4x78xf32>
    %196 = math.tanh %195 : vector<4x78xf32>
    %cst_95 = arith.constant 5.000000e-01 : f32
    %197 = vector.broadcast %cst_95 : f32 to vector<4x78xf32>
    %198 = arith.mulf %197, %196 : vector<4x78xf32>
    %cst_96 = arith.constant 5.000000e-01 : f32
    %199 = vector.broadcast %cst_96 : f32 to vector<4x78xf32>
    %200 = arith.addf %198, %199 : vector<4x78xf32>
    %201 = arith.mulf %192, %200 : vector<4x78xf32>
    %c0_97 = arith.constant 0 : index
    %c32_98 = arith.constant 32 : index
    %202 = vector.load %arg5[%c0_97, %c32_98] : memref<8x128xbf16, #tpu.memory_space<vmem>>, vector<8x8xbf16>
    %203 = vector.extract_strided_slice %173 {offsets = [0, 1], sizes = [8, 78], strides = [1, 1]} : vector<8x100xbf16> to vector<8x78xbf16>
    %cst_99 = arith.constant dense<0.000000e+00> : vector<8x78xf32>
    %204 = tpu.matmul %202, %203, %cst_99 {dimension_numbers = #tpu.dot_dimension_numbers<[1], [0], [0], [1], [0, 0, 1, 1], [], []>} : vector<8x8xbf16>, vector<8x78xbf16>, vector<8x78xf32> -> vector<8x78xf32>
    %205 = vector.broadcast %174 : vector<8x1xf32> to vector<8x78xf32>
    %206 = arith.addf %205, %204 : vector<8x78xf32>
    %c0_100 = arith.constant 0 : index
    %c40 = arith.constant 40 : index
    %207 = vector.load %arg5[%c0_100, %c40] : memref<8x128xbf16, #tpu.memory_space<vmem>>, vector<8x8xbf16>
    %208 = vector.extract_strided_slice %173 {offsets = [0, 2], sizes = [8, 78], strides = [1, 1]} : vector<8x100xbf16> to vector<8x78xbf16>
    %cst_101 = arith.constant dense<0.000000e+00> : vector<8x78xf32>
    %209 = tpu.matmul %207, %208, %cst_101 {dimension_numbers = #tpu.dot_dimension_numbers<[1], [0], [0], [1], [0, 0, 1, 1], [], []>} : vector<8x8xbf16>, vector<8x78xbf16>, vector<8x78xf32> -> vector<8x78xf32>
    %210 = arith.addf %206, %209 : vector<8x78xf32>
    %c0_102 = arith.constant 0 : index
    %c48_103 = arith.constant 48 : index
    %211 = vector.load %arg5[%c0_102, %c48_103] : memref<8x128xbf16, #tpu.memory_space<vmem>>, vector<8x8xbf16>
    %212 = vector.extract_strided_slice %173 {offsets = [0, 11], sizes = [8, 78], strides = [1, 1]} : vector<8x100xbf16> to vector<8x78xbf16>
    %cst_104 = arith.constant dense<0.000000e+00> : vector<8x78xf32>
    %213 = tpu.matmul %211, %212, %cst_104 {dimension_numbers = #tpu.dot_dimension_numbers<[1], [0], [0], [1], [0, 0, 1, 1], [], []>} : vector<8x8xbf16>, vector<8x78xbf16>, vector<8x78xf32> -> vector<8x78xf32>
    %214 = arith.addf %210, %213 : vector<8x78xf32>
    %c0_105 = arith.constant 0 : index
    %c56 = arith.constant 56 : index
    %215 = vector.load %arg5[%c0_105, %c56] : memref<8x128xbf16, #tpu.memory_space<vmem>>, vector<8x8xbf16>
    %216 = vector.extract_strided_slice %173 {offsets = [0, 12], sizes = [8, 78], strides = [1, 1]} : vector<8x100xbf16> to vector<8x78xbf16>
    %cst_106 = arith.constant dense<0.000000e+00> : vector<8x78xf32>
    %217 = tpu.matmul %215, %216, %cst_106 {dimension_numbers = #tpu.dot_dimension_numbers<[1], [0], [0], [1], [0, 0, 1, 1], [], []>} : vector<8x8xbf16>, vector<8x78xbf16>, vector<8x78xf32> -> vector<8x78xf32>
    %218 = arith.addf %214, %217 : vector<8x78xf32>
    %219 = vector.extract_strided_slice %218 {offsets = [0, 0], sizes = [4, 78], strides = [1, 1]} : vector<8x78xf32> to vector<4x78xf32>
    %220 = vector.extract_strided_slice %218 {offsets = [4, 0], sizes = [4, 78], strides = [1, 1]} : vector<8x78xf32> to vector<4x78xf32>
    %cst_107 = arith.constant 5.000000e-01 : f32
    %221 = vector.broadcast %cst_107 : f32 to vector<4x78xf32>
    %222 = arith.mulf %221, %220 : vector<4x78xf32>
    %223 = math.tanh %222 : vector<4x78xf32>
    %cst_108 = arith.constant 5.000000e-01 : f32
    %224 = vector.broadcast %cst_108 : f32 to vector<4x78xf32>
    %225 = arith.mulf %224, %223 : vector<4x78xf32>
    %cst_109 = arith.constant 5.000000e-01 : f32
    %226 = vector.broadcast %cst_109 : f32 to vector<4x78xf32>
    %227 = arith.addf %225, %226 : vector<4x78xf32>
    %228 = arith.mulf %219, %227 : vector<4x78xf32>
    %c0_110 = arith.constant 0 : index
    %c64_111 = arith.constant 64 : index
    %229 = vector.load %arg5[%c0_110, %c64_111] : memref<8x128xbf16, #tpu.memory_space<vmem>>, vector<8x8xbf16>
    %230 = vector.extract_strided_slice %173 {offsets = [0, 10], sizes = [8, 78], strides = [1, 1]} : vector<8x100xbf16> to vector<8x78xbf16>
    %cst_112 = arith.constant dense<0.000000e+00> : vector<8x78xf32>
    %231 = tpu.matmul %229, %230, %cst_112 {dimension_numbers = #tpu.dot_dimension_numbers<[1], [0], [0], [1], [0, 0, 1, 1], [], []>} : vector<8x8xbf16>, vector<8x78xbf16>, vector<8x78xf32> -> vector<8x78xf32>
    %232 = vector.broadcast %174 : vector<8x1xf32> to vector<8x78xf32>
    %233 = arith.addf %232, %231 : vector<8x78xf32>
    %c0_113 = arith.constant 0 : index
    %c72 = arith.constant 72 : index
    %234 = vector.load %arg5[%c0_113, %c72] : memref<8x128xbf16, #tpu.memory_space<vmem>>, vector<8x8xbf16>
    %235 = vector.extract_strided_slice %173 {offsets = [0, 11], sizes = [8, 78], strides = [1, 1]} : vector<8x100xbf16> to vector<8x78xbf16>
    %cst_114 = arith.constant dense<0.000000e+00> : vector<8x78xf32>
    %236 = tpu.matmul %234, %235, %cst_114 {dimension_numbers = #tpu.dot_dimension_numbers<[1], [0], [0], [1], [0, 0, 1, 1], [], []>} : vector<8x8xbf16>, vector<8x78xbf16>, vector<8x78xf32> -> vector<8x78xf32>
    %237 = arith.addf %233, %236 : vector<8x78xf32>
    %c0_115 = arith.constant 0 : index
    %c80_116 = arith.constant 80 : index
    %238 = vector.load %arg5[%c0_115, %c80_116] : memref<8x128xbf16, #tpu.memory_space<vmem>>, vector<8x8xbf16>
    %239 = vector.extract_strided_slice %173 {offsets = [0, 20], sizes = [8, 78], strides = [1, 1]} : vector<8x100xbf16> to vector<8x78xbf16>
    %cst_117 = arith.constant dense<0.000000e+00> : vector<8x78xf32>
    %240 = tpu.matmul %238, %239, %cst_117 {dimension_numbers = #tpu.dot_dimension_numbers<[1], [0], [0], [1], [0, 0, 1, 1], [], []>} : vector<8x8xbf16>, vector<8x78xbf16>, vector<8x78xf32> -> vector<8x78xf32>
    %241 = arith.addf %237, %240 : vector<8x78xf32>
    %c0_118 = arith.constant 0 : index
    %c88 = arith.constant 88 : index
    %242 = vector.load %arg5[%c0_118, %c88] : memref<8x128xbf16, #tpu.memory_space<vmem>>, vector<8x8xbf16>
    %243 = vector.extract_strided_slice %173 {offsets = [0, 21], sizes = [8, 78], strides = [1, 1]} : vector<8x100xbf16> to vector<8x78xbf16>
    %cst_119 = arith.constant dense<0.000000e+00> : vector<8x78xf32>
    %244 = tpu.matmul %242, %243, %cst_119 {dimension_numbers = #tpu.dot_dimension_numbers<[1], [0], [0], [1], [0, 0, 1, 1], [], []>} : vector<8x8xbf16>, vector<8x78xbf16>, vector<8x78xf32> -> vector<8x78xf32>
    %245 = arith.addf %241, %244 : vector<8x78xf32>
    %246 = vector.extract_strided_slice %245 {offsets = [0, 0], sizes = [4, 78], strides = [1, 1]} : vector<8x78xf32> to vector<4x78xf32>
    %247 = vector.extract_strided_slice %245 {offsets = [4, 0], sizes = [4, 78], strides = [1, 1]} : vector<8x78xf32> to vector<4x78xf32>
    %cst_120 = arith.constant 5.000000e-01 : f32
    %248 = vector.broadcast %cst_120 : f32 to vector<4x78xf32>
    %249 = arith.mulf %248, %247 : vector<4x78xf32>
    %250 = math.tanh %249 : vector<4x78xf32>
    %cst_121 = arith.constant 5.000000e-01 : f32
    %251 = vector.broadcast %cst_121 : f32 to vector<4x78xf32>
    %252 = arith.mulf %251, %250 : vector<4x78xf32>
    %cst_122 = arith.constant 5.000000e-01 : f32
    %253 = vector.broadcast %cst_122 : f32 to vector<4x78xf32>
    %254 = arith.addf %252, %253 : vector<4x78xf32>
    %255 = arith.mulf %246, %254 : vector<4x78xf32>
    %c0_123 = arith.constant 0 : index
    %c96_124 = arith.constant 96 : index
    %256 = vector.load %arg5[%c0_123, %c96_124] : memref<8x128xbf16, #tpu.memory_space<vmem>>, vector<8x8xbf16>
    %257 = vector.extract_strided_slice %173 {offsets = [0, 11], sizes = [8, 78], strides = [1, 1]} : vector<8x100xbf16> to vector<8x78xbf16>
    %cst_125 = arith.constant dense<0.000000e+00> : vector<8x78xf32>
    %258 = tpu.matmul %256, %257, %cst_125 {dimension_numbers = #tpu.dot_dimension_numbers<[1], [0], [0], [1], [0, 0, 1, 1], [], []>} : vector<8x8xbf16>, vector<8x78xbf16>, vector<8x78xf32> -> vector<8x78xf32>
    %259 = vector.broadcast %174 : vector<8x1xf32> to vector<8x78xf32>
    %260 = arith.addf %259, %258 : vector<8x78xf32>
    %c0_126 = arith.constant 0 : index
    %c104 = arith.constant 104 : index
    %261 = vector.load %arg5[%c0_126, %c104] : memref<8x128xbf16, #tpu.memory_space<vmem>>, vector<8x8xbf16>
    %262 = vector.extract_strided_slice %173 {offsets = [0, 12], sizes = [8, 78], strides = [1, 1]} : vector<8x100xbf16> to vector<8x78xbf16>
    %cst_127 = arith.constant dense<0.000000e+00> : vector<8x78xf32>
    %263 = tpu.matmul %261, %262, %cst_127 {dimension_numbers = #tpu.dot_dimension_numbers<[1], [0], [0], [1], [0, 0, 1, 1], [], []>} : vector<8x8xbf16>, vector<8x78xbf16>, vector<8x78xf32> -> vector<8x78xf32>
    %264 = arith.addf %260, %263 : vector<8x78xf32>
    %c0_128 = arith.constant 0 : index
    %c112_129 = arith.constant 112 : index
    %265 = vector.load %arg5[%c0_128, %c112_129] : memref<8x128xbf16, #tpu.memory_space<vmem>>, vector<8x8xbf16>
    %266 = vector.extract_strided_slice %173 {offsets = [0, 21], sizes = [8, 78], strides = [1, 1]} : vector<8x100xbf16> to vector<8x78xbf16>
    %cst_130 = arith.constant dense<0.000000e+00> : vector<8x78xf32>
    %267 = tpu.matmul %265, %266, %cst_130 {dimension_numbers = #tpu.dot_dimension_numbers<[1], [0], [0], [1], [0, 0, 1, 1], [], []>} : vector<8x8xbf16>, vector<8x78xbf16>, vector<8x78xf32> -> vector<8x78xf32>
    %268 = arith.addf %264, %267 : vector<8x78xf32>
    %c0_131 = arith.constant 0 : index
    %c120 = arith.constant 120 : index
    %269 = vector.load %arg5[%c0_131, %c120] : memref<8x128xbf16, #tpu.memory_space<vmem>>, vector<8x8xbf16>
    %270 = vector.extract_strided_slice %173 {offsets = [0, 22], sizes = [8, 78], strides = [1, 1]} : vector<8x100xbf16> to vector<8x78xbf16>
    %cst_132 = arith.constant dense<0.000000e+00> : vector<8x78xf32>
    %271 = tpu.matmul %269, %270, %cst_132 {dimension_numbers = #tpu.dot_dimension_numbers<[1], [0], [0], [1], [0, 0, 1, 1], [], []>} : vector<8x8xbf16>, vector<8x78xbf16>, vector<8x78xf32> -> vector<8x78xf32>
    %272 = arith.addf %268, %271 : vector<8x78xf32>
    %273 = vector.extract_strided_slice %272 {offsets = [0, 0], sizes = [4, 78], strides = [1, 1]} : vector<8x78xf32> to vector<4x78xf32>
    %274 = vector.extract_strided_slice %272 {offsets = [4, 0], sizes = [4, 78], strides = [1, 1]} : vector<8x78xf32> to vector<4x78xf32>
    %cst_133 = arith.constant 5.000000e-01 : f32
    %275 = vector.broadcast %cst_133 : f32 to vector<4x78xf32>
    %276 = arith.mulf %275, %274 : vector<4x78xf32>
    %277 = math.tanh %276 : vector<4x78xf32>
    %cst_134 = arith.constant 5.000000e-01 : f32
    %278 = vector.broadcast %cst_134 : f32 to vector<4x78xf32>
    %279 = arith.mulf %278, %277 : vector<4x78xf32>
    %cst_135 = arith.constant 5.000000e-01 : f32
    %280 = vector.broadcast %cst_135 : f32 to vector<4x78xf32>
    %281 = arith.addf %279, %280 : vector<4x78xf32>
    %282 = arith.mulf %273, %281 : vector<4x78xf32>
    %c0_136 = arith.constant 0 : index
    %c0_137 = arith.constant 0 : index
    %c0_138 = arith.constant 0 : index
    %283 = vector.load %arg7[%c0_136, %c0_137, %c0_138] : memref<2x8x16xf32, #tpu.memory_space<vmem>>, vector<1x8x16xf32>
    %284 = vector.shape_cast %283 : vector<1x8x16xf32> to vector<8x16xf32>
    %c1_139 = arith.constant 1 : index
    %c0_140 = arith.constant 0 : index
    %c0_141 = arith.constant 0 : index
    %285 = vector.load %arg7[%c1_139, %c0_140, %c0_141] : memref<2x8x16xf32, #tpu.memory_space<vmem>>, vector<1x8x16xf32>
    %286 = vector.shape_cast %285 : vector<1x8x16xf32> to vector<8x16xf32>
    %287 = vector.extract_strided_slice %201 {offsets = [0, 0], sizes = [4, 8], strides = [1, 1]} : vector<4x78xf32> to vector<4x8xf32>
    %cst_142 = arith.constant dense<0.000000e+00> : vector<4x16xf32>
    %288 = tpu.matmul %287, %284, %cst_142 {dimension_numbers = #tpu.dot_dimension_numbers<[1], [0], [0], [1], [0, 0, 1, 1], [], []>} : vector<4x8xf32>, vector<8x16xf32>, vector<4x16xf32> -> vector<4x16xf32>
    %289 = vector.extract_strided_slice %228 {offsets = [0, 0], sizes = [4, 8], strides = [1, 1]} : vector<4x78xf32> to vector<4x8xf32>
    %cst_143 = arith.constant dense<0.000000e+00> : vector<4x16xf32>
    %290 = tpu.matmul %289, %286, %cst_143 {dimension_numbers = #tpu.dot_dimension_numbers<[1], [0], [0], [1], [0, 0, 1, 1], [], []>} : vector<4x8xf32>, vector<8x16xf32>, vector<4x16xf32> -> vector<4x16xf32>
    %291 = arith.addf %288, %290 : vector<4x16xf32>
    %c0_144 = arith.constant 0 : index
    %c0_145 = arith.constant 0 : index
    %c0_146 = arith.constant 0 : index
    %292 = vector.load %arg8[%c0_144, %c0_145, %c0_146] : memref<1x4x256xf32, #tpu.memory_space<vmem>>, vector<1x4x16xf32>
    %293 = vector.shape_cast %292 : vector<1x4x16xf32> to vector<4x16xf32>
    %294 = vector.shape_cast %291 : vector<4x16xf32> to vector<1x4x16xf32>
    tpu.vector_store %arg8[%c0_144, %c0_145, %c0_146], %294 {strides = array<i32>} : memref<1x4x256xf32, #tpu.memory_space<vmem>>, vector<1x4x16xf32>,
    %295 = vector.extract_strided_slice %255 {offsets = [0, 0], sizes = [4, 8], strides = [1, 1]} : vector<4x78xf32> to vector<4x8xf32>
    %cst_147 = arith.constant dense<0.000000e+00> : vector<4x16xf32>
    %296 = tpu.matmul %295, %284, %cst_147 {dimension_numbers = #tpu.dot_dimension_numbers<[1], [0], [0], [1], [0, 0, 1, 1], [], []>} : vector<4x8xf32>, vector<8x16xf32>, vector<4x16xf32> -> vector<4x16xf32>
    %297 = vector.extract_strided_slice %282 {offsets = [0, 0], sizes = [4, 8], strides = [1, 1]} : vector<4x78xf32> to vector<4x8xf32>
    %cst_148 = arith.constant dense<0.000000e+00> : vector<4x16xf32>
    %298 = tpu.matmul %297, %286, %cst_148 {dimension_numbers = #tpu.dot_dimension_numbers<[1], [0], [0], [1], [0, 0, 1, 1], [], []>} : vector<4x8xf32>, vector<8x16xf32>, vector<4x16xf32> -> vector<4x16xf32>
    %299 = arith.addf %296, %298 : vector<4x16xf32>
    %c0_149 = arith.constant 0 : index
    %c0_150 = arith.constant 0 : index
    %c16_151 = arith.constant 16 : index
    %300 = vector.load %arg8[%c0_149, %c0_150, %c16_151] : memref<1x4x256xf32, #tpu.memory_space<vmem>>, vector<1x4x16xf32>
    %301 = vector.shape_cast %300 : vector<1x4x16xf32> to vector<4x16xf32>
    %302 = vector.shape_cast %299 : vector<4x16xf32> to vector<1x4x16xf32>
    tpu.vector_store %arg8[%c0_149, %c0_150, %c16_151], %302 {strides = array<i32>} : memref<1x4x256xf32, #tpu.memory_space<vmem>>, vector<1x4x16xf32>,
    %303 = vector.extract_strided_slice %201 {offsets = [0, 10], sizes = [4, 8], strides = [1, 1]} : vector<4x78xf32> to vector<4x8xf32>
    %cst_152 = arith.constant dense<0.000000e+00> : vector<4x16xf32>
    %304 = tpu.matmul %303, %284, %cst_152 {dimension_numbers = #tpu.dot_dimension_numbers<[1], [0], [0], [1], [0, 0, 1, 1], [], []>} : vector<4x8xf32>, vector<8x16xf32>, vector<4x16xf32> -> vector<4x16xf32>
    %305 = vector.extract_strided_slice %228 {offsets = [0, 10], sizes = [4, 8], strides = [1, 1]} : vector<4x78xf32> to vector<4x8xf32>
    %cst_153 = arith.constant dense<0.000000e+00> : vector<4x16xf32>
    %306 = tpu.matmul %305, %286, %cst_153 {dimension_numbers = #tpu.dot_dimension_numbers<[1], [0], [0], [1], [0, 0, 1, 1], [], []>} : vector<4x8xf32>, vector<8x16xf32>, vector<4x16xf32> -> vector<4x16xf32>
    %307 = arith.addf %304, %306 : vector<4x16xf32>
    %c0_154 = arith.constant 0 : index
    %c0_155 = arith.constant 0 : index
    %c32_156 = arith.constant 32 : index
    %308 = vector.load %arg8[%c0_154, %c0_155, %c32_156] : memref<1x4x256xf32, #tpu.memory_space<vmem>>, vector<1x4x16xf32>
    %309 = vector.shape_cast %308 : vector<1x4x16xf32> to vector<4x16xf32>
    %310 = vector.shape_cast %307 : vector<4x16xf32> to vector<1x4x16xf32>
    tpu.vector_store %arg8[%c0_154, %c0_155, %c32_156], %310 {strides = array<i32>} : memref<1x4x256xf32, #tpu.memory_space<vmem>>, vector<1x4x16xf32>,
    %311 = vector.extract_strided_slice %255 {offsets = [0, 10], sizes = [4, 8], strides = [1, 1]} : vector<4x78xf32> to vector<4x8xf32>
    %cst_157 = arith.constant dense<0.000000e+00> : vector<4x16xf32>
    %312 = tpu.matmul %311, %284, %cst_157 {dimension_numbers = #tpu.dot_dimension_numbers<[1], [0], [0], [1], [0, 0, 1, 1], [], []>} : vector<4x8xf32>, vector<8x16xf32>, vector<4x16xf32> -> vector<4x16xf32>
    %313 = vector.extract_strided_slice %282 {offsets = [0, 10], sizes = [4, 8], strides = [1, 1]} : vector<4x78xf32> to vector<4x8xf32>
    %cst_158 = arith.constant dense<0.000000e+00> : vector<4x16xf32>
    %314 = tpu.matmul %313, %286, %cst_158 {dimension_numbers = #tpu.dot_dimension_numbers<[1], [0], [0], [1], [0, 0, 1, 1], [], []>} : vector<4x8xf32>, vector<8x16xf32>, vector<4x16xf32> -> vector<4x16xf32>
    %315 = arith.addf %312, %314 : vector<4x16xf32>
    %c0_159 = arith.constant 0 : index
    %c0_160 = arith.constant 0 : index
    %c48_161 = arith.constant 48 : index
    %316 = vector.load %arg8[%c0_159, %c0_160, %c48_161] : memref<1x4x256xf32, #tpu.memory_space<vmem>>, vector<1x4x16xf32>
    %317 = vector.shape_cast %316 : vector<1x4x16xf32> to vector<4x16xf32>
    %318 = vector.shape_cast %315 : vector<4x16xf32> to vector<1x4x16xf32>
    tpu.vector_store %arg8[%c0_159, %c0_160, %c48_161], %318 {strides = array<i32>} : memref<1x4x256xf32, #tpu.memory_space<vmem>>, vector<1x4x16xf32>,
    %319 = vector.extract_strided_slice %201 {offsets = [0, 20], sizes = [4, 8], strides = [1, 1]} : vector<4x78xf32> to vector<4x8xf32>
    %cst_162 = arith.constant dense<0.000000e+00> : vector<4x16xf32>
    %320 = tpu.matmul %319, %284, %cst_162 {dimension_numbers = #tpu.dot_dimension_numbers<[1], [0], [0], [1], [0, 0, 1, 1], [], []>} : vector<4x8xf32>, vector<8x16xf32>, vector<4x16xf32> -> vector<4x16xf32>
    %321 = vector.extract_strided_slice %228 {offsets = [0, 20], sizes = [4, 8], strides = [1, 1]} : vector<4x78xf32> to vector<4x8xf32>
    %cst_163 = arith.constant dense<0.000000e+00> : vector<4x16xf32>
    %322 = tpu.matmul %321, %286, %cst_163 {dimension_numbers = #tpu.dot_dimension_numbers<[1], [0], [0], [1], [0, 0, 1, 1], [], []>} : vector<4x8xf32>, vector<8x16xf32>, vector<4x16xf32> -> vector<4x16xf32>
    %323 = arith.addf %320, %322 : vector<4x16xf32>
    %c0_164 = arith.constant 0 : index
    %c0_165 = arith.constant 0 : index
    %c64_166 = arith.constant 64 : index
    %324 = vector.load %arg8[%c0_164, %c0_165, %c64_166] : memref<1x4x256xf32, #tpu.memory_space<vmem>>, vector<1x4x16xf32>
    %325 = vector.shape_cast %324 : vector<1x4x16xf32> to vector<4x16xf32>
    %326 = vector.shape_cast %323 : vector<4x16xf32> to vector<1x4x16xf32>
    tpu.vector_store %arg8[%c0_164, %c0_165, %c64_166], %326 {strides = array<i32>} : memref<1x4x256xf32, #tpu.memory_space<vmem>>, vector<1x4x16xf32>,
    %327 = vector.extract_strided_slice %255 {offsets = [0, 20], sizes = [4, 8], strides = [1, 1]} : vector<4x78xf32> to vector<4x8xf32>
    %cst_167 = arith.constant dense<0.000000e+00> : vector<4x16xf32>
    %328 = tpu.matmul %327, %284, %cst_167 {dimension_numbers = #tpu.dot_dimension_numbers<[1], [0], [0], [1], [0, 0, 1, 1], [], []>} : vector<4x8xf32>, vector<8x16xf32>, vector<4x16xf32> -> vector<4x16xf32>
    %329 = vector.extract_strided_slice %282 {offsets = [0, 20], sizes = [4, 8], strides = [1, 1]} : vector<4x78xf32> to vector<4x8xf32>
    %cst_168 = arith.constant dense<0.000000e+00> : vector<4x16xf32>
    %330 = tpu.matmul %329, %286, %cst_168 {dimension_numbers = #tpu.dot_dimension_numbers<[1], [0], [0], [1], [0, 0, 1, 1], [], []>} : vector<4x8xf32>, vector<8x16xf32>, vector<4x16xf32> -> vector<4x16xf32>
    %331 = arith.addf %328, %330 : vector<4x16xf32>
    %c0_169 = arith.constant 0 : index
    %c0_170 = arith.constant 0 : index
    %c80_171 = arith.constant 80 : index
    %332 = vector.load %arg8[%c0_169, %c0_170, %c80_171] : memref<1x4x256xf32, #tpu.memory_space<vmem>>, vector<1x4x16xf32>
    %333 = vector.shape_cast %332 : vector<1x4x16xf32> to vector<4x16xf32>
    %334 = vector.shape_cast %331 : vector<4x16xf32> to vector<1x4x16xf32>
    tpu.vector_store %arg8[%c0_169, %c0_170, %c80_171], %334 {strides = array<i32>} : memref<1x4x256xf32, #tpu.memory_space<vmem>>, vector<1x4x16xf32>,
    %335 = vector.extract_strided_slice %201 {offsets = [0, 30], sizes = [4, 8], strides = [1, 1]} : vector<4x78xf32> to vector<4x8xf32>
    %cst_172 = arith.constant dense<0.000000e+00> : vector<4x16xf32>
    %336 = tpu.matmul %335, %284, %cst_172 {dimension_numbers = #tpu.dot_dimension_numbers<[1], [0], [0], [1], [0, 0, 1, 1], [], []>} : vector<4x8xf32>, vector<8x16xf32>, vector<4x16xf32> -> vector<4x16xf32>
    %337 = vector.extract_strided_slice %228 {offsets = [0, 30], sizes = [4, 8], strides = [1, 1]} : vector<4x78xf32> to vector<4x8xf32>
    %cst_173 = arith.constant dense<0.000000e+00> : vector<4x16xf32>
    %338 = tpu.matmul %337, %286, %cst_173 {dimension_numbers = #tpu.dot_dimension_numbers<[1], [0], [0], [1], [0, 0, 1, 1], [], []>} : vector<4x8xf32>, vector<8x16xf32>, vector<4x16xf32> -> vector<4x16xf32>
    %339 = arith.addf %336, %338 : vector<4x16xf32>
    %c0_174 = arith.constant 0 : index
    %c0_175 = arith.constant 0 : index
    %c96_176 = arith.constant 96 : index
    %340 = vector.load %arg8[%c0_174, %c0_175, %c96_176] : memref<1x4x256xf32, #tpu.memory_space<vmem>>, vector<1x4x16xf32>
    %341 = vector.shape_cast %340 : vector<1x4x16xf32> to vector<4x16xf32>
    %342 = vector.shape_cast %339 : vector<4x16xf32> to vector<1x4x16xf32>
    tpu.vector_store %arg8[%c0_174, %c0_175, %c96_176], %342 {strides = array<i32>} : memref<1x4x256xf32, #tpu.memory_space<vmem>>, vector<1x4x16xf32>,
    %343 = vector.extract_strided_slice %255 {offsets = [0, 30], sizes = [4, 8], strides = [1, 1]} : vector<4x78xf32> to vector<4x8xf32>
    %cst_177 = arith.constant dense<0.000000e+00> : vector<4x16xf32>
    %344 = tpu.matmul %343, %284, %cst_177 {dimension_numbers = #tpu.dot_dimension_numbers<[1], [0], [0], [1], [0, 0, 1, 1], [], []>} : vector<4x8xf32>, vector<8x16xf32>, vector<4x16xf32> -> vector<4x16xf32>
    %345 = vector.extract_strided_slice %282 {offsets = [0, 30], sizes = [4, 8], strides = [1, 1]} : vector<4x78xf32> to vector<4x8xf32>
    %cst_178 = arith.constant dense<0.000000e+00> : vector<4x16xf32>
    %346 = tpu.matmul %345, %286, %cst_178 {dimension_numbers = #tpu.dot_dimension_numbers<[1], [0], [0], [1], [0, 0, 1, 1], [], []>} : vector<4x8xf32>, vector<8x16xf32>, vector<4x16xf32> -> vector<4x16xf32>
    %347 = arith.addf %344, %346 : vector<4x16xf32>
    %c0_179 = arith.constant 0 : index
    %c0_180 = arith.constant 0 : index
    %c112_181 = arith.constant 112 : index
    %348 = vector.load %arg8[%c0_179, %c0_180, %c112_181] : memref<1x4x256xf32, #tpu.memory_space<vmem>>, vector<1x4x16xf32>
    %349 = vector.shape_cast %348 : vector<1x4x16xf32> to vector<4x16xf32>
    %350 = vector.shape_cast %347 : vector<4x16xf32> to vector<1x4x16xf32>
    tpu.vector_store %arg8[%c0_179, %c0_180, %c112_181], %350 {strides = array<i32>} : memref<1x4x256xf32, #tpu.memory_space<vmem>>, vector<1x4x16xf32>,
    %351 = vector.extract_strided_slice %201 {offsets = [0, 40], sizes = [4, 8], strides = [1, 1]} : vector<4x78xf32> to vector<4x8xf32>
    %cst_182 = arith.constant dense<0.000000e+00> : vector<4x16xf32>
    %352 = tpu.matmul %351, %284, %cst_182 {dimension_numbers = #tpu.dot_dimension_numbers<[1], [0], [0], [1], [0, 0, 1, 1], [], []>} : vector<4x8xf32>, vector<8x16xf32>, vector<4x16xf32> -> vector<4x16xf32>
    %353 = vector.extract_strided_slice %228 {offsets = [0, 40], sizes = [4, 8], strides = [1, 1]} : vector<4x78xf32> to vector<4x8xf32>
    %cst_183 = arith.constant dense<0.000000e+00> : vector<4x16xf32>
    %354 = tpu.matmul %353, %286, %cst_183 {dimension_numbers = #tpu.dot_dimension_numbers<[1], [0], [0], [1], [0, 0, 1, 1], [], []>} : vector<4x8xf32>, vector<8x16xf32>, vector<4x16xf32> -> vector<4x16xf32>
    %355 = arith.addf %352, %354 : vector<4x16xf32>
    %c0_184 = arith.constant 0 : index
    %c0_185 = arith.constant 0 : index
    %c128_186 = arith.constant 128 : index
    %356 = vector.load %arg8[%c0_184, %c0_185, %c128_186] : memref<1x4x256xf32, #tpu.memory_space<vmem>>, vector<1x4x16xf32>
    %357 = vector.shape_cast %356 : vector<1x4x16xf32> to vector<4x16xf32>
    %358 = vector.shape_cast %355 : vector<4x16xf32> to vector<1x4x16xf32>
    tpu.vector_store %arg8[%c0_184, %c0_185, %c128_186], %358 {strides = array<i32>} : memref<1x4x256xf32, #tpu.memory_space<vmem>>, vector<1x4x16xf32>,
    %359 = vector.extract_strided_slice %255 {offsets = [0, 40], sizes = [4, 8], strides = [1, 1]} : vector<4x78xf32> to vector<4x8xf32>
    %cst_187 = arith.constant dense<0.000000e+00> : vector<4x16xf32>
    %360 = tpu.matmul %359, %284, %cst_187 {dimension_numbers = #tpu.dot_dimension_numbers<[1], [0], [0], [1], [0, 0, 1, 1], [], []>} : vector<4x8xf32>, vector<8x16xf32>, vector<4x16xf32> -> vector<4x16xf32>
    %361 = vector.extract_strided_slice %282 {offsets = [0, 40], sizes = [4, 8], strides = [1, 1]} : vector<4x78xf32> to vector<4x8xf32>
    %cst_188 = arith.constant dense<0.000000e+00> : vector<4x16xf32>
    %362 = tpu.matmul %361, %286, %cst_188 {dimension_numbers = #tpu.dot_dimension_numbers<[1], [0], [0], [1], [0, 0, 1, 1], [], []>} : vector<4x8xf32>, vector<8x16xf32>, vector<4x16xf32> -> vector<4x16xf32>
    %363 = arith.addf %360, %362 : vector<4x16xf32>
    %c0_189 = arith.constant 0 : index
    %c0_190 = arith.constant 0 : index
    %c144_191 = arith.constant 144 : index
    %364 = vector.load %arg8[%c0_189, %c0_190, %c144_191] : memref<1x4x256xf32, #tpu.memory_space<vmem>>, vector<1x4x16xf32>
    %365 = vector.shape_cast %364 : vector<1x4x16xf32> to vector<4x16xf32>
    %366 = vector.shape_cast %363 : vector<4x16xf32> to vector<1x4x16xf32>
    tpu.vector_store %arg8[%c0_189, %c0_190, %c144_191], %366 {strides = array<i32>} : memref<1x4x256xf32, #tpu.memory_space<vmem>>, vector<1x4x16xf32>,
    %367 = vector.extract_strided_slice %201 {offsets = [0, 50], sizes = [4, 8], strides = [1, 1]} : vector<4x78xf32> to vector<4x8xf32>
    %cst_192 = arith.constant dense<0.000000e+00> : vector<4x16xf32>
    %368 = tpu.matmul %367, %284, %cst_192 {dimension_numbers = #tpu.dot_dimension_numbers<[1], [0], [0], [1], [0, 0, 1, 1], [], []>} : vector<4x8xf32>, vector<8x16xf32>, vector<4x16xf32> -> vector<4x16xf32>
    %369 = vector.extract_strided_slice %228 {offsets = [0, 50], sizes = [4, 8], strides = [1, 1]} : vector<4x78xf32> to vector<4x8xf32>
    %cst_193 = arith.constant dense<0.000000e+00> : vector<4x16xf32>
    %370 = tpu.matmul %369, %286, %cst_193 {dimension_numbers = #tpu.dot_dimension_numbers<[1], [0], [0], [1], [0, 0, 1, 1], [], []>} : vector<4x8xf32>, vector<8x16xf32>, vector<4x16xf32> -> vector<4x16xf32>
    %371 = arith.addf %368, %370 : vector<4x16xf32>
    %c0_194 = arith.constant 0 : index
    %c0_195 = arith.constant 0 : index
    %c160_196 = arith.constant 160 : index
    %372 = vector.load %arg8[%c0_194, %c0_195, %c160_196] : memref<1x4x256xf32, #tpu.memory_space<vmem>>, vector<1x4x16xf32>
    %373 = vector.shape_cast %372 : vector<1x4x16xf32> to vector<4x16xf32>
    %374 = vector.shape_cast %371 : vector<4x16xf32> to vector<1x4x16xf32>
    tpu.vector_store %arg8[%c0_194, %c0_195, %c160_196], %374 {strides = array<i32>} : memref<1x4x256xf32, #tpu.memory_space<vmem>>, vector<1x4x16xf32>,
    %375 = vector.extract_strided_slice %255 {offsets = [0, 50], sizes = [4, 8], strides = [1, 1]} : vector<4x78xf32> to vector<4x8xf32>
    %cst_197 = arith.constant dense<0.000000e+00> : vector<4x16xf32>
    %376 = tpu.matmul %375, %284, %cst_197 {dimension_numbers = #tpu.dot_dimension_numbers<[1], [0], [0], [1], [0, 0, 1, 1], [], []>} : vector<4x8xf32>, vector<8x16xf32>, vector<4x16xf32> -> vector<4x16xf32>
    %377 = vector.extract_strided_slice %282 {offsets = [0, 50], sizes = [4, 8], strides = [1, 1]} : vector<4x78xf32> to vector<4x8xf32>
    %cst_198 = arith.constant dense<0.000000e+00> : vector<4x16xf32>
    %378 = tpu.matmul %377, %286, %cst_198 {dimension_numbers = #tpu.dot_dimension_numbers<[1], [0], [0], [1], [0, 0, 1, 1], [], []>} : vector<4x8xf32>, vector<8x16xf32>, vector<4x16xf32> -> vector<4x16xf32>
    %379 = arith.addf %376, %378 : vector<4x16xf32>
    %c0_199 = arith.constant 0 : index
    %c0_200 = arith.constant 0 : index
    %c176_201 = arith.constant 176 : index
    %380 = vector.load %arg8[%c0_199, %c0_200, %c176_201] : memref<1x4x256xf32, #tpu.memory_space<vmem>>, vector<1x4x16xf32>
    %381 = vector.shape_cast %380 : vector<1x4x16xf32> to vector<4x16xf32>
    %382 = vector.shape_cast %379 : vector<4x16xf32> to vector<1x4x16xf32>
    tpu.vector_store %arg8[%c0_199, %c0_200, %c176_201], %382 {strides = array<i32>} : memref<1x4x256xf32, #tpu.memory_space<vmem>>, vector<1x4x16xf32>,
    %383 = vector.extract_strided_slice %201 {offsets = [0, 60], sizes = [4, 8], strides = [1, 1]} : vector<4x78xf32> to vector<4x8xf32>
    %cst_202 = arith.constant dense<0.000000e+00> : vector<4x16xf32>
    %384 = tpu.matmul %383, %284, %cst_202 {dimension_numbers = #tpu.dot_dimension_numbers<[1], [0], [0], [1], [0, 0, 1, 1], [], []>} : vector<4x8xf32>, vector<8x16xf32>, vector<4x16xf32> -> vector<4x16xf32>
    %385 = vector.extract_strided_slice %228 {offsets = [0, 60], sizes = [4, 8], strides = [1, 1]} : vector<4x78xf32> to vector<4x8xf32>
    %cst_203 = arith.constant dense<0.000000e+00> : vector<4x16xf32>
    %386 = tpu.matmul %385, %286, %cst_203 {dimension_numbers = #tpu.dot_dimension_numbers<[1], [0], [0], [1], [0, 0, 1, 1], [], []>} : vector<4x8xf32>, vector<8x16xf32>, vector<4x16xf32> -> vector<4x16xf32>
    %387 = arith.addf %384, %386 : vector<4x16xf32>
    %c0_204 = arith.constant 0 : index
    %c0_205 = arith.constant 0 : index
    %c192_206 = arith.constant 192 : index
    %388 = vector.load %arg8[%c0_204, %c0_205, %c192_206] : memref<1x4x256xf32, #tpu.memory_space<vmem>>, vector<1x4x16xf32>
    %389 = vector.shape_cast %388 : vector<1x4x16xf32> to vector<4x16xf32>
    %390 = vector.shape_cast %387 : vector<4x16xf32> to vector<1x4x16xf32>
    tpu.vector_store %arg8[%c0_204, %c0_205, %c192_206], %390 {strides = array<i32>} : memref<1x4x256xf32, #tpu.memory_space<vmem>>, vector<1x4x16xf32>,
    %391 = vector.extract_strided_slice %255 {offsets = [0, 60], sizes = [4, 8], strides = [1, 1]} : vector<4x78xf32> to vector<4x8xf32>
    %cst_207 = arith.constant dense<0.000000e+00> : vector<4x16xf32>
    %392 = tpu.matmul %391, %284, %cst_207 {dimension_numbers = #tpu.dot_dimension_numbers<[1], [0], [0], [1], [0, 0, 1, 1], [], []>} : vector<4x8xf32>, vector<8x16xf32>, vector<4x16xf32> -> vector<4x16xf32>
    %393 = vector.extract_strided_slice %282 {offsets = [0, 60], sizes = [4, 8], strides = [1, 1]} : vector<4x78xf32> to vector<4x8xf32>
    %cst_208 = arith.constant dense<0.000000e+00> : vector<4x16xf32>
    %394 = tpu.matmul %393, %286, %cst_208 {dimension_numbers = #tpu.dot_dimension_numbers<[1], [0], [0], [1], [0, 0, 1, 1], [], []>} : vector<4x8xf32>, vector<8x16xf32>, vector<4x16xf32> -> vector<4x16xf32>
    %395 = arith.addf %392, %394 : vector<4x16xf32>
    %c0_209 = arith.constant 0 : index
    %c0_210 = arith.constant 0 : index
    %c208_211 = arith.constant 208 : index
    %396 = vector.load %arg8[%c0_209, %c0_210, %c208_211] : memref<1x4x256xf32, #tpu.memory_space<vmem>>, vector<1x4x16xf32>
    %397 = vector.shape_cast %396 : vector<1x4x16xf32> to vector<4x16xf32>
    %398 = vector.shape_cast %395 : vector<4x16xf32> to vector<1x4x16xf32>
    tpu.vector_store %arg8[%c0_209, %c0_210, %c208_211], %398 {strides = array<i32>} : memref<1x4x256xf32, #tpu.memory_space<vmem>>, vector<1x4x16xf32>,
    %399 = vector.extract_strided_slice %201 {offsets = [0, 70], sizes = [4, 8], strides = [1, 1]} : vector<4x78xf32> to vector<4x8xf32>
    %cst_212 = arith.constant dense<0.000000e+00> : vector<4x16xf32>
    %400 = tpu.matmul %399, %284, %cst_212 {dimension_numbers = #tpu.dot_dimension_numbers<[1], [0], [0], [1], [0, 0, 1, 1], [], []>} : vector<4x8xf32>, vector<8x16xf32>, vector<4x16xf32> -> vector<4x16xf32>
    %401 = vector.extract_strided_slice %228 {offsets = [0, 70], sizes = [4, 8], strides = [1, 1]} : vector<4x78xf32> to vector<4x8xf32>
    %cst_213 = arith.constant dense<0.000000e+00> : vector<4x16xf32>
    %402 = tpu.matmul %401, %286, %cst_213 {dimension_numbers = #tpu.dot_dimension_numbers<[1], [0], [0], [1], [0, 0, 1, 1], [], []>} : vector<4x8xf32>, vector<8x16xf32>, vector<4x16xf32> -> vector<4x16xf32>
    %403 = arith.addf %400, %402 : vector<4x16xf32>
    %c0_214 = arith.constant 0 : index
    %c0_215 = arith.constant 0 : index
    %c224_216 = arith.constant 224 : index
    %404 = vector.load %arg8[%c0_214, %c0_215, %c224_216] : memref<1x4x256xf32, #tpu.memory_space<vmem>>, vector<1x4x16xf32>
    %405 = vector.shape_cast %404 : vector<1x4x16xf32> to vector<4x16xf32>
    %406 = vector.shape_cast %403 : vector<4x16xf32> to vector<1x4x16xf32>
    tpu.vector_store %arg8[%c0_214, %c0_215, %c224_216], %406 {strides = array<i32>} : memref<1x4x256xf32, #tpu.memory_space<vmem>>, vector<1x4x16xf32>,
    %407 = vector.extract_strided_slice %255 {offsets = [0, 70], sizes = [4, 8], strides = [1, 1]} : vector<4x78xf32> to vector<4x8xf32>
    %cst_217 = arith.constant dense<0.000000e+00> : vector<4x16xf32>
    %408 = tpu.matmul %407, %284, %cst_217 {dimension_numbers = #tpu.dot_dimension_numbers<[1], [0], [0], [1], [0, 0, 1, 1], [], []>} : vector<4x8xf32>, vector<8x16xf32>, vector<4x16xf32> -> vector<4x16xf32>
    %409 = vector.extract_strided_slice %282 {offsets = [0, 70], sizes = [4, 8], strides = [1, 1]} : vector<4x78xf32> to vector<4x8xf32>
    %cst_218 = arith.constant dense<0.000000e+00> : vector<4x16xf32>
    %410 = tpu.matmul %409, %286, %cst_218 {dimension_numbers = #tpu.dot_dimension_numbers<[1], [0], [0], [1], [0, 0, 1, 1], [], []>} : vector<4x8xf32>, vector<8x16xf32>, vector<4x16xf32> -> vector<4x16xf32>
    %411 = arith.addf %408, %410 : vector<4x16xf32>
    %c0_219 = arith.constant 0 : index
    %c0_220 = arith.constant 0 : index
    %c240_221 = arith.constant 240 : index
    %412 = vector.load %arg8[%c0_219, %c0_220, %c240_221] : memref<1x4x256xf32, #tpu.memory_space<vmem>>, vector<1x4x16xf32>
    %413 = vector.shape_cast %412 : vector<1x4x16xf32> to vector<4x16xf32>
    %414 = vector.shape_cast %411 : vector<4x16xf32> to vector<1x4x16xf32>
    tpu.vector_store %arg8[%c0_219, %c0_220, %c240_221], %414 {strides = array<i32>} : memref<1x4x256xf32, #tpu.memory_space<vmem>>, vector<1x4x16xf32>,
    return
  }
  func.func @transform_0(%arg0: i32) -> (i32, i32, i32) {
    %c0_i32 = arith.constant 0 : i32
    %c0_i32_0 = arith.constant 0 : i32
    %c0_i32_1 = arith.constant 0 : i32
    return %arg0, %c0_i32, %c0_i32_0 : i32, i32, i32
  }
  func.func @transform_1(%arg0: i32) -> (i32, i32) {
    %c0_i32 = arith.constant 0 : i32
    %c0_i32_0 = arith.constant 0 : i32
    %c0_i32_1 = arith.constant 0 : i32
    return %c0_i32, %c0_i32_0 : i32, i32
  }
  func.func @transform_2(%arg0: i32) -> (i32, i32) {
    %c0_i32 = arith.constant 0 : i32
    %c0_i32_0 = arith.constant 0 : i32
    %c0_i32_1 = arith.constant 0 : i32
    return %c0_i32, %c0_i32_0 : i32, i32
  }
  func.func @transform_3(%arg0: i32) -> (i32, i32, i32) {
    %c0_i32 = arith.constant 0 : i32
    %c0_i32_0 = arith.constant 0 : i32
    %c0_i32_1 = arith.constant 0 : i32
    %c0_i32_2 = arith.constant 0 : i32
    return %c0_i32, %c0_i32_0, %c0_i32_1 : i32, i32, i32
  }
  func.func @transform_4(%arg0: i32) -> (i32, i32) {
    %c0_i32 = arith.constant 0 : i32
    %c0_i32_0 = arith.constant 0 : i32
    %c0_i32_1 = arith.constant 0 : i32
    return %c0_i32, %c0_i32_0 : i32, i32
  }
  func.func @transform_5(%arg0: i32) -> (i32, i32) {
    %c0_i32 = arith.constant 0 : i32
    %c0_i32_0 = arith.constant 0 : i32
    %c0_i32_1 = arith.constant 0 : i32
    return %c0_i32, %c0_i32_0 : i32, i32
  }
  func.func @transform_6(%arg0: i32) -> (i32, i32, i32) {
    %c0_i32 = arith.constant 0 : i32
    %c0_i32_0 = arith.constant 0 : i32
    %c0_i32_1 = arith.constant 0 : i32
    %c0_i32_2 = arith.constant 0 : i32
    return %c0_i32, %c0_i32_0, %c0_i32_1 : i32, i32, i32
  }
  func.func @transform_7(%arg0: i32) -> (i32, i32, i32) {
    %c0_i32 = arith.constant 0 : i32
    %c0_i32_0 = arith.constant 0 : i32
    %c0_i32_1 = arith.constant 0 : i32
    return %arg0, %c0_i32, %c0_i32_0 : i32, i32, i32
  }
}

module attributes {stable_mosaic.version = 11 : i64} {
  func.func @kernel(%arg0: i32, %arg1: memref<1x16x36xbf16, #tpu.memory_space<vmem>>, %arg2: memref<16x256xbf16, #tpu.memory_space<vmem>>, %arg3: memref<16x1xf32, #tpu.memory_space<vmem>>, %arg4: memref<2x4x8xf32, #tpu.memory_space<vmem>>, %arg5: memref<8x128xbf16, #tpu.memory_space<vmem>>, %arg6: memref<8x1xf32, #tpu.memory_space<vmem>>, %arg7: memref<2x8x16xf32, #tpu.memory_space<vmem>>, %arg8: memref<1x4x256xf32, #tpu.memory_space<vmem>>, %arg9: memref<8x100xbf16, #tpu.memory_space<vmem>>) attributes {dimension_semantics = [#tpu.dimension_semantics<parallel>], iteration_bounds = array<i64: 2>, scalar_prefetch = 0 : i64, scratch_operands = 1 : i64, tpu.core_type = #tpu.core_type<tc>, window_params = [{transform_indices = @transform_0, window_bounds = array<i64: 1, 16, 36>}, {pipeline_mode = #tpu.pipeline_mode<synchronous>, transform_indices = @transform_1, window_bounds = array<i64: 16, 256>}, {pipeline_mode = #tpu.pipeline_mode<synchronous>, transform_indices = @transform_2, window_bounds = array<i64: 16, 1>}, {pipeline_mode = #tpu.pipeline_mode<synchronous>, transform_indices = @transform_3, window_bounds = array<i64: 2, 4, 8>}, {pipeline_mode = #tpu.pipeline_mode<synchronous>, transform_indices = @transform_4, window_bounds = array<i64: 8, 128>}, {pipeline_mode = #tpu.pipeline_mode<synchronous>, transform_indices = @transform_5, window_bounds = array<i64: 8, 1>}, {pipeline_mode = #tpu.pipeline_mode<synchronous>, transform_indices = @transform_6, window_bounds = array<i64: 2, 8, 16>}, {transform_indices = @transform_7, window_bounds = array<i64: 1, 4, 256>}]} {
    %c0 = arith.constant 0 : index
    %c0_0 = arith.constant 0 : index
    %c0_1 = arith.constant 0 : index
    %0 = vector.load %arg1[%c0, %c0_0, %c0_1] : memref<1x16x36xbf16, #tpu.memory_space<vmem>>, vector<1x16x36xbf16>
    %1 = vector.shape_cast %0 : vector<1x16x36xbf16> to vector<16x36xbf16>
    %c0_2 = arith.constant 0 : index
    %c0_3 = arith.constant 0 : index
    %2 = vector.load %arg3[%c0_2, %c0_3] : memref<16x1xf32, #tpu.memory_space<vmem>>, vector<16x1xf32>
    %c0_4 = arith.constant 0 : index
    %c0_5 = arith.constant 0 : index
    %3 = vector.load %arg2[%c0_4, %c0_5] : memref<16x256xbf16, #tpu.memory_space<vmem>>, vector<16x16xbf16>
    %4 = vector.extract_strided_slice %1 {offsets = [0, 0], sizes = [16, 22], strides = [1, 1]} : vector<16x36xbf16> to vector<16x22xbf16>
    %cst = arith.constant dense<0.000000e+00> : vector<16x22xf32>
    %5 = tpu.matmul %3, %4, %cst {dimension_numbers = #tpu.dot_dimension_numbers<[1], [0], [0], [1], [0, 0, 1, 1], [], []>} : vector<16x16xbf16>, vector<16x22xbf16>, vector<16x22xf32> -> vector<16x22xf32>
    %6 = vector.broadcast %2 : vector<16x1xf32> to vector<16x22xf32>
    %7 = arith.addf %6, %5 : vector<16x22xf32>
    %c0_6 = arith.constant 0 : index
    %c16 = arith.constant 16 : index
    %8 = vector.load %arg2[%c0_6, %c16] : memref<16x256xbf16, #tpu.memory_space<vmem>>, vector<16x16xbf16>
    %9 = vector.extract_strided_slice %1 {offsets = [0, 1], sizes = [16, 22], strides = [1, 1]} : vector<16x36xbf16> to vector<16x22xbf16>
    %cst_7 = arith.constant dense<0.000000e+00> : vector<16x22xf32>
    %10 = tpu.matmul %8, %9, %cst_7 {dimension_numbers = #tpu.dot_dimension_numbers<[1], [0], [0], [1], [0, 0, 1, 1], [], []>} : vector<16x16xbf16>, vector<16x22xbf16>, vector<16x22xf32> -> vector<16x22xf32>
    %11 = arith.addf %7, %10 : vector<16x22xf32>
    %c0_8 = arith.constant 0 : index
    %c32 = arith.constant 32 : index
    %12 = vector.load %arg2[%c0_8, %c32] : memref<16x256xbf16, #tpu.memory_space<vmem>>, vector<16x16xbf16>
    %13 = vector.extract_strided_slice %1 {offsets = [0, 6], sizes = [16, 22], strides = [1, 1]} : vector<16x36xbf16> to vector<16x22xbf16>
    %cst_9 = arith.constant dense<0.000000e+00> : vector<16x22xf32>
    %14 = tpu.matmul %12, %13, %cst_9 {dimension_numbers = #tpu.dot_dimension_numbers<[1], [0], [0], [1], [0, 0, 1, 1], [], []>} : vector<16x16xbf16>, vector<16x22xbf16>, vector<16x22xf32> -> vector<16x22xf32>
    %15 = arith.addf %11, %14 : vector<16x22xf32>
    %c0_10 = arith.constant 0 : index
    %c48 = arith.constant 48 : index
    %16 = vector.load %arg2[%c0_10, %c48] : memref<16x256xbf16, #tpu.memory_space<vmem>>, vector<16x16xbf16>
    %17 = vector.extract_strided_slice %1 {offsets = [0, 7], sizes = [16, 22], strides = [1, 1]} : vector<16x36xbf16> to vector<16x22xbf16>
    %cst_11 = arith.constant dense<0.000000e+00> : vector<16x22xf32>
    %18 = tpu.matmul %16, %17, %cst_11 {dimension_numbers = #tpu.dot_dimension_numbers<[1], [0], [0], [1], [0, 0, 1, 1], [], []>} : vector<16x16xbf16>, vector<16x22xbf16>, vector<16x22xf32> -> vector<16x22xf32>
    %19 = arith.addf %15, %18 : vector<16x22xf32>
    %20 = vector.extract_strided_slice %19 {offsets = [0, 0], sizes = [8, 22], strides = [1, 1]} : vector<16x22xf32> to vector<8x22xf32>
    %21 = vector.extract_strided_slice %19 {offsets = [8, 0], sizes = [8, 22], strides = [1, 1]} : vector<16x22xf32> to vector<8x22xf32>
    %cst_12 = arith.constant 5.000000e-01 : f32
    %22 = vector.broadcast %cst_12 : f32 to vector<8x22xf32>
    %23 = arith.mulf %22, %21 : vector<8x22xf32>
    %24 = math.tanh %23 : vector<8x22xf32>
    %cst_13 = arith.constant 5.000000e-01 : f32
    %25 = vector.broadcast %cst_13 : f32 to vector<8x22xf32>
    %26 = arith.mulf %25, %24 : vector<8x22xf32>
    %cst_14 = arith.constant 5.000000e-01 : f32
    %27 = vector.broadcast %cst_14 : f32 to vector<8x22xf32>
    %28 = arith.addf %26, %27 : vector<8x22xf32>
    %29 = arith.mulf %20, %28 : vector<8x22xf32>
    %c0_15 = arith.constant 0 : index
    %c64 = arith.constant 64 : index
    %30 = vector.load %arg2[%c0_15, %c64] : memref<16x256xbf16, #tpu.memory_space<vmem>>, vector<16x16xbf16>
    %31 = vector.extract_strided_slice %1 {offsets = [0, 1], sizes = [16, 22], strides = [1, 1]} : vector<16x36xbf16> to vector<16x22xbf16>
    %cst_16 = arith.constant dense<0.000000e+00> : vector<16x22xf32>
    %32 = tpu.matmul %30, %31, %cst_16 {dimension_numbers = #tpu.dot_dimension_numbers<[1], [0], [0], [1], [0, 0, 1, 1], [], []>} : vector<16x16xbf16>, vector<16x22xbf16>, vector<16x22xf32> -> vector<16x22xf32>
    %33 = vector.broadcast %2 : vector<16x1xf32> to vector<16x22xf32>
    %34 = arith.addf %33, %32 : vector<16x22xf32>
    %c0_17 = arith.constant 0 : index
    %c80 = arith.constant 80 : index
    %35 = vector.load %arg2[%c0_17, %c80] : memref<16x256xbf16, #tpu.memory_space<vmem>>, vector<16x16xbf16>
    %36 = vector.extract_strided_slice %1 {offsets = [0, 2], sizes = [16, 22], strides = [1, 1]} : vector<16x36xbf16> to vector<16x22xbf16>
    %cst_18 = arith.constant dense<0.000000e+00> : vector<16x22xf32>
    %37 = tpu.matmul %35, %36, %cst_18 {dimension_numbers = #tpu.dot_dimension_numbers<[1], [0], [0], [1], [0, 0, 1, 1], [], []>} : vector<16x16xbf16>, vector<16x22xbf16>, vector<16x22xf32> -> vector<16x22xf32>
    %38 = arith.addf %34, %37 : vector<16x22xf32>
    %c0_19 = arith.constant 0 : index
    %c96 = arith.constant 96 : index
    %39 = vector.load %arg2[%c0_19, %c96] : memref<16x256xbf16, #tpu.memory_space<vmem>>, vector<16x16xbf16>
    %40 = vector.extract_strided_slice %1 {offsets = [0, 7], sizes = [16, 22], strides = [1, 1]} : vector<16x36xbf16> to vector<16x22xbf16>
    %cst_20 = arith.constant dense<0.000000e+00> : vector<16x22xf32>
    %41 = tpu.matmul %39, %40, %cst_20 {dimension_numbers = #tpu.dot_dimension_numbers<[1], [0], [0], [1], [0, 0, 1, 1], [], []>} : vector<16x16xbf16>, vector<16x22xbf16>, vector<16x22xf32> -> vector<16x22xf32>
    %42 = arith.addf %38, %41 : vector<16x22xf32>
    %c0_21 = arith.constant 0 : index
    %c112 = arith.constant 112 : index
    %43 = vector.load %arg2[%c0_21, %c112] : memref<16x256xbf16, #tpu.memory_space<vmem>>, vector<16x16xbf16>
    %44 = vector.extract_strided_slice %1 {offsets = [0, 8], sizes = [16, 22], strides = [1, 1]} : vector<16x36xbf16> to vector<16x22xbf16>
    %cst_22 = arith.constant dense<0.000000e+00> : vector<16x22xf32>
    %45 = tpu.matmul %43, %44, %cst_22 {dimension_numbers = #tpu.dot_dimension_numbers<[1], [0], [0], [1], [0, 0, 1, 1], [], []>} : vector<16x16xbf16>, vector<16x22xbf16>, vector<16x22xf32> -> vector<16x22xf32>
    %46 = arith.addf %42, %45 : vector<16x22xf32>
    %47 = vector.extract_strided_slice %46 {offsets = [0, 0], sizes = [8, 22], strides = [1, 1]} : vector<16x22xf32> to vector<8x22xf32>
    %48 = vector.extract_strided_slice %46 {offsets = [8, 0], sizes = [8, 22], strides = [1, 1]} : vector<16x22xf32> to vector<8x22xf32>
    %cst_23 = arith.constant 5.000000e-01 : f32
    %49 = vector.broadcast %cst_23 : f32 to vector<8x22xf32>
    %50 = arith.mulf %49, %48 : vector<8x22xf32>
    %51 = math.tanh %50 : vector<8x22xf32>
    %cst_24 = arith.constant 5.000000e-01 : f32
    %52 = vector.broadcast %cst_24 : f32 to vector<8x22xf32>
    %53 = arith.mulf %52, %51 : vector<8x22xf32>
    %cst_25 = arith.constant 5.000000e-01 : f32
    %54 = vector.broadcast %cst_25 : f32 to vector<8x22xf32>
    %55 = arith.addf %53, %54 : vector<8x22xf32>
    %56 = arith.mulf %47, %55 : vector<8x22xf32>
    %c0_26 = arith.constant 0 : index
    %c128 = arith.constant 128 : index
    %57 = vector.load %arg2[%c0_26, %c128] : memref<16x256xbf16, #tpu.memory_space<vmem>>, vector<16x16xbf16>
    %58 = vector.extract_strided_slice %1 {offsets = [0, 6], sizes = [16, 22], strides = [1, 1]} : vector<16x36xbf16> to vector<16x22xbf16>
    %cst_27 = arith.constant dense<0.000000e+00> : vector<16x22xf32>
    %59 = tpu.matmul %57, %58, %cst_27 {dimension_numbers = #tpu.dot_dimension_numbers<[1], [0], [0], [1], [0, 0, 1, 1], [], []>} : vector<16x16xbf16>, vector<16x22xbf16>, vector<16x22xf32> -> vector<16x22xf32>
    %60 = vector.broadcast %2 : vector<16x1xf32> to vector<16x22xf32>
    %61 = arith.addf %60, %59 : vector<16x22xf32>
    %c0_28 = arith.constant 0 : index
    %c144 = arith.constant 144 : index
    %62 = vector.load %arg2[%c0_28, %c144] : memref<16x256xbf16, #tpu.memory_space<vmem>>, vector<16x16xbf16>
    %63 = vector.extract_strided_slice %1 {offsets = [0, 7], sizes = [16, 22], strides = [1, 1]} : vector<16x36xbf16> to vector<16x22xbf16>
    %cst_29 = arith.constant dense<0.000000e+00> : vector<16x22xf32>
    %64 = tpu.matmul %62, %63, %cst_29 {dimension_numbers = #tpu.dot_dimension_numbers<[1], [0], [0], [1], [0, 0, 1, 1], [], []>} : vector<16x16xbf16>, vector<16x22xbf16>, vector<16x22xf32> -> vector<16x22xf32>
    %65 = arith.addf %61, %64 : vector<16x22xf32>
    %c0_30 = arith.constant 0 : index
    %c160 = arith.constant 160 : index
    %66 = vector.load %arg2[%c0_30, %c160] : memref<16x256xbf16, #tpu.memory_space<vmem>>, vector<16x16xbf16>
    %67 = vector.extract_strided_slice %1 {offsets = [0, 12], sizes = [16, 22], strides = [1, 1]} : vector<16x36xbf16> to vector<16x22xbf16>
    %cst_31 = arith.constant dense<0.000000e+00> : vector<16x22xf32>
    %68 = tpu.matmul %66, %67, %cst_31 {dimension_numbers = #tpu.dot_dimension_numbers<[1], [0], [0], [1], [0, 0, 1, 1], [], []>} : vector<16x16xbf16>, vector<16x22xbf16>, vector<16x22xf32> -> vector<16x22xf32>
    %69 = arith.addf %65, %68 : vector<16x22xf32>
    %c0_32 = arith.constant 0 : index
    %c176 = arith.constant 176 : index
    %70 = vector.load %arg2[%c0_32, %c176] : memref<16x256xbf16, #tpu.memory_space<vmem>>, vector<16x16xbf16>
    %71 = vector.extract_strided_slice %1 {offsets = [0, 13], sizes = [16, 22], strides = [1, 1]} : vector<16x36xbf16> to vector<16x22xbf16>
    %cst_33 = arith.constant dense<0.000000e+00> : vector<16x22xf32>
    %72 = tpu.matmul %70, %71, %cst_33 {dimension_numbers = #tpu.dot_dimension_numbers<[1], [0], [0], [1], [0, 0, 1, 1], [], []>} : vector<16x16xbf16>, vector<16x22xbf16>, vector<16x22xf32> -> vector<16x22xf32>
    %73 = arith.addf %69, %72 : vector<16x22xf32>
    %74 = vector.extract_strided_slice %73 {offsets = [0, 0], sizes = [8, 22], strides = [1, 1]} : vector<16x22xf32> to vector<8x22xf32>
    %75 = vector.extract_strided_slice %73 {offsets = [8, 0], sizes = [8, 22], strides = [1, 1]} : vector<16x22xf32> to vector<8x22xf32>
    %cst_34 = arith.constant 5.000000e-01 : f32
    %76 = vector.broadcast %cst_34 : f32 to vector<8x22xf32>
    %77 = arith.mulf %76, %75 : vector<8x22xf32>
    %78 = math.tanh %77 : vector<8x22xf32>
    %cst_35 = arith.constant 5.000000e-01 : f32
    %79 = vector.broadcast %cst_35 : f32 to vector<8x22xf32>
    %80 = arith.mulf %79, %78 : vector<8x22xf32>
    %cst_36 = arith.constant 5.000000e-01 : f32
    %81 = vector.broadcast %cst_36 : f32 to vector<8x22xf32>
    %82 = arith.addf %80, %81 : vector<8x22xf32>
    %83 = arith.mulf %74, %82 : vector<8x22xf32>
    %c0_37 = arith.constant 0 : index
    %c192 = arith.constant 192 : index
    %84 = vector.load %arg2[%c0_37, %c192] : memref<16x256xbf16, #tpu.memory_space<vmem>>, vector<16x16xbf16>
    %85 = vector.extract_strided_slice %1 {offsets = [0, 7], sizes = [16, 22], strides = [1, 1]} : vector<16x36xbf16> to vector<16x22xbf16>
    %cst_38 = arith.constant dense<0.000000e+00> : vector<16x22xf32>
    %86 = tpu.matmul %84, %85, %cst_38 {dimension_numbers = #tpu.dot_dimension_numbers<[1], [0], [0], [1], [0, 0, 1, 1], [], []>} : vector<16x16xbf16>, vector<16x22xbf16>, vector<16x22xf32> -> vector<16x22xf32>
    %87 = vector.broadcast %2 : vector<16x1xf32> to vector<16x22xf32>
    %88 = arith.addf %87, %86 : vector<16x22xf32>
    %c0_39 = arith.constant 0 : index
    %c208 = arith.constant 208 : index
    %89 = vector.load %arg2[%c0_39, %c208] : memref<16x256xbf16, #tpu.memory_space<vmem>>, vector<16x16xbf16>
    %90 = vector.extract_strided_slice %1 {offsets = [0, 8], sizes = [16, 22], strides = [1, 1]} : vector<16x36xbf16> to vector<16x22xbf16>
    %cst_40 = arith.constant dense<0.000000e+00> : vector<16x22xf32>
    %91 = tpu.matmul %89, %90, %cst_40 {dimension_numbers = #tpu.dot_dimension_numbers<[1], [0], [0], [1], [0, 0, 1, 1], [], []>} : vector<16x16xbf16>, vector<16x22xbf16>, vector<16x22xf32> -> vector<16x22xf32>
    %92 = arith.addf %88, %91 : vector<16x22xf32>
    %c0_41 = arith.constant 0 : index
    %c224 = arith.constant 224 : index
    %93 = vector.load %arg2[%c0_41, %c224] : memref<16x256xbf16, #tpu.memory_space<vmem>>, vector<16x16xbf16>
    %94 = vector.extract_strided_slice %1 {offsets = [0, 13], sizes = [16, 22], strides = [1, 1]} : vector<16x36xbf16> to vector<16x22xbf16>
    %cst_42 = arith.constant dense<0.000000e+00> : vector<16x22xf32>
    %95 = tpu.matmul %93, %94, %cst_42 {dimension_numbers = #tpu.dot_dimension_numbers<[1], [0], [0], [1], [0, 0, 1, 1], [], []>} : vector<16x16xbf16>, vector<16x22xbf16>, vector<16x22xf32> -> vector<16x22xf32>
    %96 = arith.addf %92, %95 : vector<16x22xf32>
    %c0_43 = arith.constant 0 : index
    %c240 = arith.constant 240 : index
    %97 = vector.load %arg2[%c0_43, %c240] : memref<16x256xbf16, #tpu.memory_space<vmem>>, vector<16x16xbf16>
    %98 = vector.extract_strided_slice %1 {offsets = [0, 14], sizes = [16, 22], strides = [1, 1]} : vector<16x36xbf16> to vector<16x22xbf16>
    %cst_44 = arith.constant dense<0.000000e+00> : vector<16x22xf32>
    %99 = tpu.matmul %97, %98, %cst_44 {dimension_numbers = #tpu.dot_dimension_numbers<[1], [0], [0], [1], [0, 0, 1, 1], [], []>} : vector<16x16xbf16>, vector<16x22xbf16>, vector<16x22xf32> -> vector<16x22xf32>
    %100 = arith.addf %96, %99 : vector<16x22xf32>
    %101 = vector.extract_strided_slice %100 {offsets = [0, 0], sizes = [8, 22], strides = [1, 1]} : vector<16x22xf32> to vector<8x22xf32>
    %102 = vector.extract_strided_slice %100 {offsets = [8, 0], sizes = [8, 22], strides = [1, 1]} : vector<16x22xf32> to vector<8x22xf32>
    %cst_45 = arith.constant 5.000000e-01 : f32
    %103 = vector.broadcast %cst_45 : f32 to vector<8x22xf32>
    %104 = arith.mulf %103, %102 : vector<8x22xf32>
    %105 = math.tanh %104 : vector<8x22xf32>
    %cst_46 = arith.constant 5.000000e-01 : f32
    %106 = vector.broadcast %cst_46 : f32 to vector<8x22xf32>
    %107 = arith.mulf %106, %105 : vector<8x22xf32>
    %cst_47 = arith.constant 5.000000e-01 : f32
    %108 = vector.broadcast %cst_47 : f32 to vector<8x22xf32>
    %109 = arith.addf %107, %108 : vector<8x22xf32>
    %110 = arith.mulf %101, %109 : vector<8x22xf32>
    %c0_48 = arith.constant 0 : index
    %c0_49 = arith.constant 0 : index
    %c0_50 = arith.constant 0 : index
    %111 = vector.load %arg4[%c0_48, %c0_49, %c0_50] : memref<2x4x8xf32, #tpu.memory_space<vmem>>, vector<1x4x8xf32>
    %112 = vector.shape_cast %111 : vector<1x4x8xf32> to vector<4x8xf32>
    %c1 = arith.constant 1 : index
    %c0_51 = arith.constant 0 : index
    %c0_52 = arith.constant 0 : index
    %113 = vector.load %arg4[%c1, %c0_51, %c0_52] : memref<2x4x8xf32, #tpu.memory_space<vmem>>, vector<1x4x8xf32>
    %114 = vector.shape_cast %113 : vector<1x4x8xf32> to vector<4x8xf32>
    %cst_53 = arith.constant 0.000000e+00 : bf16
    %115 = vector.broadcast %cst_53 : bf16 to vector<8x100xbf16>
    %c0_54 = arith.constant 0 : index
    %c0_55 = arith.constant 0 : index
    %116 = vector.load %arg9[%c0_54, %c0_55] : memref<8x100xbf16, #tpu.memory_space<vmem>>, vector<8x100xbf16>
    tpu.vector_store %arg9[%c0_54, %c0_55], %115 {strides = array<i32>} : memref<8x100xbf16, #tpu.memory_space<vmem>>, vector<8x100xbf16>,
    %117 = vector.extract_strided_slice %29 {offsets = [0, 0], sizes = [8, 4], strides = [1, 1]} : vector<8x22xf32> to vector<8x4xf32>
    %cst_56 = arith.constant dense<0.000000e+00> : vector<8x8xf32>
    %118 = tpu.matmul %117, %112, %cst_56 {dimension_numbers = #tpu.dot_dimension_numbers<[1], [0], [0], [1], [0, 0, 1, 1], [], []>} : vector<8x4xf32>, vector<4x8xf32>, vector<8x8xf32> -> vector<8x8xf32>
    %119 = vector.extract_strided_slice %56 {offsets = [0, 0], sizes = [8, 4], strides = [1, 1]} : vector<8x22xf32> to vector<8x4xf32>
    %cst_57 = arith.constant dense<0.000000e+00> : vector<8x8xf32>
    %120 = tpu.matmul %119, %114, %cst_57 {dimension_numbers = #tpu.dot_dimension_numbers<[1], [0], [0], [1], [0, 0, 1, 1], [], []>} : vector<8x4xf32>, vector<4x8xf32>, vector<8x8xf32> -> vector<8x8xf32>
    %121 = arith.addf %118, %120 : vector<8x8xf32>
    %122 = arith.truncf %121 : vector<8x8xf32> to vector<8x8xbf16>
    %c0_58 = arith.constant 0 : index
    %c11 = arith.constant 11 : index
    %123 = vector.load %arg9[%c0_58, %c11] : memref<8x100xbf16, #tpu.memory_space<vmem>>, vector<8x8xbf16>
    tpu.vector_store %arg9[%c0_58, %c11], %122 {strides = array<i32>} : memref<8x100xbf16, #tpu.memory_space<vmem>>, vector<8x8xbf16>,
    %124 = vector.extract_strided_slice %83 {offsets = [0, 0], sizes = [8, 4], strides = [1, 1]} : vector<8x22xf32> to vector<8x4xf32>
    %cst_59 = arith.constant dense<0.000000e+00> : vector<8x8xf32>
    %125 = tpu.matmul %124, %112, %cst_59 {dimension_numbers = #tpu.dot_dimension_numbers<[1], [0], [0], [1], [0, 0, 1, 1], [], []>} : vector<8x4xf32>, vector<4x8xf32>, vector<8x8xf32> -> vector<8x8xf32>
    %126 = vector.extract_strided_slice %110 {offsets = [0, 0], sizes = [8, 4], strides = [1, 1]} : vector<8x22xf32> to vector<8x4xf32>
    %cst_60 = arith.constant dense<0.000000e+00> : vector<8x8xf32>
    %127 = tpu.matmul %126, %114, %cst_60 {dimension_numbers = #tpu.dot_dimension_numbers<[1], [0], [0], [1], [0, 0, 1, 1], [], []>} : vector<8x4xf32>, vector<4x8xf32>, vector<8x8xf32> -> vector<8x8xf32>
    %128 = arith.addf %125, %127 : vector<8x8xf32>
    %129 = arith.truncf %128 : vector<8x8xf32> to vector<8x8xbf16>
    %c0_61 = arith.constant 0 : index
    %c21 = arith.constant 21 : index
    %130 = vector.load %arg9[%c0_61, %c21] : memref<8x100xbf16, #tpu.memory_space<vmem>>, vector<8x8xbf16>
    tpu.vector_store %arg9[%c0_61, %c21], %129 {strides = array<i32>} : memref<8x100xbf16, #tpu.memory_space<vmem>>, vector<8x8xbf16>,
    %131 = vector.extract_strided_slice %29 {offsets = [0, 6], sizes = [8, 4], strides = [1, 1]} : vector<8x22xf32> to vector<8x4xf32>
    %cst_62 = arith.constant dense<0.000000e+00> : vector<8x8xf32>
    %132 = tpu.matmul %131, %112, %cst_62 {dimension_numbers = #tpu.dot_dimension_numbers<[1], [0], [0], [1], [0, 0, 1, 1], [], []>} : vector<8x4xf32>, vector<4x8xf32>, vector<8x8xf32> -> vector<8x8xf32>
    %133 = vector.extract_strided_slice %56 {offsets = [0, 6], sizes = [8, 4], strides = [1, 1]} : vector<8x22xf32> to vector<8x4xf32>
    %cst_63 = arith.constant dense<0.000000e+00> : vector<8x8xf32>
    %134 = tpu.matmul %133, %114, %cst_63 {dimension_numbers = #tpu.dot_dimension_numbers<[1], [0], [0], [1], [0, 0, 1, 1], [], []>} : vector<8x4xf32>, vector<4x8xf32>, vector<8x8xf32> -> vector<8x8xf32>
    %135 = arith.addf %132, %134 : vector<8x8xf32>
    %136 = arith.truncf %135 : vector<8x8xf32> to vector<8x8xbf16>
    %c0_64 = arith.constant 0 : index
    %c31 = arith.constant 31 : index
    %137 = vector.load %arg9[%c0_64, %c31] : memref<8x100xbf16, #tpu.memory_space<vmem>>, vector<8x8xbf16>
    tpu.vector_store %arg9[%c0_64, %c31], %136 {strides = array<i32>} : memref<8x100xbf16, #tpu.memory_space<vmem>>, vector<8x8xbf16>,
    %138 = vector.extract_strided_slice %83 {offsets = [0, 6], sizes = [8, 4], strides = [1, 1]} : vector<8x22xf32> to vector<8x4xf32>
    %cst_65 = arith.constant dense<0.000000e+00> : vector<8x8xf32>
    %139 = tpu.matmul %138, %112, %cst_65 {dimension_numbers = #tpu.dot_dimension_numbers<[1], [0], [0], [1], [0, 0, 1, 1], [], []>} : vector<8x4xf32>, vector<4x8xf32>, vector<8x8xf32> -> vector<8x8xf32>
    %140 = vector.extract_strided_slice %110 {offsets = [0, 6], sizes = [8, 4], strides = [1, 1]} : vector<8x22xf32> to vector<8x4xf32>
    %cst_66 = arith.constant dense<0.000000e+00> : vector<8x8xf32>
    %141 = tpu.matmul %140, %114, %cst_66 {dimension_numbers = #tpu.dot_dimension_numbers<[1], [0], [0], [1], [0, 0, 1, 1], [], []>} : vector<8x4xf32>, vector<4x8xf32>, vector<8x8xf32> -> vector<8x8xf32>
    %142 = arith.addf %139, %141 : vector<8x8xf32>
    %143 = arith.truncf %142 : vector<8x8xf32> to vector<8x8xbf16>
    %c0_67 = arith.constant 0 : index
    %c41 = arith.constant 41 : index
    %144 = vector.load %arg9[%c0_67, %c41] : memref<8x100xbf16, #tpu.memory_space<vmem>>, vector<8x8xbf16>
    tpu.vector_store %arg9[%c0_67, %c41], %143 {strides = array<i32>} : memref<8x100xbf16, #tpu.memory_space<vmem>>, vector<8x8xbf16>,
    %145 = vector.extract_strided_slice %29 {offsets = [0, 12], sizes = [8, 4], strides = [1, 1]} : vector<8x22xf32> to vector<8x4xf32>
    %cst_68 = arith.constant dense<0.000000e+00> : vector<8x8xf32>
    %146 = tpu.matmul %145, %112, %cst_68 {dimension_numbers = #tpu.dot_dimension_numbers<[1], [0], [0], [1], [0, 0, 1, 1], [], []>} : vector<8x4xf32>, vector<4x8xf32>, vector<8x8xf32> -> vector<8x8xf32>
    %147 = vector.extract_strided_slice %56 {offsets = [0, 12], sizes = [8, 4], strides = [1, 1]} : vector<8x22xf32> to vector<8x4xf32>
    %cst_69 = arith.constant dense<0.000000e+00> : vector<8x8xf32>
    %148 = tpu.matmul %147, %114, %cst_69 {dimension_numbers = #tpu.dot_dimension_numbers<[1], [0], [0], [1], [0, 0, 1, 1], [], []>} : vector<8x4xf32>, vector<4x8xf32>, vector<8x8xf32> -> vector<8x8xf32>
    %149 = arith.addf %146, %148 : vector<8x8xf32>
    %150 = arith.truncf %149 : vector<8x8xf32> to vector<8x8xbf16>
    %c0_70 = arith.constant 0 : index
    %c51 = arith.constant 51 : index
    %151 = vector.load %arg9[%c0_70, %c51] : memref<8x100xbf16, #tpu.memory_space<vmem>>, vector<8x8xbf16>
    tpu.vector_store %arg9[%c0_70, %c51], %150 {strides = array<i32>} : memref<8x100xbf16, #tpu.memory_space<vmem>>, vector<8x8xbf16>,
    %152 = vector.extract_strided_slice %83 {offsets = [0, 12], sizes = [8, 4], strides = [1, 1]} : vector<8x22xf32> to vector<8x4xf32>
    %cst_71 = arith.constant dense<0.000000e+00> : vector<8x8xf32>
    %153 = tpu.matmul %152, %112, %cst_71 {dimension_numbers = #tpu.dot_dimension_numbers<[1], [0], [0], [1], [0, 0, 1, 1], [], []>} : vector<8x4xf32>, vector<4x8xf32>, vector<8x8xf32> -> vector<8x8xf32>
    %154 = vector.extract_strided_slice %110 {offsets = [0, 12], sizes = [8, 4], strides = [1, 1]} : vector<8x22xf32> to vector<8x4xf32>
    %cst_72 = arith.constant dense<0.000000e+00> : vector<8x8xf32>
    %155 = tpu.matmul %154, %114, %cst_72 {dimension_numbers = #tpu.dot_dimension_numbers<[1], [0], [0], [1], [0, 0, 1, 1], [], []>} : vector<8x4xf32>, vector<4x8xf32>, vector<8x8xf32> -> vector<8x8xf32>
    %156 = arith.addf %153, %155 : vector<8x8xf32>
    %157 = arith.truncf %156 : vector<8x8xf32> to vector<8x8xbf16>
    %c0_73 = arith.constant 0 : index
    %c61 = arith.constant 61 : index
    %158 = vector.load %arg9[%c0_73, %c61] : memref<8x100xbf16, #tpu.memory_space<vmem>>, vector<8x8xbf16>
    tpu.vector_store %arg9[%c0_73, %c61], %157 {strides = array<i32>} : memref<8x100xbf16, #tpu.memory_space<vmem>>, vector<8x8xbf16>,
    %159 = vector.extract_strided_slice %29 {offsets = [0, 18], sizes = [8, 4], strides = [1, 1]} : vector<8x22xf32> to vector<8x4xf32>
    %cst_74 = arith.constant dense<0.000000e+00> : vector<8x8xf32>
    %160 = tpu.matmul %159, %112, %cst_74 {dimension_numbers = #tpu.dot_dimension_numbers<[1], [0], [0], [1], [0, 0, 1, 1], [], []>} : vector<8x4xf32>, vector<4x8xf32>, vector<8x8xf32> -> vector<8x8xf32>
    %161 = vector.extract_strided_slice %56 {offsets = [0, 18], sizes = [8, 4], strides = [1, 1]} : vector<8x22xf32> to vector<8x4xf32>
    %cst_75 = arith.constant dense<0.000000e+00> : vector<8x8xf32>
    %162 = tpu.matmul %161, %114, %cst_75 {dimension_numbers = #tpu.dot_dimension_numbers<[1], [0], [0], [1], [0, 0, 1, 1], [], []>} : vector<8x4xf32>, vector<4x8xf32>, vector<8x8xf32> -> vector<8x8xf32>
    %163 = arith.addf %160, %162 : vector<8x8xf32>
    %164 = arith.truncf %163 : vector<8x8xf32> to vector<8x8xbf16>
    %c0_76 = arith.constant 0 : index
    %c71 = arith.constant 71 : index
    %165 = vector.load %arg9[%c0_76, %c71] : memref<8x100xbf16, #tpu.memory_space<vmem>>, vector<8x8xbf16>
    tpu.vector_store %arg9[%c0_76, %c71], %164 {strides = array<i32>} : memref<8x100xbf16, #tpu.memory_space<vmem>>, vector<8x8xbf16>,
    %166 = vector.extract_strided_slice %83 {offsets = [0, 18], sizes = [8, 4], strides = [1, 1]} : vector<8x22xf32> to vector<8x4xf32>
    %cst_77 = arith.constant dense<0.000000e+00> : vector<8x8xf32>
    %167 = tpu.matmul %166, %112, %cst_77 {dimension_numbers = #tpu.dot_dimension_numbers<[1], [0], [0], [1], [0, 0, 1, 1], [], []>} : vector<8x4xf32>, vector<4x8xf32>, vector<8x8xf32> -> vector<8x8xf32>
    %168 = vector.extract_strided_slice %110 {offsets = [0, 18], sizes = [8, 4], strides = [1, 1]} : vector<8x22xf32> to vector<8x4xf32>
    %cst_78 = arith.constant dense<0.000000e+00> : vector<8x8xf32>
    %169 = tpu.matmul %168, %114, %cst_78 {dimension_numbers = #tpu.dot_dimension_numbers<[1], [0], [0], [1], [0, 0, 1, 1], [], []>} : vector<8x4xf32>, vector<4x8xf32>, vector<8x8xf32> -> vector<8x8xf32>
    %170 = arith.addf %167, %169 : vector<8x8xf32>
    %171 = arith.truncf %170 : vector<8x8xf32> to vector<8x8xbf16>
    %c0_79 = arith.constant 0 : index
    %c81 = arith.constant 81 : index
    %172 = vector.load %arg9[%c0_79, %c81] : memref<8x100xbf16, #tpu.memory_space<vmem>>, vector<8x8xbf16>
    tpu.vector_store %arg9[%c0_79, %c81], %171 {strides = array<i32>} : memref<8x100xbf16, #tpu.memory_space<vmem>>, vector<8x8xbf16>,
    %c0_80 = arith.constant 0 : index
    %c0_81 = arith.constant 0 : index
    %173 = vector.load %arg9[%c0_80, %c0_81] : memref<8x100xbf16, #tpu.memory_space<vmem>>, vector<8x100xbf16>
    %c0_82 = arith.constant 0 : index
    %c0_83 = arith.constant 0 : index
    %174 = vector.load %arg6[%c0_82, %c0_83] : memref<8x1xf32, #tpu.memory_space<vmem>>, vector<8x1xf32>
    %c0_84 = arith.constant 0 : index
    %c0_85 = arith.constant 0 : index
    %175 = vector.load %arg5[%c0_84, %c0_85] : memref<8x128xbf16, #tpu.memory_space<vmem>>, vector<8x8xbf16>
    %176 = vector.extract_strided_slice %173 {offsets = [0, 0], sizes = [8, 78], strides = [1, 1]} : vector<8x100xbf16> to vector<8x78xbf16>
    %cst_86 = arith.constant dense<0.000000e+00> : vector<8x78xf32>
    %177 = tpu.matmul %175, %176, %cst_86 {dimension_numbers = #tpu.dot_dimension_numbers<[1], [0], [0], [1], [0, 0, 1, 1], [], []>} : vector<8x8xbf16>, vector<8x78xbf16>, vector<8x78xf32> -> vector<8x78xf32>
    %178 = vector.broadcast %174 : vector<8x1xf32> to vector<8x78xf32>
    %179 = arith.addf %178, %177 : vector<8x78xf32>
    %c0_87 = arith.constant 0 : index
    %c8 = arith.constant 8 : index
    %180 = vector.load %arg5[%c0_87, %c8] : memref<8x128xbf16, #tpu.memory_space<vmem>>, vector<8x8xbf16>
    %181 = vector.extract_strided_slice %173 {offsets = [0, 1], sizes = [8, 78], strides = [1, 1]} : vector<8x100xbf16> to vector<8x78xbf16>
    %cst_88 = arith.constant dense<0.000000e+00> : vector<8x78xf32>
    %182 = tpu.matmul %180, %181, %cst_88 {dimension_numbers = #tpu.dot_dimension_numbers<[1], [0], [0], [1], [0, 0, 1, 1], [], []>} : vector<8x8xbf16>, vector<8x78xbf16>, vector<8x78xf32> -> vector<8x78xf32>
    %183 = arith.addf %179, %182 : vector<8x78xf32>
    %c0_89 = arith.constant 0 : index
    %c16_90 = arith.constant 16 : index
    %184 = vector.load %arg5[%c0_89, %c16_90] : memref<8x128xbf16, #tpu.memory_space<vmem>>, vector<8x8xbf16>
    %185 = vector.extract_strided_slice %173 {offsets = [0, 10], sizes = [8, 78], strides = [1, 1]} : vector<8x100xbf16> to vector<8x78xbf16>
    %cst_91 = arith.constant dense<0.000000e+00> : vector<8x78xf32>
    %186 = tpu.matmul %184, %185, %cst_91 {dimension_numbers = #tpu.dot_dimension_numbers<[1], [0], [0], [1], [0, 0, 1, 1], [], []>} : vector<8x8xbf16>, vector<8x78xbf16>, vector<8x78xf32> -> vector<8x78xf32>
    %187 = arith.addf %183, %186 : vector<8x78xf32>
    %c0_92 = arith.constant 0 : index
    %c24 = arith.constant 24 : index
    %188 = vector.load %arg5[%c0_92, %c24] : memref<8x128xbf16, #tpu.memory_space<vmem>>, vector<8x8xbf16>
    %189 = vector.extract_strided_slice %173 {offsets = [0, 11], sizes = [8, 78], strides = [1, 1]} : vector<8x100xbf16> to vector<8x78xbf16>
    %cst_93 = arith.constant dense<0.000000e+00> : vector<8x78xf32>
    %190 = tpu.matmul %188, %189, %cst_93 {dimension_numbers = #tpu.dot_dimension_numbers<[1], [0], [0], [1], [0, 0, 1, 1], [], []>} : vector<8x8xbf16>, vector<8x78xbf16>, vector<8x78xf32> -> vector<8x78xf32>
    %191 = arith.addf %187, %190 : vector<8x78xf32>
    %192 = vector.extract_strided_slice %191 {offsets = [0, 0], sizes = [4, 78], strides = [1, 1]} : vector<8x78xf32> to vector<4x78xf32>
    %193 = vector.extract_strided_slice %191 {offsets = [4, 0], sizes = [4, 78], strides = [1, 1]} : vector<8x78xf32> to vector<4x78xf32>
    %cst_94 = arith.constant 5.000000e-01 : f32
    %194 = vector.broadcast %cst_94 : f32 to vector<4x78xf32>
    %195 = arith.mulf %194, %193 : vector<4x78xf32>
    %196 = math.tanh %195 : vector<4x78xf32>
    %cst_95 = arith.constant 5.000000e-01 : f32
    %197 = vector.broadcast %cst_95 : f32 to vector<4x78xf32>
    %198 = arith.mulf %197, %196 : vector<4x78xf32>
    %cst_96 = arith.constant 5.000000e-01 : f32
    %199 = vector.broadcast %cst_96 : f32 to vector<4x78xf32>
    %200 = arith.addf %198, %199 : vector<4x78xf32>
    %201 = arith.mulf %192, %200 : vector<4x78xf32>
    %c0_97 = arith.constant 0 : index
    %c32_98 = arith.constant 32 : index
    %202 = vector.load %arg5[%c0_97, %c32_98] : memref<8x128xbf16, #tpu.memory_space<vmem>>, vector<8x8xbf16>
    %203 = vector.extract_strided_slice %173 {offsets = [0, 1], sizes = [8, 78], strides = [1, 1]} : vector<8x100xbf16> to vector<8x78xbf16>
    %cst_99 = arith.constant dense<0.000000e+00> : vector<8x78xf32>
    %204 = tpu.matmul %202, %203, %cst_99 {dimension_numbers = #tpu.dot_dimension_numbers<[1], [0], [0], [1], [0, 0, 1, 1], [], []>} : vector<8x8xbf16>, vector<8x78xbf16>, vector<8x78xf32> -> vector<8x78xf32>
    %205 = vector.broadcast %174 : vector<8x1xf32> to vector<8x78xf32>
    %206 = arith.addf %205, %204 : vector<8x78xf32>
    %c0_100 = arith.constant 0 : index
    %c40 = arith.constant 40 : index
    %207 = vector.load %arg5[%c0_100, %c40] : memref<8x128xbf16, #tpu.memory_space<vmem>>, vector<8x8xbf16>
    %208 = vector.extract_strided_slice %173 {offsets = [0, 2], sizes = [8, 78], strides = [1, 1]} : vector<8x100xbf16> to vector<8x78xbf16>
    %cst_101 = arith.constant dense<0.000000e+00> : vector<8x78xf32>
    %209 = tpu.matmul %207, %208, %cst_101 {dimension_numbers = #tpu.dot_dimension_numbers<[1], [0], [0], [1], [0, 0, 1, 1], [], []>} : vector<8x8xbf16>, vector<8x78xbf16>, vector<8x78xf32> -> vector<8x78xf32>
    %210 = arith.addf %206, %209 : vector<8x78xf32>
    %c0_102 = arith.constant 0 : index
    %c48_103 = arith.constant 48 : index
    %211 = vector.load %arg5[%c0_102, %c48_103] : memref<8x128xbf16, #tpu.memory_space<vmem>>, vector<8x8xbf16>
    %212 = vector.extract_strided_slice %173 {offsets = [0, 11], sizes = [8, 78], strides = [1, 1]} : vector<8x100xbf16> to vector<8x78xbf16>
    %cst_104 = arith.constant dense<0.000000e+00> : vector<8x78xf32>
    %213 = tpu.matmul %211, %212, %cst_104 {dimension_numbers = #tpu.dot_dimension_numbers<[1], [0], [0], [1], [0, 0, 1, 1], [], []>} : vector<8x8xbf16>, vector<8x78xbf16>, vector<8x78xf32> -> vector<8x78xf32>
    %214 = arith.addf %210, %213 : vector<8x78xf32>
    %c0_105 = arith.constant 0 : index
    %c56 = arith.constant 56 : index
    %215 = vector.load %arg5[%c0_105, %c56] : memref<8x128xbf16, #tpu.memory_space<vmem>>, vector<8x8xbf16>
    %216 = vector.extract_strided_slice %173 {offsets = [0, 12], sizes = [8, 78], strides = [1, 1]} : vector<8x100xbf16> to vector<8x78xbf16>
    %cst_106 = arith.constant dense<0.000000e+00> : vector<8x78xf32>
    %217 = tpu.matmul %215, %216, %cst_106 {dimension_numbers = #tpu.dot_dimension_numbers<[1], [0], [0], [1], [0, 0, 1, 1], [], []>} : vector<8x8xbf16>, vector<8x78xbf16>, vector<8x78xf32> -> vector<8x78xf32>
    %218 = arith.addf %214, %217 : vector<8x78xf32>
    %219 = vector.extract_strided_slice %218 {offsets = [0, 0], sizes = [4, 78], strides = [1, 1]} : vector<8x78xf32> to vector<4x78xf32>
    %220 = vector.extract_strided_slice %218 {offsets = [4, 0], sizes = [4, 78], strides = [1, 1]} : vector<8x78xf32> to vector<4x78xf32>
    %cst_107 = arith.constant 5.000000e-01 : f32
    %221 = vector.broadcast %cst_107 : f32 to vector<4x78xf32>
    %222 = arith.mulf %221, %220 : vector<4x78xf32>
    %223 = math.tanh %222 : vector<4x78xf32>
    %cst_108 = arith.constant 5.000000e-01 : f32
    %224 = vector.broadcast %cst_108 : f32 to vector<4x78xf32>
    %225 = arith.mulf %224, %223 : vector<4x78xf32>
    %cst_109 = arith.constant 5.000000e-01 : f32
    %226 = vector.broadcast %cst_109 : f32 to vector<4x78xf32>
    %227 = arith.addf %225, %226 : vector<4x78xf32>
    %228 = arith.mulf %219, %227 : vector<4x78xf32>
    %c0_110 = arith.constant 0 : index
    %c64_111 = arith.constant 64 : index
    %229 = vector.load %arg5[%c0_110, %c64_111] : memref<8x128xbf16, #tpu.memory_space<vmem>>, vector<8x8xbf16>
    %230 = vector.extract_strided_slice %173 {offsets = [0, 10], sizes = [8, 78], strides = [1, 1]} : vector<8x100xbf16> to vector<8x78xbf16>
    %cst_112 = arith.constant dense<0.000000e+00> : vector<8x78xf32>
    %231 = tpu.matmul %229, %230, %cst_112 {dimension_numbers = #tpu.dot_dimension_numbers<[1], [0], [0], [1], [0, 0, 1, 1], [], []>} : vector<8x8xbf16>, vector<8x78xbf16>, vector<8x78xf32> -> vector<8x78xf32>
    %232 = vector.broadcast %174 : vector<8x1xf32> to vector<8x78xf32>
    %233 = arith.addf %232, %231 : vector<8x78xf32>
    %c0_113 = arith.constant 0 : index
    %c72 = arith.constant 72 : index
    %234 = vector.load %arg5[%c0_113, %c72] : memref<8x128xbf16, #tpu.memory_space<vmem>>, vector<8x8xbf16>
    %235 = vector.extract_strided_slice %173 {offsets = [0, 11], sizes = [8, 78], strides = [1, 1]} : vector<8x100xbf16> to vector<8x78xbf16>
    %cst_114 = arith.constant dense<0.000000e+00> : vector<8x78xf32>
    %236 = tpu.matmul %234, %235, %cst_114 {dimension_numbers = #tpu.dot_dimension_numbers<[1], [0], [0], [1], [0, 0, 1, 1], [], []>} : vector<8x8xbf16>, vector<8x78xbf16>, vector<8x78xf32> -> vector<8x78xf32>
    %237 = arith.addf %233, %236 : vector<8x78xf32>
    %c0_115 = arith.constant 0 : index
    %c80_116 = arith.constant 80 : index
    %238 = vector.load %arg5[%c0_115, %c80_116] : memref<8x128xbf16, #tpu.memory_space<vmem>>, vector<8x8xbf16>
    %239 = vector.extract_strided_slice %173 {offsets = [0, 20], sizes = [8, 78], strides = [1, 1]} : vector<8x100xbf16> to vector<8x78xbf16>
    %cst_117 = arith.constant dense<0.000000e+00> : vector<8x78xf32>
    %240 = tpu.matmul %238, %239, %cst_117 {dimension_numbers = #tpu.dot_dimension_numbers<[1], [0], [0], [1], [0, 0, 1, 1], [], []>} : vector<8x8xbf16>, vector<8x78xbf16>, vector<8x78xf32> -> vector<8x78xf32>
    %241 = arith.addf %237, %240 : vector<8x78xf32>
    %c0_118 = arith.constant 0 : index
    %c88 = arith.constant 88 : index
    %242 = vector.load %arg5[%c0_118, %c88] : memref<8x128xbf16, #tpu.memory_space<vmem>>, vector<8x8xbf16>
    %243 = vector.extract_strided_slice %173 {offsets = [0, 21], sizes = [8, 78], strides = [1, 1]} : vector<8x100xbf16> to vector<8x78xbf16>
    %cst_119 = arith.constant dense<0.000000e+00> : vector<8x78xf32>
    %244 = tpu.matmul %242, %243, %cst_119 {dimension_numbers = #tpu.dot_dimension_numbers<[1], [0], [0], [1], [0, 0, 1, 1], [], []>} : vector<8x8xbf16>, vector<8x78xbf16>, vector<8x78xf32> -> vector<8x78xf32>
    %245 = arith.addf %241, %244 : vector<8x78xf32>
    %246 = vector.extract_strided_slice %245 {offsets = [0, 0], sizes = [4, 78], strides = [1, 1]} : vector<8x78xf32> to vector<4x78xf32>
    %247 = vector.extract_strided_slice %245 {offsets = [4, 0], sizes = [4, 78], strides = [1, 1]} : vector<8x78xf32> to vector<4x78xf32>
    %cst_120 = arith.constant 5.000000e-01 : f32
    %248 = vector.broadcast %cst_120 : f32 to vector<4x78xf32>
    %249 = arith.mulf %248, %247 : vector<4x78xf32>
    %250 = math.tanh %249 : vector<4x78xf32>
    %cst_121 = arith.constant 5.000000e-01 : f32
    %251 = vector.broadcast %cst_121 : f32 to vector<4x78xf32>
    %252 = arith.mulf %251, %250 : vector<4x78xf32>
    %cst_122 = arith.constant 5.000000e-01 : f32
    %253 = vector.broadcast %cst_122 : f32 to vector<4x78xf32>
    %254 = arith.addf %252, %253 : vector<4x78xf32>
    %255 = arith.mulf %246, %254 : vector<4x78xf32>
    %c0_123 = arith.constant 0 : index
    %c96_124 = arith.constant 96 : index
    %256 = vector.load %arg5[%c0_123, %c96_124] : memref<8x128xbf16, #tpu.memory_space<vmem>>, vector<8x8xbf16>
    %257 = vector.extract_strided_slice %173 {offsets = [0, 11], sizes = [8, 78], strides = [1, 1]} : vector<8x100xbf16> to vector<8x78xbf16>
    %cst_125 = arith.constant dense<0.000000e+00> : vector<8x78xf32>
    %258 = tpu.matmul %256, %257, %cst_125 {dimension_numbers = #tpu.dot_dimension_numbers<[1], [0], [0], [1], [0, 0, 1, 1], [], []>} : vector<8x8xbf16>, vector<8x78xbf16>, vector<8x78xf32> -> vector<8x78xf32>
    %259 = vector.broadcast %174 : vector<8x1xf32> to vector<8x78xf32>
    %260 = arith.addf %259, %258 : vector<8x78xf32>
    %c0_126 = arith.constant 0 : index
    %c104 = arith.constant 104 : index
    %261 = vector.load %arg5[%c0_126, %c104] : memref<8x128xbf16, #tpu.memory_space<vmem>>, vector<8x8xbf16>
    %262 = vector.extract_strided_slice %173 {offsets = [0, 12], sizes = [8, 78], strides = [1, 1]} : vector<8x100xbf16> to vector<8x78xbf16>
    %cst_127 = arith.constant dense<0.000000e+00> : vector<8x78xf32>
    %263 = tpu.matmul %261, %262, %cst_127 {dimension_numbers = #tpu.dot_dimension_numbers<[1], [0], [0], [1], [0, 0, 1, 1], [], []>} : vector<8x8xbf16>, vector<8x78xbf16>, vector<8x78xf32> -> vector<8x78xf32>
    %264 = arith.addf %260, %263 : vector<8x78xf32>
    %c0_128 = arith.constant 0 : index
    %c112_129 = arith.constant 112 : index
    %265 = vector.load %arg5[%c0_128, %c112_129] : memref<8x128xbf16, #tpu.memory_space<vmem>>, vector<8x8xbf16>
    %266 = vector.extract_strided_slice %173 {offsets = [0, 21], sizes = [8, 78], strides = [1, 1]} : vector<8x100xbf16> to vector<8x78xbf16>
    %cst_130 = arith.constant dense<0.000000e+00> : vector<8x78xf32>
    %267 = tpu.matmul %265, %266, %cst_130 {dimension_numbers = #tpu.dot_dimension_numbers<[1], [0], [0], [1], [0, 0, 1, 1], [], []>} : vector<8x8xbf16>, vector<8x78xbf16>, vector<8x78xf32> -> vector<8x78xf32>
    %268 = arith.addf %264, %267 : vector<8x78xf32>
    %c0_131 = arith.constant 0 : index
    %c120 = arith.constant 120 : index
    %269 = vector.load %arg5[%c0_131, %c120] : memref<8x128xbf16, #tpu.memory_space<vmem>>, vector<8x8xbf16>
    %270 = vector.extract_strided_slice %173 {offsets = [0, 22], sizes = [8, 78], strides = [1, 1]} : vector<8x100xbf16> to vector<8x78xbf16>
    %cst_132 = arith.constant dense<0.000000e+00> : vector<8x78xf32>
    %271 = tpu.matmul %269, %270, %cst_132 {dimension_numbers = #tpu.dot_dimension_numbers<[1], [0], [0], [1], [0, 0, 1, 1], [], []>} : vector<8x8xbf16>, vector<8x78xbf16>, vector<8x78xf32> -> vector<8x78xf32>
    %272 = arith.addf %268, %271 : vector<8x78xf32>
    %273 = vector.extract_strided_slice %272 {offsets = [0, 0], sizes = [4, 78], strides = [1, 1]} : vector<8x78xf32> to vector<4x78xf32>
    %274 = vector.extract_strided_slice %272 {offsets = [4, 0], sizes = [4, 78], strides = [1, 1]} : vector<8x78xf32> to vector<4x78xf32>
    %cst_133 = arith.constant 5.000000e-01 : f32
    %275 = vector.broadcast %cst_133 : f32 to vector<4x78xf32>
    %276 = arith.mulf %275, %274 : vector<4x78xf32>
    %277 = math.tanh %276 : vector<4x78xf32>
    %cst_134 = arith.constant 5.000000e-01 : f32
    %278 = vector.broadcast %cst_134 : f32 to vector<4x78xf32>
    %279 = arith.mulf %278, %277 : vector<4x78xf32>
    %cst_135 = arith.constant 5.000000e-01 : f32
    %280 = vector.broadcast %cst_135 : f32 to vector<4x78xf32>
    %281 = arith.addf %279, %280 : vector<4x78xf32>
    %282 = arith.mulf %273, %281 : vector<4x78xf32>
    %c0_136 = arith.constant 0 : index
    %c0_137 = arith.constant 0 : index
    %c0_138 = arith.constant 0 : index
    %283 = vector.load %arg7[%c0_136, %c0_137, %c0_138] : memref<2x8x16xf32, #tpu.memory_space<vmem>>, vector<1x8x16xf32>
    %284 = vector.shape_cast %283 : vector<1x8x16xf32> to vector<8x16xf32>
    %c1_139 = arith.constant 1 : index
    %c0_140 = arith.constant 0 : index
    %c0_141 = arith.constant 0 : index
    %285 = vector.load %arg7[%c1_139, %c0_140, %c0_141] : memref<2x8x16xf32, #tpu.memory_space<vmem>>, vector<1x8x16xf32>
    %286 = vector.shape_cast %285 : vector<1x8x16xf32> to vector<8x16xf32>
    %287 = vector.extract_strided_slice %201 {offsets = [0, 0], sizes = [4, 8], strides = [1, 1]} : vector<4x78xf32> to vector<4x8xf32>
    %cst_142 = arith.constant dense<0.000000e+00> : vector<4x16xf32>
    %288 = tpu.matmul %287, %284, %cst_142 {dimension_numbers = #tpu.dot_dimension_numbers<[1], [0], [0], [1], [0, 0, 1, 1], [], []>} : vector<4x8xf32>, vector<8x16xf32>, vector<4x16xf32> -> vector<4x16xf32>
    %289 = vector.extract_strided_slice %228 {offsets = [0, 0], sizes = [4, 8], strides = [1, 1]} : vector<4x78xf32> to vector<4x8xf32>
    %cst_143 = arith.constant dense<0.000000e+00> : vector<4x16xf32>
    %290 = tpu.matmul %289, %286, %cst_143 {dimension_numbers = #tpu.dot_dimension_numbers<[1], [0], [0], [1], [0, 0, 1, 1], [], []>} : vector<4x8xf32>, vector<8x16xf32>, vector<4x16xf32> -> vector<4x16xf32>
    %291 = arith.addf %288, %290 : vector<4x16xf32>
    %c0_144 = arith.constant 0 : index
    %c0_145 = arith.constant 0 : index
    %c0_146 = arith.constant 0 : index
    %292 = vector.load %arg8[%c0_144, %c0_145, %c0_146] : memref<1x4x256xf32, #tpu.memory_space<vmem>>, vector<1x4x16xf32>
    %293 = vector.shape_cast %292 : vector<1x4x16xf32> to vector<4x16xf32>
    %294 = vector.shape_cast %291 : vector<4x16xf32> to vector<1x4x16xf32>
    tpu.vector_store %arg8[%c0_144, %c0_145, %c0_146], %294 {strides = array<i32>} : memref<1x4x256xf32, #tpu.memory_space<vmem>>, vector<1x4x16xf32>,
    %295 = vector.extract_strided_slice %255 {offsets = [0, 0], sizes = [4, 8], strides = [1, 1]} : vector<4x78xf32> to vector<4x8xf32>
    %cst_147 = arith.constant dense<0.000000e+00> : vector<4x16xf32>
    %296 = tpu.matmul %295, %284, %cst_147 {dimension_numbers = #tpu.dot_dimension_numbers<[1], [0], [0], [1], [0, 0, 1, 1], [], []>} : vector<4x8xf32>, vector<8x16xf32>, vector<4x16xf32> -> vector<4x16xf32>
    %297 = vector.extract_strided_slice %282 {offsets = [0, 0], sizes = [4, 8], strides = [1, 1]} : vector<4x78xf32> to vector<4x8xf32>
    %cst_148 = arith.constant dense<0.000000e+00> : vector<4x16xf32>
    %298 = tpu.matmul %297, %286, %cst_148 {dimension_numbers = #tpu.dot_dimension_numbers<[1], [0], [0], [1], [0, 0, 1, 1], [], []>} : vector<4x8xf32>, vector<8x16xf32>, vector<4x16xf32> -> vector<4x16xf32>
    %299 = arith.addf %296, %298 : vector<4x16xf32>
    %c0_149 = arith.constant 0 : index
    %c0_150 = arith.constant 0 : index
    %c16_151 = arith.constant 16 : index
    %300 = vector.load %arg8[%c0_149, %c0_150, %c16_151] : memref<1x4x256xf32, #tpu.memory_space<vmem>>, vector<1x4x16xf32>
    %301 = vector.shape_cast %300 : vector<1x4x16xf32> to vector<4x16xf32>
    %302 = vector.shape_cast %299 : vector<4x16xf32> to vector<1x4x16xf32>
    tpu.vector_store %arg8[%c0_149, %c0_150, %c16_151], %302 {strides = array<i32>} : memref<1x4x256xf32, #tpu.memory_space<vmem>>, vector<1x4x16xf32>,
    %303 = vector.extract_strided_slice %201 {offsets = [0, 10], sizes = [4, 8], strides = [1, 1]} : vector<4x78xf32> to vector<4x8xf32>
    %cst_152 = arith.constant dense<0.000000e+00> : vector<4x16xf32>
    %304 = tpu.matmul %303, %284, %cst_152 {dimension_numbers = #tpu.dot_dimension_numbers<[1], [0], [0], [1], [0, 0, 1, 1], [], []>} : vector<4x8xf32>, vector<8x16xf32>, vector<4x16xf32> -> vector<4x16xf32>
    %305 = vector.extract_strided_slice %228 {offsets = [0, 10], sizes = [4, 8], strides = [1, 1]} : vector<4x78xf32> to vector<4x8xf32>
    %cst_153 = arith.constant dense<0.000000e+00> : vector<4x16xf32>
    %306 = tpu.matmul %305, %286, %cst_153 {dimension_numbers = #tpu.dot_dimension_numbers<[1], [0], [0], [1], [0, 0, 1, 1], [], []>} : vector<4x8xf32>, vector<8x16xf32>, vector<4x16xf32> -> vector<4x16xf32>
    %307 = arith.addf %304, %306 : vector<4x16xf32>
    %c0_154 = arith.constant 0 : index
    %c0_155 = arith.constant 0 : index
    %c32_156 = arith.constant 32 : index
    %308 = vector.load %arg8[%c0_154, %c0_155, %c32_156] : memref<1x4x256xf32, #tpu.memory_space<vmem>>, vector<1x4x16xf32>
    %309 = vector.shape_cast %308 : vector<1x4x16xf32> to vector<4x16xf32>
    %310 = vector.shape_cast %307 : vector<4x16xf32> to vector<1x4x16xf32>
    tpu.vector_store %arg8[%c0_154, %c0_155, %c32_156], %310 {strides = array<i32>} : memref<1x4x256xf32, #tpu.memory_space<vmem>>, vector<1x4x16xf32>,
    %311 = vector.extract_strided_slice %255 {offsets = [0, 10], sizes = [4, 8], strides = [1, 1]} : vector<4x78xf32> to vector<4x8xf32>
    %cst_157 = arith.constant dense<0.000000e+00> : vector<4x16xf32>
    %312 = tpu.matmul %311, %284, %cst_157 {dimension_numbers = #tpu.dot_dimension_numbers<[1], [0], [0], [1], [0, 0, 1, 1], [], []>} : vector<4x8xf32>, vector<8x16xf32>, vector<4x16xf32> -> vector<4x16xf32>
    %313 = vector.extract_strided_slice %282 {offsets = [0, 10], sizes = [4, 8], strides = [1, 1]} : vector<4x78xf32> to vector<4x8xf32>
    %cst_158 = arith.constant dense<0.000000e+00> : vector<4x16xf32>
    %314 = tpu.matmul %313, %286, %cst_158 {dimension_numbers = #tpu.dot_dimension_numbers<[1], [0], [0], [1], [0, 0, 1, 1], [], []>} : vector<4x8xf32>, vector<8x16xf32>, vector<4x16xf32> -> vector<4x16xf32>
    %315 = arith.addf %312, %314 : vector<4x16xf32>
    %c0_159 = arith.constant 0 : index
    %c0_160 = arith.constant 0 : index
    %c48_161 = arith.constant 48 : index
    %316 = vector.load %arg8[%c0_159, %c0_160, %c48_161] : memref<1x4x256xf32, #tpu.memory_space<vmem>>, vector<1x4x16xf32>
    %317 = vector.shape_cast %316 : vector<1x4x16xf32> to vector<4x16xf32>
    %318 = vector.shape_cast %315 : vector<4x16xf32> to vector<1x4x16xf32>
    tpu.vector_store %arg8[%c0_159, %c0_160, %c48_161], %318 {strides = array<i32>} : memref<1x4x256xf32, #tpu.memory_space<vmem>>, vector<1x4x16xf32>,
    %319 = vector.extract_strided_slice %201 {offsets = [0, 20], sizes = [4, 8], strides = [1, 1]} : vector<4x78xf32> to vector<4x8xf32>
    %cst_162 = arith.constant dense<0.000000e+00> : vector<4x16xf32>
    %320 = tpu.matmul %319, %284, %cst_162 {dimension_numbers = #tpu.dot_dimension_numbers<[1], [0], [0], [1], [0, 0, 1, 1], [], []>} : vector<4x8xf32>, vector<8x16xf32>, vector<4x16xf32> -> vector<4x16xf32>
    %321 = vector.extract_strided_slice %228 {offsets = [0, 20], sizes = [4, 8], strides = [1, 1]} : vector<4x78xf32> to vector<4x8xf32>
    %cst_163 = arith.constant dense<0.000000e+00> : vector<4x16xf32>
    %322 = tpu.matmul %321, %286, %cst_163 {dimension_numbers = #tpu.dot_dimension_numbers<[1], [0], [0], [1], [0, 0, 1, 1], [], []>} : vector<4x8xf32>, vector<8x16xf32>, vector<4x16xf32> -> vector<4x16xf32>
    %323 = arith.addf %320, %322 : vector<4x16xf32>
    %c0_164 = arith.constant 0 : index
    %c0_165 = arith.constant 0 : index
    %c64_166 = arith.constant 64 : index
    %324 = vector.load %arg8[%c0_164, %c0_165, %c64_166] : memref<1x4x256xf32, #tpu.memory_space<vmem>>, vector<1x4x16xf32>
    %325 = vector.shape_cast %324 : vector<1x4x16xf32> to vector<4x16xf32>
    %326 = vector.shape_cast %323 : vector<4x16xf32> to vector<1x4x16xf32>
    tpu.vector_store %arg8[%c0_164, %c0_165, %c64_166], %326 {strides = array<i32>} : memref<1x4x256xf32, #tpu.memory_space<vmem>>, vector<1x4x16xf32>,
    %327 = vector.extract_strided_slice %255 {offsets = [0, 20], sizes = [4, 8], strides = [1, 1]} : vector<4x78xf32> to vector<4x8xf32>
    %cst_167 = arith.constant dense<0.000000e+00> : vector<4x16xf32>
    %328 = tpu.matmul %327, %284, %cst_167 {dimension_numbers = #tpu.dot_dimension_numbers<[1], [0], [0], [1], [0, 0, 1, 1], [], []>} : vector<4x8xf32>, vector<8x16xf32>, vector<4x16xf32> -> vector<4x16xf32>
    %329 = vector.extract_strided_slice %282 {offsets = [0, 20], sizes = [4, 8], strides = [1, 1]} : vector<4x78xf32> to vector<4x8xf32>
    %cst_168 = arith.constant dense<0.000000e+00> : vector<4x16xf32>
    %330 = tpu.matmul %329, %286, %cst_168 {dimension_numbers = #tpu.dot_dimension_numbers<[1], [0], [0], [1], [0, 0, 1, 1], [], []>} : vector<4x8xf32>, vector<8x16xf32>, vector<4x16xf32> -> vector<4x16xf32>
    %331 = arith.addf %328, %330 : vector<4x16xf32>
    %c0_169 = arith.constant 0 : index
    %c0_170 = arith.constant 0 : index
    %c80_171 = arith.constant 80 : index
    %332 = vector.load %arg8[%c0_169, %c0_170, %c80_171] : memref<1x4x256xf32, #tpu.memory_space<vmem>>, vector<1x4x16xf32>
    %333 = vector.shape_cast %332 : vector<1x4x16xf32> to vector<4x16xf32>
    %334 = vector.shape_cast %331 : vector<4x16xf32> to vector<1x4x16xf32>
    tpu.vector_store %arg8[%c0_169, %c0_170, %c80_171], %334 {strides = array<i32>} : memref<1x4x256xf32, #tpu.memory_space<vmem>>, vector<1x4x16xf32>,
    %335 = vector.extract_strided_slice %201 {offsets = [0, 30], sizes = [4, 8], strides = [1, 1]} : vector<4x78xf32> to vector<4x8xf32>
    %cst_172 = arith.constant dense<0.000000e+00> : vector<4x16xf32>
    %336 = tpu.matmul %335, %284, %cst_172 {dimension_numbers = #tpu.dot_dimension_numbers<[1], [0], [0], [1], [0, 0, 1, 1], [], []>} : vector<4x8xf32>, vector<8x16xf32>, vector<4x16xf32> -> vector<4x16xf32>
    %337 = vector.extract_strided_slice %228 {offsets = [0, 30], sizes = [4, 8], strides = [1, 1]} : vector<4x78xf32> to vector<4x8xf32>
    %cst_173 = arith.constant dense<0.000000e+00> : vector<4x16xf32>
    %338 = tpu.matmul %337, %286, %cst_173 {dimension_numbers = #tpu.dot_dimension_numbers<[1], [0], [0], [1], [0, 0, 1, 1], [], []>} : vector<4x8xf32>, vector<8x16xf32>, vector<4x16xf32> -> vector<4x16xf32>
    %339 = arith.addf %336, %338 : vector<4x16xf32>
    %c0_174 = arith.constant 0 : index
    %c0_175 = arith.constant 0 : index
    %c96_176 = arith.constant 96 : index
    %340 = vector.load %arg8[%c0_174, %c0_175, %c96_176] : memref<1x4x256xf32, #tpu.memory_space<vmem>>, vector<1x4x16xf32>
    %341 = vector.shape_cast %340 : vector<1x4x16xf32> to vector<4x16xf32>
    %342 = vector.shape_cast %339 : vector<4x16xf32> to vector<1x4x16xf32>
    tpu.vector_store %arg8[%c0_174, %c0_175, %c96_176], %342 {strides = array<i32>} : memref<1x4x256xf32, #tpu.memory_space<vmem>>, vector<1x4x16xf32>,
    %343 = vector.extract_strided_slice %255 {offsets = [0, 30], sizes = [4, 8], strides = [1, 1]} : vector<4x78xf32> to vector<4x8xf32>
    %cst_177 = arith.constant dense<0.000000e+00> : vector<4x16xf32>
    %344 = tpu.matmul %343, %284, %cst_177 {dimension_numbers = #tpu.dot_dimension_numbers<[1], [0], [0], [1], [0, 0, 1, 1], [], []>} : vector<4x8xf32>, vector<8x16xf32>, vector<4x16xf32> -> vector<4x16xf32>
    %345 = vector.extract_strided_slice %282 {offsets = [0, 30], sizes = [4, 8], strides = [1, 1]} : vector<4x78xf32> to vector<4x8xf32>
    %cst_178 = arith.constant dense<0.000000e+00> : vector<4x16xf32>
    %346 = tpu.matmul %345, %286, %cst_178 {dimension_numbers = #tpu.dot_dimension_numbers<[1], [0], [0], [1], [0, 0, 1, 1], [], []>} : vector<4x8xf32>, vector<8x16xf32>, vector<4x16xf32> -> vector<4x16xf32>
    %347 = arith.addf %344, %346 : vector<4x16xf32>
    %c0_179 = arith.constant 0 : index
    %c0_180 = arith.constant 0 : index
    %c112_181 = arith.constant 112 : index
    %348 = vector.load %arg8[%c0_179, %c0_180, %c112_181] : memref<1x4x256xf32, #tpu.memory_space<vmem>>, vector<1x4x16xf32>
    %349 = vector.shape_cast %348 : vector<1x4x16xf32> to vector<4x16xf32>
    %350 = vector.shape_cast %347 : vector<4x16xf32> to vector<1x4x16xf32>
    tpu.vector_store %arg8[%c0_179, %c0_180, %c112_181], %350 {strides = array<i32>} : memref<1x4x256xf32, #tpu.memory_space<vmem>>, vector<1x4x16xf32>,
    %351 = vector.extract_strided_slice %201 {offsets = [0, 40], sizes = [4, 8], strides = [1, 1]} : vector<4x78xf32> to vector<4x8xf32>
    %cst_182 = arith.constant dense<0.000000e+00> : vector<4x16xf32>
    %352 = tpu.matmul %351, %284, %cst_182 {dimension_numbers = #tpu.dot_dimension_numbers<[1], [0], [0], [1], [0, 0, 1, 1], [], []>} : vector<4x8xf32>, vector<8x16xf32>, vector<4x16xf32> -> vector<4x16xf32>
    %353 = vector.extract_strided_slice %228 {offsets = [0, 40], sizes = [4, 8], strides = [1, 1]} : vector<4x78xf32> to vector<4x8xf32>
    %cst_183 = arith.constant dense<0.000000e+00> : vector<4x16xf32>
    %354 = tpu.matmul %353, %286, %cst_183 {dimension_numbers = #tpu.dot_dimension_numbers<[1], [0], [0], [1], [0, 0, 1, 1], [], []>} : vector<4x8xf32>, vector<8x16xf32>, vector<4x16xf32> -> vector<4x16xf32>
    %355 = arith.addf %352, %354 : vector<4x16xf32>
    %c0_184 = arith.constant 0 : index
    %c0_185 = arith.constant 0 : index
    %c128_186 = arith.constant 128 : index
    %356 = vector.load %arg8[%c0_184, %c0_185, %c128_186] : memref<1x4x256xf32, #tpu.memory_space<vmem>>, vector<1x4x16xf32>
    %357 = vector.shape_cast %356 : vector<1x4x16xf32> to vector<4x16xf32>
    %358 = vector.shape_cast %355 : vector<4x16xf32> to vector<1x4x16xf32>
    tpu.vector_store %arg8[%c0_184, %c0_185, %c128_186], %358 {strides = array<i32>} : memref<1x4x256xf32, #tpu.memory_space<vmem>>, vector<1x4x16xf32>,
    %359 = vector.extract_strided_slice %255 {offsets = [0, 40], sizes = [4, 8], strides = [1, 1]} : vector<4x78xf32> to vector<4x8xf32>
    %cst_187 = arith.constant dense<0.000000e+00> : vector<4x16xf32>
    %360 = tpu.matmul %359, %284, %cst_187 {dimension_numbers = #tpu.dot_dimension_numbers<[1], [0], [0], [1], [0, 0, 1, 1], [], []>} : vector<4x8xf32>, vector<8x16xf32>, vector<4x16xf32> -> vector<4x16xf32>
    %361 = vector.extract_strided_slice %282 {offsets = [0, 40], sizes = [4, 8], strides = [1, 1]} : vector<4x78xf32> to vector<4x8xf32>
    %cst_188 = arith.constant dense<0.000000e+00> : vector<4x16xf32>
    %362 = tpu.matmul %361, %286, %cst_188 {dimension_numbers = #tpu.dot_dimension_numbers<[1], [0], [0], [1], [0, 0, 1, 1], [], []>} : vector<4x8xf32>, vector<8x16xf32>, vector<4x16xf32> -> vector<4x16xf32>
    %363 = arith.addf %360, %362 : vector<4x16xf32>
    %c0_189 = arith.constant 0 : index
    %c0_190 = arith.constant 0 : index
    %c144_191 = arith.constant 144 : index
    %364 = vector.load %arg8[%c0_189, %c0_190, %c144_191] : memref<1x4x256xf32, #tpu.memory_space<vmem>>, vector<1x4x16xf32>
    %365 = vector.shape_cast %364 : vector<1x4x16xf32> to vector<4x16xf32>
    %366 = vector.shape_cast %363 : vector<4x16xf32> to vector<1x4x16xf32>
    tpu.vector_store %arg8[%c0_189, %c0_190, %c144_191], %366 {strides = array<i32>} : memref<1x4x256xf32, #tpu.memory_space<vmem>>, vector<1x4x16xf32>,
    %367 = vector.extract_strided_slice %201 {offsets = [0, 50], sizes = [4, 8], strides = [1, 1]} : vector<4x78xf32> to vector<4x8xf32>
    %cst_192 = arith.constant dense<0.000000e+00> : vector<4x16xf32>
    %368 = tpu.matmul %367, %284, %cst_192 {dimension_numbers = #tpu.dot_dimension_numbers<[1], [0], [0], [1], [0, 0, 1, 1], [], []>} : vector<4x8xf32>, vector<8x16xf32>, vector<4x16xf32> -> vector<4x16xf32>
    %369 = vector.extract_strided_slice %228 {offsets = [0, 50], sizes = [4, 8], strides = [1, 1]} : vector<4x78xf32> to vector<4x8xf32>
    %cst_193 = arith.constant dense<0.000000e+00> : vector<4x16xf32>
    %370 = tpu.matmul %369, %286, %cst_193 {dimension_numbers = #tpu.dot_dimension_numbers<[1], [0], [0], [1], [0, 0, 1, 1], [], []>} : vector<4x8xf32>, vector<8x16xf32>, vector<4x16xf32> -> vector<4x16xf32>
    %371 = arith.addf %368, %370 : vector<4x16xf32>
    %c0_194 = arith.constant 0 : index
    %c0_195 = arith.constant 0 : index
    %c160_196 = arith.constant 160 : index
    %372 = vector.load %arg8[%c0_194, %c0_195, %c160_196] : memref<1x4x256xf32, #tpu.memory_space<vmem>>, vector<1x4x16xf32>
    %373 = vector.shape_cast %372 : vector<1x4x16xf32> to vector<4x16xf32>
    %374 = vector.shape_cast %371 : vector<4x16xf32> to vector<1x4x16xf32>
    tpu.vector_store %arg8[%c0_194, %c0_195, %c160_196], %374 {strides = array<i32>} : memref<1x4x256xf32, #tpu.memory_space<vmem>>, vector<1x4x16xf32>,
    %375 = vector.extract_strided_slice %255 {offsets = [0, 50], sizes = [4, 8], strides = [1, 1]} : vector<4x78xf32> to vector<4x8xf32>
    %cst_197 = arith.constant dense<0.000000e+00> : vector<4x16xf32>
    %376 = tpu.matmul %375, %284, %cst_197 {dimension_numbers = #tpu.dot_dimension_numbers<[1], [0], [0], [1], [0, 0, 1, 1], [], []>} : vector<4x8xf32>, vector<8x16xf32>, vector<4x16xf32> -> vector<4x16xf32>
    %377 = vector.extract_strided_slice %282 {offsets = [0, 50], sizes = [4, 8], strides = [1, 1]} : vector<4x78xf32> to vector<4x8xf32>
    %cst_198 = arith.constant dense<0.000000e+00> : vector<4x16xf32>
    %378 = tpu.matmul %377, %286, %cst_198 {dimension_numbers = #tpu.dot_dimension_numbers<[1], [0], [0], [1], [0, 0, 1, 1], [], []>} : vector<4x8xf32>, vector<8x16xf32>, vector<4x16xf32> -> vector<4x16xf32>
    %379 = arith.addf %376, %378 : vector<4x16xf32>
    %c0_199 = arith.constant 0 : index
    %c0_200 = arith.constant 0 : index
    %c176_201 = arith.constant 176 : index
    %380 = vector.load %arg8[%c0_199, %c0_200, %c176_201] : memref<1x4x256xf32, #tpu.memory_space<vmem>>, vector<1x4x16xf32>
    %381 = vector.shape_cast %380 : vector<1x4x16xf32> to vector<4x16xf32>
    %382 = vector.shape_cast %379 : vector<4x16xf32> to vector<1x4x16xf32>
    tpu.vector_store %arg8[%c0_199, %c0_200, %c176_201], %382 {strides = array<i32>} : memref<1x4x256xf32, #tpu.memory_space<vmem>>, vector<1x4x16xf32>,
    %383 = vector.extract_strided_slice %201 {offsets = [0, 60], sizes = [4, 8], strides = [1, 1]} : vector<4x78xf32> to vector<4x8xf32>
    %cst_202 = arith.constant dense<0.000000e+00> : vector<4x16xf32>
    %384 = tpu.matmul %383, %284, %cst_202 {dimension_numbers = #tpu.dot_dimension_numbers<[1], [0], [0], [1], [0, 0, 1, 1], [], []>} : vector<4x8xf32>, vector<8x16xf32>, vector<4x16xf32> -> vector<4x16xf32>
    %385 = vector.extract_strided_slice %228 {offsets = [0, 60], sizes = [4, 8], strides = [1, 1]} : vector<4x78xf32> to vector<4x8xf32>
    %cst_203 = arith.constant dense<0.000000e+00> : vector<4x16xf32>
    %386 = tpu.matmul %385, %286, %cst_203 {dimension_numbers = #tpu.dot_dimension_numbers<[1], [0], [0], [1], [0, 0, 1, 1], [], []>} : vector<4x8xf32>, vector<8x16xf32>, vector<4x16xf32> -> vector<4x16xf32>
    %387 = arith.addf %384, %386 : vector<4x16xf32>
    %c0_204 = arith.constant 0 : index
    %c0_205 = arith.constant 0 : index
    %c192_206 = arith.constant 192 : index
    %388 = vector.load %arg8[%c0_204, %c0_205, %c192_206] : memref<1x4x256xf32, #tpu.memory_space<vmem>>, vector<1x4x16xf32>
    %389 = vector.shape_cast %388 : vector<1x4x16xf32> to vector<4x16xf32>
    %390 = vector.shape_cast %387 : vector<4x16xf32> to vector<1x4x16xf32>
    tpu.vector_store %arg8[%c0_204, %c0_205, %c192_206], %390 {strides = array<i32>} : memref<1x4x256xf32, #tpu.memory_space<vmem>>, vector<1x4x16xf32>,
    %391 = vector.extract_strided_slice %255 {offsets = [0, 60], sizes = [4, 8], strides = [1, 1]} : vector<4x78xf32> to vector<4x8xf32>
    %cst_207 = arith.constant dense<0.000000e+00> : vector<4x16xf32>
    %392 = tpu.matmul %391, %284, %cst_207 {dimension_numbers = #tpu.dot_dimension_numbers<[1], [0], [0], [1], [0, 0, 1, 1], [], []>} : vector<4x8xf32>, vector<8x16xf32>, vector<4x16xf32> -> vector<4x16xf32>
    %393 = vector.extract_strided_slice %282 {offsets = [0, 60], sizes = [4, 8], strides = [1, 1]} : vector<4x78xf32> to vector<4x8xf32>
    %cst_208 = arith.constant dense<0.000000e+00> : vector<4x16xf32>
    %394 = tpu.matmul %393, %286, %cst_208 {dimension_numbers = #tpu.dot_dimension_numbers<[1], [0], [0], [1], [0, 0, 1, 1], [], []>} : vector<4x8xf32>, vector<8x16xf32>, vector<4x16xf32> -> vector<4x16xf32>
    %395 = arith.addf %392, %394 : vector<4x16xf32>
    %c0_209 = arith.constant 0 : index
    %c0_210 = arith.constant 0 : index
    %c208_211 = arith.constant 208 : index
    %396 = vector.load %arg8[%c0_209, %c0_210, %c208_211] : memref<1x4x256xf32, #tpu.memory_space<vmem>>, vector<1x4x16xf32>
    %397 = vector.shape_cast %396 : vector<1x4x16xf32> to vector<4x16xf32>
    %398 = vector.shape_cast %395 : vector<4x16xf32> to vector<1x4x16xf32>
    tpu.vector_store %arg8[%c0_209, %c0_210, %c208_211], %398 {strides = array<i32>} : memref<1x4x256xf32, #tpu.memory_space<vmem>>, vector<1x4x16xf32>,
    %399 = vector.extract_strided_slice %201 {offsets = [0, 70], sizes = [4, 8], strides = [1, 1]} : vector<4x78xf32> to vector<4x8xf32>
    %cst_212 = arith.constant dense<0.000000e+00> : vector<4x16xf32>
    %400 = tpu.matmul %399, %284, %cst_212 {dimension_numbers = #tpu.dot_dimension_numbers<[1], [0], [0], [1], [0, 0, 1, 1], [], []>} : vector<4x8xf32>, vector<8x16xf32>, vector<4x16xf32> -> vector<4x16xf32>
    %401 = vector.extract_strided_slice %228 {offsets = [0, 70], sizes = [4, 8], strides = [1, 1]} : vector<4x78xf32> to vector<4x8xf32>
    %cst_213 = arith.constant dense<0.000000e+00> : vector<4x16xf32>
    %402 = tpu.matmul %401, %286, %cst_213 {dimension_numbers = #tpu.dot_dimension_numbers<[1], [0], [0], [1], [0, 0, 1, 1], [], []>} : vector<4x8xf32>, vector<8x16xf32>, vector<4x16xf32> -> vector<4x16xf32>
    %403 = arith.addf %400, %402 : vector<4x16xf32>
    %c0_214 = arith.constant 0 : index
    %c0_215 = arith.constant 0 : index
    %c224_216 = arith.constant 224 : index
    %404 = vector.load %arg8[%c0_214, %c0_215, %c224_216] : memref<1x4x256xf32, #tpu.memory_space<vmem>>, vector<1x4x16xf32>
    %405 = vector.shape_cast %404 : vector<1x4x16xf32> to vector<4x16xf32>
    %406 = vector.shape_cast %403 : vector<4x16xf32> to vector<1x4x16xf32>
    tpu.vector_store %arg8[%c0_214, %c0_215, %c224_216], %406 {strides = array<i32>} : memref<1x4x256xf32, #tpu.memory_space<vmem>>, vector<1x4x16xf32>,
    %407 = vector.extract_strided_slice %255 {offsets = [0, 70], sizes = [4, 8], strides = [1, 1]} : vector<4x78xf32> to vector<4x8xf32>
    %cst_217 = arith.constant dense<0.000000e+00> : vector<4x16xf32>
    %408 = tpu.matmul %407, %284, %cst_217 {dimension_numbers = #tpu.dot_dimension_numbers<[1], [0], [0], [1], [0, 0, 1, 1], [], []>} : vector<4x8xf32>, vector<8x16xf32>, vector<4x16xf32> -> vector<4x16xf32>
    %409 = vector.extract_strided_slice %282 {offsets = [0, 70], sizes = [4, 8], strides = [1, 1]} : vector<4x78xf32> to vector<4x8xf32>
    %cst_218 = arith.constant dense<0.000000e+00> : vector<4x16xf32>
    %410 = tpu.matmul %409, %286, %cst_218 {dimension_numbers = #tpu.dot_dimension_numbers<[1], [0], [0], [1], [0, 0, 1, 1], [], []>} : vector<4x8xf32>, vector<8x16xf32>, vector<4x16xf32> -> vector<4x16xf32>
    %411 = arith.addf %408, %410 : vector<4x16xf32>
    %c0_219 = arith.constant 0 : index
    %c0_220 = arith.constant 0 : index
    %c240_221 = arith.constant 240 : index
    %412 = vector.load %arg8[%c0_219, %c0_220, %c240_221] : memref<1x4x256xf32, #tpu.memory_space<vmem>>, vector<1x4x16xf32>
    %413 = vector.shape_cast %412 : vector<1x4x16xf32> to vector<4x16xf32>
    %414 = vector.shape_cast %411 : vector<4x16xf32> to vector<1x4x16xf32>
    tpu.vector_store %arg8[%c0_219, %c0_220, %c240_221], %414 {strides = array<i32>} : memref<1x4x256xf32, #tpu.memory_space<vmem>>, vector<1x4x16xf32>,
    return
  }
  func.func @transform_0(%arg0: i32) -> (i32, i32, i32) {
    %c0_i32 = arith.constant 0 : i32
    %c0_i32_0 = arith.constant 0 : i32
    %c0_i32_1 = arith.constant 0 : i32
    return %arg0, %c0_i32, %c0_i32_0 : i32, i32, i32
  }
  func.func @transform_1(%arg0: i32) -> (i32, i32) {
    %c0_i32 = arith.constant 0 : i32
    %c0_i32_0 = arith.constant 0 : i32
    %c0_i32_1 = arith.constant 0 : i32
    return %c0_i32, %c0_i32_0 : i32, i32
  }
  func.func @transform_2(%arg0: i32) -> (i32, i32) {
    %c0_i32 = arith.constant 0 : i32
    %c0_i32_0 = arith.constant 0 : i32
    %c0_i32_1 = arith.constant 0 : i32
    return %c0_i32, %c0_i32_0 : i32, i32
  }
  func.func @transform_3(%arg0: i32) -> (i32, i32, i32) {
    %c0_i32 = arith.constant 0 : i32
    %c0_i32_0 = arith.constant 0 : i32
    %c0_i32_1 = arith.constant 0 : i32
    %c0_i32_2 = arith.constant 0 : i32
    return %c0_i32, %c0_i32_0, %c0_i32_1 : i32, i32, i32
  }
  func.func @transform_4(%arg0: i32) -> (i32, i32) {
    %c0_i32 = arith.constant 0 : i32
    %c0_i32_0 = arith.constant 0 : i32
    %c0_i32_1 = arith.constant 0 : i32
    return %c0_i32, %c0_i32_0 : i32, i32
  }
  func.func @transform_5(%arg0: i32) -> (i32, i32) {
    %c0_i32 = arith.constant 0 : i32
    %c0_i32_0 = arith.constant 0 : i32
    %c0_i32_1 = arith.constant 0 : i32
    return %c0_i32, %c0_i32_0 : i32, i32
  }
  func.func @transform_6(%arg0: i32) -> (i32, i32, i32) {
    %c0_i32 = arith.constant 0 : i32
    %c0_i32_0 = arith.constant 0 : i32
    %c0_i32_1 = arith.constant 0 : i32
    %c0_i32_2 = arith.constant 0 : i32
    return %c0_i32, %c0_i32_0, %c0_i32_1 : i32, i32, i32
  }
  func.func @transform_7(%arg0: i32) -> (i32, i32, i32) {
    %c0_i32 = arith.constant 0 : i32
    %c0_i32_0 = arith.constant 0 : i32
    %c0_i32_1 = arith.constant 0 : i32
    return %arg0, %c0_i32, %c0_i32_0 : i32, i32, i32
  }
}

</mosaic_0001>

<bundles_post_ra>
// kernel: tpu_custom_call.1
= control target key start
LH: loop header
LB: loop body
LE: loop exit
PB: predicated region body
PF: predicated region fallthrough
CT: control target
= control target key end

     0   :  { %12 = vsyncpa [#allocation4], 0  ;;  %s7634_s0 = inlined_call_operand.vmem [shape: bf16[2,16,36], index: 0, kind: input, shape index: {}]   ;;  %s7635_s1 = inlined_call_operand.hbm [shape: bf16[16,256], index: 1, kind: input, shape index: {}]   ;;  %s7636_s2 = inlined_call_operand.vmem [shape: f32[16,1], index: 2, kind: input, shape index: {}]   ;;  %s7637_s3 = inlined_call_operand.hbm [shape: f32[2,4,8], index: 3, kind: input, shape index: {}]   ;;  %s7638_s4 = inlined_call_operand.hbm [shape: bf16[8,128], index: 4, kind: input, shape index: {}]   ;;  %s7639_s5 = inlined_call_operand.vmem [shape: f32[8,1], index: 5, kind: input, shape index: {}]   ;;  %s7640_s6 = inlined_call_operand.vmem [shape: f32[2,8,16], index: 6, kind: input, shape index: {}]   ;;  %s7641_s7 = inlined_call_operand.hbm [shape: f32[2,4,256], index: 7, kind: output, shape index: {}]  }
   0x1   :  { %13 = vsyncpa [#allocation7], 0 }
   0x2   :  { %14 = vsyncpa [#allocation5], 0 }
   0x3   :  { %16 = vsyncpa [#allocation5 + $0x1], 0  ;;  %s6913_s24 = smov 0   ;;  %s6915_s25 = smov 0  }
   0x4   :  { %s6917_s26 = smov 0   ;;  %s6919_s27 = smov 0  }
   0x5 LB: > { %s6934_s28 = sadd.s32 4294967295, %s6820_s27   ;;  %s5804_s29 = sadd.s32 4294967294, %s6820_s27   ;;  %s6820_s27 = sphi %s6919_s27, %s7669_s27   ;;  %s6816_s26 = sphi %s6917_s26, %s7668_s26   ;;  %s6812_s25 = sphi %s6915_s25, %s7667_s25   ;;  %s6808_s24 = sphi %s6913_s24, %s7666_s24  }
   0x6   : > { %s6938_s30 = sadd.s32 1, %s6820_s27   ;;  %s181_s8 = sadd.s32 1, %s6816_s26 }
   0x7   : > { %s178_s9 = ssub.s32 %s6820_s27, %s6938_s30  ;;  %p191_p0 = scmp.ne.s32.totalorder %s6816_s26, %s6812_s25 }
   0x8   : > { %p179_p1 = scmp.eq.s32.totalorder %s178_s9, 0  ;;  %p192_p2 = scmp.eq.s32.totalorder %s6934_s28, 1 }
   0x9   : > { %p197_p3 = scmp.ne.s32.totalorder %s6812_s25, %s6808_s24  ;;  %p198_p4 = scmp.eq.s32.totalorder %s5804_s29, 1 }
   0xa   : > { %s6949_s10 = scalar_select %p179_p1, %s6816_s26, %s181_s8  }
   0xb   : > { %p6951_p5 = por %p192_p2, %p191_p0  ;;  %p6955_p6 = por %p198_p4, %p197_p3 }
   0xc   : > { %p5805_p7 = scmp.ge.s32.totalorder %s6820_s27, 1  ;;  %p205_p8 = scmp.lt.s32.totalorder %s6820_s27, 3 }
   0xd   : > { %s7653_s12 = scalar_select %p6955_p6, 1, 0 }
   0xe   : > { %p7642_p9 = scmp.eq.s32.totalorder %s6934_s28, 0  ;;  %p6962_p10 = pnand %p5805_p7, %p205_p8 }
   0xf   : > { %s6822_s14 = smov [#allocation6]   ;;  %s6823_s17 = smov [#allocation3]  }
  0x10   : > { %s233_s15 = sshll.u32 %s6822_s14, 4  ;;  %p6548_p11 = pneg %p6962_p10  ;;  %s234_s15 = int_to_ptr.vmem [resolvable:$true] %s233_s15 }
  0x11   : > { %s217_s18 = sshll.u32 %s6823_s17, 4  ;;  %s6685_s19 = scalar_lea.vmem %s234_s15, 128  ;;  %s218_s18 = int_to_ptr.vmem [resolvable:$true] %s217_s18 }
  0x12   : > { %p6970_p12 = pnand %p7642_p9, %p6548_p11  ;;  %p6686_p0 = scmp.ne.s32.totalorder %s234_s15, %s6685_s19 }
  0x13   : > { %p6693_p3 = scmp.lt.s32.totalorder %s234_s15, %s234_s15  ;;  %p6694_p4 = scmp.lt.s32.totalorder %s6685_s19, %s6685_s19 }
  0x14   : > { %p6676_p13 = pneg %p6970_p12 }
  0x15   : > { %p6695_p7 = por %p6694_p4, %p6693_p3 }
  0x16   : > { %p6688_p1 = pnand %p6686_p0, %p6676_p13 }
  0x18   : > { %p6689_p2 = pneg %p6688_p1 }
  0x1a   : > { %p6696_p8 = pnand %p6695_p7, %p6689_p2 }
  0x1c   : > { %6699 = shalt.err (!%p6696_p8)
}
  0x1d   : > { %s6824_s20 = smov 64   ;;  %s6825_s21 = smov 4  }
  0x1e   : > { %6554 = dma.hbm_to_vmem [thread:$0]  (!%p6970_p12), %s7637_s3, 128, %s234_s15, [#allocation7], %s6824_s20, %s6824_s20, %s6825_s21  }
  0x1f   : > { %s6711_s29 = scalar_lea.vmem %s218_s18, 256  ;;  %p6719_p9 = scmp.lt.s32.totalorder %s218_s18, %s218_s18 }
  0x20   : > { %p6712_p11 = scmp.ne.s32.totalorder %s218_s18, %s6711_s29  ;;  %p6720_p6 = scmp.lt.s32.totalorder %s6711_s29, %s6711_s29 }
  0x22   : > { %p6714_p0 = pnand %p6712_p11, %p6676_p13  ;;  %p6721_p3 = por %p6720_p6, %p6719_p9 }
  0x24   : > { %p6715_p1 = pneg %p6714_p0 }
  0x26   : > { %p6722_p2 = pnand %p6721_p3, %p6715_p1 }
  0x28   : > { %6725 = shalt.err (!%p6722_p2)
}
  0x29   : > { %s6826_s8 = smov 128   ;;  %s6827_s9 = smov 8  }
  0x2a   : > { %6551 = dma.hbm_to_vmem [thread:$0]  (!%p6970_p12), %s7635_s1, 256, %s218_s18, [#allocation4], %s6826_s8, %s6826_s8, %s6827_s9  }
  0x2b   : > { %s6828_s15 = smov [#allocation8]  }
  0x2c   : > { %s247_s19 = sshll.u32 %s6828_s15, 4  ;;  %s248_s19 = int_to_ptr.vmem [resolvable:$true] %s247_s19 }
  0x2d   : > { %s6737_s20 = scalar_lea.vmem %s248_s19, 64  ;;  %p6745_p9 = scmp.lt.s32.totalorder %s248_s19, %s248_s19 }
  0x2e   : > { %p6738_p4 = scmp.ne.s32.totalorder %s248_s19, %s6737_s20  ;;  %p6746_p8 = scmp.lt.s32.totalorder %s6737_s20, %s6737_s20 }
  0x30   : > { %p6740_p7 = pnand %p6738_p4, %p6676_p13  ;;  %p6747_p11 = por %p6746_p8, %p6745_p9 }
  0x32   : > { %p6741_p6 = pneg %p6740_p7 }
  0x34   : > { %p6748_p0 = pnand %p6747_p11, %p6741_p6 }
  0x36   : > { %6751 = shalt.err (!%p6748_p0)
}
  0x37   : > { %6557 = dma.hbm_to_vmem [thread:$0]  (!%p6970_p12), %s7638_s4, 64, %s248_s19, [#allocation7]  }
  0x38   : > { %274 = sbr.rel (%p6962_p10) target bundleno = 1802 (0x70a), region = 48  ;;  %p7656_p1 = scmp.eq.s32.totalorder (!%p6962_p10), %s6934_s28, 0 }
  0x3d   : > { %6795 = dma.done.wait (%p7656_p1), [#allocation4], 256   ;;  %p7657_p13 = pmov %p7656_p1 }
  0x3e   : > { %p7658_p3 = pmov %p7656_p1 }
  0x3f   : > { %6797 = vsyncadd (%p7657_p13), [#allocation4], 4294967040 }
  0x40   : > { %6799 = dma.done.wait (%p7658_p3), [#allocation7], 192   ;;  %p7659_p2 = pmov %p7656_p1 }
  0x41   : > { %p314_p4 = scmp.lt.s32.totalorder %s6934_s28, 1  ;;  %v6829_v0 = vmov 0.0   ;;  %vm6830_vm0 = vmmov 0   ;;  %s6831_s8 = smov 127   ;;  %v6654_v2 = vld [vmem:[#allocation3] ss:$8 sps:$4 sm:$0xff]  }
  0x42   : > { %6801 = vsyncadd (%p7659_p2), [#allocation7], 4294967104  ;;  %6102 = vmatprep.subr.bf16.mxu0 %v6829_v0  ;;  %6104 = vmatprep.mubr.msk.bf16.mxu0 %vm6830_vm0, %v6829_v0  ;;  %s6832_s9 = smov 122   ;;  %vm337_vm1 = vcmask 130048   ;;  %s7646_s14 = smov 112   ;;  %vm1166_vm2 = vcmask 814080  }
  0x43   : > { %s315_s13 = scalar_select %p314_p4, %s6934_s28, 1  ;;  %6108 = vmatprep.subr.bf16.mxu1 %v6829_v0  ;;  %6110 = vmatprep.mubr.msk.bf16.mxu1 %vm6830_vm0, %v6829_v0  ;;  %v7036_v3 = vld [vmem:[#allocation3 + $0x4] ss:$8 sps:$4 sm:$0xff]   ;;  %v322_v4 = vld [vmem:[%s7636_s2] sm:$0xff]  ;;  %v6846_v6 = vmov 0   ;;  %vm1172_vm3 = vcmask 1043456  }
  0x44   : > { %s6834_s17 = smov 121   ;;  %s7648_s15 = smov 96   ;;  %v323_v5 = vld [vmem:[%s7636_s2 + $0x8] sm:$0xff]  ;;  %6652 = vset.pattern.permute.xlu1 %v6846_v6  ;;  %1167 = vst.msk [vmem:[#allocation2] sm:$0xf] %vm1166_vm2, %v6846_v6  ;;  %6651 = vset.pattern.permute.xlu0 %v6846_v6  ;;  %vm1168_vm4 = vcmask 31744  }
  0x45   : > { %s5932_s16 = sshll.u32 %s315_s13, 3  ;;  %s7644_s19 = smov 80   ;;  %v7120_v33 = vld [vmem:[#allocation6] sm:$0xf]  ;;  %v7125_v34 = vld [vmem:[#allocation6 + $0x4] sm:$0xf] }
  0x46   : > { %s318_s29 = scalar_lea.vmem %s7634_s0, %s5932_s16  ;;  %s7643_s20 = smov 126   ;;  %vm1329_vm5 = vcmask 150616   ;;  %vm1484_vm6 = vcmask 232616   ;;  %vm1641_vm7 = vcmask 314616   ;;  %vm1798_vm8 = vcmask 396616  }
  0x47   : > { %v6653_v1 = vld [vmem:[%s318_s29] sm:$0xff]   ;;  %s6838_s21 = smov 64   ;;  %s6839_s22 = smov 48   ;;  %vm1955_vm9 = vcmask 478616   ;;  %vm2112_vm10 = vcmask 560616   ;;  %vm2269_vm11 = vcmask 642616  }
  0x48   : > { %396 = vrot.lane.b32.xlu0 %v6653_v1, %s6831_s8  ;;  %447 = vrot.lane.b32.xlu1 %v6653_v1, %s6832_s9  ;;  %s6840_s13 = smov 120   ;;  %s6841_s16 = smov 32   ;;  %vm2426_vm12 = vcmask 724616   ;;  %vm2431_vm13 = vcmask 64512   ;;  %vm3401_vm14 = vcmask 125952   ;;  %vm3553_vm15 = vcmask 257152  }
  0x49   : > { %6103 = vmatpush3.bf16.msra.mxu0 %v6653_v1  ;;  %s6842_s18 = smov 16   ;;  %s6843_s23 = smov 116   ;;  %vm4015_vm2 = vcmask 650752  }
  0x4a   : > { %6114 = vmatprep.subr.bf16.mxu0 %v6829_v0  ;;  %s6844_s29 = smov 115  }
  0x4c   : > { %394 = vrot.lane.b32.xlu0 %v6654_v2, %s7646_s14  ;;  %498 = vrot.lane.b32.xlu1 %v6653_v1, %s6834_s17  ;;  %s6845_s17 = smov 114  }
  0x4d   : > { %6105 = vmatmul.mubr.msk.bf16.vlgmr.msra.gmra.mxu0 %vm337_vm1, %v6654_v2 }
  0x4e   : > { %6116 = vmatprep.mubr.msk.bf16.mxu0 %vm6830_vm0, %v6829_v0 }
  0x50   : > { %445 = vrot.lane.b32.xlu0 %v6654_v2, %s7648_s15  ;;  %496 = vrot.lane.b32.xlu1 %v6654_v2, %s7644_s19 }
  0x54   : > { %602 = vrot.lane.b32.xlu0 %v6653_v1, %s7643_s20  ;;  %552 = vrot.lane.b32.xlu1 %v6654_v2, %s6838_s21  ;;  %s6850_s20 = smov 31  }
  0x58   : > { %600 = vrot.lane.b32.xlu0 %v6654_v2, %s6839_s22  ;;  %701 = vrot.lane.b32.xlu1 %v6653_v1, %s6840_s13 }
  0x5c   : > { %651 = vrot.lane.b32.xlu0 %v6654_v2, %s6841_s16  ;;  %699 = vrot.lane.b32.xlu1 %v6654_v2, %s6842_s18 }
  0x60   : > { %808 = vrot.lane.b32.xlu0 %v7036_v3, %s7646_s14  ;;  %858 = vrot.lane.b32.xlu1 %v6653_v1, %s6843_s23  ;;  %s6847_s14 = smov 110  }
  0x64   : > { %909 = vrot.lane.b32.xlu0 %v6653_v1, %s6844_s29  ;;  %856 = vrot.lane.b32.xlu1 %v7036_v3, %s7648_s15  ;;  %s6852_s29 = smov 51  }
  0x68   : > { %907 = vrot.lane.b32.xlu0 %v7036_v3, %s7644_s19  ;;  %963 = vrot.lane.b32.xlu1 %v7036_v3, %s6838_s21  ;;  %s6849_s19 = smov 21  }
  0x6c   : > { %1011 = vrot.lane.b32.xlu0 %v7036_v3, %s6839_s22  ;;  %1109 = vrot.lane.b32.xlu1 %v6653_v1, %s6845_s17  ;;  %s6851_s17 = smov 41  }
  0x70   : > { %1059 = vrot.lane.b32.xlu0 %v7036_v3, %s6841_s16  ;;  %1107 = vrot.lane.b32.xlu1 %v7036_v3, %s6842_s18 }
  0x74   : > { %384 = vperm.xlu1 %6652, %v322_v4   ;;  %389 = vperm.xlu0 %6651, %v323_v5  }
  0xba   : > { %v397_v7 = vpop.permute.xlu0 %396  ;;  %v448_v8 = vpop.permute.xlu1 %447 }
  0xbb   : > { %6109 = vmatpush3.bf16.msra.mxu1 %v397_v7  ;;  %6115 = vmatpush3.bf16.msra.mxu0 %v448_v8 }
  0xbc   : > { %6120 = vmatprep.subr.bf16.mxu1 %v6829_v0  ;;  %6126 = vmatprep.subr.bf16.mxu0 %v6829_v0 }
  0xbe   : > { %v395_v9 = vpop.permute.xlu0 %394  ;;  %v499_v10 = vpop.permute.xlu1 %498 }
  0xbf   : > { %6111 = vmatmul.mubr.msk.bf16.vlgmr.msra.gmra.mxu1 %vm337_vm1, %v395_v9 }
  0xc0   : > { %6121 = vmatpush3.bf16.msra.mxu1 %v499_v10  ;;  %6122 = vmatprep.mubr.msk.bf16.mxu1 %vm6830_vm0, %v6829_v0 }
  0xc1   : > { %6132 = vmatprep.subr.bf16.mxu1 %v6829_v0 }
  0xc2   : > { %v446_v11 = vpop.permute.xlu0 %445  ;;  %v497_v12 = vpop.permute.xlu1 %496 }
  0xc3   : > { %6117 = vmatmul.mubr.msk.bf16.vlgmr.msra.gmra.mxu0 %vm337_vm1, %v446_v11 }
  0xc4   : > { %6127 = vmatpush3.bf16.msra.mxu0 %v397_v7  ;;  %6128 = vmatprep.mubr.msk.bf16.mxu0 %vm6830_vm0, %v6829_v0 }
  0xc5   : > { %6138 = vmatprep.subr.bf16.mxu0 %v6829_v0 }
  0xc6   : > { %v603_v13 = vpop.permute.xlu0 %602  ;;  %v553_v14 = vpop.permute.xlu1 %552 }
  0xc7   : > { %6123 = vmatmul.mubr.msk.bf16.vlgmr.msra.gmra.mxu1 %vm337_vm1, %v497_v12 }
  0xc8   : > { %6133 = vmatpush3.bf16.msra.mxu1 %v603_v13  ;;  %6134 = vmatprep.mubr.msk.bf16.mxu1 %vm6830_vm0, %v6829_v0 }
  0xc9   : > { %6144 = vmatprep.subr.bf16.mxu1 %v6829_v0 }
  0xca   : > { %v601_v15 = vpop.permute.xlu0 %600  ;;  %v702_v16 = vpop.permute.xlu1 %701 }
  0xcb   : > { %6129 = vmatmul.mubr.msk.bf16.vlgmr.msra.gmra.mxu0 %vm337_vm1, %v553_v14 }
  0xcc   : > { %6139 = vmatpush3.bf16.msra.mxu0 %v499_v10  ;;  %6140 = vmatprep.mubr.msk.bf16.mxu0 %vm6830_vm0, %v6829_v0 }
  0xcd   : > { %6150 = vmatprep.subr.bf16.mxu0 %v6829_v0 }
  0xce   : > { %v652_v17 = vpop.permute.xlu0 %651  ;;  %v700_v18 = vpop.permute.xlu1 %699 }
  0xcf   : > { %6135 = vmatmul.mubr.msk.bf16.vlgmr.msra.gmra.mxu1 %vm337_vm1, %v601_v15 }
  0xd0   : > { %6145 = vmatpush3.bf16.msra.mxu1 %v702_v16  ;;  %6146 = vmatprep.mubr.msk.bf16.mxu1 %vm6830_vm0, %v6829_v0 }
  0xd1   : > { %6156 = vmatprep.subr.bf16.mxu1 %v6829_v0 }
  0xd2   : > { %v809_v19 = vpop.permute.xlu0 %808  ;;  %v859_v20 = vpop.permute.xlu1 %858 }
  0xd3   : > { %6141 = vmatmul.mubr.msk.bf16.vlgmr.msra.gmra.mxu0 %vm337_vm1, %v652_v17 }
  0xd4   : > { %6151 = vmatpush3.bf16.msra.mxu0 %v448_v8  ;;  %6152 = vmatprep.mubr.msk.bf16.mxu0 %vm6830_vm0, %v6829_v0 }
  0xd5   : > { %6162 = vmatprep.subr.bf16.mxu0 %v6829_v0 }
  0xd6   : > { %v910_v21 = vpop.permute.xlu0 %909  ;;  %v857_v22 = vpop.permute.xlu1 %856 }
  0xd7   : > { %6147 = vmatmul.mubr.msk.bf16.vlgmr.msra.gmra.mxu1 %vm337_vm1, %v700_v18 }
  0xd8   : > { %6157 = vmatpush3.bf16.msra.mxu1 %v499_v10  ;;  %6158 = vmatprep.mubr.msk.bf16.mxu1 %vm6830_vm0, %v6829_v0 }
  0xd9   : > { %6168 = vmatprep.subr.bf16.mxu1 %v6829_v0 }
  0xda   : > { %v908_v23 = vpop.permute.xlu0 %907  ;;  %v964_v24 = vpop.permute.xlu1 %963 }
  0xdb   : > { %6153 = vmatmul.mubr.msk.bf16.vlgmr.msra.gmra.mxu0 %vm337_vm1, %v7036_v3 }
  0xdc   : > { %6163 = vmatpush3.bf16.msra.mxu0 %v859_v20  ;;  %6164 = vmatprep.mubr.msk.bf16.mxu0 %vm6830_vm0, %v6829_v0 }
  0xdd   : > { %6174 = vmatprep.subr.bf16.mxu0 %v6829_v0 }
  0xde   : > { %v1012_v25 = vpop.permute.xlu0 %1011  ;;  %v1110_v26 = vpop.permute.xlu1 %1109 }
  0xdf   : > { %6159 = vmatmul.mubr.msk.bf16.vlgmr.msra.gmra.mxu1 %vm337_vm1, %v809_v19 }
  0xe0   : > { %6169 = vmatpush3.bf16.msra.mxu1 %v910_v21  ;;  %6170 = vmatprep.mubr.msk.bf16.mxu1 %vm6830_vm0, %v6829_v0 }
  0xe1   : > { %6180 = vmatprep.subr.bf16.mxu1 %v6829_v0 }
  0xe2   : > { %v1060_v27 = vpop.permute.xlu0 %1059  ;;  %v1108_v28 = vpop.permute.xlu1 %1107 }
  0xe3   : > { %6165 = vmatmul.mubr.msk.bf16.vlgmr.msra.gmra.mxu0 %vm337_vm1, %v857_v22 }
  0xe4   : > { %6175 = vmatpush3.bf16.msra.mxu0 %v499_v10  ;;  %6176 = vmatprep.mubr.msk.bf16.mxu0 %vm6830_vm0, %v6829_v0 }
  0xe5   : > { %6186 = vmatprep.subr.bf16.mxu0 %v6829_v0 }
  0xe7   : > { %6171 = vmatmul.mubr.msk.bf16.vlgmr.msra.gmra.mxu1 %vm337_vm1, %v908_v23 }
  0xe8   : > { %6181 = vmatpush3.bf16.msra.mxu1 %v702_v16  ;;  %6182 = vmatprep.mubr.msk.bf16.mxu1 %vm6830_vm0, %v6829_v0 }
  0xe9   : > { %6192 = vmatprep.subr.bf16.mxu1 %v6829_v0 }
  0xeb   : > { %6177 = vmatmul.mubr.msk.bf16.vlgmr.msra.gmra.mxu0 %vm337_vm1, %v964_v24 }
  0xec   : > { %6187 = vmatpush3.bf16.msra.mxu0 %v910_v21  ;;  %6188 = vmatprep.mubr.msk.bf16.mxu0 %vm6830_vm0, %v6829_v0 }
  0xed   : > { %6198 = vmatprep.subr.mxu0 %v6829_v0 }
  0xef   : > { %6183 = vmatmul.mubr.msk.bf16.vlgmr.msra.gmra.mxu1 %vm337_vm1, %v1012_v25  ;;  %v7130_v37 = vpop.permute.xlu0 %389  ;;  %v7133_v61 = vpop.permute.xlu1 %384 }
  0xf0   : > { %6193 = vmatpush3.bf16.msra.mxu1 %v1110_v26  ;;  %6194 = vmatprep.mubr.msk.bf16.mxu1 %vm6830_vm0, %v6829_v0 }
  0xf1   : > { %6203 = vmatprep.subr.mxu1 %v6829_v0 }
  0xf3   : > { %6189 = vmatmul.mubr.msk.bf16.vlgmr.msra.gmra.mxu0 %vm337_vm1, %v1060_v27 }
  0xf4   : > { %6200 = vmatprep.mubr.msk.f32.mxu0 %vm6830_vm0, %v6829_v0  ;;  %6199 = vmatpush3.msk.msra.mxu0 %vm1172_vm3, %v7125_v34 }
  0xf5   : > { %6208 = vmatprep.subr.mxu0 %v6829_v0 }
  0xf7   : > { %6195 = vmatmul.mubr.msk.bf16.vlgmr.msra.gmra.mxu1 %vm337_vm1, %v1108_v28  ;;  %vm3861_vm1 = vcmask 519552  }
  0xf8   : > { %6205 = vmatprep.mubr.msk.f32.mxu1 %vm6830_vm0, %v6829_v0  ;;  %6204 = vmatpush3.msk.msra.mxu1 %vm1172_vm3, %v7120_v33 }
  0xf9   : > { %6213 = vmatprep.subr.mxu1 %v6829_v0 }
 0x10d   : > { %v375_v29 = vpop.f32.mrf.mxu0 }
 0x10e   : > { %v392_v4 = vadd.f32 %v7133_v61, %v375_v29 }
 0x10f   : > { %v6106_v30 = vpop.f32.mrf.mxu0 }
 0x111   : > { %v378_v31 = vpop.f32.mrf.mxu0 }
 0x112   : > { %v393_v42 = vadd.f32 %v7130_v37, %v378_v31 }
 0x113   : > { %v6107_v32 = vpop.f32.mrf.mxu0 }
 0x17f   : > { %v436_v35 = vpop.f32.mrf.mxu1 }
 0x180   : > { %v443_v11 = vadd.f32 %v436_v35, %v392_v4 }
 0x181   : > { %v6112_v36 = vpop.f32.mrf.mxu1 }
 0x183   : > { %v439_v38 = vpop.f32.mrf.mxu1  ;;  %v487_v39 = vpop.f32.mrf.mxu0 }
 0x184   : > { %v444_v45 = vadd.f32 %v439_v38, %v393_v42  ;;  %v494_v16 = vadd.f32 %v487_v39, %v443_v11 }
 0x185   : > { %v6113_v40 = vpop.f32.mrf.mxu1  ;;  %v6118_v41 = vpop.f32.mrf.mxu0 }
 0x187   : > { %v490_v43 = vpop.f32.mrf.mxu0  ;;  %v538_v44 = vpop.f32.mrf.mxu1 }
 0x188   : > { %v495_v48 = vadd.f32 %v490_v43, %v444_v45  ;;  %v545_v21 = vadd.f32 %v538_v44, %v494_v16 }
 0x189   : > { %v6119_v46 = vpop.f32.mrf.mxu0  ;;  %v6124_v47 = vpop.f32.mrf.mxu1 }
 0x18b   : > { %v541_v49 = vpop.f32.mrf.mxu1  ;;  %v591_v50 = vpop.f32.mrf.mxu0 }
 0x18c   : > { %v546_v51 = vadd.f32 %v541_v49, %v495_v48  ;;  %v598_v35 = vadd.f32 %v591_v50, %v7133_v61 }
 0x18d   : > { %v6125_v52 = vpop.f32.mrf.mxu1  ;;  %v6130_v53 = vpop.f32.mrf.mxu0 }
 0x18e   : > { %v547_v54 = vmul.f32 0.5, %v546_v51 }
 0x18f   : > { %v594_v55 = vpop.f32.mrf.mxu0  ;;  %v642_v56 = vpop.f32.mrf.mxu1 }
 0x190   : > { %6658 = vtanh.f32 %v547_v54  ;;  %v599_v1 = vadd.f32 %v594_v55, %v7130_v37  ;;  %v649_v43 = vadd.f32 %v642_v56, %v598_v35 }
 0x191   : > { %v6131_v57 = vpop.f32.mrf.mxu0  ;;  %v6136_v58 = vpop.f32.mrf.mxu1 }
 0x193   : > { %v645_v59 = vpop.f32.mrf.mxu1  ;;  %v690_v60 = vpop.f32.mrf.mxu0 }
 0x194   : > { %v650_v5 = vadd.f32 %v645_v59, %v599_v1  ;;  %v697_v48 = vadd.f32 %v690_v60, %v649_v43 }
 0x195   : > { %v6137_v62 = vpop.f32.mrf.mxu1  ;;  %v6142_v63 = vpop.f32.mrf.mxu0 }
 0x197   : > { %v693_v2 = vpop.f32.mrf.mxu0  ;;  %v741_v3 = vpop.f32.mrf.mxu1 }
 0x198   : > { %v698_v8 = vadd.f32 %v693_v2, %v650_v5  ;;  %v748_v54 = vadd.f32 %v741_v3, %v697_v48 }
 0x199   : > { %v6143_v6 = vpop.f32.mrf.mxu0  ;;  %v6148_v7 = vpop.f32.mrf.mxu1 }
 0x19b   : > { %v744_v9 = vpop.f32.mrf.mxu1  ;;  %v7137_v10 = vpop.f32.mrf.mxu0 }
 0x19c   : > { %v749_v12 = vadd.f32 %v744_v9, %v698_v8  ;;  %v806_v3 = vadd.f32 %v7137_v10, %v7133_v61 }
 0x19d   : > { %v6659_v13 = vpop.eup %6658  ;;  %v6149_v14 = vpop.f32.mrf.mxu1 }
 0x19e   : > { %v6154_v15 = vpop.f32.mrf.mxu0  ;;  %v549_v17 = vmul.f32 0.5, %v6659_v13  ;;  %v750_v18 = vmul.f32 0.5, %v749_v12 }
 0x19f   : > { %v847_v20 = vpop.f32.mrf.mxu1 }
 0x1a0   : > { %v802_v19 = vpop.f32.mrf.mxu0  ;;  %v550_v22 = vadd.f32 0.5, %v549_v17  ;;  %6660 = vtanh.f32 %v750_v18  ;;  %v854_v9 = vadd.f32 %v847_v20, %v806_v3 }
 0x1a1   : > { %v6160_v24 = vpop.f32.mrf.mxu1  ;;  %v807_v30 = vadd.f32 %v802_v19, %v7130_v37 }
 0x1a2   : > { %v6155_v23 = vpop.f32.mrf.mxu0  ;;  %v7139_v25 = vmul.f32 %v550_v22, %v545_v21 }
 0x1a3   : > { %v850_v26 = vpop.f32.mrf.mxu1 }
 0x1a4   : > { %v898_v27 = vpop.f32.mrf.mxu0  ;;  %1560 = vrot.lane.b32.xlu0 %v7139_v25, %s6832_s9  ;;  %6206 = vmatmul.mubr.msk.f32.vlgmr.msra.gmra.mxu1 %vm1168_vm4, %v7139_v25  ;;  %v855_v36 = vadd.f32 %v850_v26, %v807_v30 }
 0x1a5   : > { %v6161_v28 = vpop.f32.mrf.mxu1  ;;  %6214 = vmatpush3.msk.msra.mxu1 %vm1172_vm3, %v7120_v33  ;;  %6215 = vmatprep.mubr.msk.f32.mxu1 %vm6830_vm0, %v6829_v0  ;;  %v905_v14 = vadd.f32 %v898_v27, %v854_v9 }
 0x1a6   : > { %v6166_v29 = vpop.f32.mrf.mxu0  ;;  %6223 = vmatprep.subr.mxu1 %v6829_v0 }
 0x1a7   : > { %v949_v32 = vpop.f32.mrf.mxu1 }
 0x1a8   : > { %v901_v31 = vpop.f32.mrf.mxu0 }
 0x1a9   : > { %v6172_v39 = vpop.f32.mrf.mxu1  ;;  %v906_v40 = vadd.f32 %v901_v31, %v855_v36 }
 0x1aa   : > { %v6167_v38 = vpop.f32.mrf.mxu0 }
 0x1ab   : > { %v952_v41 = vpop.f32.mrf.mxu1 }
 0x1ac   : > { %v1002_v42 = vpop.f32.mrf.mxu0  ;;  %v957_v44 = vadd.f32 %v952_v41, %v906_v40 }
 0x1ad   : > { %v6661_v45 = vpop.eup %6660  ;;  %v6173_v46 = vpop.f32.mrf.mxu1  ;;  %v1009_v10 = vadd.f32 %v1002_v42, %v7133_v61 }
 0x1ae   : > { %v6178_v47 = vpop.f32.mrf.mxu0  ;;  %v752_v49 = vmul.f32 0.5, %v6661_v45  ;;  %v958_v51 = vmul.f32 0.5, %v957_v44 }
 0x1af   : > { %v1050_v53 = vpop.f32.mrf.mxu1 }
 0x1b0   : > { %v1005_v52 = vpop.f32.mrf.mxu0  ;;  %v753_v55 = vadd.f32 0.5, %v752_v49  ;;  %6662 = vtanh.f32 %v958_v51  ;;  %v1057_v19 = vadd.f32 %v1050_v53, %v1009_v10 }
 0x1b1   : > { %v6184_v57 = vpop.f32.mrf.mxu1  ;;  %v1010_v60 = vadd.f32 %v1005_v52, %v7130_v37  ;;  %v956_v37 = vadd.f32 %v949_v32, %v905_v14 }
 0x1b2   : > { %v6179_v50 = vpop.f32.mrf.mxu0  ;;  %v754_v58 = vmul.f32 %v753_v55, %v748_v54 }
 0x1b3   : > { %v1053_v59 = vpop.f32.mrf.mxu1 }
 0x1b4   : > { %v1098_v62 = vpop.f32.mrf.mxu0  ;;  %1486 = vrot.lane.b32.xlu1 %v754_v58, %s6832_s9  ;;  %6201 = vmatmul.mubr.msk.f32.vlgmr.msra.gmra.mxu0 %vm1168_vm4, %v754_v58  ;;  %v1058_v4 = vadd.f32 %v1053_v59, %v1010_v60 }
 0x1b5   : > { %v6185_v56 = vpop.f32.mrf.mxu1  ;;  %6209 = vmatpush3.msk.msra.mxu0 %vm1172_vm3, %v7125_v34  ;;  %6210 = vmatprep.mubr.msk.f32.mxu0 %vm6830_vm0, %v6829_v0  ;;  %v1105_v21 = vadd.f32 %v1098_v62, %v1057_v19 }
 0x1b6   : > { %v6190_v63 = vpop.f32.mrf.mxu0  ;;  %6218 = vmatprep.subr.mxu0 %v6829_v0 }
 0x1b7   : > { %v1149_v2 = vpop.f32.mrf.mxu1 }
 0x1b8   : > { %v1101_v1 = vpop.f32.mrf.mxu0  ;;  %v1156_v23 = vadd.f32 %v1149_v2, %v1105_v21 }
 0x1b9   : > { %v6196_v6 = vpop.f32.mrf.mxu1  ;;  %v1106_v7 = vadd.f32 %v1101_v1, %v1058_v4 }
 0x1ba   : > { %v6191_v5 = vpop.f32.mrf.mxu0 }
 0x1bb   : > { %v1152_v8 = vpop.f32.mrf.mxu1 }
 0x1bc   : > { %v1157_v11 = vadd.f32 %v1152_v8, %v1106_v7 }
 0x1bd   : > { %v6663_v12 = vpop.eup %6662  ;;  %v6197_v13 = vpop.f32.mrf.mxu1 }
 0x1be   : > { %v960_v15 = vmul.f32 0.5, %v6663_v12  ;;  %v1158_v16 = vmul.f32 0.5, %v1157_v11 }
 0x1c0   : > { %v961_v17 = vadd.f32 0.5, %v960_v15  ;;  %6664 = vtanh.f32 %v1158_v16 }
 0x1c2   : > { %v962_v18 = vmul.f32 %v961_v17, %v956_v37 }
 0x1c4   : > { %1717 = vrot.lane.b32.xlu0 %v962_v18, %s6832_s9  ;;  %6216 = vmatmul.mubr.msk.f32.vlgmr.msra.gmra.mxu1 %vm1168_vm4, %v962_v18 }
 0x1c5   : > { %6224 = vmatpush3.msk.msra.mxu1 %vm1172_vm3, %v7120_v33  ;;  %6225 = vmatprep.mubr.msk.f32.mxu1 %vm6830_vm0, %v6829_v0 }
 0x1c6   : > { %6233 = vmatprep.subr.mxu1 %v6829_v0 }
 0x1c8   : > { %1874 = vrot.lane.b32.xlu0 %v7139_v25, %s6843_s23 }
 0x1cc   : > { %2031 = vrot.lane.b32.xlu0 %v962_v18, %s6843_s23 }
 0x1cd   : > { %v6665_v20 = vpop.eup %6664 }
 0x1ce   : > { %v1160_v22 = vmul.f32 0.5, %v6665_v20 }
 0x1d0   : > { %v1161_v24 = vadd.f32 0.5, %v1160_v22  ;;  %2188 = vrot.lane.b32.xlu0 %v7139_v25, %s6847_s14 }
 0x1d2   : > { %v1162_v26 = vmul.f32 %v1161_v24, %v1156_v23  ;;  %v2430_v24 = vld [vmem:[#allocation8] sm:$0xf] }
 0x1d4   : > { %2345 = vrot.lane.b32.xlu0 %v962_v18, %s6847_s14  ;;  %1643 = vrot.lane.b32.xlu1 %v1162_v26, %s6832_s9  ;;  %s6848_s9 = smov 11  }
 0x1d5   : > { %6211 = vmatmul.mubr.msk.f32.vlgmr.msra.gmra.mxu0 %vm1168_vm4, %v1162_v26 }
 0x1d6   : > { %6219 = vmatpush3.msk.msra.mxu0 %vm1172_vm3, %v7125_v34  ;;  %6220 = vmatprep.mubr.msk.f32.mxu0 %vm6830_vm0, %v6829_v0 }
 0x1d7   : > { %6228 = vmatprep.subr.mxu0 %v6829_v0 }
 0x1d8   : > { %1800 = vrot.lane.b32.xlu1 %v754_v58, %s6843_s23 }
 0x1dc   : > { %1957 = vrot.lane.b32.xlu1 %v1162_v26, %s6843_s23 }
 0x1e0   : > { %2114 = vrot.lane.b32.xlu1 %v754_v58, %s6847_s14 }
 0x1e4   : > { %2271 = vrot.lane.b32.xlu1 %v1162_v26, %s6847_s14  ;;  %s6853_s14 = smov 61  }
 0x216   : > { %v1561_v61 = vpop.permute.xlu0 %1560 }
 0x217   : > { %6226 = vmatmul.mubr.msk.f32.vlgmr.msra.gmra.mxu1 %vm1168_vm4, %v1561_v61  ;;  %v5877_v61 = vcombine.low %v2430_v24, %v2430_v24 }
 0x218   : > { %6234 = vmatpush3.msk.msra.mxu1 %vm1172_vm3, %v7120_v33  ;;  %6235 = vmatprep.mubr.msk.f32.mxu1 %vm6830_vm0, %v6829_v0 }
 0x219   : > { %6243 = vmatprep.subr.mxu1 %v6829_v0 }
 0x226   : > { %v1487_v25 = vpop.permute.xlu1 %1486 }
 0x227   : > { %6221 = vmatmul.mubr.msk.f32.vlgmr.msra.gmra.mxu0 %vm1168_vm4, %v1487_v25 }
 0x228   : > { %6229 = vmatpush3.msk.msra.mxu0 %vm1172_vm3, %v7125_v34  ;;  %6230 = vmatprep.mubr.msk.f32.mxu0 %vm6830_vm0, %v6829_v0 }
 0x229   : > { %6238 = vmatprep.subr.mxu0 %v6829_v0 }
 0x236   : > { %v1718_v27 = vpop.permute.xlu0 %1717 }
 0x237   : > { %6236 = vmatmul.mubr.msk.f32.vlgmr.msra.gmra.mxu1 %vm1168_vm4, %v1718_v27 }
 0x238   : > { %6244 = vmatpush3.msk.msra.mxu1 %vm1172_vm3, %v7120_v33  ;;  %6245 = vmatprep.mubr.msk.f32.mxu1 %vm6830_vm0, %v6829_v0 }
 0x239   : > { %6253 = vmatprep.subr.mxu1 %v6829_v0 }
 0x23a   : > { %v1875_v28 = vpop.permute.xlu0 %1874 }
 0x23b   : > { %6246 = vmatmul.mubr.msk.f32.vlgmr.msra.gmra.mxu1 %vm1168_vm4, %v1875_v28 }
 0x23c   : > { %6254 = vmatpush3.msk.msra.mxu1 %vm1172_vm3, %v7120_v33  ;;  %6255 = vmatprep.mubr.msk.f32.mxu1 %vm6830_vm0, %v6829_v0 }
 0x23d   : > { %6263 = vmatprep.subr.mxu1 %v6829_v0 }
 0x23e   : > { %v2032_v29 = vpop.permute.xlu0 %2031 }
 0x23f   : > { %6256 = vmatmul.mubr.msk.f32.vlgmr.msra.gmra.mxu1 %vm1168_vm4, %v2032_v29 }
 0x240   : > { %6264 = vmatpush3.msk.msra.mxu1 %vm1172_vm3, %v7120_v33  ;;  %6265 = vmatprep.mubr.msk.f32.mxu1 %vm6830_vm0, %v6829_v0 }
 0x241   : > { %6273 = vmatprep.subr.mxu1 %v6829_v0 }
 0x242   : > { %v2189_v30 = vpop.permute.xlu0 %2188 }
 0x243   : > { %6266 = vmatmul.mubr.msk.f32.vlgmr.msra.gmra.mxu1 %vm1168_vm4, %v2189_v30 }
 0x244   : > { %6274 = vmatpush3.msk.msra.mxu1 %vm1172_vm3, %v7120_v33  ;;  %6275 = vmatprep.mubr.msk.f32.mxu1 %vm6830_vm0, %v6829_v0 }
 0x245   : > { %6284 = vmatprep.subr.bf16.mxu1 %v6829_v0 }
 0x246   : > { %v2346_v31 = vpop.permute.xlu0 %2345  ;;  %v1644_v32 = vpop.permute.xlu1 %1643 }
 0x247   : > { %6231 = vmatmul.mubr.msk.f32.vlgmr.msra.gmra.mxu0 %vm1168_vm4, %v1644_v32  ;;  %6276 = vmatmul.mubr.msk.f32.vlgmr.msra.gmra.mxu1 %vm1168_vm4, %v2346_v31 }
 0x248   : > { %6239 = vmatpush3.msk.msra.mxu0 %vm1172_vm3, %v7125_v34  ;;  %6240 = vmatprep.mubr.msk.f32.mxu0 %vm6830_vm0, %v6829_v0 }
 0x249   : > { %6248 = vmatprep.subr.mxu0 %v6829_v0  ;;  %6286 = vmatprep.mubr.msk.bf16.mxu1 %vm6830_vm0, %v6829_v0 }
 0x24a   : > { %v1801_v33 = vpop.permute.xlu1 %1800 }
 0x24b   : > { %6241 = vmatmul.mubr.msk.f32.vlgmr.msra.gmra.mxu0 %vm1168_vm4, %v1801_v33 }
 0x24c   : > { %6249 = vmatpush3.msk.msra.mxu0 %vm1172_vm3, %v7125_v34  ;;  %6250 = vmatprep.mubr.msk.f32.mxu0 %vm6830_vm0, %v6829_v0 }
 0x24d   : > { %6258 = vmatprep.subr.mxu0 %v6829_v0 }
 0x24e   : > { %v1958_v35 = vpop.permute.xlu1 %1957 }
 0x24f   : > { %6251 = vmatmul.mubr.msk.f32.vlgmr.msra.gmra.mxu0 %vm1168_vm4, %v1958_v35 }
 0x250   : > { %6259 = vmatpush3.msk.msra.mxu0 %vm1172_vm3, %v7125_v34  ;;  %6260 = vmatprep.mubr.msk.f32.mxu0 %vm6830_vm0, %v6829_v0 }
 0x251   : > { %6268 = vmatprep.subr.mxu0 %v6829_v0 }
 0x252   : > { %v2115_v36 = vpop.permute.xlu1 %2114 }
 0x253   : > { %6261 = vmatmul.mubr.msk.f32.vlgmr.msra.gmra.mxu0 %vm1168_vm4, %v2115_v36  ;;  %v2429_v36 = vld [vmem:[%s7639_s5] sm:$0xff] }
 0x254   : > { %6269 = vmatpush3.msk.msra.mxu0 %vm1172_vm3, %v7125_v34  ;;  %6270 = vmatprep.mubr.msk.f32.mxu0 %vm6830_vm0, %v6829_v0 }
 0x255   : > { %6278 = vmatprep.subr.bf16.mxu0 %v6829_v0 }
 0x256   : > { %v2272_v38 = vpop.permute.xlu1 %2271 }
 0x257   : > { %6271 = vmatmul.mubr.msk.f32.vlgmr.msra.gmra.mxu0 %vm1168_vm4, %v2272_v38  ;;  %vm4323_vm4 = vcmask 913152  }
 0x258   : > { %6280 = vmatprep.mubr.msk.bf16.mxu0 %vm6830_vm0, %v6829_v0 }
 0x264   : > { %v1318_v39 = vpop.f32.mrf.mxu1 }
 0x266   : > { %v6207_v40 = vpop.f32.mrf.mxu1 }
 0x274   : > { %v1242_v41 = vpop.f32.mrf.mxu0 }
 0x275   : > { %v1319_v42 = vadd.f32 %v1318_v39, %v1242_v41 }
 0x276   : > { %v6202_v43 = vpop.f32.mrf.mxu0 }
 0x277   : > { %v5933_v44 = vpack.c.bf16 %v1319_v42, %v1319_v42 }
 0x279   : > { %1326 = vrot.lane.b32.xlu1 %v5933_v44, %s6848_s9  ;;  %s6854_s9 = smov 71  }
 0x284   : > { %v1473_v34 = vpop.f32.mrf.mxu1 }
 0x286   : > { %v6217_v45 = vpop.f32.mrf.mxu1 }
 0x295   : > { %v1400_v46 = vpop.f32.mrf.mxu0 }
 0x296   : > { %v1474_v47 = vadd.f32 %v1473_v34, %v1400_v46 }
 0x297   : > { %v6212_v48 = vpop.f32.mrf.mxu0 }
 0x298   : > { %v5934_v49 = vpack.c.bf16 %v1474_v47, %v1474_v47 }
 0x29a   : > { %1481 = vrot.lane.b32.xlu0 %v5934_v49, %s6849_s19  ;;  %s6855_s19 = smov 81  }
 0x2d7   : > { %v1630_v51 = vpop.f32.mrf.mxu1 }
 0x2d9   : > { %v6227_v52 = vpop.f32.mrf.mxu1 }
 0x2e7   : > { %v1556_v53 = vpop.f32.mrf.mxu0 }
 0x2e8   : > { %v1631_v54 = vadd.f32 %v1630_v51, %v1556_v53 }
 0x2e9   : > { %v6222_v55 = vpop.f32.mrf.mxu0 }
 0x2ea   : > { %v5935_v50 = vpack.c.bf16 %v1631_v54, %v1631_v54 }
 0x2eb   : > { %v1327_v57 = vpop.permute.xlu1 %1326 }
 0x2ec   : > { %1330 = vst.msk [vmem:[#allocation2] sm:$0xf] %vm1329_vm5, %v1327_v57  ;;  %1638 = vrot.lane.b32.xlu1 %v5935_v50, %s6850_s20  ;;  %s6857_s20 = smov 104   ;;  %vm4477_vm5 = vcmask 1044352  }
 0x2f7   : > { %v1787_v58 = vpop.f32.mrf.mxu1 }
 0x2f9   : > { %v6237_v59 = vpop.f32.mrf.mxu1 }
 0x2fb   : > { %v1944_v62 = vpop.f32.mrf.mxu1 }
 0x2fd   : > { %v6247_v56 = vpop.f32.mrf.mxu1 }
 0x2ff   : > { %v2101_v63 = vpop.f32.mrf.mxu1 }
 0x301   : > { %v6257_v60 = vpop.f32.mrf.mxu1 }
 0x303   : > { %v2258_v1 = vpop.f32.mrf.mxu1 }
 0x305   : > { %v6267_v2 = vpop.f32.mrf.mxu1 }
 0x307   : > { %v1713_v3 = vpop.f32.mrf.mxu0  ;;  %v2415_v4 = vpop.f32.mrf.mxu1 }
 0x308   : > { %v1788_v5 = vadd.f32 %v1787_v58, %v1713_v3 }
 0x309   : > { %v6232_v6 = vpop.f32.mrf.mxu0  ;;  %v6277_v7 = vpop.f32.mrf.mxu1 }
 0x30a   : > { %v5936_v8 = vpack.c.bf16 %v1788_v5, %v1788_v5 }
 0x30b   : > { %v1870_v9 = vpop.f32.mrf.mxu0 }
 0x30c   : > { %v1482_v11 = vpop.permute.xlu0 %1481  ;;  %v1945_v12 = vadd.f32 %v1944_v62, %v1870_v9  ;;  %1795 = vrot.lane.b32.xlu0 %v5936_v8, %s6851_s17  ;;  %s7650_s17 = smov 118  }
 0x30d   : > { %1485 = vst.msk [vmem:[#allocation2] sm:$0xf] %vm1484_vm6, %v1482_v11  ;;  %v6242_v13 = vpop.f32.mrf.mxu0  ;;  %v7342_v11 = vld [vmem:[%s7640_s6] sm:$0xff] }
 0x30e   : > { %v5937_v14 = vpack.c.bf16 %v1945_v12, %v1945_v12  ;;  %v7349_v12 = vld [vmem:[%s7640_s6 + $0x8] sm:$0xff] }
 0x30f   : > { %v2027_v15 = vpop.f32.mrf.mxu0 }
 0x310   : > { %v2102_v16 = vadd.f32 %v2101_v63, %v2027_v15  ;;  %1952 = vrot.lane.b32.xlu1 %v5937_v14, %s6852_s29  ;;  %s7660_s29 = smov 112  }
 0x311   : > { %v6252_v37 = vpop.f32.mrf.mxu0 }
 0x312   : > { %v5938_v17 = vpack.c.bf16 %v2102_v16, %v2102_v16 }
 0x313   : > { %v2184_v18 = vpop.f32.mrf.mxu0 }
 0x314   : > { %v2259_v10 = vadd.f32 %v2258_v1, %v2184_v18  ;;  %2109 = vrot.lane.b32.xlu0 %v5938_v17, %s6853_s14  ;;  %s7661_s14 = smov 126  }
 0x315   : > { %v6262_v19 = vpop.f32.mrf.mxu0 }
 0x316   : > { %v5939_v20 = vpack.c.bf16 %v2259_v10, %v2259_v10 }
 0x317   : > { %v2341_v21 = vpop.f32.mrf.mxu0 }
 0x318   : > { %v2416_v22 = vadd.f32 %v2415_v4, %v2341_v21  ;;  %2266 = vrot.lane.b32.xlu1 %v5939_v20, %s6854_s9  ;;  %s6860_s9 = smov 88  }
 0x319   : > { %v6272_v23 = vpop.f32.mrf.mxu0 }
 0x31a   : > { %v5940_v26 = vpack.c.bf16 %v2416_v22, %v2416_v22 }
 0x31c   : > { %2423 = vrot.lane.b32.xlu0 %v5940_v26, %s6855_s19  ;;  %s6861_s19 = smov 56  }
 0x320   : > { %2487 = vrot.lane.b32.xlu0 %v5877_v61, %s6840_s13  ;;  %s6856_s13 = smov 117  }
 0x35e   : > { %v1639_v25 = vpop.permute.xlu1 %1638 }
 0x35f   : > { %1642 = vst.msk [vmem:[#allocation2] sm:$0xf] %vm1641_vm7, %v1639_v25 }
 0x37e   : > { %v1796_v27 = vpop.permute.xlu0 %1795 }
 0x37f   : > { %1799 = vst.msk [vmem:[#allocation2] sm:$0xf] %vm1798_vm8, %v1796_v27 }
 0x382   : > { %v1953_v28 = vpop.permute.xlu1 %1952 }
 0x383   : > { %1956 = vst.msk [vmem:[#allocation2] sm:$0xf] %vm1955_vm9, %v1953_v28 }
 0x386   : > { %v2110_v29 = vpop.permute.xlu0 %2109 }
 0x387   : > { %2113 = vst.msk [vmem:[#allocation2] sm:$0xf] %vm2112_vm10, %v2110_v29 }
 0x38a   : > { %v2267_v30 = vpop.permute.xlu1 %2266 }
 0x38b   : > { %2270 = vst.msk [vmem:[#allocation2] sm:$0xf] %vm2269_vm11, %v2267_v30 }
 0x38e   : > { %v2424_v31 = vpop.permute.xlu0 %2423 }
 0x38f   : > { %2427 = vst.msk [vmem:[#allocation2] sm:$0xf] %vm2426_vm12, %v2424_v31 }
 0x392   : > { %v2488_v38 = vpop.permute.xlu0 %2487 }
 0x396   : > { %v2428_v32 = vld [vmem:[#allocation2] sm:$0xf] }
 0x397   : > { %v2436_v33 = vsel %vm1172_vm3, %v2428_v32, 0  ;;  %v5878_v35 = vcombine.low %v2428_v32, %v2428_v32 }
 0x398   : > { %6279 = vmatpush3.bf16.msra.mxu0 %v2436_v33 }
 0x399   : > { %2594 = vrot.lane.b32.xlu0 %v5878_v35, %s6856_s13  ;;  %2492 = vrot.lane.b32.xlu1 %v5878_v35, %s6831_s8  ;;  %s6859_s8 = smov 72   ;;  %s7662_s13 = smov 80  }
 0x39a   : > { %6290 = vmatprep.subr.bf16.mxu0 %v6829_v0 }
 0x39b   : > { %6281 = vmatmul.mubr.msk.bf16.vlgmr.msra.gmra.mxu0 %vm2431_vm13, %v2430_v24 }
 0x39c   : > { %6292 = vmatprep.mubr.msk.bf16.mxu0 %vm6830_vm0, %v6829_v0 }
 0x39d   : > { %2592 = vrot.lane.b32.xlu0 %v5877_v61, %s6857_s20  ;;  %2543 = vrot.lane.b32.xlu1 %v5878_v35, %s7650_s17  ;;  %s6862_s20 = smov 107   ;;  %s6864_s17 = smov 108  }
 0x3a1   : > { %2651 = vrot.lane.b32.xlu0 %v5877_v61, %s7648_s15  ;;  %2541 = vrot.lane.b32.xlu1 %v5877_v61, %s7660_s29  ;;  %s6863_s15 = smov 40  }
 0x3a5   : > { %2796 = vrot.lane.b32.xlu0 %v5878_v35, %s6843_s23  ;;  %2699 = vrot.lane.b32.xlu1 %v5878_v35, %s7661_s14  ;;  %s6865_s23 = smov 24   ;;  %s6871_s14 = smov 58  }
 0x3a9   : > { %2794 = vrot.lane.b32.xlu0 %v5877_v61, %s6859_s8  ;;  %2697 = vrot.lane.b32.xlu1 %v5877_v61, %s6860_s9 }
 0x3ad   : > { %2899 = vrot.lane.b32.xlu0 %v5877_v61, %s6861_s19  ;;  %2748 = vrot.lane.b32.xlu1 %v5877_v61, %s7662_s13  ;;  %s6866_s19 = smov 106  }
 0x3b1   : > { %2998 = vrot.lane.b32.xlu0 %v5878_v35, %s6862_s20  ;;  %2853 = vrot.lane.b32.xlu1 %v5877_v61, %s6838_s21  ;;  %s6867_s20 = smov 8  }
 0x3b5   : > { %2996 = vrot.lane.b32.xlu0 %v5877_v61, %s6863_s15  ;;  %2947 = vrot.lane.b32.xlu1 %v5878_v35, %s6864_s17  ;;  %s6869_s15 = smov 78  }
 0x3b9   : > { %3101 = vrot.lane.b32.xlu0 %v5877_v61, %s6865_s23  ;;  %2945 = vrot.lane.b32.xlu1 %v5877_v61, %s6839_s22  ;;  %s6870_s23 = smov 68  }
 0x3bd   : > { %3147 = vrot.lane.b32.xlu0 %v5877_v61, %s6842_s18  ;;  %3055 = vrot.lane.b32.xlu1 %v5877_v61, %s6841_s16 }
 0x3c1   : > { %2480 = vperm.xlu0 %6651, %v2429_v36   ;;  %3195 = vrot.lane.b32.xlu1 %v5878_v35, %s6866_s19  ;;  %s7663_s19 = smov 118  }
 0x3c5   : > { %3193 = vrot.lane.b32.xlu1 %v5877_v61, %s6867_s20  ;;  %s6868_s20 = smov 98  }
 0x40b   : > { %v2493_v39 = vpop.permute.xlu1 %2492  ;;  %v2595_v40 = vpop.permute.xlu0 %2594 }
 0x40c   : > { %v2498_v41 = vsel %vm1172_vm3, %v2493_v39, 0  ;;  %v2600_v44 = vsel %vm1172_vm3, %v2595_v40, 0 }
 0x40d   : > { %6285 = vmatpush3.bf16.msra.mxu1 %v2498_v41 }
 0x40e   : > { %6296 = vmatprep.subr.bf16.mxu1 %v6829_v0 }
 0x40f   : > { %v2544_v42 = vpop.permute.xlu1 %2543  ;;  %v2593_v43 = vpop.permute.xlu0 %2592 }
 0x410   : > { %v2549_v34 = vsel %vm1172_vm3, %v2544_v42, 0  ;;  %6287 = vmatmul.mubr.msk.bf16.vlgmr.msra.gmra.mxu1 %vm2431_vm13, %v2488_v38 }
 0x411   : > { %6291 = vmatpush3.bf16.msra.mxu0 %v2549_v34  ;;  %6297 = vmatpush3.bf16.msra.mxu1 %v2600_v44 }
 0x412   : > { %6302 = vmatprep.subr.bf16.mxu0 %v6829_v0  ;;  %6298 = vmatprep.mubr.msk.bf16.mxu1 %vm6830_vm0, %v6829_v0 }
 0x413   : > { %v2542_v45 = vpop.permute.xlu1 %2541  ;;  %6308 = vmatprep.subr.bf16.mxu1 %v6829_v0  ;;  %v2652_v46 = vpop.permute.xlu0 %2651 }
 0x414   : > { %6293 = vmatmul.mubr.msk.bf16.vlgmr.msra.gmra.mxu0 %vm2431_vm13, %v2542_v45 }
 0x415   : > { %6303 = vmatpush3.bf16.msra.mxu0 %v2498_v41  ;;  %6304 = vmatprep.mubr.msk.bf16.mxu0 %vm6830_vm0, %v6829_v0 }
 0x416   : > { %6314 = vmatprep.subr.bf16.mxu0 %v6829_v0 }
 0x417   : > { %v2700_v47 = vpop.permute.xlu1 %2699  ;;  %v2797_v49 = vpop.permute.xlu0 %2796 }
 0x418   : > { %v2705_v48 = vsel %vm1172_vm3, %v2700_v47, 0  ;;  %6299 = vmatmul.mubr.msk.bf16.vlgmr.msra.gmra.mxu1 %vm2431_vm13, %v2593_v43  ;;  %v2802_v53 = vsel %vm1172_vm3, %v2797_v49, 0 }
 0x419   : > { %6309 = vmatpush3.bf16.msra.mxu1 %v2705_v48  ;;  %6310 = vmatprep.mubr.msk.bf16.mxu1 %vm6830_vm0, %v6829_v0 }
 0x41a   : > { %6320 = vmatprep.subr.bf16.mxu1 %v6829_v0 }
 0x41b   : > { %v2698_v51 = vpop.permute.xlu1 %2697  ;;  %v2795_v54 = vpop.permute.xlu0 %2794 }
 0x41c   : > { %6305 = vmatmul.mubr.msk.bf16.vlgmr.msra.gmra.mxu0 %vm2431_vm13, %v2652_v46 }
 0x41d   : > { %6315 = vmatpush3.bf16.msra.mxu0 %v2600_v44  ;;  %6316 = vmatprep.mubr.msk.bf16.mxu0 %vm6830_vm0, %v6829_v0 }
 0x41e   : > { %6326 = vmatprep.subr.bf16.mxu0 %v6829_v0 }
 0x41f   : > { %v2749_v52 = vpop.permute.xlu1 %2748  ;;  %v2900_v50 = vpop.permute.xlu0 %2899 }
 0x420   : > { %6311 = vmatmul.mubr.msk.bf16.vlgmr.msra.gmra.mxu1 %vm2431_vm13, %v2698_v51 }
 0x421   : > { %6321 = vmatpush3.bf16.msra.mxu1 %v2802_v53  ;;  %6322 = vmatprep.mubr.msk.bf16.mxu1 %vm6830_vm0, %v6829_v0 }
 0x422   : > { %6332 = vmatprep.subr.bf16.mxu1 %v6829_v0 }
 0x423   : > { %v2854_v55 = vpop.permute.xlu1 %2853  ;;  %v2999_v59 = vpop.permute.xlu0 %2998 }
 0x424   : > { %6317 = vmatmul.mubr.msk.bf16.vlgmr.msra.gmra.mxu0 %vm2431_vm13, %v2749_v52  ;;  %v3004_v62 = vsel %vm1172_vm3, %v2999_v59, 0 }
 0x425   : > { %6327 = vmatpush3.bf16.msra.mxu0 %v2549_v34  ;;  %6328 = vmatprep.mubr.msk.bf16.mxu0 %vm6830_vm0, %v6829_v0 }
 0x426   : > { %6338 = vmatprep.subr.bf16.mxu0 %v6829_v0 }
 0x427   : > { %v2948_v57 = vpop.permute.xlu1 %2947  ;;  %v2997_v60 = vpop.permute.xlu0 %2996 }
 0x428   : > { %6323 = vmatmul.mubr.msk.bf16.vlgmr.msra.gmra.mxu1 %vm2431_vm13, %v2795_v54  ;;  %v2953_v58 = vsel %vm1172_vm3, %v2948_v57, 0 }
 0x429   : > { %6333 = vmatpush3.bf16.msra.mxu1 %v2600_v44  ;;  %6334 = vmatprep.mubr.msk.bf16.mxu1 %vm6830_vm0, %v6829_v0 }
 0x42a   : > { %6344 = vmatprep.subr.bf16.mxu1 %v6829_v0 }
 0x42b   : > { %v2946_v56 = vpop.permute.xlu1 %2945  ;;  %v3102_v2 = vpop.permute.xlu0 %3101 }
 0x42c   : > { %6329 = vmatmul.mubr.msk.bf16.vlgmr.msra.gmra.mxu0 %vm2431_vm13, %v2854_v55 }
 0x42d   : > { %6339 = vmatpush3.bf16.msra.mxu0 %v2953_v58  ;;  %6340 = vmatprep.mubr.msk.bf16.mxu0 %vm6830_vm0, %v6829_v0 }
 0x42e   : > { %6350 = vmatprep.subr.bf16.mxu0 %v6829_v0 }
 0x42f   : > { %v3056_v63 = vpop.permute.xlu1 %3055  ;;  %v3148_v4 = vpop.permute.xlu0 %3147 }
 0x430   : > { %6335 = vmatmul.mubr.msk.bf16.vlgmr.msra.gmra.mxu1 %vm2431_vm13, %v2900_v50 }
 0x431   : > { %6345 = vmatpush3.bf16.msra.mxu1 %v3004_v62  ;;  %6346 = vmatprep.mubr.msk.bf16.mxu1 %vm6830_vm0, %v6829_v0 }
 0x432   : > { %6356 = vmatprep.subr.bf16.mxu1 %v6829_v0 }
 0x433   : > { %v3196_v1 = vpop.permute.xlu1 %3195 }
 0x434   : > { %6341 = vmatmul.mubr.msk.bf16.vlgmr.msra.gmra.mxu0 %vm2431_vm13, %v2946_v56  ;;  %v3201_v3 = vsel %vm1172_vm3, %v3196_v1, 0  ;;  %vm4169_vm3 = vcmask 781952  }
 0x435   : > { %6351 = vmatpush3.bf16.msra.mxu0 %v2600_v44  ;;  %6352 = vmatprep.mubr.msk.bf16.mxu0 %vm6830_vm0, %v6829_v0 }
 0x436   : > { %6362 = vmatprep.subr.bf16.mxu0 %v6829_v0 }
 0x437   : > { %v3194_v5 = vpop.permute.xlu1 %3193 }
 0x438   : > { %6347 = vmatmul.mubr.msk.bf16.vlgmr.msra.gmra.mxu1 %vm2431_vm13, %v2997_v60 }
 0x439   : > { %6357 = vmatpush3.bf16.msra.mxu1 %v2802_v53  ;;  %6358 = vmatprep.mubr.msk.bf16.mxu1 %vm6830_vm0, %v6829_v0 }
 0x43a   : > { %6368 = vmatprep.subr.bf16.mxu1 %v6829_v0 }
 0x43c   : > { %6353 = vmatmul.mubr.msk.bf16.vlgmr.msra.gmra.mxu0 %vm2431_vm13, %v3056_v63  ;;  %v7353_v14 = vpop.permute.xlu0 %2480 }
 0x43d   : > { %6363 = vmatpush3.bf16.msra.mxu0 %v3004_v62  ;;  %6364 = vmatprep.mubr.msk.bf16.mxu0 %vm6830_vm0, %v6829_v0 }
 0x43e   : > { %6374 = vmatprep.subr.mxu0 %v6829_v0 }
 0x440   : > { %6359 = vmatmul.mubr.msk.bf16.vlgmr.msra.gmra.mxu1 %vm2431_vm13, %v3102_v2 }
 0x441   : > { %6369 = vmatpush3.bf16.msra.mxu1 %v3201_v3  ;;  %6370 = vmatprep.mubr.msk.bf16.mxu1 %vm6830_vm0, %v6829_v0 }
 0x442   : > { %6379 = vmatprep.subr.mxu1 %v6829_v0 }
 0x444   : > { %6365 = vmatmul.mubr.msk.bf16.vlgmr.msra.gmra.mxu0 %vm2431_vm13, %v3148_v4 }
 0x445   : > { %6376 = vmatprep.mubr.msk.f32.mxu0 %vm6830_vm0, %v6829_v0  ;;  %6375 = vmatpush3.msra.mxu0 %v7349_v12 }
 0x446   : > { %6384 = vmatprep.subr.mxu0 %v6829_v0 }
 0x448   : > { %6371 = vmatmul.mubr.msk.bf16.vlgmr.msra.gmra.mxu1 %vm2431_vm13, %v3194_v5 }
 0x449   : > { %6381 = vmatprep.mubr.msk.f32.mxu1 %vm6830_vm0, %v6829_v0  ;;  %6380 = vmatpush3.msra.mxu1 %v7342_v11 }
 0x44a   : > { %6389 = vmatprep.subr.mxu1 %v6829_v0 }
 0x45b   : > { %v2472_v6 = vpop.f32.mrf.mxu0 }
 0x45c   : > { %v2483_v16 = vadd.f32 %v7353_v14, %v2472_v6 }
 0x45d   : > { %v6282_v7 = vpop.f32.mrf.mxu0 }
 0x45f   : > { %v2475_v8 = vpop.f32.mrf.mxu0 }
 0x461   : > { %v6283_v9 = vpop.f32.mrf.mxu0 }
 0x4d0   : > { %v2534_v13 = vpop.f32.mrf.mxu1 }
 0x4d1   : > { %v2540_v18 = vadd.f32 %v2534_v13, %v2483_v16 }
 0x4d2   : > { %v6288_v15 = vpop.f32.mrf.mxu1 }
 0x4d4   : > { %v2537_v37 = vpop.f32.mrf.mxu1  ;;  %v2585_v17 = vpop.f32.mrf.mxu0 }
 0x4d5   : > { %v2591_v20 = vadd.f32 %v2585_v17, %v2540_v18 }
 0x4d6   : > { %v6289_v10 = vpop.f32.mrf.mxu1  ;;  %v6294_v19 = vpop.f32.mrf.mxu0 }
 0x4d8   : > { %v2588_v21 = vpop.f32.mrf.mxu0  ;;  %v2636_v22 = vpop.f32.mrf.mxu1 }
 0x4d9   : > { %v2642_v23 = vadd.f32 %v2636_v22, %v2591_v20 }
 0x4da   : > { %v6295_v24 = vpop.f32.mrf.mxu0  ;;  %v6300_v26 = vpop.f32.mrf.mxu1 }
 0x4db   : > { %v2643_v61 = vmul.f32 0.5, %v2642_v23 }
 0x4dc   : > { %v2639_v25 = vpop.f32.mrf.mxu1  ;;  %v2690_v27 = vpop.f32.mrf.mxu0 }
 0x4dd   : > { %6666 = vtanh.f32 %v2643_v61  ;;  %v2696_v35 = vadd.f32 %v2690_v27, %v7353_v14 }
 0x4de   : > { %v6301_v28 = vpop.f32.mrf.mxu1  ;;  %v6306_v29 = vpop.f32.mrf.mxu0 }
 0x4e0   : > { %v2693_v30 = vpop.f32.mrf.mxu0  ;;  %v2741_v31 = vpop.f32.mrf.mxu1 }
 0x4e1   : > { %v2747_v39 = vadd.f32 %v2741_v31, %v2696_v35 }
 0x4e2   : > { %v6307_v32 = vpop.f32.mrf.mxu0  ;;  %v6312_v33 = vpop.f32.mrf.mxu1 }
 0x4e4   : > { %v2744_v36 = vpop.f32.mrf.mxu1  ;;  %v2787_v38 = vpop.f32.mrf.mxu0 }
 0x4e5   : > { %v2793_v42 = vadd.f32 %v2787_v38, %v2747_v39 }
 0x4e6   : > { %v6313_v40 = vpop.f32.mrf.mxu1  ;;  %v6318_v41 = vpop.f32.mrf.mxu0 }
 0x4e8   : > { %v2790_v43 = vpop.f32.mrf.mxu0  ;;  %v2838_v44 = vpop.f32.mrf.mxu1 }
 0x4e9   : > { %v2844_v34 = vadd.f32 %v2838_v44, %v2793_v42 }
 0x4ea   : > { %v6667_v45 = vpop.eup %6666  ;;  %v6319_v46 = vpop.f32.mrf.mxu0 }
 0x4eb   : > { %v6324_v47 = vpop.f32.mrf.mxu1  ;;  %v2645_v48 = vmul.f32 0.5, %v6667_v45  ;;  %v2845_v49 = vmul.f32 0.5, %v2844_v34 }
 0x4ec   : > { %v2892_v52 = vpop.f32.mrf.mxu0 }
 0x4ed   : > { %v2841_v51 = vpop.f32.mrf.mxu1  ;;  %v2646_v53 = vadd.f32 0.5, %v2645_v48  ;;  %6668 = vtanh.f32 %v2845_v49  ;;  %v2898_v63 = vadd.f32 %v2892_v52, %v7353_v14 }
 0x4ee   : > { %v6330_v55 = vpop.f32.mrf.mxu0 }
 0x4ef   : > { %v6325_v54 = vpop.f32.mrf.mxu1  ;;  %v2648_v50 = vrot.slane %v2646_v53, 4 }
 0x4f0   : > { %v2895_v57 = vpop.f32.mrf.mxu0 }
 0x4f1   : > { %v2938_v58 = vpop.f32.mrf.mxu1  ;;  %v7357_v59 = vmul.f32 %v2648_v50, %v2642_v23 }
 0x4f2   : > { %v6331_v62 = vpop.f32.mrf.mxu0  ;;  %v2944_v2 = vadd.f32 %v2938_v58, %v2898_v63 }
 0x4f3   : > { %v6336_v56 = vpop.f32.mrf.mxu1  ;;  %3629 = vrot.lane.b32.xlu0 %v7357_v59, %s7663_s19  ;;  %6382 = vmatmul.mubr.msk.f32.vlgmr.msra.gmra.mxu1 %vm2431_vm13, %v7357_v59 }
 0x4f4   : > { %v2989_v1 = vpop.f32.mrf.mxu0  ;;  %6390 = vmatpush3.msra.mxu1 %v7342_v11  ;;  %6391 = vmatprep.mubr.msk.f32.mxu1 %vm6830_vm0, %v6829_v0 }
 0x4f5   : > { %v2941_v60 = vpop.f32.mrf.mxu1  ;;  %6399 = vmatprep.subr.mxu1 %v6829_v0  ;;  %v2995_v5 = vadd.f32 %v2989_v1, %v2944_v2 }
 0x4f6   : > { %v6342_v4 = vpop.f32.mrf.mxu0 }
 0x4f7   : > { %v6337_v3 = vpop.f32.mrf.mxu1 }
 0x4f8   : > { %v2992_v6 = vpop.f32.mrf.mxu0 }
 0x4f9   : > { %v3040_v7 = vpop.f32.mrf.mxu1 }
 0x4fa   : > { %v3046_v8 = vadd.f32 %v3040_v7, %v2995_v5  ;;  %v6669_v9 = vpop.eup %6668  ;;  %v6343_v13 = vpop.f32.mrf.mxu0 }
 0x4fb   : > { %v6348_v15 = vpop.f32.mrf.mxu1  ;;  %v2847_v16 = vmul.f32 0.5, %v6669_v9 }
 0x4fc   : > { %v3047_v37 = vmul.f32 0.5, %v3046_v8  ;;  %v3094_v18 = vpop.f32.mrf.mxu0 }
 0x4fd   : > { %v3043_v17 = vpop.f32.mrf.mxu1  ;;  %v2848_v10 = vadd.f32 0.5, %v2847_v16  ;;  %v3100_v25 = vadd.f32 %v3094_v18, %v7353_v14 }
 0x4fe   : > { %6670 = vtanh.f32 %v3047_v37  ;;  %v6354_v20 = vpop.f32.mrf.mxu0 }
 0x4ff   : > { %v6349_v19 = vpop.f32.mrf.mxu1  ;;  %v2850_v21 = vrot.slane %v2848_v10, 4 }
 0x500   : > { %v3097_v22 = vpop.f32.mrf.mxu0 }
 0x501   : > { %v3140_v23 = vpop.f32.mrf.mxu1  ;;  %v7368_v24 = vmul.f32 %v2850_v21, %v2844_v34 }
 0x502   : > { %v6355_v26 = vpop.f32.mrf.mxu0  ;;  %v3146_v29 = vadd.f32 %v3140_v23, %v3100_v25 }
 0x503   : > { %v6360_v61 = vpop.f32.mrf.mxu1  ;;  %3555 = vrot.lane.b32.xlu1 %v7368_v24, %s7663_s19  ;;  %6377 = vmatmul.mubr.msk.f32.vlgmr.msra.gmra.mxu0 %vm2431_vm13, %v7368_v24 }
 0x504   : > { %v3186_v28 = vpop.f32.mrf.mxu0  ;;  %6385 = vmatpush3.msra.mxu0 %v7349_v12  ;;  %6386 = vmatprep.mubr.msk.f32.mxu0 %vm6830_vm0, %v6829_v0 }
 0x505   : > { %v3143_v27 = vpop.f32.mrf.mxu1  ;;  %6394 = vmatprep.subr.mxu0 %v6829_v0  ;;  %v3192_v32 = vadd.f32 %v3186_v28, %v3146_v29 }
 0x506   : > { %v6366_v31 = vpop.f32.mrf.mxu0 }
 0x507   : > { %v6361_v30 = vpop.f32.mrf.mxu1 }
 0x508   : > { %v3189_v14 = vpop.f32.mrf.mxu0 }
 0x509   : > { %v3237_v33 = vpop.f32.mrf.mxu1 }
 0x50a   : > { %v3243_v35 = vadd.f32 %v3237_v33, %v3192_v32  ;;  %v6367_v38 = vpop.f32.mrf.mxu0 }
 0x50b   : > { %v6671_v36 = vpop.eup %6670  ;;  %v6372_v39 = vpop.f32.mrf.mxu1 }
 0x50c   : > { %v3049_v40 = vmul.f32 0.5, %v6671_v36  ;;  %v3244_v41 = vmul.f32 0.5, %v3243_v35 }
 0x50d   : > { %v3240_v42 = vpop.f32.mrf.mxu1 }
 0x50e   : > { %v3050_v43 = vadd.f32 0.5, %v3049_v40  ;;  %6672 = vtanh.f32 %v3244_v41 }
 0x50f   : > { %v6373_v44 = vpop.f32.mrf.mxu1 }
 0x510   : > { %v3052_v34 = vrot.slane %v3050_v43, 4 }
 0x512   : > { %v3054_v45 = vmul.f32 %v3052_v34, %v3046_v8 }
 0x514   : > { %3783 = vrot.lane.b32.xlu0 %v3054_v45, %s7663_s19  ;;  %6392 = vmatmul.mubr.msk.f32.vlgmr.msra.gmra.mxu1 %vm2431_vm13, %v3054_v45 }
 0x515   : > { %6400 = vmatpush3.msra.mxu1 %v7342_v11  ;;  %6401 = vmatprep.mubr.msk.f32.mxu1 %vm6830_vm0, %v6829_v0 }
 0x516   : > { %6409 = vmatprep.subr.mxu1 %v6829_v0 }
 0x518   : > { %3937 = vrot.lane.b32.xlu0 %v7357_v59, %s6864_s17 }
 0x51b   : > { %v6673_v46 = vpop.eup %6672 }
 0x51c   : > { %v3246_v47 = vmul.f32 0.5, %v6673_v46  ;;  %4091 = vrot.lane.b32.xlu0 %v3054_v45, %s6864_s17 }
 0x51e   : > { %v3247_v48 = vadd.f32 0.5, %v3246_v47 }
 0x520   : > { %v3249_v49 = vrot.slane %v3247_v48, 4  ;;  %4245 = vrot.lane.b32.xlu0 %v7357_v59, %s6868_s20 }
 0x522   : > { %v3251_v51 = vmul.f32 %v3249_v49, %v3243_v35 }
 0x524   : > { %4399 = vrot.lane.b32.xlu0 %v3054_v45, %s6868_s20  ;;  %3709 = vrot.lane.b32.xlu1 %v3251_v51, %s7663_s19  ;;  %s7664_s19 = smov 96  }
 0x525   : > { %6387 = vmatmul.mubr.msk.f32.vlgmr.msra.gmra.mxu0 %vm2431_vm13, %v3251_v51 }
 0x526   : > { %6395 = vmatpush3.msra.mxu0 %v7349_v12  ;;  %6396 = vmatprep.mubr.msk.f32.mxu0 %vm6830_vm0, %v6829_v0 }
 0x527   : > { %6404 = vmatprep.subr.mxu0 %v6829_v0 }
 0x528   : > { %4553 = vrot.lane.b32.xlu0 %v7357_v59, %s6860_s9  ;;  %3863 = vrot.lane.b32.xlu1 %v7368_v24, %s6864_s17 }
 0x52c   : > { %4702 = vrot.lane.b32.xlu0 %v3054_v45, %s6860_s9  ;;  %4017 = vrot.lane.b32.xlu1 %v3251_v51, %s6864_s17  ;;  %s311_s17 = sand.u32 1, %s6812_s25  }
 0x530   : > { %4855 = vrot.lane.b32.xlu0 %v7357_v59, %s6869_s15  ;;  %4171 = vrot.lane.b32.xlu1 %v7368_v24, %s6868_s20 }
 0x534   : > { %5008 = vrot.lane.b32.xlu0 %v3054_v45, %s6869_s15  ;;  %4325 = vrot.lane.b32.xlu1 %v3251_v51, %s6868_s20 }
 0x538   : > { %5161 = vrot.lane.b32.xlu0 %v7357_v59, %s6870_s23  ;;  %4479 = vrot.lane.b32.xlu1 %v7368_v24, %s6860_s9 }
 0x53c   : > { %5314 = vrot.lane.b32.xlu0 %v3054_v45, %s6870_s23  ;;  %4628 = vrot.lane.b32.xlu1 %v3251_v51, %s6860_s9  ;;  %s5814_s9 = sshll.u32 %s311_s17, 3 }
 0x53d   : > { %s7543_s8 = scalar_lea.vmem [#allocation9], %s5814_s9 }
 0x540   : > { %5467 = vrot.lane.b32.xlu0 %v7357_v59, %s6871_s14  ;;  %4781 = vrot.lane.b32.xlu1 %v7368_v24, %s6869_s15 }
 0x544   : > { %5620 = vrot.lane.b32.xlu0 %v3054_v45, %s6871_s14  ;;  %4934 = vrot.lane.b32.xlu1 %v3251_v51, %s6869_s15 }
 0x548   : > { %5087 = vrot.lane.b32.xlu1 %v7368_v24, %s6870_s23 }
 0x54c   : > { %5240 = vrot.lane.b32.xlu1 %v3251_v51, %s6870_s23 }
 0x550   : > { %5393 = vrot.lane.b32.xlu1 %v7368_v24, %s6871_s14 }
 0x554   : > { %5546 = vrot.lane.b32.xlu1 %v3251_v51, %s6871_s14 }
 0x565   : > { %v3630_v52 = vpop.permute.xlu0 %3629 }
 0x566   : > { %6402 = vmatmul.mubr.msk.f32.vlgmr.msra.gmra.mxu1 %vm2431_vm13, %v3630_v52 }
 0x567   : > { %6410 = vmatpush3.msra.mxu1 %v7342_v11  ;;  %6411 = vmatprep.mubr.msk.f32.mxu1 %vm6830_vm0, %v6829_v0 }
 0x568   : > { %6419 = vmatprep.subr.mxu1 %v6829_v0 }
 0x575   : > { %v3556_v53 = vpop.permute.xlu1 %3555 }
 0x576   : > { %6397 = vmatmul.mubr.msk.f32.vlgmr.msra.gmra.mxu0 %vm2431_vm13, %v3556_v53 }
 0x577   : > { %6405 = vmatpush3.msra.mxu0 %v7349_v12  ;;  %6406 = vmatprep.mubr.msk.f32.mxu0 %vm6830_vm0, %v6829_v0 }
 0x578   : > { %6414 = vmatprep.subr.mxu0 %v6829_v0 }
 0x586   : > { %v3784_v54 = vpop.permute.xlu0 %3783 }
 0x587   : > { %6412 = vmatmul.mubr.msk.f32.vlgmr.msra.gmra.mxu1 %vm2431_vm13, %v3784_v54 }
 0x588   : > { %6420 = vmatpush3.msra.mxu1 %v7342_v11  ;;  %6421 = vmatprep.mubr.msk.f32.mxu1 %vm6830_vm0, %v6829_v0 }
 0x589   : > { %6429 = vmatprep.subr.mxu1 %v6829_v0 }
 0x58a   : > { %v3938_v55 = vpop.permute.xlu0 %3937 }
 0x58b   : > { %6422 = vmatmul.mubr.msk.f32.vlgmr.msra.gmra.mxu1 %vm2431_vm13, %v3938_v55 }
 0x58c   : > { %6430 = vmatpush3.msra.mxu1 %v7342_v11  ;;  %6431 = vmatprep.mubr.msk.f32.mxu1 %vm6830_vm0, %v6829_v0 }
 0x58d   : > { %6439 = vmatprep.subr.mxu1 %v6829_v0 }
 0x58e   : > { %v4092_v50 = vpop.permute.xlu0 %4091 }
 0x58f   : > { %6432 = vmatmul.mubr.msk.f32.vlgmr.msra.gmra.mxu1 %vm2431_vm13, %v4092_v50 }
 0x590   : > { %6440 = vmatpush3.msra.mxu1 %v7342_v11  ;;  %6441 = vmatprep.mubr.msk.f32.mxu1 %vm6830_vm0, %v6829_v0 }
 0x591   : > { %6449 = vmatprep.subr.mxu1 %v6829_v0 }
 0x592   : > { %v4246_v57 = vpop.permute.xlu0 %4245 }
 0x593   : > { %6442 = vmatmul.mubr.msk.f32.vlgmr.msra.gmra.mxu1 %vm2431_vm13, %v4246_v57 }
 0x594   : > { %6450 = vmatpush3.msra.mxu1 %v7342_v11  ;;  %6451 = vmatprep.mubr.msk.f32.mxu1 %vm6830_vm0, %v6829_v0 }
 0x595   : > { %6459 = vmatprep.subr.mxu1 %v6829_v0 }
 0x596   : > { %v4400_v58 = vpop.permute.xlu0 %4399  ;;  %v3710_v59 = vpop.permute.xlu1 %3709 }
 0x597   : > { %6407 = vmatmul.mubr.msk.f32.vlgmr.msra.gmra.mxu0 %vm2431_vm13, %v3710_v59  ;;  %6452 = vmatmul.mubr.msk.f32.vlgmr.msra.gmra.mxu1 %vm2431_vm13, %v4400_v58 }
 0x598   : > { %6460 = vmatpush3.msra.mxu1 %v7342_v11  ;;  %6461 = vmatprep.mubr.msk.f32.mxu1 %vm6830_vm0, %v6829_v0 }
 0x599   : > { %6415 = vmatpush3.msra.mxu0 %v7349_v12  ;;  %6416 = vmatprep.mubr.msk.f32.mxu0 %vm6830_vm0, %v6829_v0 }
 0x59a   : > { %v4554_v62 = vpop.permute.xlu0 %4553  ;;  %v3864_v56 = vpop.permute.xlu1 %3863  ;;  %6424 = vmatprep.subr.mxu0 %v6829_v0  ;;  %6469 = vmatprep.subr.mxu1 %v6829_v0 }
 0x59b   : > { %6417 = vmatmul.mubr.msk.f32.vlgmr.msra.gmra.mxu0 %vm2431_vm13, %v3864_v56  ;;  %6462 = vmatmul.mubr.msk.f32.vlgmr.msra.gmra.mxu1 %vm2431_vm13, %v4554_v62 }
 0x59c   : > { %6470 = vmatpush3.msra.mxu1 %v7342_v11  ;;  %6471 = vmatprep.mubr.msk.f32.mxu1 %vm6830_vm0, %v6829_v0 }
 0x59d   : > { %6425 = vmatpush3.msra.mxu0 %v7349_v12  ;;  %6426 = vmatprep.mubr.msk.f32.mxu0 %vm6830_vm0, %v6829_v0 }
 0x59e   : > { %v4703_v63 = vpop.permute.xlu0 %4702  ;;  %v4018_v60 = vpop.permute.xlu1 %4017  ;;  %6434 = vmatprep.subr.mxu0 %v6829_v0  ;;  %6479 = vmatprep.subr.mxu1 %v6829_v0 }
 0x59f   : > { %6427 = vmatmul.mubr.msk.f32.vlgmr.msra.gmra.mxu0 %vm2431_vm13, %v4018_v60  ;;  %6472 = vmatmul.mubr.msk.f32.vlgmr.msra.gmra.mxu1 %vm2431_vm13, %v4703_v63 }
 0x5a0   : > { %6480 = vmatpush3.msra.mxu1 %v7342_v11  ;;  %6481 = vmatprep.mubr.msk.f32.mxu1 %vm6830_vm0, %v6829_v0 }
 0x5a1   : > { %6435 = vmatpush3.msra.mxu0 %v7349_v12  ;;  %6436 = vmatprep.mubr.msk.f32.mxu0 %vm6830_vm0, %v6829_v0 }
 0x5a2   : > { %v4856_v1 = vpop.permute.xlu0 %4855  ;;  %v4172_v2 = vpop.permute.xlu1 %4171  ;;  %6444 = vmatprep.subr.mxu0 %v6829_v0  ;;  %6489 = vmatprep.subr.mxu1 %v6829_v0 }
 0x5a3   : > { %6437 = vmatmul.mubr.msk.f32.vlgmr.msra.gmra.mxu0 %vm2431_vm13, %v4172_v2  ;;  %6482 = vmatmul.mubr.msk.f32.vlgmr.msra.gmra.mxu1 %vm2431_vm13, %v4856_v1 }
 0x5a4   : > { %6490 = vmatpush3.msra.mxu1 %v7342_v11  ;;  %6491 = vmatprep.mubr.msk.f32.mxu1 %vm6830_vm0, %v6829_v0 }
 0x5a5   : > { %6445 = vmatpush3.msra.mxu0 %v7349_v12  ;;  %6446 = vmatprep.mubr.msk.f32.mxu0 %vm6830_vm0, %v6829_v0 }
 0x5a6   : > { %v5009_v3 = vpop.permute.xlu0 %5008  ;;  %v4326_v4 = vpop.permute.xlu1 %4325  ;;  %6454 = vmatprep.subr.mxu0 %v6829_v0  ;;  %6499 = vmatprep.subr.mxu1 %v6829_v0 }
 0x5a7   : > { %6447 = vmatmul.mubr.msk.f32.vlgmr.msra.gmra.mxu0 %vm2431_vm13, %v4326_v4  ;;  %6492 = vmatmul.mubr.msk.f32.vlgmr.msra.gmra.mxu1 %vm2431_vm13, %v5009_v3 }
 0x5a8   : > { %6500 = vmatpush3.msra.mxu1 %v7342_v11  ;;  %6501 = vmatprep.mubr.msk.f32.mxu1 %vm6830_vm0, %v6829_v0 }
 0x5a9   : > { %6455 = vmatpush3.msra.mxu0 %v7349_v12  ;;  %6456 = vmatprep.mubr.msk.f32.mxu0 %vm6830_vm0, %v6829_v0 }
 0x5aa   : > { %v5162_v5 = vpop.permute.xlu0 %5161  ;;  %v4480_v6 = vpop.permute.xlu1 %4479  ;;  %6464 = vmatprep.subr.mxu0 %v6829_v0  ;;  %6509 = vmatprep.subr.mxu1 %v6829_v0 }
 0x5ab   : > { %6457 = vmatmul.mubr.msk.f32.vlgmr.msra.gmra.mxu0 %vm2431_vm13, %v4480_v6  ;;  %6502 = vmatmul.mubr.msk.f32.vlgmr.msra.gmra.mxu1 %vm2431_vm13, %v5162_v5 }
 0x5ac   : > { %6510 = vmatpush3.msra.mxu1 %v7342_v11  ;;  %6511 = vmatprep.mubr.msk.f32.mxu1 %vm6830_vm0, %v6829_v0 }
 0x5ad   : > { %6465 = vmatpush3.msra.mxu0 %v7349_v12  ;;  %6466 = vmatprep.mubr.msk.f32.mxu0 %vm6830_vm0, %v6829_v0 }
 0x5ae   : > { %v5315_v7 = vpop.permute.xlu0 %5314  ;;  %v4629_v8 = vpop.permute.xlu1 %4628  ;;  %6474 = vmatprep.subr.mxu0 %v6829_v0  ;;  %6519 = vmatprep.subr.mxu1 %v6829_v0 }
 0x5af   : > { %6467 = vmatmul.mubr.msk.f32.vlgmr.msra.gmra.mxu0 %vm2431_vm13, %v4629_v8  ;;  %6512 = vmatmul.mubr.msk.f32.vlgmr.msra.gmra.mxu1 %vm2431_vm13, %v5315_v7 }
 0x5b0   : > { %6520 = vmatpush3.msra.mxu1 %v7342_v11  ;;  %6521 = vmatprep.mubr.msk.f32.mxu1 %vm6830_vm0, %v6829_v0 }
 0x5b1   : > { %6475 = vmatpush3.msra.mxu0 %v7349_v12  ;;  %6476 = vmatprep.mubr.msk.f32.mxu0 %vm6830_vm0, %v6829_v0 }
 0x5b2   : > { %v5468_v9 = vpop.permute.xlu0 %5467  ;;  %v4782_v13 = vpop.permute.xlu1 %4781  ;;  %6484 = vmatprep.subr.mxu0 %v6829_v0  ;;  %6529 = vmatprep.subr.mxu1 %v6829_v0 }
 0x5b3   : > { %6477 = vmatmul.mubr.msk.f32.vlgmr.msra.gmra.mxu0 %vm2431_vm13, %v4782_v13  ;;  %6522 = vmatmul.mubr.msk.f32.vlgmr.msra.gmra.mxu1 %vm2431_vm13, %v5468_v9  ;;  %v3397_v15 = vpop.f32.mrf.mxu1 }
 0x5b4   : > { %6530 = vmatpush3.msra.mxu1 %v7342_v11  ;;  %6531 = vmatprep.mubr.msk.f32.mxu1 %vm6830_vm0, %v6829_v0 }
 0x5b5   : > { %6485 = vmatpush3.msra.mxu0 %v7349_v12  ;;  %6486 = vmatprep.mubr.msk.f32.mxu0 %vm6830_vm0, %v6829_v0  ;;  %v6383_v16 = vpop.f32.mrf.mxu1 }
 0x5b6   : > { %v5621_v37 = vpop.permute.xlu0 %5620  ;;  %6494 = vmatprep.subr.mxu0 %v6829_v0  ;;  %v4935_v17 = vpop.permute.xlu1 %4934 }
 0x5b7   : > { %6532 = vmatmul.mubr.msk.f32.vlgmr.msra.gmra.mxu1 %vm2431_vm13, %v5621_v37  ;;  %6487 = vmatmul.mubr.msk.f32.vlgmr.msra.gmra.mxu0 %vm2431_vm13, %v4935_v17 }
 0x5b8   : > { %6495 = vmatpush3.msra.mxu0 %v7349_v12  ;;  %6496 = vmatprep.mubr.msk.f32.mxu0 %vm6830_vm0, %v6829_v0 }
 0x5b9   : > { %6504 = vmatprep.subr.mxu0 %v6829_v0 }
 0x5ba   : > { %v5088_v11 = vpop.permute.xlu1 %5087 }
 0x5bb   : > { %6497 = vmatmul.mubr.msk.f32.vlgmr.msra.gmra.mxu0 %vm2431_vm13, %v5088_v11 }
 0x5bc   : > { %6505 = vmatpush3.msra.mxu0 %v7349_v12  ;;  %6506 = vmatprep.mubr.msk.f32.mxu0 %vm6830_vm0, %v6829_v0 }
 0x5bd   : > { %6514 = vmatprep.subr.mxu0 %v6829_v0 }
 0x5be   : > { %v5241_v18 = vpop.permute.xlu1 %5240 }
 0x5bf   : > { %6507 = vmatmul.mubr.msk.f32.vlgmr.msra.gmra.mxu0 %vm2431_vm13, %v5241_v18 }
 0x5c0   : > { %6515 = vmatpush3.msra.mxu0 %v7349_v12  ;;  %6516 = vmatprep.mubr.msk.f32.mxu0 %vm6830_vm0, %v6829_v0 }
 0x5c1   : > { %6524 = vmatprep.subr.mxu0 %v6829_v0 }
 0x5c2   : > { %v5394_v10 = vpop.permute.xlu1 %5393 }
 0x5c3   : > { %6517 = vmatmul.mubr.msk.f32.vlgmr.msra.gmra.mxu0 %vm2431_vm13, %v5394_v10  ;;  %v3324_v19 = vpop.f32.mrf.mxu0 }
 0x5c4   : > { %v3398_v20 = vadd.f32 %v3397_v15, %v3324_v19  ;;  %6525 = vmatpush3.msra.mxu0 %v7349_v12  ;;  %6526 = vmatprep.mubr.msk.f32.mxu0 %vm6830_vm0, %v6829_v0  ;;  %vm3707_vm0 = vcmask 388352  }
 0x5c5   : > { %v6378_v21 = vpop.f32.mrf.mxu0 }
 0x5c6   : > { %3402 = vst.msk [vmem:[%s7543_s8] sm:$0xf] %vm3401_vm14, %v3398_v20  ;;  %v5547_v22 = vpop.permute.xlu1 %5546 }
 0x5c7   : > { %6527 = vmatmul.mubr.msk.f32.vlgmr.msra.gmra.mxu0 %vm2431_vm13, %v5547_v22 }
 0x5d4   : > { %v3545_v23 = vpop.f32.mrf.mxu1 }
 0x5d6   : > { %v6393_v24 = vpop.f32.mrf.mxu1 }
 0x5e5   : > { %v3472_v26 = vpop.f32.mrf.mxu0 }
 0x5e6   : > { %v3546_v61 = vadd.f32 %v3545_v23, %v3472_v26 }
 0x5e7   : > { %v6388_v25 = vpop.f32.mrf.mxu0 }
 0x5e8   : > { %3550 = vrot.lane.b32.xlu1 %v3546_v61, %s6842_s18 }
 0x626   : > { %v3699_v12 = vpop.f32.mrf.mxu1 }
 0x628   : > { %v6403_v27 = vpop.f32.mrf.mxu1 }
 0x636   : > { %v3625_v28 = vpop.f32.mrf.mxu0 }
 0x637   : > { %v3700_v0 = vadd.f32 %v3699_v12, %v3625_v28 }
 0x638   : > { %v6398_v29 = vpop.f32.mrf.mxu0 }
 0x639   : > { %3704 = vrot.lane.b32.xlu1 %v3700_v0, %s6841_s16 }
 0x647   : > { %v3853_v30 = vpop.f32.mrf.mxu1 }
 0x649   : > { %v6413_v31 = vpop.f32.mrf.mxu1 }
 0x64b   : > { %v4007_v32 = vpop.f32.mrf.mxu1 }
 0x64d   : > { %v6423_v14 = vpop.f32.mrf.mxu1 }
 0x64f   : > { %v4161_v33 = vpop.f32.mrf.mxu1 }
 0x651   : > { %v6433_v35 = vpop.f32.mrf.mxu1 }
 0x653   : > { %v4315_v36 = vpop.f32.mrf.mxu1 }
 0x655   : > { %v6443_v38 = vpop.f32.mrf.mxu1 }
 0x657   : > { %v3779_v39 = vpop.f32.mrf.mxu0  ;;  %v4469_v40 = vpop.f32.mrf.mxu1 }
 0x658   : > { %v3854_v41 = vadd.f32 %v3853_v30, %v3779_v39 }
 0x659   : > { %v6453_v42 = vpop.f32.mrf.mxu1  ;;  %v6408_v43 = vpop.f32.mrf.mxu0 }
 0x65a   : > { %v3551_v44 = vpop.permute.xlu1 %3550  ;;  %3858 = vrot.lane.b32.xlu1 %v3854_v41, %s6839_s22 }
 0x65b   : > { %3554 = vst.msk [vmem:[%s7543_s8] sm:$0xf] %vm3553_vm15, %v3551_v44  ;;  %v3933_v34 = vpop.f32.mrf.mxu0  ;;  %v4623_v45 = vpop.f32.mrf.mxu1 }
 0x65c   : > { %v4008_v46 = vadd.f32 %v4007_v32, %v3933_v34 }
 0x65d   : > { %v6418_v47 = vpop.f32.mrf.mxu0  ;;  %v6463_v48 = vpop.f32.mrf.mxu1 }
 0x65e   : > { %4012 = vrot.lane.b32.xlu1 %v4008_v46, %s6838_s21 }
 0x65f   : > { %v4087_v49 = vpop.f32.mrf.mxu0  ;;  %v4772_v51 = vpop.f32.mrf.mxu1 }
 0x660   : > { %v4162_v52 = vadd.f32 %v4161_v33, %v4087_v49 }
 0x661   : > { %v6428_v53 = vpop.f32.mrf.mxu0  ;;  %v6473_v54 = vpop.f32.mrf.mxu1 }
 0x662   : > { %4166 = vrot.lane.b32.xlu1 %v4162_v52, %s7662_s13 }
 0x663   : > { %v4241_v55 = vpop.f32.mrf.mxu0  ;;  %v4925_v50 = vpop.f32.mrf.mxu1 }
 0x664   : > { %v4316_v57 = vadd.f32 %v4315_v36, %v4241_v55 }
 0x665   : > { %v6438_v58 = vpop.f32.mrf.mxu0  ;;  %v6483_v59 = vpop.f32.mrf.mxu1 }
 0x666   : > { %4320 = vrot.lane.b32.xlu1 %v4316_v57, %s7664_s19 }
 0x667   : > { %v4395_v62 = vpop.f32.mrf.mxu0  ;;  %v5078_v56 = vpop.f32.mrf.mxu1 }
 0x668   : > { %v4470_v63 = vadd.f32 %v4469_v40, %v4395_v62 }
 0x669   : > { %v6448_v60 = vpop.f32.mrf.mxu0  ;;  %v6493_v1 = vpop.f32.mrf.mxu1 }
 0x66a   : > { %4474 = vrot.lane.b32.xlu1 %v4470_v63, %s7660_s29 }
 0x66b   : > { %v4549_v2 = vpop.f32.mrf.mxu0  ;;  %v5231_v3 = vpop.f32.mrf.mxu1 }
 0x66c   : > { %v4624_v4 = vadd.f32 %v4623_v45, %v4549_v2 }
 0x66d   : > { %v6458_v5 = vpop.f32.mrf.mxu0  ;;  %v6503_v6 = vpop.f32.mrf.mxu1 }
 0x66e   : > { %4627 = vst.msk [vmem:[%s7543_s8 + $0x4] sm:$0xf] %vm3401_vm14, %v4624_v4 }
 0x66f   : > { %v4698_v7 = vpop.f32.mrf.mxu0  ;;  %v5384_v8 = vpop.f32.mrf.mxu1 }
 0x670   : > { %v4773_v9 = vadd.f32 %v4772_v51, %v4698_v7 }
 0x671   : > { %v6468_v13 = vpop.f32.mrf.mxu0  ;;  %v6513_v15 = vpop.f32.mrf.mxu1 }
 0x672   : > { %4777 = vrot.lane.b32.xlu0 %v4773_v9, %s6842_s18 }
 0x673   : > { %v4851_v16 = vpop.f32.mrf.mxu0  ;;  %v5537_v37 = vpop.f32.mrf.mxu1 }
 0x674   : > { %v4926_v17 = vadd.f32 %v4925_v50, %v4851_v16 }
 0x675   : > { %v6478_v11 = vpop.f32.mrf.mxu0  ;;  %v6523_v18 = vpop.f32.mrf.mxu1 }
 0x676   : > { %4930 = vrot.lane.b32.xlu0 %v4926_v17, %s6841_s16 }
 0x677   : > { %v5690_v10 = vpop.f32.mrf.mxu1  ;;  %v5004_v19 = vpop.f32.mrf.mxu0 }
 0x678   : > { %v5079_v20 = vadd.f32 %v5078_v56, %v5004_v19 }
 0x679   : > { %v6533_v21 = vpop.f32.mrf.mxu1  ;;  %v6488_v22 = vpop.f32.mrf.mxu0 }
 0x67a   : > { %5083 = vrot.lane.b32.xlu0 %v5079_v20, %s6839_s22  ;;  %s5714_s22 = sshll.u32 %s7543_s8, 4  ;;  %s5715_s22 = int_to_ptr.vmem [resolvable:$true] %s5714_s22 }
 0x67b   : > { %v5157_v23 = vpop.f32.mrf.mxu0  ;;  %s6752_s20 = scalar_lea.vmem %s5715_s22, 128 }
 0x67c   : > { %v5232_v24 = vadd.f32 %v5231_v3, %v5157_v23  ;;  %p6753_p10 = scmp.ne.s32.totalorder %s5715_s22, %s6752_s20 }
 0x67d   : > { %v6498_v26 = vpop.f32.mrf.mxu0 }
 0x67e   : > { %5236 = vrot.lane.b32.xlu0 %v5232_v24, %s6838_s21  ;;  %s5941_s21 = sshll.u32 %s6934_s28, 7  ;;  %p6754_p12 = pnand %p6753_p10, %p6951_p5 }
 0x67f   : > { %v5310_v61 = vpop.f32.mrf.mxu0  ;;  %s6872_s28 = smov [#allocation9]  }
 0x680   : > { %v5385_v25 = vadd.f32 %v5384_v8, %v5310_v61  ;;  %p6755_p7 = pneg %p6754_p12  ;;  %s6756_s15 = sshll.u32 %s6872_s28, 4  ;;  %s6757_s15 = int_to_ptr.vmem [resolvable:$false] %s6756_s15 }
 0x681   : > { %v6508_v12 = vpop.f32.mrf.mxu0  ;;  %s6758_s23 = scalar_lea.vmem %s6757_s15, 256  ;;  %p6759_p6 = scmp.lt.s32.totalorder %s5715_s22, %s6757_s15 }
 0x682   : > { %5389 = vrot.lane.b32.xlu0 %v5385_v25, %s7662_s13  ;;  %s5700_s13 = scalar_lea.sflag [#allocation5], %s311_s17  ;;  %p6760_p9 = scmp.lt.s32.totalorder %s6758_s23, %s6752_s20 }
 0x683   : > { %v5463_v27 = vpop.f32.mrf.mxu0 }
 0x684   : > { %v5538_v28 = vadd.f32 %v5537_v37, %v5463_v27  ;;  %p6761_p8 = por %p6760_p9, %p6759_p6 }
 0x685   : > { %v6518_v0 = vpop.f32.mrf.mxu0 }
 0x686   : > { %5542 = vrot.lane.b32.xlu0 %v5538_v28, %s7664_s19  ;;  %p6762_p11 = pnand %p6761_p8, %p6755_p7 }
 0x687   : > { %v5616_v29 = vpop.f32.mrf.mxu0 }
 0x688   : > { %v5691_v30 = vadd.f32 %v5690_v10, %v5616_v29 }
 0x689   : > { %v6528_v31 = vpop.f32.mrf.mxu0 }
 0x68a   : > { %5695 = vrot.lane.b32.xlu0 %v5691_v30, %s7660_s29  ;;  %s7595_s29 = scalar_lea.hbm %s7641_s7, %s5941_s21 }
 0x6ab   : > { %v3705_v32 = vpop.permute.xlu1 %3704 }
 0x6ac   : > { %3708 = vst.msk [vmem:[%s7543_s8] sm:$0xf] %vm3707_vm0, %v3705_v32 }
 0x6cc   : > { %v3859_v14 = vpop.permute.xlu1 %3858 }
 0x6cd   : > { %3862 = vst.msk [vmem:[%s7543_s8] sm:$0xf] %vm3861_vm1, %v3859_v14 }
 0x6d0   : > { %v4013_v33 = vpop.permute.xlu1 %4012 }
 0x6d1   : > { %4016 = vst.msk [vmem:[%s7543_s8] sm:$0xf] %vm4015_vm2, %v4013_v33 }
 0x6d4   : > { %v4167_v35 = vpop.permute.xlu1 %4166 }
 0x6d5   : > { %4170 = vst.msk [vmem:[%s7543_s8] sm:$0xf] %vm4169_vm3, %v4167_v35 }
 0x6d8   : > { %v4321_v36 = vpop.permute.xlu1 %4320 }
 0x6d9   : > { %4324 = vst.msk [vmem:[%s7543_s8] sm:$0xf] %vm4323_vm4, %v4321_v36 }
 0x6dc   : > { %v4475_v38 = vpop.permute.xlu1 %4474 }
 0x6dd   : > { %4478 = vst.msk [vmem:[%s7543_s8] sm:$0xf] %vm4477_vm5, %v4475_v38 }
 0x6e4   : > { %v4778_v39 = vpop.permute.xlu0 %4777 }
 0x6e5   : > { %4780 = vst.msk [vmem:[%s7543_s8 + $0x4] sm:$0xf] %vm3553_vm15, %v4778_v39 }
 0x6e8   : > { %v4931_v40 = vpop.permute.xlu0 %4930 }
 0x6e9   : > { %4933 = vst.msk [vmem:[%s7543_s8 + $0x4] sm:$0xf] %vm3707_vm0, %v4931_v40 }
 0x6ec   : > { %v5084_v41 = vpop.permute.xlu0 %5083 }
 0x6ed   : > { %5086 = vst.msk [vmem:[%s7543_s8 + $0x4] sm:$0xf] %vm3861_vm1, %v5084_v41 }
 0x6f0   : > { %v5237_v42 = vpop.permute.xlu0 %5236 }
 0x6f1   : > { %5239 = vst.msk [vmem:[%s7543_s8 + $0x4] sm:$0xf] %vm4015_vm2, %v5237_v42 }
 0x6f4   : > { %v5390_v43 = vpop.permute.xlu0 %5389 }
 0x6f5   : > { %5392 = vst.msk [vmem:[%s7543_s8 + $0x4] sm:$0xf] %vm4169_vm3, %v5390_v43 }
 0x6f8   : > { %v5543_v44 = vpop.permute.xlu0 %5542 }
 0x6f9   : > { %5545 = vst.msk [vmem:[%s7543_s8 + $0x4] sm:$0xf] %vm4323_vm4, %v5543_v44 }
 0x6fc   : > { %v5696_v34 = vpop.permute.xlu0 %5695 }
 0x6fd   : > { %5698 = vst.msk [vmem:[%s7543_s8 + $0x4] sm:$0xf] %vm4477_vm5, %v5696_v34 }
 0x6fe   : > { %6765 = shalt.err (!%p6762_p11)
}
 0x6ff   : > { %s6766_s14 = scalar_lea.hbm %s7595_s29, 128  ;;  %s6770_s8 = scalar_lea.hbm %s7641_s7, 256 }
 0x700   : > { %p6767_p0 = scmp.ne.s32.totalorder %s7595_s29, %s6766_s14  ;;  %p6771_p3 = scmp.lt.s32.totalorder %s7595_s29, %s7641_s7 }
 0x701   : > { %p6772_p2 = scmp.lt.s32.totalorder %s6770_s8, %s6766_s14 }
 0x702   : > { %p6768_p1 = pnand %p6767_p0, %p6951_p5 }
 0x703   : > { %p6773_p4 = por %p6772_p2, %p6771_p3 }
 0x704   : > { %p6769_p13 = pneg %p6768_p1 }
 0x706   : > { %p6774_p10 = pnand %p6773_p4, %p6769_p13 }
 0x708   : > { %6777 = shalt.err (!%p6774_p10)
}
 0x709   : > { %6546 = dma.vmem_to_hbm [thread:$0]  (%p6951_p5), %s5715_s22, 128, %s7595_s29, %s5700_s13  }
 0x70a PF: > { %p6568_p12 = scmp.ge.s32.totalorder %s6820_s27, 2  ;;  %s5726_s16 = sand.u32 1, %s6808_s24  }
 0x70b   : > { %p7665_p7 = scmp.ne.s32.totalorder %s7653_s12, 0  ;;  %s5727_s18 = scalar_lea.sflag [#allocation5], %s5726_s16 }
 0x70d   : > { %p6559_p6 = pnand %p6568_p12, %p7665_p7 }
 0x70f   : > { %p6560_p9 = pneg %p6559_p6 }
 0x711   : > { %6803 = dma.done.wait (%p6560_p9), %s5727_s18, 128  }
 0x712   : > { %6805 = vsyncadd (%p6560_p9), %s5727_s18, 4294967168  ;;  %p19_p8 = scmp.ge.s32.totalorder %s6938_s30, 4   ;;  %s7666_s24 = smov %s6812_s25 }
 0x713   : > { %s7667_s25 = smov %s6816_s26  ;;  %s7668_s26 = smov %s6949_s10 }
 0x714   : > { %s7669_s27 = smov %s6938_s30  ;;  %21 = sbr.rel (!%p19_p8) target bundleno = 5 (0x5), region = 98 }
 0x719   :  { %5732 = vsyncpa [#allocation4], 1 }
 0x71a   :  { %5734 = vsyncpa [#allocation4 + $0x1], 1 }
 0x71b   :  { %5735 = vsyncpa [#allocation7], 1 }
 0x71c   :  { %5736 = vsyncpa [#allocation5], 1 }
 0x71d   :  { %5738 = vsyncpa [#allocation5 + $0x1], 1 }

// kernel: tpu_custom_call.1
= control target key start
LH: loop header
LB: loop body
LE: loop exit
PB: predicated region body
PF: predicated region fallthrough
CT: control target
= control target key end

     0   :  { %12 = vsyncpa [#allocation4], 0  ;;  %s7634_s0 = inlined_call_operand.vmem [shape: bf16[2,16,36], index: 0, kind: input, shape index: {}]   ;;  %s7635_s1 = inlined_call_operand.hbm [shape: bf16[16,256], index: 1, kind: input, shape index: {}]   ;;  %s7636_s2 = inlined_call_operand.vmem [shape: f32[16,1], index: 2, kind: input, shape index: {}]   ;;  %s7637_s3 = inlined_call_operand.hbm [shape: f32[2,4,8], index: 3, kind: input, shape index: {}]   ;;  %s7638_s4 = inlined_call_operand.hbm [shape: bf16[8,128], index: 4, kind: input, shape index: {}]   ;;  %s7639_s5 = inlined_call_operand.vmem [shape: f32[8,1], index: 5, kind: input, shape index: {}]   ;;  %s7640_s6 = inlined_call_operand.vmem [shape: f32[2,8,16], index: 6, kind: input, shape index: {}]   ;;  %s7641_s7 = inlined_call_operand.hbm [shape: f32[2,4,256], index: 7, kind: output, shape index: {}]  }
   0x1   :  { %13 = vsyncpa [#allocation7], 0 }
   0x2   :  { %14 = vsyncpa [#allocation5], 0 }
   0x3   :  { %16 = vsyncpa [#allocation5 + $0x1], 0  ;;  %s6913_s24 = smov 0   ;;  %s6915_s25 = smov 0  }
   0x4   :  { %s6917_s26 = smov 0   ;;  %s6919_s27 = smov 0  }
   0x5 LB: > { %s6934_s28 = sadd.s32 4294967295, %s6820_s27   ;;  %s5804_s29 = sadd.s32 4294967294, %s6820_s27   ;;  %s6820_s27 = sphi %s6919_s27, %s7669_s27   ;;  %s6816_s26 = sphi %s6917_s26, %s7668_s26   ;;  %s6812_s25 = sphi %s6915_s25, %s7667_s25   ;;  %s6808_s24 = sphi %s6913_s24, %s7666_s24  }
   0x6   : > { %s6938_s30 = sadd.s32 1, %s6820_s27   ;;  %s181_s8 = sadd.s32 1, %s6816_s26 }
   0x7   : > { %s178_s9 = ssub.s32 %s6820_s27, %s6938_s30  ;;  %p191_p0 = scmp.ne.s32.totalorder %s6816_s26, %s6812_s25 }
   0x8   : > { %p179_p1 = scmp.eq.s32.totalorder %s178_s9, 0  ;;  %p192_p2 = scmp.eq.s32.totalorder %s6934_s28, 1 }
   0x9   : > { %p197_p3 = scmp.ne.s32.totalorder %s6812_s25, %s6808_s24  ;;  %p198_p4 = scmp.eq.s32.totalorder %s5804_s29, 1 }
   0xa   : > { %s6949_s10 = scalar_select %p179_p1, %s6816_s26, %s181_s8  }
   0xb   : > { %p6951_p5 = por %p192_p2, %p191_p0  ;;  %p6955_p6 = por %p198_p4, %p197_p3 }
   0xc   : > { %p5805_p7 = scmp.ge.s32.totalorder %s6820_s27, 1  ;;  %p205_p8 = scmp.lt.s32.totalorder %s6820_s27, 3 }
   0xd   : > { %s7653_s12 = scalar_select %p6955_p6, 1, 0 }
   0xe   : > { %p7642_p9 = scmp.eq.s32.totalorder %s6934_s28, 0  ;;  %p6962_p10 = pnand %p5805_p7, %p205_p8 }
   0xf   : > { %s6822_s14 = smov [#allocation6]   ;;  %s6823_s17 = smov [#allocation3]  }
  0x10   : > { %s233_s15 = sshll.u32 %s6822_s14, 4  ;;  %p6548_p11 = pneg %p6962_p10  ;;  %s234_s15 = int_to_ptr.vmem [resolvable:$true] %s233_s15 }
  0x11   : > { %s217_s18 = sshll.u32 %s6823_s17, 4  ;;  %s6685_s19 = scalar_lea.vmem %s234_s15, 128  ;;  %s218_s18 = int_to_ptr.vmem [resolvable:$true] %s217_s18 }
  0x12   : > { %p6970_p12 = pnand %p7642_p9, %p6548_p11  ;;  %p6686_p0 = scmp.ne.s32.totalorder %s234_s15, %s6685_s19 }
  0x13   : > { %p6693_p3 = scmp.lt.s32.totalorder %s234_s15, %s234_s15  ;;  %p6694_p4 = scmp.lt.s32.totalorder %s6685_s19, %s6685_s19 }
  0x14   : > { %p6676_p13 = pneg %p6970_p12 }
  0x15   : > { %p6695_p7 = por %p6694_p4, %p6693_p3 }
  0x16   : > { %p6688_p1 = pnand %p6686_p0, %p6676_p13 }
  0x18   : > { %p6689_p2 = pneg %p6688_p1 }
  0x1a   : > { %p6696_p8 = pnand %p6695_p7, %p6689_p2 }
  0x1c   : > { %6699 = shalt.err (!%p6696_p8)
}
  0x1d   : > { %s6824_s20 = smov 64   ;;  %s6825_s21 = smov 4  }
  0x1e   : > { %6554 = dma.hbm_to_vmem [thread:$0]  (!%p6970_p12), %s7637_s3, 128, %s234_s15, [#allocation7], %s6824_s20, %s6824_s20, %s6825_s21  }
  0x1f   : > { %s6711_s29 = scalar_lea.vmem %s218_s18, 256  ;;  %p6719_p9 = scmp.lt.s32.totalorder %s218_s18, %s218_s18 }
  0x20   : > { %p6712_p11 = scmp.ne.s32.totalorder %s218_s18, %s6711_s29  ;;  %p6720_p6 = scmp.lt.s32.totalorder %s6711_s29, %s6711_s29 }
  0x22   : > { %p6714_p0 = pnand %p6712_p11, %p6676_p13  ;;  %p6721_p3 = por %p6720_p6, %p6719_p9 }
  0x24   : > { %p6715_p1 = pneg %p6714_p0 }
  0x26   : > { %p6722_p2 = pnand %p6721_p3, %p6715_p1 }
  0x28   : > { %6725 = shalt.err (!%p6722_p2)
}
  0x29   : > { %s6826_s8 = smov 128   ;;  %s6827_s9 = smov 8  }
  0x2a   : > { %6551 = dma.hbm_to_vmem [thread:$0]  (!%p6970_p12), %s7635_s1, 256, %s218_s18, [#allocation4], %s6826_s8, %s6826_s8, %s6827_s9  }
  0x2b   : > { %s6828_s15 = smov [#allocation8]  }
  0x2c   : > { %s247_s19 = sshll.u32 %s6828_s15, 4  ;;  %s248_s19 = int_to_ptr.vmem [resolvable:$true] %s247_s19 }
  0x2d   : > { %s6737_s20 = scalar_lea.vmem %s248_s19, 64  ;;  %p6745_p9 = scmp.lt.s32.totalorder %s248_s19, %s248_s19 }
  0x2e   : > { %p6738_p4 = scmp.ne.s32.totalorder %s248_s19, %s6737_s20  ;;  %p6746_p8 = scmp.lt.s32.totalorder %s6737_s20, %s6737_s20 }
  0x30   : > { %p6740_p7 = pnand %p6738_p4, %p6676_p13  ;;  %p6747_p11 = por %p6746_p8, %p6745_p9 }
  0x32   : > { %p6741_p6 = pneg %p6740_p7 }
  0x34   : > { %p6748_p0 = pnand %p6747_p11, %p6741_p6 }
  0x36   : > { %6751 = shalt.err (!%p6748_p0)
}
  0x37   : > { %6557 = dma.hbm_to_vmem [thread:$0]  (!%p6970_p12), %s7638_s4, 64, %s248_s19, [#allocation7]  }
  0x38   : > { %274 = sbr.rel (%p6962_p10) target bundleno = 1802 (0x70a), region = 48  ;;  %p7656_p1 = scmp.eq.s32.totalorder (!%p6962_p10), %s6934_s28, 0 }
  0x3d   : > { %6795 = dma.done.wait (%p7656_p1), [#allocation4], 256   ;;  %p7657_p13 = pmov %p7656_p1 }
  0x3e   : > { %p7658_p3 = pmov %p7656_p1 }
  0x3f   : > { %6797 = vsyncadd (%p7657_p13), [#allocation4], 4294967040 }
  0x40   : > { %6799 = dma.done.wait (%p7658_p3), [#allocation7], 192   ;;  %p7659_p2 = pmov %p7656_p1 }
  0x41   : > { %p314_p4 = scmp.lt.s32.totalorder %s6934_s28, 1  ;;  %v6829_v0 = vmov 0.0   ;;  %vm6830_vm0 = vmmov 0   ;;  %s6831_s8 = smov 127   ;;  %v6654_v2 = vld [vmem:[#allocation3] ss:$8 sps:$4 sm:$0xff]  }
  0x42   : > { %6801 = vsyncadd (%p7659_p2), [#allocation7], 4294967104  ;;  %6102 = vmatprep.subr.bf16.mxu0 %v6829_v0  ;;  %6104 = vmatprep.mubr.msk.bf16.mxu0 %vm6830_vm0, %v6829_v0  ;;  %s6832_s9 = smov 122   ;;  %vm337_vm1 = vcmask 130048   ;;  %s7646_s14 = smov 112   ;;  %vm1166_vm2 = vcmask 814080  }
  0x43   : > { %s315_s13 = scalar_select %p314_p4, %s6934_s28, 1  ;;  %6108 = vmatprep.subr.bf16.mxu1 %v6829_v0  ;;  %6110 = vmatprep.mubr.msk.bf16.mxu1 %vm6830_vm0, %v6829_v0  ;;  %v7036_v3 = vld [vmem:[#allocation3 + $0x4] ss:$8 sps:$4 sm:$0xff]   ;;  %v322_v4 = vld [vmem:[%s7636_s2] sm:$0xff]  ;;  %v6846_v6 = vmov 0   ;;  %vm1172_vm3 = vcmask 1043456  }
  0x44   : > { %s6834_s17 = smov 121   ;;  %s7648_s15 = smov 96   ;;  %v323_v5 = vld [vmem:[%s7636_s2 + $0x8] sm:$0xff]  ;;  %6652 = vset.pattern.permute.xlu1 %v6846_v6  ;;  %1167 = vst.msk [vmem:[#allocation2] sm:$0xf] %vm1166_vm2, %v6846_v6  ;;  %6651 = vset.pattern.permute.xlu0 %v6846_v6  ;;  %vm1168_vm4 = vcmask 31744  }
  0x45   : > { %s5932_s16 = sshll.u32 %s315_s13, 3  ;;  %s7644_s19 = smov 80   ;;  %v7120_v33 = vld [vmem:[#allocation6] sm:$0xf]  ;;  %v7125_v34 = vld [vmem:[#allocation6 + $0x4] sm:$0xf] }
  0x46   : > { %s318_s29 = scalar_lea.vmem %s7634_s0, %s5932_s16  ;;  %s7643_s20 = smov 126   ;;  %vm1329_vm5 = vcmask 150616   ;;  %vm1484_vm6 = vcmask 232616   ;;  %vm1641_vm7 = vcmask 314616   ;;  %vm1798_vm8 = vcmask 396616  }
  0x47   : > { %v6653_v1 = vld [vmem:[%s318_s29] sm:$0xff]   ;;  %s6838_s21 = smov 64   ;;  %s6839_s22 = smov 48   ;;  %vm1955_vm9 = vcmask 478616   ;;  %vm2112_vm10 = vcmask 560616   ;;  %vm2269_vm11 = vcmask 642616  }
  0x48   : > { %396 = vrot.lane.b32.xlu0 %v6653_v1, %s6831_s8  ;;  %447 = vrot.lane.b32.xlu1 %v6653_v1, %s6832_s9  ;;  %s6840_s13 = smov 120   ;;  %s6841_s16 = smov 32   ;;  %vm2426_vm12 = vcmask 724616   ;;  %vm2431_vm13 = vcmask 64512   ;;  %vm3401_vm14 = vcmask 125952   ;;  %vm3553_vm15 = vcmask 257152  }
  0x49   : > { %6103 = vmatpush3.bf16.msra.mxu0 %v6653_v1  ;;  %s6842_s18 = smov 16   ;;  %s6843_s23 = smov 116   ;;  %vm4015_vm2 = vcmask 650752  }
  0x4a   : > { %6114 = vmatprep.subr.bf16.mxu0 %v6829_v0  ;;  %s6844_s29 = smov 115  }
  0x4c   : > { %394 = vrot.lane.b32.xlu0 %v6654_v2, %s7646_s14  ;;  %498 = vrot.lane.b32.xlu1 %v6653_v1, %s6834_s17  ;;  %s6845_s17 = smov 114  }
  0x4d   : > { %6105 = vmatmul.mubr.msk.bf16.vlgmr.msra.gmra.mxu0 %vm337_vm1, %v6654_v2 }
  0x4e   : > { %6116 = vmatprep.mubr.msk.bf16.mxu0 %vm6830_vm0, %v6829_v0 }
  0x50   : > { %445 = vrot.lane.b32.xlu0 %v6654_v2, %s7648_s15  ;;  %496 = vrot.lane.b32.xlu1 %v6654_v2, %s7644_s19 }
  0x54   : > { %602 = vrot.lane.b32.xlu0 %v6653_v1, %s7643_s20  ;;  %552 = vrot.lane.b32.xlu1 %v6654_v2, %s6838_s21  ;;  %s6850_s20 = smov 31  }
  0x58   : > { %600 = vrot.lane.b32.xlu0 %v6654_v2, %s6839_s22  ;;  %701 = vrot.lane.b32.xlu1 %v6653_v1, %s6840_s13 }
  0x5c   : > { %651 = vrot.lane.b32.xlu0 %v6654_v2, %s6841_s16  ;;  %699 = vrot.lane.b32.xlu1 %v6654_v2, %s6842_s18 }
  0x60   : > { %808 = vrot.lane.b32.xlu0 %v7036_v3, %s7646_s14  ;;  %858 = vrot.lane.b32.xlu1 %v6653_v1, %s6843_s23  ;;  %s6847_s14 = smov 110  }
  0x64   : > { %909 = vrot.lane.b32.xlu0 %v6653_v1, %s6844_s29  ;;  %856 = vrot.lane.b32.xlu1 %v7036_v3, %s7648_s15  ;;  %s6852_s29 = smov 51  }
  0x68   : > { %907 = vrot.lane.b32.xlu0 %v7036_v3, %s7644_s19  ;;  %963 = vrot.lane.b32.xlu1 %v7036_v3, %s6838_s21  ;;  %s6849_s19 = smov 21  }
  0x6c   : > { %1011 = vrot.lane.b32.xlu0 %v7036_v3, %s6839_s22  ;;  %1109 = vrot.lane.b32.xlu1 %v6653_v1, %s6845_s17  ;;  %s6851_s17 = smov 41  }
  0x70   : > { %1059 = vrot.lane.b32.xlu0 %v7036_v3, %s6841_s16  ;;  %1107 = vrot.lane.b32.xlu1 %v7036_v3, %s6842_s18 }
  0x74   : > { %384 = vperm.xlu1 %6652, %v322_v4   ;;  %389 = vperm.xlu0 %6651, %v323_v5  }
  0xba   : > { %v397_v7 = vpop.permute.xlu0 %396  ;;  %v448_v8 = vpop.permute.xlu1 %447 }
  0xbb   : > { %6109 = vmatpush3.bf16.msra.mxu1 %v397_v7  ;;  %6115 = vmatpush3.bf16.msra.mxu0 %v448_v8 }
  0xbc   : > { %6120 = vmatprep.subr.bf16.mxu1 %v6829_v0  ;;  %6126 = vmatprep.subr.bf16.mxu0 %v6829_v0 }
  0xbe   : > { %v395_v9 = vpop.permute.xlu0 %394  ;;  %v499_v10 = vpop.permute.xlu1 %498 }
  0xbf   : > { %6111 = vmatmul.mubr.msk.bf16.vlgmr.msra.gmra.mxu1 %vm337_vm1, %v395_v9 }
  0xc0   : > { %6121 = vmatpush3.bf16.msra.mxu1 %v499_v10  ;;  %6122 = vmatprep.mubr.msk.bf16.mxu1 %vm6830_vm0, %v6829_v0 }
  0xc1   : > { %6132 = vmatprep.subr.bf16.mxu1 %v6829_v0 }
  0xc2   : > { %v446_v11 = vpop.permute.xlu0 %445  ;;  %v497_v12 = vpop.permute.xlu1 %496 }
  0xc3   : > { %6117 = vmatmul.mubr.msk.bf16.vlgmr.msra.gmra.mxu0 %vm337_vm1, %v446_v11 }
  0xc4   : > { %6127 = vmatpush3.bf16.msra.mxu0 %v397_v7  ;;  %6128 = vmatprep.mubr.msk.bf16.mxu0 %vm6830_vm0, %v6829_v0 }
  0xc5   : > { %6138 = vmatprep.subr.bf16.mxu0 %v6829_v0 }
  0xc6   : > { %v603_v13 = vpop.permute.xlu0 %602  ;;  %v553_v14 = vpop.permute.xlu1 %552 }
  0xc7   : > { %6123 = vmatmul.mubr.msk.bf16.vlgmr.msra.gmra.mxu1 %vm337_vm1, %v497_v12 }
  0xc8   : > { %6133 = vmatpush3.bf16.msra.mxu1 %v603_v13  ;;  %6134 = vmatprep.mubr.msk.bf16.mxu1 %vm6830_vm0, %v6829_v0 }
  0xc9   : > { %6144 = vmatprep.subr.bf16.mxu1 %v6829_v0 }
  0xca   : > { %v601_v15 = vpop.permute.xlu0 %600  ;;  %v702_v16 = vpop.permute.xlu1 %701 }
  0xcb   : > { %6129 = vmatmul.mubr.msk.bf16.vlgmr.msra.gmra.mxu0 %vm337_vm1, %v553_v14 }
  0xcc   : > { %6139 = vmatpush3.bf16.msra.mxu0 %v499_v10  ;;  %6140 = vmatprep.mubr.msk.bf16.mxu0 %vm6830_vm0, %v6829_v0 }
  0xcd   : > { %6150 = vmatprep.subr.bf16.mxu0 %v6829_v0 }
  0xce   : > { %v652_v17 = vpop.permute.xlu0 %651  ;;  %v700_v18 = vpop.permute.xlu1 %699 }
  0xcf   : > { %6135 = vmatmul.mubr.msk.bf16.vlgmr.msra.gmra.mxu1 %vm337_vm1, %v601_v15 }
  0xd0   : > { %6145 = vmatpush3.bf16.msra.mxu1 %v702_v16  ;;  %6146 = vmatprep.mubr.msk.bf16.mxu1 %vm6830_vm0, %v6829_v0 }
  0xd1   : > { %6156 = vmatprep.subr.bf16.mxu1 %v6829_v0 }
  0xd2   : > { %v809_v19 = vpop.permute.xlu0 %808  ;;  %v859_v20 = vpop.permute.xlu1 %858 }
  0xd3   : > { %6141 = vmatmul.mubr.msk.bf16.vlgmr.msra.gmra.mxu0 %vm337_vm1, %v652_v17 }
  0xd4   : > { %6151 = vmatpush3.bf16.msra.mxu0 %v448_v8  ;;  %6152 = vmatprep.mubr.msk.bf16.mxu0 %vm6830_vm0, %v6829_v0 }
  0xd5   : > { %6162 = vmatprep.subr.bf16.mxu0 %v6829_v0 }
  0xd6   : > { %v910_v21 = vpop.permute.xlu0 %909  ;;  %v857_v22 = vpop.permute.xlu1 %856 }
  0xd7   : > { %6147 = vmatmul.mubr.msk.bf16.vlgmr.msra.gmra.mxu1 %vm337_vm1, %v700_v18 }
  0xd8   : > { %6157 = vmatpush3.bf16.msra.mxu1 %v499_v10  ;;  %6158 = vmatprep.mubr.msk.bf16.mxu1 %vm6830_vm0, %v6829_v0 }
  0xd9   : > { %6168 = vmatprep.subr.bf16.mxu1 %v6829_v0 }
  0xda   : > { %v908_v23 = vpop.permute.xlu0 %907  ;;  %v964_v24 = vpop.permute.xlu1 %963 }
  0xdb   : > { %6153 = vmatmul.mubr.msk.bf16.vlgmr.msra.gmra.mxu0 %vm337_vm1, %v7036_v3 }
  0xdc   : > { %6163 = vmatpush3.bf16.msra.mxu0 %v859_v20  ;;  %6164 = vmatprep.mubr.msk.bf16.mxu0 %vm6830_vm0, %v6829_v0 }
  0xdd   : > { %6174 = vmatprep.subr.bf16.mxu0 %v6829_v0 }
  0xde   : > { %v1012_v25 = vpop.permute.xlu0 %1011  ;;  %v1110_v26 = vpop.permute.xlu1 %1109 }
  0xdf   : > { %6159 = vmatmul.mubr.msk.bf16.vlgmr.msra.gmra.mxu1 %vm337_vm1, %v809_v19 }
  0xe0   : > { %6169 = vmatpush3.bf16.msra.mxu1 %v910_v21  ;;  %6170 = vmatprep.mubr.msk.bf16.mxu1 %vm6830_vm0, %v6829_v0 }
  0xe1   : > { %6180 = vmatprep.subr.bf16.mxu1 %v6829_v0 }
  0xe2   : > { %v1060_v27 = vpop.permute.xlu0 %1059  ;;  %v1108_v28 = vpop.permute.xlu1 %1107 }
  0xe3   : > { %6165 = vmatmul.mubr.msk.bf16.vlgmr.msra.gmra.mxu0 %vm337_vm1, %v857_v22 }
  0xe4   : > { %6175 = vmatpush3.bf16.msra.mxu0 %v499_v10  ;;  %6176 = vmatprep.mubr.msk.bf16.mxu0 %vm6830_vm0, %v6829_v0 }
  0xe5   : > { %6186 = vmatprep.subr.bf16.mxu0 %v6829_v0 }
  0xe7   : > { %6171 = vmatmul.mubr.msk.bf16.vlgmr.msra.gmra.mxu1 %vm337_vm1, %v908_v23 }
  0xe8   : > { %6181 = vmatpush3.bf16.msra.mxu1 %v702_v16  ;;  %6182 = vmatprep.mubr.msk.bf16.mxu1 %vm6830_vm0, %v6829_v0 }
  0xe9   : > { %6192 = vmatprep.subr.bf16.mxu1 %v6829_v0 }
  0xeb   : > { %6177 = vmatmul.mubr.msk.bf16.vlgmr.msra.gmra.mxu0 %vm337_vm1, %v964_v24 }
  0xec   : > { %6187 = vmatpush3.bf16.msra.mxu0 %v910_v21  ;;  %6188 = vmatprep.mubr.msk.bf16.mxu0 %vm6830_vm0, %v6829_v0 }
  0xed   : > { %6198 = vmatprep.subr.mxu0 %v6829_v0 }
  0xef   : > { %6183 = vmatmul.mubr.msk.bf16.vlgmr.msra.gmra.mxu1 %vm337_vm1, %v1012_v25  ;;  %v7130_v37 = vpop.permute.xlu0 %389  ;;  %v7133_v61 = vpop.permute.xlu1 %384 }
  0xf0   : > { %6193 = vmatpush3.bf16.msra.mxu1 %v1110_v26  ;;  %6194 = vmatprep.mubr.msk.bf16.mxu1 %vm6830_vm0, %v6829_v0 }
  0xf1   : > { %6203 = vmatprep.subr.mxu1 %v6829_v0 }
  0xf3   : > { %6189 = vmatmul.mubr.msk.bf16.vlgmr.msra.gmra.mxu0 %vm337_vm1, %v1060_v27 }
  0xf4   : > { %6200 = vmatprep.mubr.msk.f32.mxu0 %vm6830_vm0, %v6829_v0  ;;  %6199 = vmatpush3.msk.msra.mxu0 %vm1172_vm3, %v7125_v34 }
  0xf5   : > { %6208 = vmatprep.subr.mxu0 %v6829_v0 }
  0xf7   : > { %6195 = vmatmul.mubr.msk.bf16.vlgmr.msra.gmra.mxu1 %vm337_vm1, %v1108_v28  ;;  %vm3861_vm1 = vcmask 519552  }
  0xf8   : > { %6205 = vmatprep.mubr.msk.f32.mxu1 %vm6830_vm0, %v6829_v0  ;;  %6204 = vmatpush3.msk.msra.mxu1 %vm1172_vm3, %v7120_v33 }
  0xf9   : > { %6213 = vmatprep.subr.mxu1 %v6829_v0 }
 0x10d   : > { %v375_v29 = vpop.f32.mrf.mxu0 }
 0x10e   : > { %v392_v4 = vadd.f32 %v7133_v61, %v375_v29 }
 0x10f   : > { %v6106_v30 = vpop.f32.mrf.mxu0 }
 0x111   : > { %v378_v31 = vpop.f32.mrf.mxu0 }
 0x112   : > { %v393_v42 = vadd.f32 %v7130_v37, %v378_v31 }
 0x113   : > { %v6107_v32 = vpop.f32.mrf.mxu0 }
 0x17f   : > { %v436_v35 = vpop.f32.mrf.mxu1 }
 0x180   : > { %v443_v11 = vadd.f32 %v436_v35, %v392_v4 }
 0x181   : > { %v6112_v36 = vpop.f32.mrf.mxu1 }
 0x183   : > { %v439_v38 = vpop.f32.mrf.mxu1  ;;  %v487_v39 = vpop.f32.mrf.mxu0 }
 0x184   : > { %v444_v45 = vadd.f32 %v439_v38, %v393_v42  ;;  %v494_v16 = vadd.f32 %v487_v39, %v443_v11 }
 0x185   : > { %v6113_v40 = vpop.f32.mrf.mxu1  ;;  %v6118_v41 = vpop.f32.mrf.mxu0 }
 0x187   : > { %v490_v43 = vpop.f32.mrf.mxu0  ;;  %v538_v44 = vpop.f32.mrf.mxu1 }
 0x188   : > { %v495_v48 = vadd.f32 %v490_v43, %v444_v45  ;;  %v545_v21 = vadd.f32 %v538_v44, %v494_v16 }
 0x189   : > { %v6119_v46 = vpop.f32.mrf.mxu0  ;;  %v6124_v47 = vpop.f32.mrf.mxu1 }
 0x18b   : > { %v541_v49 = vpop.f32.mrf.mxu1  ;;  %v591_v50 = vpop.f32.mrf.mxu0 }
 0x18c   : > { %v546_v51 = vadd.f32 %v541_v49, %v495_v48  ;;  %v598_v35 = vadd.f32 %v591_v50, %v7133_v61 }
 0x18d   : > { %v6125_v52 = vpop.f32.mrf.mxu1  ;;  %v6130_v53 = vpop.f32.mrf.mxu0 }
 0x18e   : > { %v547_v54 = vmul.f32 0.5, %v546_v51 }
 0x18f   : > { %v594_v55 = vpop.f32.mrf.mxu0  ;;  %v642_v56 = vpop.f32.mrf.mxu1 }
 0x190   : > { %6658 = vtanh.f32 %v547_v54  ;;  %v599_v1 = vadd.f32 %v594_v55, %v7130_v37  ;;  %v649_v43 = vadd.f32 %v642_v56, %v598_v35 }
 0x191   : > { %v6131_v57 = vpop.f32.mrf.mxu0  ;;  %v6136_v58 = vpop.f32.mrf.mxu1 }
 0x193   : > { %v645_v59 = vpop.f32.mrf.mxu1  ;;  %v690_v60 = vpop.f32.mrf.mxu0 }
 0x194   : > { %v650_v5 = vadd.f32 %v645_v59, %v599_v1  ;;  %v697_v48 = vadd.f32 %v690_v60, %v649_v43 }
 0x195   : > { %v6137_v62 = vpop.f32.mrf.mxu1  ;;  %v6142_v63 = vpop.f32.mrf.mxu0 }
 0x197   : > { %v693_v2 = vpop.f32.mrf.mxu0  ;;  %v741_v3 = vpop.f32.mrf.mxu1 }
 0x198   : > { %v698_v8 = vadd.f32 %v693_v2, %v650_v5  ;;  %v748_v54 = vadd.f32 %v741_v3, %v697_v48 }
 0x199   : > { %v6143_v6 = vpop.f32.mrf.mxu0  ;;  %v6148_v7 = vpop.f32.mrf.mxu1 }
 0x19b   : > { %v744_v9 = vpop.f32.mrf.mxu1  ;;  %v7137_v10 = vpop.f32.mrf.mxu0 }
 0x19c   : > { %v749_v12 = vadd.f32 %v744_v9, %v698_v8  ;;  %v806_v3 = vadd.f32 %v7137_v10, %v7133_v61 }
 0x19d   : > { %v6659_v13 = vpop.eup %6658  ;;  %v6149_v14 = vpop.f32.mrf.mxu1 }
 0x19e   : > { %v6154_v15 = vpop.f32.mrf.mxu0  ;;  %v549_v17 = vmul.f32 0.5, %v6659_v13  ;;  %v750_v18 = vmul.f32 0.5, %v749_v12 }
 0x19f   : > { %v847_v20 = vpop.f32.mrf.mxu1 }
 0x1a0   : > { %v802_v19 = vpop.f32.mrf.mxu0  ;;  %v550_v22 = vadd.f32 0.5, %v549_v17  ;;  %6660 = vtanh.f32 %v750_v18  ;;  %v854_v9 = vadd.f32 %v847_v20, %v806_v3 }
 0x1a1   : > { %v6160_v24 = vpop.f32.mrf.mxu1  ;;  %v807_v30 = vadd.f32 %v802_v19, %v7130_v37 }
 0x1a2   : > { %v6155_v23 = vpop.f32.mrf.mxu0  ;;  %v7139_v25 = vmul.f32 %v550_v22, %v545_v21 }
 0x1a3   : > { %v850_v26 = vpop.f32.mrf.mxu1 }
 0x1a4   : > { %v898_v27 = vpop.f32.mrf.mxu0  ;;  %1560 = vrot.lane.b32.xlu0 %v7139_v25, %s6832_s9  ;;  %6206 = vmatmul.mubr.msk.f32.vlgmr.msra.gmra.mxu1 %vm1168_vm4, %v7139_v25  ;;  %v855_v36 = vadd.f32 %v850_v26, %v807_v30 }
 0x1a5   : > { %v6161_v28 = vpop.f32.mrf.mxu1  ;;  %6214 = vmatpush3.msk.msra.mxu1 %vm1172_vm3, %v7120_v33  ;;  %6215 = vmatprep.mubr.msk.f32.mxu1 %vm6830_vm0, %v6829_v0  ;;  %v905_v14 = vadd.f32 %v898_v27, %v854_v9 }
 0x1a6   : > { %v6166_v29 = vpop.f32.mrf.mxu0  ;;  %6223 = vmatprep.subr.mxu1 %v6829_v0 }
 0x1a7   : > { %v949_v32 = vpop.f32.mrf.mxu1 }
 0x1a8   : > { %v901_v31 = vpop.f32.mrf.mxu0 }
 0x1a9   : > { %v6172_v39 = vpop.f32.mrf.mxu1  ;;  %v906_v40 = vadd.f32 %v901_v31, %v855_v36 }
 0x1aa   : > { %v6167_v38 = vpop.f32.mrf.mxu0 }
 0x1ab   : > { %v952_v41 = vpop.f32.mrf.mxu1 }
 0x1ac   : > { %v1002_v42 = vpop.f32.mrf.mxu0  ;;  %v957_v44 = vadd.f32 %v952_v41, %v906_v40 }
 0x1ad   : > { %v6661_v45 = vpop.eup %6660  ;;  %v6173_v46 = vpop.f32.mrf.mxu1  ;;  %v1009_v10 = vadd.f32 %v1002_v42, %v7133_v61 }
 0x1ae   : > { %v6178_v47 = vpop.f32.mrf.mxu0  ;;  %v752_v49 = vmul.f32 0.5, %v6661_v45  ;;  %v958_v51 = vmul.f32 0.5, %v957_v44 }
 0x1af   : > { %v1050_v53 = vpop.f32.mrf.mxu1 }
 0x1b0   : > { %v1005_v52 = vpop.f32.mrf.mxu0  ;;  %v753_v55 = vadd.f32 0.5, %v752_v49  ;;  %6662 = vtanh.f32 %v958_v51  ;;  %v1057_v19 = vadd.f32 %v1050_v53, %v1009_v10 }
 0x1b1   : > { %v6184_v57 = vpop.f32.mrf.mxu1  ;;  %v1010_v60 = vadd.f32 %v1005_v52, %v7130_v37  ;;  %v956_v37 = vadd.f32 %v949_v32, %v905_v14 }
 0x1b2   : > { %v6179_v50 = vpop.f32.mrf.mxu0  ;;  %v754_v58 = vmul.f32 %v753_v55, %v748_v54 }
 0x1b3   : > { %v1053_v59 = vpop.f32.mrf.mxu1 }
 0x1b4   : > { %v1098_v62 = vpop.f32.mrf.mxu0  ;;  %1486 = vrot.lane.b32.xlu1 %v754_v58, %s6832_s9  ;;  %6201 = vmatmul.mubr.msk.f32.vlgmr.msra.gmra.mxu0 %vm1168_vm4, %v754_v58  ;;  %v1058_v4 = vadd.f32 %v1053_v59, %v1010_v60 }
 0x1b5   : > { %v6185_v56 = vpop.f32.mrf.mxu1  ;;  %6209 = vmatpush3.msk.msra.mxu0 %vm1172_vm3, %v7125_v34  ;;  %6210 = vmatprep.mubr.msk.f32.mxu0 %vm6830_vm0, %v6829_v0  ;;  %v1105_v21 = vadd.f32 %v1098_v62, %v1057_v19 }
 0x1b6   : > { %v6190_v63 = vpop.f32.mrf.mxu0  ;;  %6218 = vmatprep.subr.mxu0 %v6829_v0 }
 0x1b7   : > { %v1149_v2 = vpop.f32.mrf.mxu1 }
 0x1b8   : > { %v1101_v1 = vpop.f32.mrf.mxu0  ;;  %v1156_v23 = vadd.f32 %v1149_v2, %v1105_v21 }
 0x1b9   : > { %v6196_v6 = vpop.f32.mrf.mxu1  ;;  %v1106_v7 = vadd.f32 %v1101_v1, %v1058_v4 }
 0x1ba   : > { %v6191_v5 = vpop.f32.mrf.mxu0 }
 0x1bb   : > { %v1152_v8 = vpop.f32.mrf.mxu1 }
 0x1bc   : > { %v1157_v11 = vadd.f32 %v1152_v8, %v1106_v7 }
 0x1bd   : > { %v6663_v12 = vpop.eup %6662  ;;  %v6197_v13 = vpop.f32.mrf.mxu1 }
 0x1be   : > { %v960_v15 = vmul.f32 0.5, %v6663_v12  ;;  %v1158_v16 = vmul.f32 0.5, %v1157_v11 }
 0x1c0   : > { %v961_v17 = vadd.f32 0.5, %v960_v15  ;;  %6664 = vtanh.f32 %v1158_v16 }
 0x1c2   : > { %v962_v18 = vmul.f32 %v961_v17, %v956_v37 }
 0x1c4   : > { %1717 = vrot.lane.b32.xlu0 %v962_v18, %s6832_s9  ;;  %6216 = vmatmul.mubr.msk.f32.vlgmr.msra.gmra.mxu1 %vm1168_vm4, %v962_v18 }
 0x1c5   : > { %6224 = vmatpush3.msk.msra.mxu1 %vm1172_vm3, %v7120_v33  ;;  %6225 = vmatprep.mubr.msk.f32.mxu1 %vm6830_vm0, %v6829_v0 }
 0x1c6   : > { %6233 = vmatprep.subr.mxu1 %v6829_v0 }
 0x1c8   : > { %1874 = vrot.lane.b32.xlu0 %v7139_v25, %s6843_s23 }
 0x1cc   : > { %2031 = vrot.lane.b32.xlu0 %v962_v18, %s6843_s23 }
 0x1cd   : > { %v6665_v20 = vpop.eup %6664 }
 0x1ce   : > { %v1160_v22 = vmul.f32 0.5, %v6665_v20 }
 0x1d0   : > { %v1161_v24 = vadd.f32 0.5, %v1160_v22  ;;  %2188 = vrot.lane.b32.xlu0 %v7139_v25, %s6847_s14 }
 0x1d2   : > { %v1162_v26 = vmul.f32 %v1161_v24, %v1156_v23  ;;  %v2430_v24 = vld [vmem:[#allocation8] sm:$0xf] }
 0x1d4   : > { %2345 = vrot.lane.b32.xlu0 %v962_v18, %s6847_s14  ;;  %1643 = vrot.lane.b32.xlu1 %v1162_v26, %s6832_s9  ;;  %s6848_s9 = smov 11  }
 0x1d5   : > { %6211 = vmatmul.mubr.msk.f32.vlgmr.msra.gmra.mxu0 %vm1168_vm4, %v1162_v26 }
 0x1d6   : > { %6219 = vmatpush3.msk.msra.mxu0 %vm1172_vm3, %v7125_v34  ;;  %6220 = vmatprep.mubr.msk.f32.mxu0 %vm6830_vm0, %v6829_v0 }
 0x1d7   : > { %6228 = vmatprep.subr.mxu0 %v6829_v0 }
 0x1d8   : > { %1800 = vrot.lane.b32.xlu1 %v754_v58, %s6843_s23 }
 0x1dc   : > { %1957 = vrot.lane.b32.xlu1 %v1162_v26, %s6843_s23 }
 0x1e0   : > { %2114 = vrot.lane.b32.xlu1 %v754_v58, %s6847_s14 }
 0x1e4   : > { %2271 = vrot.lane.b32.xlu1 %v1162_v26, %s6847_s14  ;;  %s6853_s14 = smov 61  }
 0x216   : > { %v1561_v61 = vpop.permute.xlu0 %1560 }
 0x217   : > { %6226 = vmatmul.mubr.msk.f32.vlgmr.msra.gmra.mxu1 %vm1168_vm4, %v1561_v61  ;;  %v5877_v61 = vcombine.low %v2430_v24, %v2430_v24 }
 0x218   : > { %6234 = vmatpush3.msk.msra.mxu1 %vm1172_vm3, %v7120_v33  ;;  %6235 = vmatprep.mubr.msk.f32.mxu1 %vm6830_vm0, %v6829_v0 }
 0x219   : > { %6243 = vmatprep.subr.mxu1 %v6829_v0 }
 0x226   : > { %v1487_v25 = vpop.permute.xlu1 %1486 }
 0x227   : > { %6221 = vmatmul.mubr.msk.f32.vlgmr.msra.gmra.mxu0 %vm1168_vm4, %v1487_v25 }
 0x228   : > { %6229 = vmatpush3.msk.msra.mxu0 %vm1172_vm3, %v7125_v34  ;;  %6230 = vmatprep.mubr.msk.f32.mxu0 %vm6830_vm0, %v6829_v0 }
 0x229   : > { %6238 = vmatprep.subr.mxu0 %v6829_v0 }
 0x236   : > { %v1718_v27 = vpop.permute.xlu0 %1717 }
 0x237   : > { %6236 = vmatmul.mubr.msk.f32.vlgmr.msra.gmra.mxu1 %vm1168_vm4, %v1718_v27 }
 0x238   : > { %6244 = vmatpush3.msk.msra.mxu1 %vm1172_vm3, %v7120_v33  ;;  %6245 = vmatprep.mubr.msk.f32.mxu1 %vm6830_vm0, %v6829_v0 }
 0x239   : > { %6253 = vmatprep.subr.mxu1 %v6829_v0 }
 0x23a   : > { %v1875_v28 = vpop.permute.xlu0 %1874 }
 0x23b   : > { %6246 = vmatmul.mubr.msk.f32.vlgmr.msra.gmra.mxu1 %vm1168_vm4, %v1875_v28 }
 0x23c   : > { %6254 = vmatpush3.msk.msra.mxu1 %vm1172_vm3, %v7120_v33  ;;  %6255 = vmatprep.mubr.msk.f32.mxu1 %vm6830_vm0, %v6829_v0 }
 0x23d   : > { %6263 = vmatprep.subr.mxu1 %v6829_v0 }
 0x23e   : > { %v2032_v29 = vpop.permute.xlu0 %2031 }
 0x23f   : > { %6256 = vmatmul.mubr.msk.f32.vlgmr.msra.gmra.mxu1 %vm1168_vm4, %v2032_v29 }
 0x240   : > { %6264 = vmatpush3.msk.msra.mxu1 %vm1172_vm3, %v7120_v33  ;;  %6265 = vmatprep.mubr.msk.f32.mxu1 %vm6830_vm0, %v6829_v0 }
 0x241   : > { %6273 = vmatprep.subr.mxu1 %v6829_v0 }
 0x242   : > { %v2189_v30 = vpop.permute.xlu0 %2188 }
 0x243   : > { %6266 = vmatmul.mubr.msk.f32.vlgmr.msra.gmra.mxu1 %vm1168_vm4, %v2189_v30 }
 0x244   : > { %6274 = vmatpush3.msk.msra.mxu1 %vm1172_vm3, %v7120_v33  ;;  %6275 = vmatprep.mubr.msk.f32.mxu1 %vm6830_vm0, %v6829_v0 }
 0x245   : > { %6284 = vmatprep.subr.bf16.mxu1 %v6829_v0 }
 0x246   : > { %v2346_v31 = vpop.permute.xlu0 %2345  ;;  %v1644_v32 = vpop.permute.xlu1 %1643 }
 0x247   : > { %6231 = vmatmul.mubr.msk.f32.vlgmr.msra.gmra.mxu0 %vm1168_vm4, %v1644_v32  ;;  %6276 = vmatmul.mubr.msk.f32.vlgmr.msra.gmra.mxu1 %vm1168_vm4, %v2346_v31 }
 0x248   : > { %6239 = vmatpush3.msk.msra.mxu0 %vm1172_vm3, %v7125_v34  ;;  %6240 = vmatprep.mubr.msk.f32.mxu0 %vm6830_vm0, %v6829_v0 }
 0x249   : > { %6248 = vmatprep.subr.mxu0 %v6829_v0  ;;  %6286 = vmatprep.mubr.msk.bf16.mxu1 %vm6830_vm0, %v6829_v0 }
 0x24a   : > { %v1801_v33 = vpop.permute.xlu1 %1800 }
 0x24b   : > { %6241 = vmatmul.mubr.msk.f32.vlgmr.msra.gmra.mxu0 %vm1168_vm4, %v1801_v33 }
 0x24c   : > { %6249 = vmatpush3.msk.msra.mxu0 %vm1172_vm3, %v7125_v34  ;;  %6250 = vmatprep.mubr.msk.f32.mxu0 %vm6830_vm0, %v6829_v0 }
 0x24d   : > { %6258 = vmatprep.subr.mxu0 %v6829_v0 }
 0x24e   : > { %v1958_v35 = vpop.permute.xlu1 %1957 }
 0x24f   : > { %6251 = vmatmul.mubr.msk.f32.vlgmr.msra.gmra.mxu0 %vm1168_vm4, %v1958_v35 }
 0x250   : > { %6259 = vmatpush3.msk.msra.mxu0 %vm1172_vm3, %v7125_v34  ;;  %6260 = vmatprep.mubr.msk.f32.mxu0 %vm6830_vm0, %v6829_v0 }
 0x251   : > { %6268 = vmatprep.subr.mxu0 %v6829_v0 }
 0x252   : > { %v2115_v36 = vpop.permute.xlu1 %2114 }
 0x253   : > { %6261 = vmatmul.mubr.msk.f32.vlgmr.msra.gmra.mxu0 %vm1168_vm4, %v2115_v36  ;;  %v2429_v36 = vld [vmem:[%s7639_s5] sm:$0xff] }
 0x254   : > { %6269 = vmatpush3.msk.msra.mxu0 %vm1172_vm3, %v7125_v34  ;;  %6270 = vmatprep.mubr.msk.f32.mxu0 %vm6830_vm0, %v6829_v0 }
 0x255   : > { %6278 = vmatprep.subr.bf16.mxu0 %v6829_v0 }
 0x256   : > { %v2272_v38 = vpop.permute.xlu1 %2271 }
 0x257   : > { %6271 = vmatmul.mubr.msk.f32.vlgmr.msra.gmra.mxu0 %vm1168_vm4, %v2272_v38  ;;  %vm4323_vm4 = vcmask 913152  }
 0x258   : > { %6280 = vmatprep.mubr.msk.bf16.mxu0 %vm6830_vm0, %v6829_v0 }
 0x264   : > { %v1318_v39 = vpop.f32.mrf.mxu1 }
 0x266   : > { %v6207_v40 = vpop.f32.mrf.mxu1 }
 0x274   : > { %v1242_v41 = vpop.f32.mrf.mxu0 }
 0x275   : > { %v1319_v42 = vadd.f32 %v1318_v39, %v1242_v41 }
 0x276   : > { %v6202_v43 = vpop.f32.mrf.mxu0 }
 0x277   : > { %v5933_v44 = vpack.c.bf16 %v1319_v42, %v1319_v42 }
 0x279   : > { %1326 = vrot.lane.b32.xlu1 %v5933_v44, %s6848_s9  ;;  %s6854_s9 = smov 71  }
 0x284   : > { %v1473_v34 = vpop.f32.mrf.mxu1 }
 0x286   : > { %v6217_v45 = vpop.f32.mrf.mxu1 }
 0x295   : > { %v1400_v46 = vpop.f32.mrf.mxu0 }
 0x296   : > { %v1474_v47 = vadd.f32 %v1473_v34, %v1400_v46 }
 0x297   : > { %v6212_v48 = vpop.f32.mrf.mxu0 }
 0x298   : > { %v5934_v49 = vpack.c.bf16 %v1474_v47, %v1474_v47 }
 0x29a   : > { %1481 = vrot.lane.b32.xlu0 %v5934_v49, %s6849_s19  ;;  %s6855_s19 = smov 81  }
 0x2d7   : > { %v1630_v51 = vpop.f32.mrf.mxu1 }
 0x2d9   : > { %v6227_v52 = vpop.f32.mrf.mxu1 }
 0x2e7   : > { %v1556_v53 = vpop.f32.mrf.mxu0 }
 0x2e8   : > { %v1631_v54 = vadd.f32 %v1630_v51, %v1556_v53 }
 0x2e9   : > { %v6222_v55 = vpop.f32.mrf.mxu0 }
 0x2ea   : > { %v5935_v50 = vpack.c.bf16 %v1631_v54, %v1631_v54 }
 0x2eb   : > { %v1327_v57 = vpop.permute.xlu1 %1326 }
 0x2ec   : > { %1330 = vst.msk [vmem:[#allocation2] sm:$0xf] %vm1329_vm5, %v1327_v57  ;;  %1638 = vrot.lane.b32.xlu1 %v5935_v50, %s6850_s20  ;;  %s6857_s20 = smov 104   ;;  %vm4477_vm5 = vcmask 1044352  }
 0x2f7   : > { %v1787_v58 = vpop.f32.mrf.mxu1 }
 0x2f9   : > { %v6237_v59 = vpop.f32.mrf.mxu1 }
 0x2fb   : > { %v1944_v62 = vpop.f32.mrf.mxu1 }
 0x2fd   : > { %v6247_v56 = vpop.f32.mrf.mxu1 }
 0x2ff   : > { %v2101_v63 = vpop.f32.mrf.mxu1 }
 0x301   : > { %v6257_v60 = vpop.f32.mrf.mxu1 }
 0x303   : > { %v2258_v1 = vpop.f32.mrf.mxu1 }
 0x305   : > { %v6267_v2 = vpop.f32.mrf.mxu1 }
 0x307   : > { %v1713_v3 = vpop.f32.mrf.mxu0  ;;  %v2415_v4 = vpop.f32.mrf.mxu1 }
 0x308   : > { %v1788_v5 = vadd.f32 %v1787_v58, %v1713_v3 }
 0x309   : > { %v6232_v6 = vpop.f32.mrf.mxu0  ;;  %v6277_v7 = vpop.f32.mrf.mxu1 }
 0x30a   : > { %v5936_v8 = vpack.c.bf16 %v1788_v5, %v1788_v5 }
 0x30b   : > { %v1870_v9 = vpop.f32.mrf.mxu0 }
 0x30c   : > { %v1482_v11 = vpop.permute.xlu0 %1481  ;;  %v1945_v12 = vadd.f32 %v1944_v62, %v1870_v9  ;;  %1795 = vrot.lane.b32.xlu0 %v5936_v8, %s6851_s17  ;;  %s7650_s17 = smov 118  }
 0x30d   : > { %1485 = vst.msk [vmem:[#allocation2] sm:$0xf] %vm1484_vm6, %v1482_v11  ;;  %v6242_v13 = vpop.f32.mrf.mxu0  ;;  %v7342_v11 = vld [vmem:[%s7640_s6] sm:$0xff] }
 0x30e   : > { %v5937_v14 = vpack.c.bf16 %v1945_v12, %v1945_v12  ;;  %v7349_v12 = vld [vmem:[%s7640_s6 + $0x8] sm:$0xff] }
 0x30f   : > { %v2027_v15 = vpop.f32.mrf.mxu0 }
 0x310   : > { %v2102_v16 = vadd.f32 %v2101_v63, %v2027_v15  ;;  %1952 = vrot.lane.b32.xlu1 %v5937_v14, %s6852_s29  ;;  %s7660_s29 = smov 112  }
 0x311   : > { %v6252_v37 = vpop.f32.mrf.mxu0 }
 0x312   : > { %v5938_v17 = vpack.c.bf16 %v2102_v16, %v2102_v16 }
 0x313   : > { %v2184_v18 = vpop.f32.mrf.mxu0 }
 0x314   : > { %v2259_v10 = vadd.f32 %v2258_v1, %v2184_v18  ;;  %2109 = vrot.lane.b32.xlu0 %v5938_v17, %s6853_s14  ;;  %s7661_s14 = smov 126  }
 0x315   : > { %v6262_v19 = vpop.f32.mrf.mxu0 }
 0x316   : > { %v5939_v20 = vpack.c.bf16 %v2259_v10, %v2259_v10 }
 0x317   : > { %v2341_v21 = vpop.f32.mrf.mxu0 }
 0x318   : > { %v2416_v22 = vadd.f32 %v2415_v4, %v2341_v21  ;;  %2266 = vrot.lane.b32.xlu1 %v5939_v20, %s6854_s9  ;;  %s6860_s9 = smov 88  }
 0x319   : > { %v6272_v23 = vpop.f32.mrf.mxu0 }
 0x31a   : > { %v5940_v26 = vpack.c.bf16 %v2416_v22, %v2416_v22 }
 0x31c   : > { %2423 = vrot.lane.b32.xlu0 %v5940_v26, %s6855_s19  ;;  %s6861_s19 = smov 56  }
 0x320   : > { %2487 = vrot.lane.b32.xlu0 %v5877_v61, %s6840_s13  ;;  %s6856_s13 = smov 117  }
 0x35e   : > { %v1639_v25 = vpop.permute.xlu1 %1638 }
 0x35f   : > { %1642 = vst.msk [vmem:[#allocation2] sm:$0xf] %vm1641_vm7, %v1639_v25 }
 0x37e   : > { %v1796_v27 = vpop.permute.xlu0 %1795 }
 0x37f   : > { %1799 = vst.msk [vmem:[#allocation2] sm:$0xf] %vm1798_vm8, %v1796_v27 }
 0x382   : > { %v1953_v28 = vpop.permute.xlu1 %1952 }
 0x383   : > { %1956 = vst.msk [vmem:[#allocation2] sm:$0xf] %vm1955_vm9, %v1953_v28 }
 0x386   : > { %v2110_v29 = vpop.permute.xlu0 %2109 }
 0x387   : > { %2113 = vst.msk [vmem:[#allocation2] sm:$0xf] %vm2112_vm10, %v2110_v29 }
 0x38a   : > { %v2267_v30 = vpop.permute.xlu1 %2266 }
 0x38b   : > { %2270 = vst.msk [vmem:[#allocation2] sm:$0xf] %vm2269_vm11, %v2267_v30 }
 0x38e   : > { %v2424_v31 = vpop.permute.xlu0 %2423 }
 0x38f   : > { %2427 = vst.msk [vmem:[#allocation2] sm:$0xf] %vm2426_vm12, %v2424_v31 }
 0x392   : > { %v2488_v38 = vpop.permute.xlu0 %2487 }
 0x396   : > { %v2428_v32 = vld [vmem:[#allocation2] sm:$0xf] }
 0x397   : > { %v2436_v33 = vsel %vm1172_vm3, %v2428_v32, 0  ;;  %v5878_v35 = vcombine.low %v2428_v32, %v2428_v32 }
 0x398   : > { %6279 = vmatpush3.bf16.msra.mxu0 %v2436_v33 }
 0x399   : > { %2594 = vrot.lane.b32.xlu0 %v5878_v35, %s6856_s13  ;;  %2492 = vrot.lane.b32.xlu1 %v5878_v35, %s6831_s8  ;;  %s6859_s8 = smov 72   ;;  %s7662_s13 = smov 80  }
 0x39a   : > { %6290 = vmatprep.subr.bf16.mxu0 %v6829_v0 }
 0x39b   : > { %6281 = vmatmul.mubr.msk.bf16.vlgmr.msra.gmra.mxu0 %vm2431_vm13, %v2430_v24 }
 0x39c   : > { %6292 = vmatprep.mubr.msk.bf16.mxu0 %vm6830_vm0, %v6829_v0 }
 0x39d   : > { %2592 = vrot.lane.b32.xlu0 %v5877_v61, %s6857_s20  ;;  %2543 = vrot.lane.b32.xlu1 %v5878_v35, %s7650_s17  ;;  %s6862_s20 = smov 107   ;;  %s6864_s17 = smov 108  }
 0x3a1   : > { %2651 = vrot.lane.b32.xlu0 %v5877_v61, %s7648_s15  ;;  %2541 = vrot.lane.b32.xlu1 %v5877_v61, %s7660_s29  ;;  %s6863_s15 = smov 40  }
 0x3a5   : > { %2796 = vrot.lane.b32.xlu0 %v5878_v35, %s6843_s23  ;;  %2699 = vrot.lane.b32.xlu1 %v5878_v35, %s7661_s14  ;;  %s6865_s23 = smov 24   ;;  %s6871_s14 = smov 58  }
 0x3a9   : > { %2794 = vrot.lane.b32.xlu0 %v5877_v61, %s6859_s8  ;;  %2697 = vrot.lane.b32.xlu1 %v5877_v61, %s6860_s9 }
 0x3ad   : > { %2899 = vrot.lane.b32.xlu0 %v5877_v61, %s6861_s19  ;;  %2748 = vrot.lane.b32.xlu1 %v5877_v61, %s7662_s13  ;;  %s6866_s19 = smov 106  }
 0x3b1   : > { %2998 = vrot.lane.b32.xlu0 %v5878_v35, %s6862_s20  ;;  %2853 = vrot.lane.b32.xlu1 %v5877_v61, %s6838_s21  ;;  %s6867_s20 = smov 8  }
 0x3b5   : > { %2996 = vrot.lane.b32.xlu0 %v5877_v61, %s6863_s15  ;;  %2947 = vrot.lane.b32.xlu1 %v5878_v35, %s6864_s17  ;;  %s6869_s15 = smov 78  }
 0x3b9   : > { %3101 = vrot.lane.b32.xlu0 %v5877_v61, %s6865_s23  ;;  %2945 = vrot.lane.b32.xlu1 %v5877_v61, %s6839_s22  ;;  %s6870_s23 = smov 68  }
 0x3bd   : > { %3147 = vrot.lane.b32.xlu0 %v5877_v61, %s6842_s18  ;;  %3055 = vrot.lane.b32.xlu1 %v5877_v61, %s6841_s16 }
 0x3c1   : > { %2480 = vperm.xlu0 %6651, %v2429_v36   ;;  %3195 = vrot.lane.b32.xlu1 %v5878_v35, %s6866_s19  ;;  %s7663_s19 = smov 118  }
 0x3c5   : > { %3193 = vrot.lane.b32.xlu1 %v5877_v61, %s6867_s20  ;;  %s6868_s20 = smov 98  }
 0x40b   : > { %v2493_v39 = vpop.permute.xlu1 %2492  ;;  %v2595_v40 = vpop.permute.xlu0 %2594 }
 0x40c   : > { %v2498_v41 = vsel %vm1172_vm3, %v2493_v39, 0  ;;  %v2600_v44 = vsel %vm1172_vm3, %v2595_v40, 0 }
 0x40d   : > { %6285 = vmatpush3.bf16.msra.mxu1 %v2498_v41 }
 0x40e   : > { %6296 = vmatprep.subr.bf16.mxu1 %v6829_v0 }
 0x40f   : > { %v2544_v42 = vpop.permute.xlu1 %2543  ;;  %v2593_v43 = vpop.permute.xlu0 %2592 }
 0x410   : > { %v2549_v34 = vsel %vm1172_vm3, %v2544_v42, 0  ;;  %6287 = vmatmul.mubr.msk.bf16.vlgmr.msra.gmra.mxu1 %vm2431_vm13, %v2488_v38 }
 0x411   : > { %6291 = vmatpush3.bf16.msra.mxu0 %v2549_v34  ;;  %6297 = vmatpush3.bf16.msra.mxu1 %v2600_v44 }
 0x412   : > { %6302 = vmatprep.subr.bf16.mxu0 %v6829_v0  ;;  %6298 = vmatprep.mubr.msk.bf16.mxu1 %vm6830_vm0, %v6829_v0 }
 0x413   : > { %v2542_v45 = vpop.permute.xlu1 %2541  ;;  %6308 = vmatprep.subr.bf16.mxu1 %v6829_v0  ;;  %v2652_v46 = vpop.permute.xlu0 %2651 }
 0x414   : > { %6293 = vmatmul.mubr.msk.bf16.vlgmr.msra.gmra.mxu0 %vm2431_vm13, %v2542_v45 }
 0x415   : > { %6303 = vmatpush3.bf16.msra.mxu0 %v2498_v41  ;;  %6304 = vmatprep.mubr.msk.bf16.mxu0 %vm6830_vm0, %v6829_v0 }
 0x416   : > { %6314 = vmatprep.subr.bf16.mxu0 %v6829_v0 }
 0x417   : > { %v2700_v47 = vpop.permute.xlu1 %2699  ;;  %v2797_v49 = vpop.permute.xlu0 %2796 }
 0x418   : > { %v2705_v48 = vsel %vm1172_vm3, %v2700_v47, 0  ;;  %6299 = vmatmul.mubr.msk.bf16.vlgmr.msra.gmra.mxu1 %vm2431_vm13, %v2593_v43  ;;  %v2802_v53 = vsel %vm1172_vm3, %v2797_v49, 0 }
 0x419   : > { %6309 = vmatpush3.bf16.msra.mxu1 %v2705_v48  ;;  %6310 = vmatprep.mubr.msk.bf16.mxu1 %vm6830_vm0, %v6829_v0 }
 0x41a   : > { %6320 = vmatprep.subr.bf16.mxu1 %v6829_v0 }
 0x41b   : > { %v2698_v51 = vpop.permute.xlu1 %2697  ;;  %v2795_v54 = vpop.permute.xlu0 %2794 }
 0x41c   : > { %6305 = vmatmul.mubr.msk.bf16.vlgmr.msra.gmra.mxu0 %vm2431_vm13, %v2652_v46 }
 0x41d   : > { %6315 = vmatpush3.bf16.msra.mxu0 %v2600_v44  ;;  %6316 = vmatprep.mubr.msk.bf16.mxu0 %vm6830_vm0, %v6829_v0 }
 0x41e   : > { %6326 = vmatprep.subr.bf16.mxu0 %v6829_v0 }
 0x41f   : > { %v2749_v52 = vpop.permute.xlu1 %2748  ;;  %v2900_v50 = vpop.permute.xlu0 %2899 }
 0x420   : > { %6311 = vmatmul.mubr.msk.bf16.vlgmr.msra.gmra.mxu1 %vm2431_vm13, %v2698_v51 }
 0x421   : > { %6321 = vmatpush3.bf16.msra.mxu1 %v2802_v53  ;;  %6322 = vmatprep.mubr.msk.bf16.mxu1 %vm6830_vm0, %v6829_v0 }
 0x422   : > { %6332 = vmatprep.subr.bf16.mxu1 %v6829_v0 }
 0x423   : > { %v2854_v55 = vpop.permute.xlu1 %2853  ;;  %v2999_v59 = vpop.permute.xlu0 %2998 }
 0x424   : > { %6317 = vmatmul.mubr.msk.bf16.vlgmr.msra.gmra.mxu0 %vm2431_vm13, %v2749_v52  ;;  %v3004_v62 = vsel %vm1172_vm3, %v2999_v59, 0 }
 0x425   : > { %6327 = vmatpush3.bf16.msra.mxu0 %v2549_v34  ;;  %6328 = vmatprep.mubr.msk.bf16.mxu0 %vm6830_vm0, %v6829_v0 }
 0x426   : > { %6338 = vmatprep.subr.bf16.mxu0 %v6829_v0 }
 0x427   : > { %v2948_v57 = vpop.permute.xlu1 %2947  ;;  %v2997_v60 = vpop.permute.xlu0 %2996 }
 0x428   : > { %6323 = vmatmul.mubr.msk.bf16.vlgmr.msra.gmra.mxu1 %vm2431_vm13, %v2795_v54  ;;  %v2953_v58 = vsel %vm1172_vm3, %v2948_v57, 0 }
 0x429   : > { %6333 = vmatpush3.bf16.msra.mxu1 %v2600_v44  ;;  %6334 = vmatprep.mubr.msk.bf16.mxu1 %vm6830_vm0, %v6829_v0 }
 0x42a   : > { %6344 = vmatprep.subr.bf16.mxu1 %v6829_v0 }
 0x42b   : > { %v2946_v56 = vpop.permute.xlu1 %2945  ;;  %v3102_v2 = vpop.permute.xlu0 %3101 }
 0x42c   : > { %6329 = vmatmul.mubr.msk.bf16.vlgmr.msra.gmra.mxu0 %vm2431_vm13, %v2854_v55 }
 0x42d   : > { %6339 = vmatpush3.bf16.msra.mxu0 %v2953_v58  ;;  %6340 = vmatprep.mubr.msk.bf16.mxu0 %vm6830_vm0, %v6829_v0 }
 0x42e   : > { %6350 = vmatprep.subr.bf16.mxu0 %v6829_v0 }
 0x42f   : > { %v3056_v63 = vpop.permute.xlu1 %3055  ;;  %v3148_v4 = vpop.permute.xlu0 %3147 }
 0x430   : > { %6335 = vmatmul.mubr.msk.bf16.vlgmr.msra.gmra.mxu1 %vm2431_vm13, %v2900_v50 }
 0x431   : > { %6345 = vmatpush3.bf16.msra.mxu1 %v3004_v62  ;;  %6346 = vmatprep.mubr.msk.bf16.mxu1 %vm6830_vm0, %v6829_v0 }
 0x432   : > { %6356 = vmatprep.subr.bf16.mxu1 %v6829_v0 }
 0x433   : > { %v3196_v1 = vpop.permute.xlu1 %3195 }
 0x434   : > { %6341 = vmatmul.mubr.msk.bf16.vlgmr.msra.gmra.mxu0 %vm2431_vm13, %v2946_v56  ;;  %v3201_v3 = vsel %vm1172_vm3, %v3196_v1, 0  ;;  %vm4169_vm3 = vcmask 781952  }
 0x435   : > { %6351 = vmatpush3.bf16.msra.mxu0 %v2600_v44  ;;  %6352 = vmatprep.mubr.msk.bf16.mxu0 %vm6830_vm0, %v6829_v0 }
 0x436   : > { %6362 = vmatprep.subr.bf16.mxu0 %v6829_v0 }
 0x437   : > { %v3194_v5 = vpop.permute.xlu1 %3193 }
 0x438   : > { %6347 = vmatmul.mubr.msk.bf16.vlgmr.msra.gmra.mxu1 %vm2431_vm13, %v2997_v60 }
 0x439   : > { %6357 = vmatpush3.bf16.msra.mxu1 %v2802_v53  ;;  %6358 = vmatprep.mubr.msk.bf16.mxu1 %vm6830_vm0, %v6829_v0 }
 0x43a   : > { %6368 = vmatprep.subr.bf16.mxu1 %v6829_v0 }
 0x43c   : > { %6353 = vmatmul.mubr.msk.bf16.vlgmr.msra.gmra.mxu0 %vm2431_vm13, %v3056_v63  ;;  %v7353_v14 = vpop.permute.xlu0 %2480 }
 0x43d   : > { %6363 = vmatpush3.bf16.msra.mxu0 %v3004_v62  ;;  %6364 = vmatprep.mubr.msk.bf16.mxu0 %vm6830_vm0, %v6829_v0 }
 0x43e   : > { %6374 = vmatprep.subr.mxu0 %v6829_v0 }
 0x440   : > { %6359 = vmatmul.mubr.msk.bf16.vlgmr.msra.gmra.mxu1 %vm2431_vm13, %v3102_v2 }
 0x441   : > { %6369 = vmatpush3.bf16.msra.mxu1 %v3201_v3  ;;  %6370 = vmatprep.mubr.msk.bf16.mxu1 %vm6830_vm0, %v6829_v0 }
 0x442   : > { %6379 = vmatprep.subr.mxu1 %v6829_v0 }
 0x444   : > { %6365 = vmatmul.mubr.msk.bf16.vlgmr.msra.gmra.mxu0 %vm2431_vm13, %v3148_v4 }
 0x445   : > { %6376 = vmatprep.mubr.msk.f32.mxu0 %vm6830_vm0, %v6829_v0  ;;  %6375 = vmatpush3.msra.mxu0 %v7349_v12 }
 0x446   : > { %6384 = vmatprep.subr.mxu0 %v6829_v0 }
 0x448   : > { %6371 = vmatmul.mubr.msk.bf16.vlgmr.msra.gmra.mxu1 %vm2431_vm13, %v3194_v5 }
 0x449   : > { %6381 = vmatprep.mubr.msk.f32.mxu1 %vm6830_vm0, %v6829_v0  ;;  %6380 = vmatpush3.msra.mxu1 %v7342_v11 }
 0x44a   : > { %6389 = vmatprep.subr.mxu1 %v6829_v0 }
 0x45b   : > { %v2472_v6 = vpop.f32.mrf.mxu0 }
 0x45c   : > { %v2483_v16 = vadd.f32 %v7353_v14, %v2472_v6 }
 0x45d   : > { %v6282_v7 = vpop.f32.mrf.mxu0 }
 0x45f   : > { %v2475_v8 = vpop.f32.mrf.mxu0 }
 0x461   : > { %v6283_v9 = vpop.f32.mrf.mxu0 }
 0x4d0   : > { %v2534_v13 = vpop.f32.mrf.mxu1 }
 0x4d1   : > { %v2540_v18 = vadd.f32 %v2534_v13, %v2483_v16 }
 0x4d2   : > { %v6288_v15 = vpop.f32.mrf.mxu1 }
 0x4d4   : > { %v2537_v37 = vpop.f32.mrf.mxu1  ;;  %v2585_v17 = vpop.f32.mrf.mxu0 }
 0x4d5   : > { %v2591_v20 = vadd.f32 %v2585_v17, %v2540_v18 }
 0x4d6   : > { %v6289_v10 = vpop.f32.mrf.mxu1  ;;  %v6294_v19 = vpop.f32.mrf.mxu0 }
 0x4d8   : > { %v2588_v21 = vpop.f32.mrf.mxu0  ;;  %v2636_v22 = vpop.f32.mrf.mxu1 }
 0x4d9   : > { %v2642_v23 = vadd.f32 %v2636_v22, %v2591_v20 }
 0x4da   : > { %v6295_v24 = vpop.f32.mrf.mxu0  ;;  %v6300_v26 = vpop.f32.mrf.mxu1 }
 0x4db   : > { %v2643_v61 = vmul.f32 0.5, %v2642_v23 }
 0x4dc   : > { %v2639_v25 = vpop.f32.mrf.mxu1  ;;  %v2690_v27 = vpop.f32.mrf.mxu0 }
 0x4dd   : > { %6666 = vtanh.f32 %v2643_v61  ;;  %v2696_v35 = vadd.f32 %v2690_v27, %v7353_v14 }
 0x4de   : > { %v6301_v28 = vpop.f32.mrf.mxu1  ;;  %v6306_v29 = vpop.f32.mrf.mxu0 }
 0x4e0   : > { %v2693_v30 = vpop.f32.mrf.mxu0  ;;  %v2741_v31 = vpop.f32.mrf.mxu1 }
 0x4e1   : > { %v2747_v39 = vadd.f32 %v2741_v31, %v2696_v35 }
 0x4e2   : > { %v6307_v32 = vpop.f32.mrf.mxu0  ;;  %v6312_v33 = vpop.f32.mrf.mxu1 }
 0x4e4   : > { %v2744_v36 = vpop.f32.mrf.mxu1  ;;  %v2787_v38 = vpop.f32.mrf.mxu0 }
 0x4e5   : > { %v2793_v42 = vadd.f32 %v2787_v38, %v2747_v39 }
 0x4e6   : > { %v6313_v40 = vpop.f32.mrf.mxu1  ;;  %v6318_v41 = vpop.f32.mrf.mxu0 }
 0x4e8   : > { %v2790_v43 = vpop.f32.mrf.mxu0  ;;  %v2838_v44 = vpop.f32.mrf.mxu1 }
 0x4e9   : > { %v2844_v34 = vadd.f32 %v2838_v44, %v2793_v42 }
 0x4ea   : > { %v6667_v45 = vpop.eup %6666  ;;  %v6319_v46 = vpop.f32.mrf.mxu0 }
 0x4eb   : > { %v6324_v47 = vpop.f32.mrf.mxu1  ;;  %v2645_v48 = vmul.f32 0.5, %v6667_v45  ;;  %v2845_v49 = vmul.f32 0.5, %v2844_v34 }
 0x4ec   : > { %v2892_v52 = vpop.f32.mrf.mxu0 }
 0x4ed   : > { %v2841_v51 = vpop.f32.mrf.mxu1  ;;  %v2646_v53 = vadd.f32 0.5, %v2645_v48  ;;  %6668 = vtanh.f32 %v2845_v49  ;;  %v2898_v63 = vadd.f32 %v2892_v52, %v7353_v14 }
 0x4ee   : > { %v6330_v55 = vpop.f32.mrf.mxu0 }
 0x4ef   : > { %v6325_v54 = vpop.f32.mrf.mxu1  ;;  %v2648_v50 = vrot.slane %v2646_v53, 4 }
 0x4f0   : > { %v2895_v57 = vpop.f32.mrf.mxu0 }
 0x4f1   : > { %v2938_v58 = vpop.f32.mrf.mxu1  ;;  %v7357_v59 = vmul.f32 %v2648_v50, %v2642_v23 }
 0x4f2   : > { %v6331_v62 = vpop.f32.mrf.mxu0  ;;  %v2944_v2 = vadd.f32 %v2938_v58, %v2898_v63 }
 0x4f3   : > { %v6336_v56 = vpop.f32.mrf.mxu1  ;;  %3629 = vrot.lane.b32.xlu0 %v7357_v59, %s7663_s19  ;;  %6382 = vmatmul.mubr.msk.f32.vlgmr.msra.gmra.mxu1 %vm2431_vm13, %v7357_v59 }
 0x4f4   : > { %v2989_v1 = vpop.f32.mrf.mxu0  ;;  %6390 = vmatpush3.msra.mxu1 %v7342_v11  ;;  %6391 = vmatprep.mubr.msk.f32.mxu1 %vm6830_vm0, %v6829_v0 }
 0x4f5   : > { %v2941_v60 = vpop.f32.mrf.mxu1  ;;  %6399 = vmatprep.subr.mxu1 %v6829_v0  ;;  %v2995_v5 = vadd.f32 %v2989_v1, %v2944_v2 }
 0x4f6   : > { %v6342_v4 = vpop.f32.mrf.mxu0 }
 0x4f7   : > { %v6337_v3 = vpop.f32.mrf.mxu1 }
 0x4f8   : > { %v2992_v6 = vpop.f32.mrf.mxu0 }
 0x4f9   : > { %v3040_v7 = vpop.f32.mrf.mxu1 }
 0x4fa   : > { %v3046_v8 = vadd.f32 %v3040_v7, %v2995_v5  ;;  %v6669_v9 = vpop.eup %6668  ;;  %v6343_v13 = vpop.f32.mrf.mxu0 }
 0x4fb   : > { %v6348_v15 = vpop.f32.mrf.mxu1  ;;  %v2847_v16 = vmul.f32 0.5, %v6669_v9 }
 0x4fc   : > { %v3047_v37 = vmul.f32 0.5, %v3046_v8  ;;  %v3094_v18 = vpop.f32.mrf.mxu0 }
 0x4fd   : > { %v3043_v17 = vpop.f32.mrf.mxu1  ;;  %v2848_v10 = vadd.f32 0.5, %v2847_v16  ;;  %v3100_v25 = vadd.f32 %v3094_v18, %v7353_v14 }
 0x4fe   : > { %6670 = vtanh.f32 %v3047_v37  ;;  %v6354_v20 = vpop.f32.mrf.mxu0 }
 0x4ff   : > { %v6349_v19 = vpop.f32.mrf.mxu1  ;;  %v2850_v21 = vrot.slane %v2848_v10, 4 }
 0x500   : > { %v3097_v22 = vpop.f32.mrf.mxu0 }
 0x501   : > { %v3140_v23 = vpop.f32.mrf.mxu1  ;;  %v7368_v24 = vmul.f32 %v2850_v21, %v2844_v34 }
 0x502   : > { %v6355_v26 = vpop.f32.mrf.mxu0  ;;  %v3146_v29 = vadd.f32 %v3140_v23, %v3100_v25 }
 0x503   : > { %v6360_v61 = vpop.f32.mrf.mxu1  ;;  %3555 = vrot.lane.b32.xlu1 %v7368_v24, %s7663_s19  ;;  %6377 = vmatmul.mubr.msk.f32.vlgmr.msra.gmra.mxu0 %vm2431_vm13, %v7368_v24 }
 0x504   : > { %v3186_v28 = vpop.f32.mrf.mxu0  ;;  %6385 = vmatpush3.msra.mxu0 %v7349_v12  ;;  %6386 = vmatprep.mubr.msk.f32.mxu0 %vm6830_vm0, %v6829_v0 }
 0x505   : > { %v3143_v27 = vpop.f32.mrf.mxu1  ;;  %6394 = vmatprep.subr.mxu0 %v6829_v0  ;;  %v3192_v32 = vadd.f32 %v3186_v28, %v3146_v29 }
 0x506   : > { %v6366_v31 = vpop.f32.mrf.mxu0 }
 0x507   : > { %v6361_v30 = vpop.f32.mrf.mxu1 }
 0x508   : > { %v3189_v14 = vpop.f32.mrf.mxu0 }
 0x509   : > { %v3237_v33 = vpop.f32.mrf.mxu1 }
 0x50a   : > { %v3243_v35 = vadd.f32 %v3237_v33, %v3192_v32  ;;  %v6367_v38 = vpop.f32.mrf.mxu0 }
 0x50b   : > { %v6671_v36 = vpop.eup %6670  ;;  %v6372_v39 = vpop.f32.mrf.mxu1 }
 0x50c   : > { %v3049_v40 = vmul.f32 0.5, %v6671_v36  ;;  %v3244_v41 = vmul.f32 0.5, %v3243_v35 }
 0x50d   : > { %v3240_v42 = vpop.f32.mrf.mxu1 }
 0x50e   : > { %v3050_v43 = vadd.f32 0.5, %v3049_v40  ;;  %6672 = vtanh.f32 %v3244_v41 }
 0x50f   : > { %v6373_v44 = vpop.f32.mrf.mxu1 }
 0x510   : > { %v3052_v34 = vrot.slane %v3050_v43, 4 }
 0x512   : > { %v3054_v45 = vmul.f32 %v3052_v34, %v3046_v8 }
 0x514   : > { %3783 = vrot.lane.b32.xlu0 %v3054_v45, %s7663_s19  ;;  %6392 = vmatmul.mubr.msk.f32.vlgmr.msra.gmra.mxu1 %vm2431_vm13, %v3054_v45 }
 0x515   : > { %6400 = vmatpush3.msra.mxu1 %v7342_v11  ;;  %6401 = vmatprep.mubr.msk.f32.mxu1 %vm6830_vm0, %v6829_v0 }
 0x516   : > { %6409 = vmatprep.subr.mxu1 %v6829_v0 }
 0x518   : > { %3937 = vrot.lane.b32.xlu0 %v7357_v59, %s6864_s17 }
 0x51b   : > { %v6673_v46 = vpop.eup %6672 }
 0x51c   : > { %v3246_v47 = vmul.f32 0.5, %v6673_v46  ;;  %4091 = vrot.lane.b32.xlu0 %v3054_v45, %s6864_s17 }
 0x51e   : > { %v3247_v48 = vadd.f32 0.5, %v3246_v47 }
 0x520   : > { %v3249_v49 = vrot.slane %v3247_v48, 4  ;;  %4245 = vrot.lane.b32.xlu0 %v7357_v59, %s6868_s20 }
 0x522   : > { %v3251_v51 = vmul.f32 %v3249_v49, %v3243_v35 }
 0x524   : > { %4399 = vrot.lane.b32.xlu0 %v3054_v45, %s6868_s20  ;;  %3709 = vrot.lane.b32.xlu1 %v3251_v51, %s7663_s19  ;;  %s7664_s19 = smov 96  }
 0x525   : > { %6387 = vmatmul.mubr.msk.f32.vlgmr.msra.gmra.mxu0 %vm2431_vm13, %v3251_v51 }
 0x526   : > { %6395 = vmatpush3.msra.mxu0 %v7349_v12  ;;  %6396 = vmatprep.mubr.msk.f32.mxu0 %vm6830_vm0, %v6829_v0 }
 0x527   : > { %6404 = vmatprep.subr.mxu0 %v6829_v0 }
 0x528   : > { %4553 = vrot.lane.b32.xlu0 %v7357_v59, %s6860_s9  ;;  %3863 = vrot.lane.b32.xlu1 %v7368_v24, %s6864_s17 }
 0x52c   : > { %4702 = vrot.lane.b32.xlu0 %v3054_v45, %s6860_s9  ;;  %4017 = vrot.lane.b32.xlu1 %v3251_v51, %s6864_s17  ;;  %s311_s17 = sand.u32 1, %s6812_s25  }
 0x530   : > { %4855 = vrot.lane.b32.xlu0 %v7357_v59, %s6869_s15  ;;  %4171 = vrot.lane.b32.xlu1 %v7368_v24, %s6868_s20 }
 0x534   : > { %5008 = vrot.lane.b32.xlu0 %v3054_v45, %s6869_s15  ;;  %4325 = vrot.lane.b32.xlu1 %v3251_v51, %s6868_s20 }
 0x538   : > { %5161 = vrot.lane.b32.xlu0 %v7357_v59, %s6870_s23  ;;  %4479 = vrot.lane.b32.xlu1 %v7368_v24, %s6860_s9 }
 0x53c   : > { %5314 = vrot.lane.b32.xlu0 %v3054_v45, %s6870_s23  ;;  %4628 = vrot.lane.b32.xlu1 %v3251_v51, %s6860_s9  ;;  %s5814_s9 = sshll.u32 %s311_s17, 3 }
 0x53d   : > { %s7543_s8 = scalar_lea.vmem [#allocation9], %s5814_s9 }
 0x540   : > { %5467 = vrot.lane.b32.xlu0 %v7357_v59, %s6871_s14  ;;  %4781 = vrot.lane.b32.xlu1 %v7368_v24, %s6869_s15 }
 0x544   : > { %5620 = vrot.lane.b32.xlu0 %v3054_v45, %s6871_s14  ;;  %4934 = vrot.lane.b32.xlu1 %v3251_v51, %s6869_s15 }
 0x548   : > { %5087 = vrot.lane.b32.xlu1 %v7368_v24, %s6870_s23 }
 0x54c   : > { %5240 = vrot.lane.b32.xlu1 %v3251_v51, %s6870_s23 }
 0x550   : > { %5393 = vrot.lane.b32.xlu1 %v7368_v24, %s6871_s14 }
 0x554   : > { %5546 = vrot.lane.b32.xlu1 %v3251_v51, %s6871_s14 }
 0x565   : > { %v3630_v52 = vpop.permute.xlu0 %3629 }
 0x566   : > { %6402 = vmatmul.mubr.msk.f32.vlgmr.msra.gmra.mxu1 %vm2431_vm13, %v3630_v52 }
 0x567   : > { %6410 = vmatpush3.msra.mxu1 %v7342_v11  ;;  %6411 = vmatprep.mubr.msk.f32.mxu1 %vm6830_vm0, %v6829_v0 }
 0x568   : > { %6419 = vmatprep.subr.mxu1 %v6829_v0 }
 0x575   : > { %v3556_v53 = vpop.permute.xlu1 %3555 }
 0x576   : > { %6397 = vmatmul.mubr.msk.f32.vlgmr.msra.gmra.mxu0 %vm2431_vm13, %v3556_v53 }
 0x577   : > { %6405 = vmatpush3.msra.mxu0 %v7349_v12  ;;  %6406 = vmatprep.mubr.msk.f32.mxu0 %vm6830_vm0, %v6829_v0 }
 0x578   : > { %6414 = vmatprep.subr.mxu0 %v6829_v0 }
 0x586   : > { %v3784_v54 = vpop.permute.xlu0 %3783 }
 0x587   : > { %6412 = vmatmul.mubr.msk.f32.vlgmr.msra.gmra.mxu1 %vm2431_vm13, %v3784_v54 }
 0x588   : > { %6420 = vmatpush3.msra.mxu1 %v7342_v11  ;;  %6421 = vmatprep.mubr.msk.f32.mxu1 %vm6830_vm0, %v6829_v0 }
 0x589   : > { %6429 = vmatprep.subr.mxu1 %v6829_v0 }
 0x58a   : > { %v3938_v55 = vpop.permute.xlu0 %3937 }
 0x58b   : > { %6422 = vmatmul.mubr.msk.f32.vlgmr.msra.gmra.mxu1 %vm2431_vm13, %v3938_v55 }
 0x58c   : > { %6430 = vmatpush3.msra.mxu1 %v7342_v11  ;;  %6431 = vmatprep.mubr.msk.f32.mxu1 %vm6830_vm0, %v6829_v0 }
 0x58d   : > { %6439 = vmatprep.subr.mxu1 %v6829_v0 }
 0x58e   : > { %v4092_v50 = vpop.permute.xlu0 %4091 }
 0x58f   : > { %6432 = vmatmul.mubr.msk.f32.vlgmr.msra.gmra.mxu1 %vm2431_vm13, %v4092_v50 }
 0x590   : > { %6440 = vmatpush3.msra.mxu1 %v7342_v11  ;;  %6441 = vmatprep.mubr.msk.f32.mxu1 %vm6830_vm0, %v6829_v0 }
 0x591   : > { %6449 = vmatprep.subr.mxu1 %v6829_v0 }
 0x592   : > { %v4246_v57 = vpop.permute.xlu0 %4245 }
 0x593   : > { %6442 = vmatmul.mubr.msk.f32.vlgmr.msra.gmra.mxu1 %vm2431_vm13, %v4246_v57 }
 0x594   : > { %6450 = vmatpush3.msra.mxu1 %v7342_v11  ;;  %6451 = vmatprep.mubr.msk.f32.mxu1 %vm6830_vm0, %v6829_v0 }
 0x595   : > { %6459 = vmatprep.subr.mxu1 %v6829_v0 }
 0x596   : > { %v4400_v58 = vpop.permute.xlu0 %4399  ;;  %v3710_v59 = vpop.permute.xlu1 %3709 }
 0x597   : > { %6407 = vmatmul.mubr.msk.f32.vlgmr.msra.gmra.mxu0 %vm2431_vm13, %v3710_v59  ;;  %6452 = vmatmul.mubr.msk.f32.vlgmr.msra.gmra.mxu1 %vm2431_vm13, %v4400_v58 }
 0x598   : > { %6460 = vmatpush3.msra.mxu1 %v7342_v11  ;;  %6461 = vmatprep.mubr.msk.f32.mxu1 %vm6830_vm0, %v6829_v0 }
 0x599   : > { %6415 = vmatpush3.msra.mxu0 %v7349_v12  ;;  %6416 = vmatprep.mubr.msk.f32.mxu0 %vm6830_vm0, %v6829_v0 }
 0x59a   : > { %v4554_v62 = vpop.permute.xlu0 %4553  ;;  %v3864_v56 = vpop.permute.xlu1 %3863  ;;  %6424 = vmatprep.subr.mxu0 %v6829_v0  ;;  %6469 = vmatprep.subr.mxu1 %v6829_v0 }
 0x59b   : > { %6417 = vmatmul.mubr.msk.f32.vlgmr.msra.gmra.mxu0 %vm2431_vm13, %v3864_v56  ;;  %6462 = vmatmul.mubr.msk.f32.vlgmr.msra.gmra.mxu1 %vm2431_vm13, %v4554_v62 }
 0x59c   : > { %6470 = vmatpush3.msra.mxu1 %v7342_v11  ;;  %6471 = vmatprep.mubr.msk.f32.mxu1 %vm6830_vm0, %v6829_v0 }
 0x59d   : > { %6425 = vmatpush3.msra.mxu0 %v7349_v12  ;;  %6426 = vmatprep.mubr.msk.f32.mxu0 %vm6830_vm0, %v6829_v0 }
 0x59e   : > { %v4703_v63 = vpop.permute.xlu0 %4702  ;;  %v4018_v60 = vpop.permute.xlu1 %4017  ;;  %6434 = vmatprep.subr.mxu0 %v6829_v0  ;;  %6479 = vmatprep.subr.mxu1 %v6829_v0 }
 0x59f   : > { %6427 = vmatmul.mubr.msk.f32.vlgmr.msra.gmra.mxu0 %vm2431_vm13, %v4018_v60  ;;  %6472 = vmatmul.mubr.msk.f32.vlgmr.msra.gmra.mxu1 %vm2431_vm13, %v4703_v63 }
 0x5a0   : > { %6480 = vmatpush3.msra.mxu1 %v7342_v11  ;;  %6481 = vmatprep.mubr.msk.f32.mxu1 %vm6830_vm0, %v6829_v0 }
 0x5a1   : > { %6435 = vmatpush3.msra.mxu0 %v7349_v12  ;;  %6436 = vmatprep.mubr.msk.f32.mxu0 %vm6830_vm0, %v6829_v0 }
 0x5a2   : > { %v4856_v1 = vpop.permute.xlu0 %4855  ;;  %v4172_v2 = vpop.permute.xlu1 %4171  ;;  %6444 = vmatprep.subr.mxu0 %v6829_v0  ;;  %6489 = vmatprep.subr.mxu1 %v6829_v0 }
 0x5a3   : > { %6437 = vmatmul.mubr.msk.f32.vlgmr.msra.gmra.mxu0 %vm2431_vm13, %v4172_v2  ;;  %6482 = vmatmul.mubr.msk.f32.vlgmr.msra.gmra.mxu1 %vm2431_vm13, %v4856_v1 }
 0x5a4   : > { %6490 = vmatpush3.msra.mxu1 %v7342_v11  ;;  %6491 = vmatprep.mubr.msk.f32.mxu1 %vm6830_vm0, %v6829_v0 }
 0x5a5   : > { %6445 = vmatpush3.msra.mxu0 %v7349_v12  ;;  %6446 = vmatprep.mubr.msk.f32.mxu0 %vm6830_vm0, %v6829_v0 }
 0x5a6   : > { %v5009_v3 = vpop.permute.xlu0 %5008  ;;  %v4326_v4 = vpop.permute.xlu1 %4325  ;;  %6454 = vmatprep.subr.mxu0 %v6829_v0  ;;  %6499 = vmatprep.subr.mxu1 %v6829_v0 }
 0x5a7   : > { %6447 = vmatmul.mubr.msk.f32.vlgmr.msra.gmra.mxu0 %vm2431_vm13, %v4326_v4  ;;  %6492 = vmatmul.mubr.msk.f32.vlgmr.msra.gmra.mxu1 %vm2431_vm13, %v5009_v3 }
 0x5a8   : > { %6500 = vmatpush3.msra.mxu1 %v7342_v11  ;;  %6501 = vmatprep.mubr.msk.f32.mxu1 %vm6830_vm0, %v6829_v0 }
 0x5a9   : > { %6455 = vmatpush3.msra.mxu0 %v7349_v12  ;;  %6456 = vmatprep.mubr.msk.f32.mxu0 %vm6830_vm0, %v6829_v0 }
 0x5aa   : > { %v5162_v5 = vpop.permute.xlu0 %5161  ;;  %v4480_v6 = vpop.permute.xlu1 %4479  ;;  %6464 = vmatprep.subr.mxu0 %v6829_v0  ;;  %6509 = vmatprep.subr.mxu1 %v6829_v0 }
 0x5ab   : > { %6457 = vmatmul.mubr.msk.f32.vlgmr.msra.gmra.mxu0 %vm2431_vm13, %v4480_v6  ;;  %6502 = vmatmul.mubr.msk.f32.vlgmr.msra.gmra.mxu1 %vm2431_vm13, %v5162_v5 }
 0x5ac   : > { %6510 = vmatpush3.msra.mxu1 %v7342_v11  ;;  %6511 = vmatprep.mubr.msk.f32.mxu1 %vm6830_vm0, %v6829_v0 }
 0x5ad   : > { %6465 = vmatpush3.msra.mxu0 %v7349_v12  ;;  %6466 = vmatprep.mubr.msk.f32.mxu0 %vm6830_vm0, %v6829_v0 }
 0x5ae   : > { %v5315_v7 = vpop.permute.xlu0 %5314  ;;  %v4629_v8 = vpop.permute.xlu1 %4628  ;;  %6474 = vmatprep.subr.mxu0 %v6829_v0  ;;  %6519 = vmatprep.subr.mxu1 %v6829_v0 }
 0x5af   : > { %6467 = vmatmul.mubr.msk.f32.vlgmr.msra.gmra.mxu0 %vm2431_vm13, %v4629_v8  ;;  %6512 = vmatmul.mubr.msk.f32.vlgmr.msra.gmra.mxu1 %vm2431_vm13, %v5315_v7 }
 0x5b0   : > { %6520 = vmatpush3.msra.mxu1 %v7342_v11  ;;  %6521 = vmatprep.mubr.msk.f32.mxu1 %vm6830_vm0, %v6829_v0 }
 0x5b1   : > { %6475 = vmatpush3.msra.mxu0 %v7349_v12  ;;  %6476 = vmatprep.mubr.msk.f32.mxu0 %vm6830_vm0, %v6829_v0 }
 0x5b2   : > { %v5468_v9 = vpop.permute.xlu0 %5467  ;;  %v4782_v13 = vpop.permute.xlu1 %4781  ;;  %6484 = vmatprep.subr.mxu0 %v6829_v0  ;;  %6529 = vmatprep.subr.mxu1 %v6829_v0 }
 0x5b3   : > { %6477 = vmatmul.mubr.msk.f32.vlgmr.msra.gmra.mxu0 %vm2431_vm13, %v4782_v13  ;;  %6522 = vmatmul.mubr.msk.f32.vlgmr.msra.gmra.mxu1 %vm2431_vm13, %v5468_v9  ;;  %v3397_v15 = vpop.f32.mrf.mxu1 }
 0x5b4   : > { %6530 = vmatpush3.msra.mxu1 %v7342_v11  ;;  %6531 = vmatprep.mubr.msk.f32.mxu1 %vm6830_vm0, %v6829_v0 }
 0x5b5   : > { %6485 = vmatpush3.msra.mxu0 %v7349_v12  ;;  %6486 = vmatprep.mubr.msk.f32.mxu0 %vm6830_vm0, %v6829_v0  ;;  %v6383_v16 = vpop.f32.mrf.mxu1 }
 0x5b6   : > { %v5621_v37 = vpop.permute.xlu0 %5620  ;;  %6494 = vmatprep.subr.mxu0 %v6829_v0  ;;  %v4935_v17 = vpop.permute.xlu1 %4934 }
 0x5b7   : > { %6532 = vmatmul.mubr.msk.f32.vlgmr.msra.gmra.mxu1 %vm2431_vm13, %v5621_v37  ;;  %6487 = vmatmul.mubr.msk.f32.vlgmr.msra.gmra.mxu0 %vm2431_vm13, %v4935_v17 }
 0x5b8   : > { %6495 = vmatpush3.msra.mxu0 %v7349_v12  ;;  %6496 = vmatprep.mubr.msk.f32.mxu0 %vm6830_vm0, %v6829_v0 }
 0x5b9   : > { %6504 = vmatprep.subr.mxu0 %v6829_v0 }
 0x5ba   : > { %v5088_v11 = vpop.permute.xlu1 %5087 }
 0x5bb   : > { %6497 = vmatmul.mubr.msk.f32.vlgmr.msra.gmra.mxu0 %vm2431_vm13, %v5088_v11 }
 0x5bc   : > { %6505 = vmatpush3.msra.mxu0 %v7349_v12  ;;  %6506 = vmatprep.mubr.msk.f32.mxu0 %vm6830_vm0, %v6829_v0 }
 0x5bd   : > { %6514 = vmatprep.subr.mxu0 %v6829_v0 }
 0x5be   : > { %v5241_v18 = vpop.permute.xlu1 %5240 }
 0x5bf   : > { %6507 = vmatmul.mubr.msk.f32.vlgmr.msra.gmra.mxu0 %vm2431_vm13, %v5241_v18 }
 0x5c0   : > { %6515 = vmatpush3.msra.mxu0 %v7349_v12  ;;  %6516 = vmatprep.mubr.msk.f32.mxu0 %vm6830_vm0, %v6829_v0 }
 0x5c1   : > { %6524 = vmatprep.subr.mxu0 %v6829_v0 }
 0x5c2   : > { %v5394_v10 = vpop.permute.xlu1 %5393 }
 0x5c3   : > { %6517 = vmatmul.mubr.msk.f32.vlgmr.msra.gmra.mxu0 %vm2431_vm13, %v5394_v10  ;;  %v3324_v19 = vpop.f32.mrf.mxu0 }
 0x5c4   : > { %v3398_v20 = vadd.f32 %v3397_v15, %v3324_v19  ;;  %6525 = vmatpush3.msra.mxu0 %v7349_v12  ;;  %6526 = vmatprep.mubr.msk.f32.mxu0 %vm6830_vm0, %v6829_v0  ;;  %vm3707_vm0 = vcmask 388352  }
 0x5c5   : > { %v6378_v21 = vpop.f32.mrf.mxu0 }
 0x5c6   : > { %3402 = vst.msk [vmem:[%s7543_s8] sm:$0xf] %vm3401_vm14, %v3398_v20  ;;  %v5547_v22 = vpop.permute.xlu1 %5546 }
 0x5c7   : > { %6527 = vmatmul.mubr.msk.f32.vlgmr.msra.gmra.mxu0 %vm2431_vm13, %v5547_v22 }
 0x5d4   : > { %v3545_v23 = vpop.f32.mrf.mxu1 }
 0x5d6   : > { %v6393_v24 = vpop.f32.mrf.mxu1 }
 0x5e5   : > { %v3472_v26 = vpop.f32.mrf.mxu0 }
 0x5e6   : > { %v3546_v61 = vadd.f32 %v3545_v23, %v3472_v26 }
 0x5e7   : > { %v6388_v25 = vpop.f32.mrf.mxu0 }
 0x5e8   : > { %3550 = vrot.lane.b32.xlu1 %v3546_v61, %s6842_s18 }
 0x626   : > { %v3699_v12 = vpop.f32.mrf.mxu1 }
 0x628   : > { %v6403_v27 = vpop.f32.mrf.mxu1 }
 0x636   : > { %v3625_v28 = vpop.f32.mrf.mxu0 }
 0x637   : > { %v3700_v0 = vadd.f32 %v3699_v12, %v3625_v28 }
 0x638   : > { %v6398_v29 = vpop.f32.mrf.mxu0 }
 0x639   : > { %3704 = vrot.lane.b32.xlu1 %v3700_v0, %s6841_s16 }
 0x647   : > { %v3853_v30 = vpop.f32.mrf.mxu1 }
 0x649   : > { %v6413_v31 = vpop.f32.mrf.mxu1 }
 0x64b   : > { %v4007_v32 = vpop.f32.mrf.mxu1 }
 0x64d   : > { %v6423_v14 = vpop.f32.mrf.mxu1 }
 0x64f   : > { %v4161_v33 = vpop.f32.mrf.mxu1 }
 0x651   : > { %v6433_v35 = vpop.f32.mrf.mxu1 }
 0x653   : > { %v4315_v36 = vpop.f32.mrf.mxu1 }
 0x655   : > { %v6443_v38 = vpop.f32.mrf.mxu1 }
 0x657   : > { %v3779_v39 = vpop.f32.mrf.mxu0  ;;  %v4469_v40 = vpop.f32.mrf.mxu1 }
 0x658   : > { %v3854_v41 = vadd.f32 %v3853_v30, %v3779_v39 }
 0x659   : > { %v6453_v42 = vpop.f32.mrf.mxu1  ;;  %v6408_v43 = vpop.f32.mrf.mxu0 }
 0x65a   : > { %v3551_v44 = vpop.permute.xlu1 %3550  ;;  %3858 = vrot.lane.b32.xlu1 %v3854_v41, %s6839_s22 }
 0x65b   : > { %3554 = vst.msk [vmem:[%s7543_s8] sm:$0xf] %vm3553_vm15, %v3551_v44  ;;  %v3933_v34 = vpop.f32.mrf.mxu0  ;;  %v4623_v45 = vpop.f32.mrf.mxu1 }
 0x65c   : > { %v4008_v46 = vadd.f32 %v4007_v32, %v3933_v34 }
 0x65d   : > { %v6418_v47 = vpop.f32.mrf.mxu0  ;;  %v6463_v48 = vpop.f32.mrf.mxu1 }
 0x65e   : > { %4012 = vrot.lane.b32.xlu1 %v4008_v46, %s6838_s21 }
 0x65f   : > { %v4087_v49 = vpop.f32.mrf.mxu0  ;;  %v4772_v51 = vpop.f32.mrf.mxu1 }
 0x660   : > { %v4162_v52 = vadd.f32 %v4161_v33, %v4087_v49 }
 0x661   : > { %v6428_v53 = vpop.f32.mrf.mxu0  ;;  %v6473_v54 = vpop.f32.mrf.mxu1 }
 0x662   : > { %4166 = vrot.lane.b32.xlu1 %v4162_v52, %s7662_s13 }
 0x663   : > { %v4241_v55 = vpop.f32.mrf.mxu0  ;;  %v4925_v50 = vpop.f32.mrf.mxu1 }
 0x664   : > { %v4316_v57 = vadd.f32 %v4315_v36, %v4241_v55 }
 0x665   : > { %v6438_v58 = vpop.f32.mrf.mxu0  ;;  %v6483_v59 = vpop.f32.mrf.mxu1 }
 0x666   : > { %4320 = vrot.lane.b32.xlu1 %v4316_v57, %s7664_s19 }
 0x667   : > { %v4395_v62 = vpop.f32.mrf.mxu0  ;;  %v5078_v56 = vpop.f32.mrf.mxu1 }
 0x668   : > { %v4470_v63 = vadd.f32 %v4469_v40, %v4395_v62 }
 0x669   : > { %v6448_v60 = vpop.f32.mrf.mxu0  ;;  %v6493_v1 = vpop.f32.mrf.mxu1 }
 0x66a   : > { %4474 = vrot.lane.b32.xlu1 %v4470_v63, %s7660_s29 }
 0x66b   : > { %v4549_v2 = vpop.f32.mrf.mxu0  ;;  %v5231_v3 = vpop.f32.mrf.mxu1 }
 0x66c   : > { %v4624_v4 = vadd.f32 %v4623_v45, %v4549_v2 }
 0x66d   : > { %v6458_v5 = vpop.f32.mrf.mxu0  ;;  %v6503_v6 = vpop.f32.mrf.mxu1 }
 0x66e   : > { %4627 = vst.msk [vmem:[%s7543_s8 + $0x4] sm:$0xf] %vm3401_vm14, %v4624_v4 }
 0x66f   : > { %v4698_v7 = vpop.f32.mrf.mxu0  ;;  %v5384_v8 = vpop.f32.mrf.mxu1 }
 0x670   : > { %v4773_v9 = vadd.f32 %v4772_v51, %v4698_v7 }
 0x671   : > { %v6468_v13 = vpop.f32.mrf.mxu0  ;;  %v6513_v15 = vpop.f32.mrf.mxu1 }
 0x672   : > { %4777 = vrot.lane.b32.xlu0 %v4773_v9, %s6842_s18 }
 0x673   : > { %v4851_v16 = vpop.f32.mrf.mxu0  ;;  %v5537_v37 = vpop.f32.mrf.mxu1 }
 0x674   : > { %v4926_v17 = vadd.f32 %v4925_v50, %v4851_v16 }
 0x675   : > { %v6478_v11 = vpop.f32.mrf.mxu0  ;;  %v6523_v18 = vpop.f32.mrf.mxu1 }
 0x676   : > { %4930 = vrot.lane.b32.xlu0 %v4926_v17, %s6841_s16 }
 0x677   : > { %v5690_v10 = vpop.f32.mrf.mxu1  ;;  %v5004_v19 = vpop.f32.mrf.mxu0 }
 0x678   : > { %v5079_v20 = vadd.f32 %v5078_v56, %v5004_v19 }
 0x679   : > { %v6533_v21 = vpop.f32.mrf.mxu1  ;;  %v6488_v22 = vpop.f32.mrf.mxu0 }
 0x67a   : > { %5083 = vrot.lane.b32.xlu0 %v5079_v20, %s6839_s22  ;;  %s5714_s22 = sshll.u32 %s7543_s8, 4  ;;  %s5715_s22 = int_to_ptr.vmem [resolvable:$true] %s5714_s22 }
 0x67b   : > { %v5157_v23 = vpop.f32.mrf.mxu0  ;;  %s6752_s20 = scalar_lea.vmem %s5715_s22, 128 }
 0x67c   : > { %v5232_v24 = vadd.f32 %v5231_v3, %v5157_v23  ;;  %p6753_p10 = scmp.ne.s32.totalorder %s5715_s22, %s6752_s20 }
 0x67d   : > { %v6498_v26 = vpop.f32.mrf.mxu0 }
 0x67e   : > { %5236 = vrot.lane.b32.xlu0 %v5232_v24, %s6838_s21  ;;  %s5941_s21 = sshll.u32 %s6934_s28, 7  ;;  %p6754_p12 = pnand %p6753_p10, %p6951_p5 }
 0x67f   : > { %v5310_v61 = vpop.f32.mrf.mxu0  ;;  %s6872_s28 = smov [#allocation9]  }
 0x680   : > { %v5385_v25 = vadd.f32 %v5384_v8, %v5310_v61  ;;  %p6755_p7 = pneg %p6754_p12  ;;  %s6756_s15 = sshll.u32 %s6872_s28, 4  ;;  %s6757_s15 = int_to_ptr.vmem [resolvable:$false] %s6756_s15 }
 0x681   : > { %v6508_v12 = vpop.f32.mrf.mxu0  ;;  %s6758_s23 = scalar_lea.vmem %s6757_s15, 256  ;;  %p6759_p6 = scmp.lt.s32.totalorder %s5715_s22, %s6757_s15 }
 0x682   : > { %5389 = vrot.lane.b32.xlu0 %v5385_v25, %s7662_s13  ;;  %s5700_s13 = scalar_lea.sflag [#allocation5], %s311_s17  ;;  %p6760_p9 = scmp.lt.s32.totalorder %s6758_s23, %s6752_s20 }
 0x683   : > { %v5463_v27 = vpop.f32.mrf.mxu0 }
 0x684   : > { %v5538_v28 = vadd.f32 %v5537_v37, %v5463_v27  ;;  %p6761_p8 = por %p6760_p9, %p6759_p6 }
 0x685   : > { %v6518_v0 = vpop.f32.mrf.mxu0 }
 0x686   : > { %5542 = vrot.lane.b32.xlu0 %v5538_v28, %s7664_s19  ;;  %p6762_p11 = pnand %p6761_p8, %p6755_p7 }
 0x687   : > { %v5616_v29 = vpop.f32.mrf.mxu0 }
 0x688   : > { %v5691_v30 = vadd.f32 %v5690_v10, %v5616_v29 }
 0x689   : > { %v6528_v31 = vpop.f32.mrf.mxu0 }
 0x68a   : > { %5695 = vrot.lane.b32.xlu0 %v5691_v30, %s7660_s29  ;;  %s7595_s29 = scalar_lea.hbm %s7641_s7, %s5941_s21 }
 0x6ab   : > { %v3705_v32 = vpop.permute.xlu1 %3704 }
 0x6ac   : > { %3708 = vst.msk [vmem:[%s7543_s8] sm:$0xf] %vm3707_vm0, %v3705_v32 }
 0x6cc   : > { %v3859_v14 = vpop.permute.xlu1 %3858 }
 0x6cd   : > { %3862 = vst.msk [vmem:[%s7543_s8] sm:$0xf] %vm3861_vm1, %v3859_v14 }
 0x6d0   : > { %v4013_v33 = vpop.permute.xlu1 %4012 }
 0x6d1   : > { %4016 = vst.msk [vmem:[%s7543_s8] sm:$0xf] %vm4015_vm2, %v4013_v33 }
 0x6d4   : > { %v4167_v35 = vpop.permute.xlu1 %4166 }
 0x6d5   : > { %4170 = vst.msk [vmem:[%s7543_s8] sm:$0xf] %vm4169_vm3, %v4167_v35 }
 0x6d8   : > { %v4321_v36 = vpop.permute.xlu1 %4320 }
 0x6d9   : > { %4324 = vst.msk [vmem:[%s7543_s8] sm:$0xf] %vm4323_vm4, %v4321_v36 }
 0x6dc   : > { %v4475_v38 = vpop.permute.xlu1 %4474 }
 0x6dd   : > { %4478 = vst.msk [vmem:[%s7543_s8] sm:$0xf] %vm4477_vm5, %v4475_v38 }
 0x6e4   : > { %v4778_v39 = vpop.permute.xlu0 %4777 }
 0x6e5   : > { %4780 = vst.msk [vmem:[%s7543_s8 + $0x4] sm:$0xf] %vm3553_vm15, %v4778_v39 }
 0x6e8   : > { %v4931_v40 = vpop.permute.xlu0 %4930 }
 0x6e9   : > { %4933 = vst.msk [vmem:[%s7543_s8 + $0x4] sm:$0xf] %vm3707_vm0, %v4931_v40 }
 0x6ec   : > { %v5084_v41 = vpop.permute.xlu0 %5083 }
 0x6ed   : > { %5086 = vst.msk [vmem:[%s7543_s8 + $0x4] sm:$0xf] %vm3861_vm1, %v5084_v41 }
 0x6f0   : > { %v5237_v42 = vpop.permute.xlu0 %5236 }
 0x6f1   : > { %5239 = vst.msk [vmem:[%s7543_s8 + $0x4] sm:$0xf] %vm4015_vm2, %v5237_v42 }
 0x6f4   : > { %v5390_v43 = vpop.permute.xlu0 %5389 }
 0x6f5   : > { %5392 = vst.msk [vmem:[%s7543_s8 + $0x4] sm:$0xf] %vm4169_vm3, %v5390_v43 }
 0x6f8   : > { %v5543_v44 = vpop.permute.xlu0 %5542 }
 0x6f9   : > { %5545 = vst.msk [vmem:[%s7543_s8 + $0x4] sm:$0xf] %vm4323_vm4, %v5543_v44 }
 0x6fc   : > { %v5696_v34 = vpop.permute.xlu0 %5695 }
 0x6fd   : > { %5698 = vst.msk [vmem:[%s7543_s8 + $0x4] sm:$0xf] %vm4477_vm5, %v5696_v34 }
 0x6fe   : > { %6765 = shalt.err (!%p6762_p11)
}
 0x6ff   : > { %s6766_s14 = scalar_lea.hbm %s7595_s29, 128  ;;  %s6770_s8 = scalar_lea.hbm %s7641_s7, 256 }
 0x700   : > { %p6767_p0 = scmp.ne.s32.totalorder %s7595_s29, %s6766_s14  ;;  %p6771_p3 = scmp.lt.s32.totalorder %s7595_s29, %s7641_s7 }
 0x701   : > { %p6772_p2 = scmp.lt.s32.totalorder %s6770_s8, %s6766_s14 }
 0x702   : > { %p6768_p1 = pnand %p6767_p0, %p6951_p5 }
 0x703   : > { %p6773_p4 = por %p6772_p2, %p6771_p3 }
 0x704   : > { %p6769_p13 = pneg %p6768_p1 }
 0x706   : > { %p6774_p10 = pnand %p6773_p4, %p6769_p13 }
 0x708   : > { %6777 = shalt.err (!%p6774_p10)
}
 0x709   : > { %6546 = dma.vmem_to_hbm [thread:$0]  (%p6951_p5), %s5715_s22, 128, %s7595_s29, %s5700_s13  }
 0x70a PF: > { %p6568_p12 = scmp.ge.s32.totalorder %s6820_s27, 2  ;;  %s5726_s16 = sand.u32 1, %s6808_s24  }
 0x70b   : > { %p7665_p7 = scmp.ne.s32.totalorder %s7653_s12, 0  ;;  %s5727_s18 = scalar_lea.sflag [#allocation5], %s5726_s16 }
 0x70d   : > { %p6559_p6 = pnand %p6568_p12, %p7665_p7 }
 0x70f   : > { %p6560_p9 = pneg %p6559_p6 }
 0x711   : > { %6803 = dma.done.wait (%p6560_p9), %s5727_s18, 128  }
 0x712   : > { %6805 = vsyncadd (%p6560_p9), %s5727_s18, 4294967168  ;;  %p19_p8 = scmp.ge.s32.totalorder %s6938_s30, 4   ;;  %s7666_s24 = smov %s6812_s25 }
 0x713   : > { %s7667_s25 = smov %s6816_s26  ;;  %s7668_s26 = smov %s6949_s10 }
 0x714   : > { %s7669_s27 = smov %s6938_s30  ;;  %21 = sbr.rel (!%p19_p8) target bundleno = 5 (0x5), region = 98 }
 0x719   :  { %5732 = vsyncpa [#allocation4], 1 }
 0x71a   :  { %5734 = vsyncpa [#allocation4 + $0x1], 1 }
 0x71b   :  { %5735 = vsyncpa [#allocation7], 1 }
 0x71c   :  { %5736 = vsyncpa [#allocation5], 1 }
 0x71d   :  { %5738 = vsyncpa [#allocation5 + $0x1], 1 }

</bundles_post_ra>
